<compile_context>
chip_gen: v7x
topology: tpu7x:2x2x1
jax: 0.10.0
libtpu: 0.0.40
codegen_flags: <defaults>
</compile_context>

<pallas_src>
import jax
import jax.numpy as jnp
from jax.experimental import pallas as pl
from jax.experimental.pallas import tpu as pltpu


def _round_up(n, m):
    return ((n + m - 1) // m) * m


# ----------------------------------------------------------------------------
# Fused kernel: one grid step == one batch tile of B_TILE images
# ----------------------------------------------------------------------------
def _fused_kernel(x_ref, w1_ref, b1_ref, w2_ref, wp1_ref, wf2_ref, bias_ref,
                  o_ref):
    # x_ref   : [BT, 784]  f32   raw images, row = h*28 + w
    # w1_ref  : [784, 3528] bf16 dense conv1, col = io*168 + jo*8 + c
    # b1_ref  : [1, 3528]  f32   conv1 bias tiled over (io, jo)
    # w2_ref  : [3528, 196] bf16 dense conv2, col = io*14 + jo
    # wp1_ref : [181, 49]  f32   (pool-anchor selection) @ fc1 weight
    # wf2_ref : [49, 10]   f32   fc2 weight (in -> out)
    # bias_ref: [3, 128]   f32   row0[0]=conv2 bias, row1[:49]=fc1 b, row2[:10]=fc2 b
    # o_ref   : [BT, 10]   f32   log-softmax outputs

    # ---- conv1 + bias + ReLU: one MXU matmul over the flattened image ------
    x16 = x_ref[...].astype(jnp.bfloat16)
    y1 = jnp.dot(x16, w1_ref[...], preferred_element_type=jnp.float32)
    y1 = jnp.maximum(y1 + b1_ref[...], 0.0)                   # [BT, 3528] f32

    # ---- conv2 + bias + ReLU: one MXU matmul ------------------------------
    y2 = jnp.dot(y1.astype(jnp.bfloat16), w2_ref[...],
                 preferred_element_type=jnp.float32)
    y2 = jnp.maximum(y2 + bias_ref[0:1, 0:1], 0.0)            # [BT, 196] f32

    # ---- 2x2 max-pool: two contiguous-slice maxima (VPU) ------------------
    # y2 col = 14*io + jo.  After the two maxima, column col holds
    # max(y2[col], y2[col+1], y2[col+14], y2[col+15]); the 49 even-anchor
    # columns (col = 28*i + 2*j) are picked up exactly by wp1 below.
    m = jnp.maximum(y2[:, 0:195], y2[:, 1:196])               # [BT, 195]
    m = jnp.maximum(m[:, 0:181], m[:, 14:195])                # [BT, 181]

    # ---- fc1 (pool-select folded in) + ReLU, fc2, log_softmax -------------
    h = jnp.dot(m, wp1_ref[...], preferred_element_type=jnp.float32)
    h = jnp.maximum(h + bias_ref[1:2, 0:49], 0.0)             # [BT, 49]
    logits = jnp.dot(h, wf2_ref[...], preferred_element_type=jnp.float32)
    logits = logits + bias_ref[2:3, 0:10]                     # [BT, 10]
    zmax = jnp.max(logits, axis=-1, keepdims=True)
    lse = zmax + jnp.log(jnp.sum(jnp.exp(logits - zmax), axis=-1, keepdims=True))
    o_ref[...] = (logits - lse).astype(o_ref.dtype)


# ----------------------------------------------------------------------------
# Host-side one-time weight re-layout
# ----------------------------------------------------------------------------
def prepare_params(params):
    """Lower the two tiny convs to dense matmul weights (one time)."""
    (w_c1, b_c1, w_c2, b_c2, w_f1, b_f1, w_f2, b_f2) = params
    dn = ("NCHW", "OIHW", "NCHW")

    with jax.default_matmul_precision("highest"):
        # conv1 as a dense matrix: columns = conv applied to basis images.
        eye1 = jnp.eye(784, dtype=jnp.float32).reshape(784, 1, 28, 28)
        y = jax.lax.conv_general_dilated(eye1, w_c1, (1, 1), "VALID",
                                         dimension_numbers=dn)   # [784,8,21,21]
        w1full = jnp.transpose(y, (0, 2, 3, 1)).reshape(784, 3528)
        # conv2 as a dense matrix over the flattened (io, jo, c) activation.
        eye2 = jnp.eye(3528, dtype=jnp.float32).reshape(3528, 21, 21, 8)
        eye2 = jnp.transpose(eye2, (0, 3, 1, 2))                 # NCHW
        y2 = jax.lax.conv_general_dilated(eye2, w_c2, (1, 1), "VALID",
                                          dimension_numbers=dn)  # [3528,1,14,14]
        w2full = y2.reshape(3528, 196)

    b1row = jnp.tile(b_c1, 441).reshape(1, 3528)                 # col%8 == c

    # Fold "select the 49 pooling anchors + flatten" into the fc1 weight:
    # anchor column for pooled (i, j) is 28*i + 2*j  (< 181).
    k = jnp.arange(49)
    anchor = 28 * (k // 7) + 2 * (k % 7)
    wp1 = jnp.zeros((181, 49), jnp.float32).at[anchor].set(w_f1.T)

    wf2 = w_f2.T                                                  # [49, 10]

    bpack = jnp.zeros((3, 128), jnp.float32)
    bpack = bpack.at[0, 0].set(b_c2[0])
    bpack = bpack.at[1, :49].set(b_f1)
    bpack = bpack.at[2, :10].set(b_f2)

    return (w1full.astype(jnp.bfloat16), b1row,
            w2full.astype(jnp.bfloat16), wp1, wf2, bpack)


def net_forward(x, prepped, b_tile=128):
    """x: [B, 1, 28, 28] -> log-softmax logits [B, 10] (eval mode)."""
    (w1full, b1row, w2full, wp1, wf2, bpack) = prepped
    B = x.shape[0]
    xf = x.reshape(B, 28 * 28).astype(jnp.float32)      # lane-dense raw image

    bt = int(min(b_tile, _round_up(B, 8)))              # batch tile (mult of 8)
    bp = _round_up(B, bt)                                # padded batch
    if bp != B:
        xf = jnp.pad(xf, ((0, bp - B), (0, 0)))

    out = pl.pallas_call(
        _fused_kernel,
        out_shape=jax.ShapeDtypeStruct((bp, 10), jnp.float32),
        grid=(bp // bt,),
        in_specs=[
            pl.BlockSpec((bt, 784), lambda i: (i, 0)),
            pl.BlockSpec((784, 3528), lambda i: (0, 0)),   # fetched once,
            pl.BlockSpec((1, 3528), lambda i: (0, 0)),     # stays VMEM-resident
            pl.BlockSpec((3528, 196), lambda i: (0, 0)),
            pl.BlockSpec((181, 49), lambda i: (0, 0)),
            pl.BlockSpec((49, 10), lambda i: (0, 0)),
            pl.BlockSpec((3, 128), lambda i: (0, 0)),
        ],
        out_specs=pl.BlockSpec((bt, 10), lambda i: (i, 0)),
        compiler_params=pltpu.CompilerParams(
            dimension_semantics=("parallel",),
            vmem_limit_bytes=40 * 1024 * 1024,
        ),
    )(xf, w1full, b1row, w2full, wp1, wf2, bpack)
    return out[:B]


# ----------------------------------------------------------------------------
# Pure-JAX reference (for in-script correctness check)
# ----------------------------------------------------------------------------
def reference_forward(x, params):
    (w_c1, b_c1, w_c2, b_c2, w_f1, b_f1, w_f2, b_f2) = params
    dn = ("NCHW", "OIHW", "NCHW")
    y = jax.lax.conv_general_dilated(x, w_c1, (1, 1), "VALID",
                                     dimension_numbers=dn)
    y = jax.nn.relu(y + b_c1[None, :, None, None])            # [B, 8, 21, 21]
    y = jax.lax.conv_general_dilated(y, w_c2, (1, 1), "VALID",
                                     dimension_numbers=dn)
    y = jax.nn.relu(y + b_c2[None, :, None, None])            # [B, 1, 14, 14]
    B = x.shape[0]
    y = y[:, 0].reshape(B, 7, 2, 7, 2).max(axis=(2, 4)).reshape(B, 49)
    h = jax.nn.relu(y @ w_f1.T + b_f1)
    logits = h @ w_f2.T + b_f2
    return jax.nn.log_softmax(logits, axis=-1)


# ----------------------------------------------------------------------------
# Deterministic parameter init (PyTorch-style uniform(-1/sqrt(fan_in), ...))
# ----------------------------------------------------------------------------
def init_params(key):
    def uniform(k, shape, fan_in):
        bound = 1.0 / jnp.sqrt(jnp.float32(fan_in))
        return jax.random.uniform(k, shape, jnp.float32, -bound, bound)

    keys = jax.random.split(key, 8)
    w_c1 = uniform(keys[0], (8, 1, 8, 8), 1 * 8 * 8)
    b_c1 = uniform(keys[1], (8,), 1 * 8 * 8)
    w_c2 = uniform(keys[2], (1, 8, 8, 8), 8 * 8 * 8)
    b_c2 = uniform(keys[3], (1,), 8 * 8 * 8)
    w_f1 = uniform(keys[4], (49, 49), 49)
    b_f1 = uniform(keys[5], (49,), 49)
    w_f2 = uniform(keys[6], (10, 49), 49)
    b_f2 = uniform(keys[7], (10,), 49)
    return (w_c1, b_c1, w_c2, b_c2, w_f1, b_f1, w_f2, b_f2)


if __name__ == "__main__":
    key = jax.random.PRNGKey(0)
    k_x, k_p = jax.random.split(key)
    params = init_params(k_p)
    prepped = prepare_params(params)          # one-time weight re-layout

    fwd = jax.jit(net_forward)

    # B=2: tiny-batch path (single padded tile).  B=130: multi-step grid with
    # a padded remainder (130 -> 256, two batch tiles of 128).
    for B in (2, 130):
        xb = jax.random.normal(jax.random.fold_in(k_x, B), (B, 1, 28, 28),
                               dtype=jnp.float32)
        out = jax.block_until_ready(fwd(xb, prepped))
        assert out.shape == (B, 10), out.shape

        # log_softmax rows should exponentiate-sum to 1
        assert jnp.allclose(jnp.sum(jnp.exp(out), axis=1), 1.0, atol=1e-3)

        # compare against a pure-JAX reference of the PyTorch forward (eval)
        with jax.default_matmul_precision("highest"):
            ref = jax.block_until_ready(reference_forward(xb, params))
        err = float(jnp.max(jnp.abs(out - ref)))
        assert err < 1e-2, err

    print("KERNEL_OK")
</pallas_src>

<mosaic_0001>
module attributes {stable_mosaic.version = 11 : i64} {
  func.func @_fused_kernel(%arg0: i32, %arg1: memref<8x784xf32, #tpu.memory_space<vmem>>, %arg2: memref<784x3528xbf16, #tpu.memory_space<vmem>>, %arg3: memref<1x3528xf32, #tpu.memory_space<vmem>>, %arg4: memref<3528x196xbf16, #tpu.memory_space<vmem>>, %arg5: memref<181x49xf32, #tpu.memory_space<vmem>>, %arg6: memref<49x10xf32, #tpu.memory_space<vmem>>, %arg7: memref<3x128xf32, #tpu.memory_space<vmem>>, %arg8: memref<8x10xf32, #tpu.memory_space<vmem>>) attributes {dimension_semantics = [#tpu.dimension_semantics<parallel>], iteration_bounds = array<i64: 1>, scalar_prefetch = 0 : i64, scratch_operands = 0 : i64, tpu.core_type = #tpu.core_type<tc>, window_params = [{transform_indices = @transform_0, window_bounds = array<i64: 8, 784>}, {pipeline_mode = #tpu.pipeline_mode<synchronous>, transform_indices = @transform_1, window_bounds = array<i64: 784, 3528>}, {pipeline_mode = #tpu.pipeline_mode<synchronous>, transform_indices = @transform_2, window_bounds = array<i64: 1, 3528>}, {pipeline_mode = #tpu.pipeline_mode<synchronous>, transform_indices = @transform_3, window_bounds = array<i64: 3528, 196>}, {pipeline_mode = #tpu.pipeline_mode<synchronous>, transform_indices = @transform_4, window_bounds = array<i64: 181, 49>}, {pipeline_mode = #tpu.pipeline_mode<synchronous>, transform_indices = @transform_5, window_bounds = array<i64: 49, 10>}, {pipeline_mode = #tpu.pipeline_mode<synchronous>, transform_indices = @transform_6, window_bounds = array<i64: 3, 128>}, {transform_indices = @transform_7, window_bounds = array<i64: 8, 10>}]} {
    %c0 = arith.constant 0 : index
    %c0_0 = arith.constant 0 : index
    %0 = vector.load %arg1[%c0, %c0_0] : memref<8x784xf32, #tpu.memory_space<vmem>>, vector<8x784xf32>
    %1 = arith.truncf %0 : vector<8x784xf32> to vector<8x784xbf16>
    %c0_1 = arith.constant 0 : index
    %c0_2 = arith.constant 0 : index
    %2 = vector.load %arg2[%c0_1, %c0_2] : memref<784x3528xbf16, #tpu.memory_space<vmem>>, vector<784x3528xbf16>
    %cst = arith.constant dense<0.000000e+00> : vector<8x3528xf32>
    %3 = tpu.matmul %1, %2, %cst {dimension_numbers = #tpu.dot_dimension_numbers<[1], [0], [0], [1], [0, 0, 1, 1], [], []>} : vector<8x784xbf16>, vector<784x3528xbf16>, vector<8x3528xf32> -> vector<8x3528xf32>
    %c0_3 = arith.constant 0 : index
    %c0_4 = arith.constant 0 : index
    %4 = vector.load %arg3[%c0_3, %c0_4] : memref<1x3528xf32, #tpu.memory_space<vmem>>, vector<1x3528xf32>
    %5 = vector.broadcast %4 : vector<1x3528xf32> to vector<8x3528xf32>
    %6 = arith.addf %3, %5 : vector<8x3528xf32>
    %cst_5 = arith.constant 0.000000e+00 : f32
    %7 = vector.broadcast %cst_5 : f32 to vector<8x3528xf32>
    %8 = arith.maximumf %6, %7 : vector<8x3528xf32>
    %9 = arith.truncf %8 : vector<8x3528xf32> to vector<8x3528xbf16>
    %c0_6 = arith.constant 0 : index
    %c0_7 = arith.constant 0 : index
    %10 = vector.load %arg4[%c0_6, %c0_7] : memref<3528x196xbf16, #tpu.memory_space<vmem>>, vector<3528x196xbf16>
    %cst_8 = arith.constant dense<0.000000e+00> : vector<8x196xf32>
    %11 = tpu.matmul %9, %10, %cst_8 {dimension_numbers = #tpu.dot_dimension_numbers<[1], [0], [0], [1], [0, 0, 1, 1], [], []>} : vector<8x3528xbf16>, vector<3528x196xbf16>, vector<8x196xf32> -> vector<8x196xf32>
    %c0_9 = arith.constant 0 : index
    %c0_10 = arith.constant 0 : index
    %12 = vector.load %arg7[%c0_9, %c0_10] : memref<3x128xf32, #tpu.memory_space<vmem>>, vector<1x1xf32>
    %13 = vector.broadcast %12 : vector<1x1xf32> to vector<8x196xf32>
    %14 = arith.addf %11, %13 : vector<8x196xf32>
    %cst_11 = arith.constant 0.000000e+00 : f32
    %15 = vector.broadcast %cst_11 : f32 to vector<8x196xf32>
    %16 = arith.maximumf %14, %15 : vector<8x196xf32>
    %17 = vector.extract_strided_slice %16 {offsets = [0, 0], sizes = [8, 195], strides = [1, 1]} : vector<8x196xf32> to vector<8x195xf32>
    %18 = vector.extract_strided_slice %16 {offsets = [0, 1], sizes = [8, 195], strides = [1, 1]} : vector<8x196xf32> to vector<8x195xf32>
    %19 = arith.maximumf %17, %18 : vector<8x195xf32>
    %20 = vector.extract_strided_slice %19 {offsets = [0, 0], sizes = [8, 181], strides = [1, 1]} : vector<8x195xf32> to vector<8x181xf32>
    %21 = vector.extract_strided_slice %19 {offsets = [0, 14], sizes = [8, 181], strides = [1, 1]} : vector<8x195xf32> to vector<8x181xf32>
    %22 = arith.maximumf %20, %21 : vector<8x181xf32>
    %c0_12 = arith.constant 0 : index
    %c0_13 = arith.constant 0 : index
    %23 = vector.load %arg5[%c0_12, %c0_13] : memref<181x49xf32, #tpu.memory_space<vmem>>, vector<181x49xf32>
    %cst_14 = arith.constant dense<0.000000e+00> : vector<8x49xf32>
    %24 = tpu.matmul %22, %23, %cst_14 {dimension_numbers = #tpu.dot_dimension_numbers<[1], [0], [0], [1], [0, 0, 1, 1], [], []>} : vector<8x181xf32>, vector<181x49xf32>, vector<8x49xf32> -> vector<8x49xf32>
    %c1 = arith.constant 1 : index
    %c0_15 = arith.constant 0 : index
    %25 = vector.load %arg7[%c1, %c0_15] : memref<3x128xf32, #tpu.memory_space<vmem>>, vector<1x49xf32>
    %26 = vector.broadcast %25 : vector<1x49xf32> to vector<8x49xf32>
    %27 = arith.addf %24, %26 : vector<8x49xf32>
    %cst_16 = arith.constant 0.000000e+00 : f32
    %28 = vector.broadcast %cst_16 : f32 to vector<8x49xf32>
    %29 = arith.maximumf %27, %28 : vector<8x49xf32>
    %c0_17 = arith.constant 0 : index
    %c0_18 = arith.constant 0 : index
    %30 = vector.load %arg6[%c0_17, %c0_18] : memref<49x10xf32, #tpu.memory_space<vmem>>, vector<49x10xf32>
    %cst_19 = arith.constant dense<0.000000e+00> : vector<8x10xf32>
    %31 = tpu.matmul %29, %30, %cst_19 {dimension_numbers = #tpu.dot_dimension_numbers<[1], [0], [0], [1], [0, 0, 1, 1], [], []>} : vector<8x49xf32>, vector<49x10xf32>, vector<8x10xf32> -> vector<8x10xf32>
    %c2 = arith.constant 2 : index
    %c0_20 = arith.constant 0 : index
    %32 = vector.load %arg7[%c2, %c0_20] : memref<3x128xf32, #tpu.memory_space<vmem>>, vector<1x10xf32>
    %33 = vector.broadcast %32 : vector<1x10xf32> to vector<8x10xf32>
    %34 = arith.addf %31, %33 : vector<8x10xf32>
    %cst_21 = arith.constant dense<0xFF800000> : vector<8xf32>
    %35 = vector.multi_reduction <maximumf>, %34, %cst_21 [1] : vector<8x10xf32> to vector<8xf32>
    %36 = vector.shape_cast %35 : vector<8xf32> to vector<8x1xf32>
    %37 = vector.broadcast %36 : vector<8x1xf32> to vector<8x10xf32>
    %38 = arith.subf %34, %37 : vector<8x10xf32>
    %39 = math.exp %38 : vector<8x10xf32>
    %cst_22 = arith.constant dense<0.000000e+00> : vector<8xf32>
    %40 = vector.multi_reduction <add>, %39, %cst_22 [1] : vector<8x10xf32> to vector<8xf32>
    %41 = vector.shape_cast %40 : vector<8xf32> to vector<8x1xf32>
    %42 = math.log %41 : vector<8x1xf32>
    %43 = arith.addf %36, %42 : vector<8x1xf32>
    %44 = vector.broadcast %43 : vector<8x1xf32> to vector<8x10xf32>
    %45 = arith.subf %34, %44 : vector<8x10xf32>
    %c0_23 = arith.constant 0 : index
    %c0_24 = arith.constant 0 : index
    %46 = vector.load %arg8[%c0_23, %c0_24] : memref<8x10xf32, #tpu.memory_space<vmem>>, vector<8x10xf32>
    tpu.vector_store %arg8[%c0_23, %c0_24], %45 {strides = array<i32>} : memref<8x10xf32, #tpu.memory_space<vmem>>, vector<8x10xf32>,
    return
  }
  func.func @transform_0(%arg0: i32) -> (i32, i32) {
    %c0_i32 = arith.constant 0 : i32
    %c0_i32_0 = arith.constant 0 : i32
    return %arg0, %c0_i32 : i32, i32
  }
  func.func @transform_1(%arg0: i32) -> (i32, i32) {
    %c0_i32 = arith.constant 0 : i32
    %c0_i32_0 = arith.constant 0 : i32
    %c0_i32_1 = arith.constant 0 : i32
    return %c0_i32, %c0_i32_0 : i32, i32
  }
  func.func @transform_2(%arg0: i32) -> (i32, i32) {
    %c0_i32 = arith.constant 0 : i32
    %c0_i32_0 = arith.constant 0 : i32
    %c0_i32_1 = arith.constant 0 : i32
    return %c0_i32, %c0_i32_0 : i32, i32
  }
  func.func @transform_3(%arg0: i32) -> (i32, i32) {
    %c0_i32 = arith.constant 0 : i32
    %c0_i32_0 = arith.constant 0 : i32
    %c0_i32_1 = arith.constant 0 : i32
    return %c0_i32, %c0_i32_0 : i32, i32
  }
  func.func @transform_4(%arg0: i32) -> (i32, i32) {
    %c0_i32 = arith.constant 0 : i32
    %c0_i32_0 = arith.constant 0 : i32
    %c0_i32_1 = arith.constant 0 : i32
    return %c0_i32, %c0_i32_0 : i32, i32
  }
  func.func @transform_5(%arg0: i32) -> (i32, i32) {
    %c0_i32 = arith.constant 0 : i32
    %c0_i32_0 = arith.constant 0 : i32
    %c0_i32_1 = arith.constant 0 : i32
    return %c0_i32, %c0_i32_0 : i32, i32
  }
  func.func @transform_6(%arg0: i32) -> (i32, i32) {
    %c0_i32 = arith.constant 0 : i32
    %c0_i32_0 = arith.constant 0 : i32
    %c0_i32_1 = arith.constant 0 : i32
    return %c0_i32, %c0_i32_0 : i32, i32
  }
  func.func @transform_7(%arg0: i32) -> (i32, i32) {
    %c0_i32 = arith.constant 0 : i32
    %c0_i32_0 = arith.constant 0 : i32
    return %arg0, %c0_i32 : i32, i32
  }
}

</mosaic_0001>

<bundles_post_ra>
// kernel: net_forward.1
= control target key start
LH: loop header
LB: loop body
LE: loop exit
PB: predicated region body
PF: predicated region fallthrough
CT: control target
= control target key end

     0   :  { %12 = vsyncpa [#allocation3], 0  ;;  %s19180_s24 = smov [#allocation2]   ;;  %s21046_s0 = inlined_call_operand.vmem [shape: f32[8,784], index: 0, kind: input, shape index: {}]   ;;  %s21047_s1 = inlined_call_operand.hbm [shape: bf16[784,3528], index: 1, kind: input, shape index: {}]   ;;  %s21048_s2 = inlined_call_operand.vmem [shape: f32[1,3528], index: 2, kind: input, shape index: {}]   ;;  %s21049_s3 = inlined_call_operand.vmem [shape: bf16[3528,196], index: 3, kind: input, shape index: {}]   ;;  %s21050_s4 = inlined_call_operand.vmem [shape: f32[181,49], index: 4, kind: input, shape index: {}]   ;;  %s21051_s5 = inlined_call_operand.vmem [shape: f32[49,10], index: 5, kind: input, shape index: {}]   ;;  %s21052_s6 = inlined_call_operand.vmem [shape: f32[3,128], index: 6, kind: input, shape index: {}]   ;;  %s21053_s7 = inlined_call_operand.vmem [shape: f32[8,10], index: 7, kind: output, shape index: {}]  }
   0x1   :  { %s20_s25 = sshll.u32 %s19180_s24, 4  ;;  %s19156_s28 = scalar_lea.hbm %s21047_s1, 175616  ;;  %s21_s25 = int_to_ptr.vmem [resolvable:$true] %s20_s25 }
   0x2   :  { %p19157_p0 = scmp.ne.s32.totalorder %s21047_s1, %s19156_s28  ;;  %p19160_p1 = scmp.lt.u32.totalorder %s19156_s28, %s21047_s1 }
   0x4   :  { %p19162_p2 = pnand %p19160_p1, %p19157_p0 }
   0x6   :  { %19165 = shalt.err (!%p19162_p2)
}
   0x7   :  { %s19166_s10 = scalar_lea.vmem %s21_s25, 175616  ;;  %p19171_p4 = scmp.lt.s32.totalorder %s21_s25, %s21_s25 }
   0x8   :  { %p19167_p3 = scmp.ne.s32.totalorder %s21_s25, %s19166_s10  ;;  %p19172_p5 = scmp.lt.s32.totalorder %s19166_s10, %s19166_s10 }
   0xa   :  { %p19173_p6 = por %p19172_p5, %p19171_p4 }
   0xc   :  { %p19174_p7 = pnand %p19173_p6, %p19167_p3 }
   0xe   :  { %19177 = shalt.err (!%p19174_p7)
}
   0xf   :  { %s19181_s11 = smov 1792   ;;  %s19182_s12 = smov 112  }
  0x10   :  { %26 = dma.hbm_to_vmem [thread:$0]  %s21047_s1, 175616, %s21_s25, [#allocation3], %s19181_s11, %s19181_s11, %s19182_s12  }
  0x11   :  { %19178 = dma.done.wait [#allocation3], 175616  }
  0x12   :  { %19179 = vsyncadd [#allocation3], 4294791680  ;;  %v19183_v0 = vmov 0   ;;  %v16428_v1 = vld [vmem:[#allocation2 + $0x4] ss:$112 sps:$4 sm:$0xff]   ;;  %vm8435_vm0 = vcmask 130048  }
  0x13   :  { %8922 = vmatprep.mubr.bf16.mxu0 %v19183_v0  ;;  %v16430_v2 = vld [vmem:[#allocation2 + $0x2a14] ss:$112 sps:$4 sm:$0xff]   ;;  %8439 = vmatprep.subr.bf16.mxu1 %v16428_v1  ;;  %v16432_v3 = vld [vmem:[#allocation2] ss:$112 sps:$4 sm:$0xff]   ;;  %v42_v49 = vld [vmem:[%s21046_s0 + $0x8] sm:$0xff]  ;;  %vm13446_vm1 = vcmask 1043456  }
  0x14   :  { %v16433_v4 = vld [vmem:[#allocation2 + $0x2a10] ss:$112 sps:$4 sm:$0xff]   ;;  %8890 = vmatprep.subr.bf16.mxu0 %v16430_v2  ;;  %v16434_v5 = vld [vmem:[#allocation2 + $0xe4] ss:$112 sps:$4 sm:$0xff]   ;;  %8440 = vmatpush1.bf16.msra.mxu1 %v16432_v3  ;;  %v19252_v51 = vpack.c.bf16 %v42_v49, %v42_v49  ;;  %vm13442_vm2 = vcmask 588800   ;;  %s19185_s30 = smov 127  }
  0x15   :  { %8891 = vmatpush1.bf16.msra.mxu0 %v16433_v4  ;;  %v16436_v6 = vld [vmem:[#allocation2 + $0x20] ss:$112 sps:$4 sm:$0xff]   ;;  %v16438_v7 = vld [vmem:[#allocation2 + $0x24] ss:$112 sps:$4 sm:$0xff]   ;;  %8441 = vmatprep.subr.bf16.mxu1 %v16434_v5  ;;  %vm14085_vm3 = vcmask 1044480   ;;  %vm14035_vm4 = vcmask 1039360  }
  0x16   :  { %v16439_v8 = vld [vmem:[#allocation2 + $0xe0] ss:$112 sps:$4 sm:$0xff]   ;;  %9095 = vmatprep.subr.bf16.mxu0 %v16438_v7  ;;  %v16440_v11 = vld [vmem:[#allocation2 + $0x1c4] ss:$112 sps:$4 sm:$0xff]   ;;  %8471 = vmatprep.mubr.bf16.mxu1 %v19252_v51  ;;  %s19187_s17 = smov 114   ;;  %vm14047_vm5 = vcmask 932864  }
  0x17   :  { %v47_v9 = vld [vmem:[%s21046_s0 + $0x30] sm:$0xff]  ;;  %vm14081_vm6 = vcmask 433152   ;;  %vm14176_vm7 = vcmask 1040384   ;;  %vm19188_vm8 = vmmov 0   ;;  %vm14172_vm9 = vcmask 400384  }
  0x18   :  { %v19245_v10 = vpack.c.bf16 %v47_v9, %v47_v9  ;;  %v16442_v12 = vld [vmem:[#allocation2 + $0x100] ss:$112 sps:$4 sm:$0xff]   ;;  %v16444_v13 = vld [vmem:[#allocation2 + $0x104] ss:$112 sps:$4 sm:$0xff]   ;;  %8442 = vmatpush1.bf16.msra.mxu1 %v16439_v8  ;;  %vm14250_vm10 = vcmask 80896  }
  0x19   :  { %v16445_v14 = vld [vmem:[#allocation2 + $0x1c0] ss:$112 sps:$4 sm:$0xff]   ;;  %8443 = vmatprep.subr.bf16.mxu1 %v16440_v11  ;;  %v16446_v15 = vld [vmem:[#allocation2 + $0x2a4] ss:$112 sps:$4 sm:$0xff]  }
  0x1a   :  { %15644 = vmatmul.mubr.msk.bf16.vlgmr.msra.gmra.mrb[0].mxu0 %vm8435_vm0, %v19245_v10  ;;  %v16450_v16 = vld [vmem:[#allocation2 + $0x1e4] ss:$112 sps:$4 sm:$0xff]   ;;  %v16451_v17 = vld [vmem:[#allocation2 + $0x2a0] ss:$112 sps:$4 sm:$0xff]  }
  0x1b   :  { %9096 = vmatpush1.bf16.msra.mxu0 %v16436_v6  ;;  %v16448_v18 = vld [vmem:[#allocation2 + $0x1e0] ss:$112 sps:$4 sm:$0xff]   ;;  %v16452_v19 = vld [vmem:[#allocation2 + $0x384] ss:$112 sps:$4 sm:$0xff]   ;;  %9127 = vmatprep.mubr.bf16.mxu0 %v19252_v51 }
  0x1c   :  { %9097 = vmatprep.subr.bf16.mxu0 %v16444_v13  ;;  %8444 = vmatpush1.bf16.msra.mxu1 %v16445_v14  ;;  %v16456_v20 = vld [vmem:[#allocation2 + $0x2c4] ss:$112 sps:$4 sm:$0xff]   ;;  %v16454_v21 = vld [vmem:[#allocation2 + $0x2c0] ss:$112 sps:$4 sm:$0xff]  }
  0x1d   :  { %8445 = vmatprep.subr.bf16.mxu1 %v16446_v15  ;;  %v16457_v22 = vld [vmem:[#allocation2 + $0x380] ss:$112 sps:$4 sm:$0xff]   ;;  %v16458_v23 = vld [vmem:[#allocation2 + $0x464] ss:$112 sps:$4 sm:$0xff]  }
  0x1e   :  { %v16462_v24 = vld [vmem:[#allocation2 + $0x3a4] ss:$112 sps:$4 sm:$0xff]   ;;  %v16463_v25 = vld [vmem:[#allocation2 + $0x460] ss:$112 sps:$4 sm:$0xff]  }
  0x1f   :  { %9098 = vmatpush1.bf16.msra.mxu0 %v16442_v12  ;;  %v16460_v26 = vld [vmem:[#allocation2 + $0x3a0] ss:$112 sps:$4 sm:$0xff]   ;;  %v16464_v27 = vld [vmem:[#allocation2 + $0x544] ss:$112 sps:$4 sm:$0xff]  }
  0x20   :  { %9099 = vmatprep.subr.bf16.mxu0 %v16450_v16  ;;  %8446 = vmatpush1.bf16.msra.mxu1 %v16451_v17  ;;  %v16468_v28 = vld [vmem:[#allocation2 + $0x484] ss:$112 sps:$4 sm:$0xff]   ;;  %v16466_v29 = vld [vmem:[#allocation2 + $0x480] ss:$112 sps:$4 sm:$0xff]  }
  0x21   :  { %8447 = vmatprep.subr.bf16.mxu1 %v16452_v19  ;;  %v16469_v30 = vld [vmem:[#allocation2 + $0x540] ss:$112 sps:$4 sm:$0xff]   ;;  %v16470_v31 = vld [vmem:[#allocation2 + $0x624] ss:$112 sps:$4 sm:$0xff]  }
  0x22   :  { %v16474_v32 = vld [vmem:[#allocation2 + $0x564] ss:$112 sps:$4 sm:$0xff]   ;;  %v16475_v33 = vld [vmem:[#allocation2 + $0x620] ss:$112 sps:$4 sm:$0xff]  }
  0x23   :  { %9100 = vmatpush1.bf16.msra.mxu0 %v16448_v18  ;;  %v16472_v34 = vld [vmem:[#allocation2 + $0x560] ss:$112 sps:$4 sm:$0xff]   ;;  %v16476_v35 = vld [vmem:[#allocation2 + $0x704] ss:$112 sps:$4 sm:$0xff]  }
  0x24   :  { %9101 = vmatprep.subr.bf16.mxu0 %v16456_v20  ;;  %8448 = vmatpush1.bf16.msra.mxu1 %v16457_v22  ;;  %v16480_v36 = vld [vmem:[#allocation2 + $0x644] ss:$112 sps:$4 sm:$0xff]   ;;  %v16478_v37 = vld [vmem:[#allocation2 + $0x640] ss:$112 sps:$4 sm:$0xff]  }
  0x25   :  { %8449 = vmatprep.subr.bf16.mxu1 %v16458_v23  ;;  %v16481_v38 = vld [vmem:[#allocation2 + $0x700] ss:$112 sps:$4 sm:$0xff]   ;;  %v16482_v39 = vld [vmem:[#allocation2 + $0x7e4] ss:$112 sps:$4 sm:$0xff]  }
  0x26   :  { %v16486_v40 = vld [vmem:[#allocation2 + $0x724] ss:$112 sps:$4 sm:$0xff]   ;;  %v16487_v41 = vld [vmem:[#allocation2 + $0x7e0] ss:$112 sps:$4 sm:$0xff]  }
  0x27   :  { %9102 = vmatpush1.bf16.msra.mxu0 %v16454_v21  ;;  %v16484_v42 = vld [vmem:[#allocation2 + $0x720] ss:$112 sps:$4 sm:$0xff]   ;;  %v16488_v43 = vld [vmem:[#allocation2 + $0x8c4] ss:$112 sps:$4 sm:$0xff]  }
  0x28   :  { %9103 = vmatprep.subr.bf16.mxu0 %v16462_v24  ;;  %8450 = vmatpush1.bf16.msra.mxu1 %v16463_v25  ;;  %v16492_v44 = vld [vmem:[#allocation2 + $0x804] ss:$112 sps:$4 sm:$0xff]   ;;  %v16490_v45 = vld [vmem:[#allocation2 + $0x800] ss:$112 sps:$4 sm:$0xff]  }
  0x29   :  { %8451 = vmatprep.subr.bf16.mxu1 %v16464_v27  ;;  %v16493_v46 = vld [vmem:[#allocation2 + $0x8c0] ss:$112 sps:$4 sm:$0xff]   ;;  %v16494_v47 = vld [vmem:[#allocation2 + $0x9a4] ss:$112 sps:$4 sm:$0xff]  }
  0x2a   :  { %v16498_v48 = vld [vmem:[#allocation2 + $0x8e4] ss:$112 sps:$4 sm:$0xff]   ;;  %v16499_v50 = vld [vmem:[#allocation2 + $0x9a0] ss:$112 sps:$4 sm:$0xff]  }
  0x2b   :  { %9104 = vmatpush1.bf16.msra.mxu0 %v16460_v26  ;;  %v16496_v52 = vld [vmem:[#allocation2 + $0x8e0] ss:$112 sps:$4 sm:$0xff]   ;;  %v16500_v53 = vld [vmem:[#allocation2 + $0xa84] ss:$112 sps:$4 sm:$0xff]  }
  0x2c   :  { %9105 = vmatprep.subr.bf16.mxu0 %v16468_v28  ;;  %8452 = vmatpush1.bf16.msra.mxu1 %v16469_v30  ;;  %v16504_v54 = vld [vmem:[#allocation2 + $0x9c4] ss:$112 sps:$4 sm:$0xff]   ;;  %v16502_v55 = vld [vmem:[#allocation2 + $0x9c0] ss:$112 sps:$4 sm:$0xff]  }
  0x2d   :  { %8453 = vmatprep.subr.bf16.mxu1 %v16470_v31  ;;  %v16505_v56 = vld [vmem:[#allocation2 + $0xa80] ss:$112 sps:$4 sm:$0xff]   ;;  %v16506_v57 = vld [vmem:[#allocation2 + $0xb64] ss:$112 sps:$4 sm:$0xff]  }
  0x2e   :  { %v16510_v58 = vld [vmem:[#allocation2 + $0xaa4] ss:$112 sps:$4 sm:$0xff]   ;;  %v16508_v59 = vld [vmem:[#allocation2 + $0xaa0] ss:$112 sps:$4 sm:$0xff]  }
  0x2f   :  { %9106 = vmatpush1.bf16.msra.mxu0 %v16466_v29  ;;  %v16511_v60 = vld [vmem:[#allocation2 + $0xb60] ss:$112 sps:$4 sm:$0xff]   ;;  %v16512_v61 = vld [vmem:[#allocation2 + $0xc44] ss:$112 sps:$4 sm:$0xff]  }
  0x30   :  { %9107 = vmatprep.subr.bf16.mxu0 %v16474_v32  ;;  %8454 = vmatpush1.bf16.msra.mxu1 %v16475_v33  ;;  %v16516_v62 = vld [vmem:[#allocation2 + $0xb84] ss:$112 sps:$4 sm:$0xff]   ;;  %v16514_v63 = vld [vmem:[#allocation2 + $0xb80] ss:$112 sps:$4 sm:$0xff]  }
  0x31   :  { %8455 = vmatprep.subr.bf16.mxu1 %v16476_v35  ;;  %v16517_v1 = vld [vmem:[#allocation2 + $0xc40] ss:$112 sps:$4 sm:$0xff]   ;;  %v16518_v2 = vld [vmem:[#allocation2 + $0xd24] ss:$112 sps:$4 sm:$0xff]   ;;  %v44_v35 = vld [vmem:[%s21046_s0 + $0x18] sm:$0xff] }
  0x32   :  { %v16522_v3 = vld [vmem:[#allocation2 + $0xc64] ss:$112 sps:$4 sm:$0xff]   ;;  %v16520_v4 = vld [vmem:[#allocation2 + $0xc60] ss:$112 sps:$4 sm:$0xff]  }
  0x33   :  { %9108 = vmatpush1.bf16.msra.mxu0 %v16472_v34  ;;  %v16523_v5 = vld [vmem:[#allocation2 + $0xd20] ss:$112 sps:$4 sm:$0xff]   ;;  %v16526_v7 = vld [vmem:[#allocation2 + $0xe04] ss:$112 sps:$4 sm:$0xff]  }
  0x34   :  { %9109 = vmatprep.subr.bf16.mxu0 %v16480_v36  ;;  %8456 = vmatpush1.bf16.msra.mxu1 %v16481_v38  ;;  %v41_v6 = vld [vmem:[%s21046_s0] sm:$0xff]  ;;  %v19266_v36 = vpack.c.bf16 %v44_v35, %v44_v35 }
  0x35   :  { %8457 = vmatprep.subr.bf16.mxu1 %v16482_v39  ;;  %v16529_v8 = vld [vmem:[#allocation2 + $0xd44] ss:$112 sps:$4 sm:$0xff]   ;;  %v19259_v9 = vpack.c.bf16 %v41_v6, %v41_v6  ;;  %v16524_v11 = vld [vmem:[#allocation2 + $0xe00] ss:$112 sps:$4 sm:$0xff]  }
  0x36   :  { %v16527_v12 = vld [vmem:[#allocation2 + $0xd40] ss:$112 sps:$4 sm:$0xff]   ;;  %v16532_v13 = vld [vmem:[#allocation2 + $0xee4] ss:$112 sps:$4 sm:$0xff]  }
  0x37   :  { %9110 = vmatpush1.bf16.msra.mxu0 %v16478_v37  ;;  %v16535_v14 = vld [vmem:[#allocation2 + $0xe24] ss:$112 sps:$4 sm:$0xff]   ;;  %v16530_v15 = vld [vmem:[#allocation2 + $0xee0] ss:$112 sps:$4 sm:$0xff]  }
  0x38   :  { %9111 = vmatprep.subr.bf16.mxu0 %v16486_v40  ;;  %8458 = vmatpush1.bf16.msra.mxu1 %v16487_v41  ;;  %v16533_v16 = vld [vmem:[#allocation2 + $0xe20] ss:$112 sps:$4 sm:$0xff]   ;;  %v16538_v17 = vld [vmem:[#allocation2 + $0xfc4] ss:$112 sps:$4 sm:$0xff]  }
  0x39   :  { %8459 = vmatprep.subr.bf16.mxu1 %v16488_v43  ;;  %v16541_v18 = vld [vmem:[#allocation2 + $0xf04] ss:$112 sps:$4 sm:$0xff]   ;;  %v16536_v19 = vld [vmem:[#allocation2 + $0xfc0] ss:$112 sps:$4 sm:$0xff]  }
  0x3a   :  { %v16539_v20 = vld [vmem:[#allocation2 + $0xf00] ss:$112 sps:$4 sm:$0xff]   ;;  %v16544_v21 = vld [vmem:[#allocation2 + $0x10a4] ss:$112 sps:$4 sm:$0xff]  }
  0x3b   :  { %9112 = vmatpush1.bf16.msra.mxu0 %v16484_v42  ;;  %v16547_v22 = vld [vmem:[#allocation2 + $0xfe4] ss:$112 sps:$4 sm:$0xff]   ;;  %v16542_v23 = vld [vmem:[#allocation2 + $0x10a0] ss:$112 sps:$4 sm:$0xff]  }
  0x3c   :  { %9113 = vmatprep.subr.bf16.mxu0 %v16492_v44  ;;  %8460 = vmatpush1.bf16.msra.mxu1 %v16493_v46  ;;  %v16545_v24 = vld [vmem:[#allocation2 + $0xfe0] ss:$112 sps:$4 sm:$0xff]   ;;  %v16550_v25 = vld [vmem:[#allocation2 + $0x1184] ss:$112 sps:$4 sm:$0xff]  }
  0x3d   :  { %8461 = vmatprep.subr.bf16.mxu1 %v16494_v47  ;;  %v16553_v26 = vld [vmem:[#allocation2 + $0x10c4] ss:$112 sps:$4 sm:$0xff]   ;;  %v16548_v27 = vld [vmem:[#allocation2 + $0x1180] ss:$112 sps:$4 sm:$0xff]  }
  0x3e   :  { %v16551_v28 = vld [vmem:[#allocation2 + $0x10c0] ss:$112 sps:$4 sm:$0xff]   ;;  %v16556_v29 = vld [vmem:[#allocation2 + $0x1264] ss:$112 sps:$4 sm:$0xff]  }
  0x3f   :  { %9114 = vmatpush1.bf16.msra.mxu0 %v16490_v45  ;;  %v16559_v30 = vld [vmem:[#allocation2 + $0x11a4] ss:$112 sps:$4 sm:$0xff]   ;;  %v16554_v31 = vld [vmem:[#allocation2 + $0x1260] ss:$112 sps:$4 sm:$0xff]  }
  0x40   :  { %9115 = vmatprep.subr.bf16.mxu0 %v16498_v48  ;;  %8462 = vmatpush1.bf16.msra.mxu1 %v16499_v50  ;;  %v16557_v32 = vld [vmem:[#allocation2 + $0x11a0] ss:$112 sps:$4 sm:$0xff]   ;;  %v16562_v33 = vld [vmem:[#allocation2 + $0x1344] ss:$112 sps:$4 sm:$0xff]  }
  0x41   :  { %8463 = vmatprep.subr.bf16.mxu1 %v16500_v53  ;;  %v16565_v34 = vld [vmem:[#allocation2 + $0x1284] ss:$112 sps:$4 sm:$0xff]   ;;  %v16560_v37 = vld [vmem:[#allocation2 + $0x1340] ss:$112 sps:$4 sm:$0xff]  }
  0x42   :  { %v16563_v38 = vld [vmem:[#allocation2 + $0x1280] ss:$112 sps:$4 sm:$0xff]   ;;  %v16568_v39 = vld [vmem:[#allocation2 + $0x1424] ss:$112 sps:$4 sm:$0xff]  }
  0x43   :  { %9116 = vmatpush1.bf16.msra.mxu0 %v16496_v52  ;;  %v16571_v40 = vld [vmem:[#allocation2 + $0x1364] ss:$112 sps:$4 sm:$0xff]   ;;  %v16566_v41 = vld [vmem:[#allocation2 + $0x1420] ss:$112 sps:$4 sm:$0xff]  }
  0x44   :  { %9117 = vmatprep.subr.bf16.mxu0 %v16504_v54  ;;  %8464 = vmatpush1.bf16.msra.mxu1 %v16505_v56  ;;  %v16569_v42 = vld [vmem:[#allocation2 + $0x1360] ss:$112 sps:$4 sm:$0xff]   ;;  %v16574_v43 = vld [vmem:[#allocation2 + $0x1504] ss:$112 sps:$4 sm:$0xff]  }
  0x45   :  { %8465 = vmatprep.subr.bf16.mxu1 %v16506_v57  ;;  %v16577_v44 = vld [vmem:[#allocation2 + $0x1444] ss:$112 sps:$4 sm:$0xff]   ;;  %v16572_v45 = vld [vmem:[#allocation2 + $0x1500] ss:$112 sps:$4 sm:$0xff]  }
  0x46   :  { %v16575_v46 = vld [vmem:[#allocation2 + $0x1440] ss:$112 sps:$4 sm:$0xff]   ;;  %v16580_v47 = vld [vmem:[#allocation2 + $0x15e4] ss:$112 sps:$4 sm:$0xff]  }
  0x47   :  { %9118 = vmatpush1.bf16.msra.mxu0 %v16502_v55  ;;  %v16583_v48 = vld [vmem:[#allocation2 + $0x1524] ss:$112 sps:$4 sm:$0xff]   ;;  %v16578_v49 = vld [vmem:[#allocation2 + $0x15e0] ss:$112 sps:$4 sm:$0xff]  }
  0x48   :  { %9119 = vmatprep.subr.bf16.mxu0 %v16510_v58  ;;  %8466 = vmatpush1.bf16.msra.mxu1 %v16511_v60  ;;  %v16581_v50 = vld [vmem:[#allocation2 + $0x1520] ss:$112 sps:$4 sm:$0xff]   ;;  %v16586_v52 = vld [vmem:[#allocation2 + $0x16c4] ss:$112 sps:$4 sm:$0xff]  }
  0x49   :  { %8467 = vmatprep.subr.bf16.mxu1 %v16512_v61  ;;  %v16589_v53 = vld [vmem:[#allocation2 + $0x1604] ss:$112 sps:$4 sm:$0xff]   ;;  %v16584_v54 = vld [vmem:[#allocation2 + $0x16c0] ss:$112 sps:$4 sm:$0xff]  }
  0x4a   :  { %v16587_v55 = vld [vmem:[#allocation2 + $0x1600] ss:$112 sps:$4 sm:$0xff]   ;;  %v16592_v56 = vld [vmem:[#allocation2 + $0x17a4] ss:$112 sps:$4 sm:$0xff]  }
  0x4b   :  { %9120 = vmatpush1.bf16.msra.mxu0 %v16508_v59  ;;  %v16595_v57 = vld [vmem:[#allocation2 + $0x16e4] ss:$112 sps:$4 sm:$0xff]   ;;  %v16590_v58 = vld [vmem:[#allocation2 + $0x17a0] ss:$112 sps:$4 sm:$0xff]  }
  0x4c   :  { %9121 = vmatprep.subr.bf16.mxu0 %v16516_v62  ;;  %8468 = vmatpush1.bf16.msra.mxu1 %v16517_v1  ;;  %v16593_v59 = vld [vmem:[#allocation2 + $0x16e0] ss:$112 sps:$4 sm:$0xff]   ;;  %v16598_v60 = vld [vmem:[#allocation2 + $0x1884] ss:$112 sps:$4 sm:$0xff]  }
  0x4d   :  { %8469 = vmatprep.subr.bf16.mxu1 %v16518_v2  ;;  %v16601_v61 = vld [vmem:[#allocation2 + $0x17c4] ss:$112 sps:$4 sm:$0xff]   ;;  %v16596_v62 = vld [vmem:[#allocation2 + $0x1880] ss:$112 sps:$4 sm:$0xff]  }
  0x4e   :  { %v16604_v1 = vld [vmem:[#allocation2 + $0x1964] ss:$112 sps:$4 sm:$0xff]  }
  0x4f   :  { %9122 = vmatpush1.bf16.msra.mxu0 %v16514_v63  ;;  %v16599_v63 = vld [vmem:[#allocation2 + $0x17c0] ss:$112 sps:$4 sm:$0xff]   ;;  %v16607_v2 = vld [vmem:[#allocation2 + $0x18a4] ss:$112 sps:$4 sm:$0xff]  }
  0x50   :  { %9123 = vmatprep.subr.bf16.mxu0 %v16522_v3  ;;  %8470 = vmatpush1.bf16.msra.mxu1 %v16523_v5  ;;  %v16602_v3 = vld [vmem:[#allocation2 + $0x1960] ss:$112 sps:$4 sm:$0xff]   ;;  %v16610_v5 = vld [vmem:[#allocation2 + $0x1a44] ss:$112 sps:$4 sm:$0xff]  }
  0x51   :  { %8480 = vmatprep.subr.bf16.mxu1 %v16526_v7  ;;  %v16613_v6 = vld [vmem:[#allocation2 + $0x1984] ss:$112 sps:$4 sm:$0xff]   ;;  %v16608_v7 = vld [vmem:[#allocation2 + $0x1a40] ss:$112 sps:$4 sm:$0xff]  }
  0x52   :  { %v16646_v35 = vld [vmem:[#allocation2 + $0x1f84] ss:$112 sps:$4 sm:$0xff]  }
  0x53   :  { %9124 = vmatpush1.bf16.msra.mxu0 %v16520_v4  ;;  %8472 = vmatmul.mubr.bf16.vlgmr.msra.gmra.mrb[0].mxu1 %v19259_v9  ;;  %v16605_v4 = vld [vmem:[#allocation2 + $0x18a0] ss:$112 sps:$4 sm:$0xff]  }
  0x54   :  { %9125 = vmatprep.subr.bf16.mxu0 %v16529_v8  ;;  %8481 = vmatpush1.bf16.msra.mxu1 %v16524_v11  ;;  %v16611_v8 = vld [vmem:[#allocation2 + $0x1980] ss:$112 sps:$4 sm:$0xff]   ;;  %v16616_v11 = vld [vmem:[#allocation2 + $0x1b24] ss:$112 sps:$4 sm:$0xff]  }
  0x55   :  { %8482 = vmatprep.subr.bf16.mxu1 %v16532_v13  ;;  %8512 = vmatprep.mubr.bf16.mxu1 %v19266_v36  ;;  %v16614_v13 = vld [vmem:[#allocation2 + $0x1b20] ss:$112 sps:$4 sm:$0xff]  }
  0x57   :  { %9126 = vmatpush1.bf16.msra.mxu0 %v16527_v12  ;;  %v16619_v12 = vld [vmem:[#allocation2 + $0x1a64] ss:$112 sps:$4 sm:$0xff]  }
  0x58   :  { %9136 = vmatprep.subr.bf16.mxu0 %v16535_v14  ;;  %8483 = vmatpush1.bf16.msra.mxu1 %v16530_v15  ;;  %v43_v14 = vld [vmem:[%s21046_s0 + $0x10] sm:$0xff] }
  0x59   :  { %8484 = vmatprep.subr.bf16.mxu1 %v16538_v17  ;;  %v16617_v15 = vld [vmem:[#allocation2 + $0x1a60] ss:$112 sps:$4 sm:$0xff]   ;;  %v16625_v17 = vld [vmem:[#allocation2 + $0x1b44] ss:$112 sps:$4 sm:$0xff]  }
  0x5a   :  { %9128 = vmatmul.mubr.bf16.vlgmr.msra.gmra.mrb[4].mxu0 %v19259_v9 }
  0x5b   :  { %9137 = vmatpush1.bf16.msra.mxu0 %v16533_v16  ;;  %9168 = vmatprep.mubr.bf16.mxu0 %v19266_v36  ;;  %v16622_v16 = vld [vmem:[#allocation2 + $0x1c04] ss:$112 sps:$4 sm:$0xff]  }
  0x5c   :  { %9138 = vmatprep.subr.bf16.mxu0 %v16541_v18  ;;  %8485 = vmatpush1.bf16.msra.mxu1 %v16536_v19  ;;  %v19273_v18 = vpack.c.bf16 %v43_v14, %v43_v14  ;;  %v16620_v19 = vld [vmem:[#allocation2 + $0x1c00] ss:$112 sps:$4 sm:$0xff]  }
  0x5d   :  { %8486 = vmatprep.subr.bf16.mxu1 %v16544_v21  ;;  %v16628_v21 = vld [vmem:[#allocation2 + $0x1ce4] ss:$112 sps:$4 sm:$0xff]   ;;  %v16698_v14 = vld [vmem:[#allocation2 + $0x2760] ss:$112 sps:$4 sm:$0xff]  }
  0x5f   :  { %9139 = vmatpush1.bf16.msra.mxu0 %v16539_v20  ;;  %v16623_v20 = vld [vmem:[#allocation2 + $0x1b40] ss:$112 sps:$4 sm:$0xff]  }
  0x60   :  { %9140 = vmatprep.subr.bf16.mxu0 %v16547_v22  ;;  %8487 = vmatpush1.bf16.msra.mxu1 %v16542_v23  ;;  %v46_v22 = vld [vmem:[%s21046_s0 + $0x28] sm:$0xff]  ;;  %v16631_v23 = vld [vmem:[#allocation2 + $0x1c24] ss:$112 sps:$4 sm:$0xff]  }
  0x61   :  { %8488 = vmatprep.subr.bf16.mxu1 %v16550_v25  ;;  %v16626_v25 = vld [vmem:[#allocation2 + $0x1ce0] ss:$112 sps:$4 sm:$0xff]  }
  0x63   :  { %9141 = vmatpush1.bf16.msra.mxu0 %v16545_v24  ;;  %v19278_v24 = vpack.c.bf16 %v46_v22, %v46_v22  ;;  %v16715_v22 = vld [vmem:[#allocation2 + $0x2864] ss:$112 sps:$4 sm:$0xff]  }
  0x64   :  { %9142 = vmatprep.subr.bf16.mxu0 %v16553_v26  ;;  %8489 = vmatpush1.bf16.msra.mxu1 %v16548_v27  ;;  %v16629_v26 = vld [vmem:[#allocation2 + $0x1c20] ss:$112 sps:$4 sm:$0xff]   ;;  %v16634_v27 = vld [vmem:[#allocation2 + $0x1dc4] ss:$112 sps:$4 sm:$0xff]  }
  0x65   :  { %8490 = vmatprep.subr.bf16.mxu1 %v16556_v29  ;;  %v16632_v29 = vld [vmem:[#allocation2 + $0x1dc0] ss:$112 sps:$4 sm:$0xff]  }
  0x67   :  { %9143 = vmatpush1.bf16.msra.mxu0 %v16551_v28  ;;  %v16637_v28 = vld [vmem:[#allocation2 + $0x1d04] ss:$112 sps:$4 sm:$0xff]  }
  0x68   :  { %9144 = vmatprep.subr.bf16.mxu0 %v16559_v30  ;;  %8491 = vmatpush1.bf16.msra.mxu1 %v16554_v31  ;;  %v16635_v30 = vld [vmem:[#allocation2 + $0x1d00] ss:$112 sps:$4 sm:$0xff]   ;;  %v16640_v31 = vld [vmem:[#allocation2 + $0x1ea4] ss:$112 sps:$4 sm:$0xff]  }
  0x69   :  { %8492 = vmatprep.subr.bf16.mxu1 %v16562_v33  ;;  %v16638_v33 = vld [vmem:[#allocation2 + $0x1ea0] ss:$112 sps:$4 sm:$0xff]  }
  0x6b   :  { %9145 = vmatpush1.bf16.msra.mxu0 %v16557_v32  ;;  %v16643_v32 = vld [vmem:[#allocation2 + $0x1de4] ss:$112 sps:$4 sm:$0xff]  }
  0x6c   :  { %9146 = vmatprep.subr.bf16.mxu0 %v16565_v34  ;;  %8493 = vmatpush1.bf16.msra.mxu1 %v16560_v37  ;;  %v16641_v34 = vld [vmem:[#allocation2 + $0x1de0] ss:$112 sps:$4 sm:$0xff]   ;;  %v16649_v37 = vld [vmem:[#allocation2 + $0x1ec4] ss:$112 sps:$4 sm:$0xff]  }
  0x6d   :  { %8494 = vmatprep.subr.bf16.mxu1 %v16568_v39  ;;  %v16647_v39 = vld [vmem:[#allocation2 + $0x1ec0] ss:$112 sps:$4 sm:$0xff]  }
  0x6f   :  { %9147 = vmatpush1.bf16.msra.mxu0 %v16563_v38  ;;  %v16644_v38 = vld [vmem:[#allocation2 + $0x1f80] ss:$112 sps:$4 sm:$0xff]  }
  0x70   :  { %9148 = vmatprep.subr.bf16.mxu0 %v16571_v40  ;;  %8495 = vmatpush1.bf16.msra.mxu1 %v16566_v41  ;;  %v16652_v40 = vld [vmem:[#allocation2 + $0x2064] ss:$112 sps:$4 sm:$0xff]  }
  0x71   :  { %8496 = vmatprep.subr.bf16.mxu1 %v16574_v43  ;;  %v16655_v41 = vld [vmem:[#allocation2 + $0x1fa4] ss:$112 sps:$4 sm:$0xff]   ;;  %v16653_v43 = vld [vmem:[#allocation2 + $0x1fa0] ss:$112 sps:$4 sm:$0xff]  }
  0x73   :  { %9149 = vmatpush1.bf16.msra.mxu0 %v16569_v42  ;;  %v16650_v42 = vld [vmem:[#allocation2 + $0x2060] ss:$112 sps:$4 sm:$0xff]  }
  0x74   :  { %9150 = vmatprep.subr.bf16.mxu0 %v16577_v44  ;;  %8497 = vmatpush1.bf16.msra.mxu1 %v16572_v45  ;;  %v16658_v44 = vld [vmem:[#allocation2 + $0x2144] ss:$112 sps:$4 sm:$0xff]  }
  0x75   :  { %8498 = vmatprep.subr.bf16.mxu1 %v16580_v47  ;;  %v16661_v45 = vld [vmem:[#allocation2 + $0x2084] ss:$112 sps:$4 sm:$0xff]   ;;  %v16659_v47 = vld [vmem:[#allocation2 + $0x2080] ss:$112 sps:$4 sm:$0xff]  }
  0x77   :  { %9151 = vmatpush1.bf16.msra.mxu0 %v16575_v46  ;;  %v16656_v46 = vld [vmem:[#allocation2 + $0x2140] ss:$112 sps:$4 sm:$0xff]  }
  0x78   :  { %9152 = vmatprep.subr.bf16.mxu0 %v16583_v48  ;;  %8499 = vmatpush1.bf16.msra.mxu1 %v16578_v49  ;;  %v16664_v48 = vld [vmem:[#allocation2 + $0x2224] ss:$112 sps:$4 sm:$0xff]  }
  0x79   :  { %8500 = vmatprep.subr.bf16.mxu1 %v16586_v52  ;;  %v16667_v49 = vld [vmem:[#allocation2 + $0x2164] ss:$112 sps:$4 sm:$0xff]   ;;  %v16665_v52 = vld [vmem:[#allocation2 + $0x2160] ss:$112 sps:$4 sm:$0xff]  }
  0x7b   :  { %9153 = vmatpush1.bf16.msra.mxu0 %v16581_v50  ;;  %v16662_v50 = vld [vmem:[#allocation2 + $0x2220] ss:$112 sps:$4 sm:$0xff]  }
  0x7c   :  { %9154 = vmatprep.subr.bf16.mxu0 %v16589_v53  ;;  %8501 = vmatpush1.bf16.msra.mxu1 %v16584_v54  ;;  %v16670_v53 = vld [vmem:[#allocation2 + $0x2304] ss:$112 sps:$4 sm:$0xff]  }
  0x7d   :  { %8502 = vmatprep.subr.bf16.mxu1 %v16592_v56  ;;  %v16673_v54 = vld [vmem:[#allocation2 + $0x2244] ss:$112 sps:$4 sm:$0xff]   ;;  %v16671_v56 = vld [vmem:[#allocation2 + $0x2240] ss:$112 sps:$4 sm:$0xff]  }
  0x7f   :  { %9155 = vmatpush1.bf16.msra.mxu0 %v16587_v55  ;;  %v16668_v55 = vld [vmem:[#allocation2 + $0x2300] ss:$112 sps:$4 sm:$0xff]  }
  0x80   :  { %9156 = vmatprep.subr.bf16.mxu0 %v16595_v57  ;;  %8503 = vmatpush1.bf16.msra.mxu1 %v16590_v58  ;;  %v16676_v57 = vld [vmem:[#allocation2 + $0x23e4] ss:$112 sps:$4 sm:$0xff]  }
  0x81   :  { %8504 = vmatprep.subr.bf16.mxu1 %v16598_v60  ;;  %v16679_v58 = vld [vmem:[#allocation2 + $0x2324] ss:$112 sps:$4 sm:$0xff]   ;;  %v16677_v60 = vld [vmem:[#allocation2 + $0x2320] ss:$112 sps:$4 sm:$0xff]  }
  0x83   :  { %9157 = vmatpush1.bf16.msra.mxu0 %v16593_v59  ;;  %v16674_v59 = vld [vmem:[#allocation2 + $0x23e0] ss:$112 sps:$4 sm:$0xff]  }
  0x84   :  { %9158 = vmatprep.subr.bf16.mxu0 %v16601_v61  ;;  %8505 = vmatpush1.bf16.msra.mxu1 %v16596_v62  ;;  %v16682_v61 = vld [vmem:[#allocation2 + $0x24c4] ss:$112 sps:$4 sm:$0xff]  }
  0x85   :  { %8506 = vmatprep.subr.bf16.mxu1 %v16604_v1  ;;  %v16685_v62 = vld [vmem:[#allocation2 + $0x2404] ss:$112 sps:$4 sm:$0xff]   ;;  %v16683_v1 = vld [vmem:[#allocation2 + $0x2400] ss:$112 sps:$4 sm:$0xff]  }
  0x87   :  { %9159 = vmatpush1.bf16.msra.mxu0 %v16599_v63  ;;  %v16680_v63 = vld [vmem:[#allocation2 + $0x24c0] ss:$112 sps:$4 sm:$0xff]  }
  0x88   :  { %9160 = vmatprep.subr.bf16.mxu0 %v16607_v2  ;;  %8507 = vmatpush1.bf16.msra.mxu1 %v16602_v3  ;;  %v16688_v2 = vld [vmem:[#allocation2 + $0x25a4] ss:$112 sps:$4 sm:$0xff]  }
  0x89   :  { %8508 = vmatprep.subr.bf16.mxu1 %v16610_v5  ;;  %v16691_v3 = vld [vmem:[#allocation2 + $0x24e4] ss:$112 sps:$4 sm:$0xff]   ;;  %v16689_v5 = vld [vmem:[#allocation2 + $0x24e0] ss:$112 sps:$4 sm:$0xff]  }
  0x8b   :  { %9161 = vmatpush1.bf16.msra.mxu0 %v16605_v4  ;;  %v16686_v4 = vld [vmem:[#allocation2 + $0x25a0] ss:$112 sps:$4 sm:$0xff]  }
  0x8c   :  { %9162 = vmatprep.subr.bf16.mxu0 %v16613_v6  ;;  %8509 = vmatpush1.bf16.msra.mxu1 %v16608_v7  ;;  %v16694_v6 = vld [vmem:[#allocation2 + $0x2684] ss:$112 sps:$4 sm:$0xff]  }
  0x8d   :  { %8510 = vmatprep.subr.bf16.mxu1 %v16616_v11  ;;  %v16697_v7 = vld [vmem:[#allocation2 + $0x25c4] ss:$112 sps:$4 sm:$0xff]   ;;  %v16695_v11 = vld [vmem:[#allocation2 + $0x25c0] ss:$112 sps:$4 sm:$0xff]  }
  0x8f   :  { %9163 = vmatpush1.bf16.msra.mxu0 %v16611_v8  ;;  %v16692_v8 = vld [vmem:[#allocation2 + $0x2680] ss:$112 sps:$4 sm:$0xff]  }
  0x90   :  { %9164 = vmatprep.subr.bf16.mxu0 %v16619_v12  ;;  %8511 = vmatpush1.bf16.msra.mxu1 %v16614_v13  ;;  %v16700_v12 = vld [vmem:[#allocation2 + $0x2764] ss:$112 sps:$4 sm:$0xff]  }
  0x91   :  { %8521 = vmatprep.subr.bf16.mxu1 %v16622_v16  ;;  %v16703_v13 = vld [vmem:[#allocation2 + $0x26a4] ss:$112 sps:$4 sm:$0xff]  }
  0x92   :  { %v16706_v16 = vld [vmem:[#allocation2 + $0x2844] ss:$112 sps:$4 sm:$0xff]  }
  0x93   :  { %9165 = vmatpush1.bf16.msra.mxu0 %v16617_v15  ;;  %8513 = vmatmul.mubr.bf16.vlgmr.msra.gmra.mrb[0].mxu1 %v19273_v18  ;;  %v16701_v15 = vld [vmem:[#allocation2 + $0x26a0] ss:$112 sps:$4 sm:$0xff]  }
  0x94   :  { %9166 = vmatprep.subr.bf16.mxu0 %v16625_v17  ;;  %8522 = vmatpush1.bf16.msra.mxu1 %v16620_v19  ;;  %v16709_v17 = vld [vmem:[#allocation2 + $0x2784] ss:$112 sps:$4 sm:$0xff]   ;;  %v16704_v19 = vld [vmem:[#allocation2 + $0x2840] ss:$112 sps:$4 sm:$0xff]  }
  0x95   :  { %8553 = vmatprep.mubr.bf16.mxu1 %v19278_v24  ;;  %8523 = vmatprep.subr.bf16.mxu1 %v16628_v21  ;;  %v16712_v21 = vld [vmem:[#allocation2 + $0x2924] ss:$112 sps:$4 sm:$0xff]  }
  0x97   :  { %9167 = vmatpush1.bf16.msra.mxu0 %v16623_v20  ;;  %v16707_v20 = vld [vmem:[#allocation2 + $0x2780] ss:$112 sps:$4 sm:$0xff]  }
  0x98   :  { %9177 = vmatprep.subr.bf16.mxu0 %v16631_v23  ;;  %8524 = vmatpush1.bf16.msra.mxu1 %v16626_v25  ;;  %v16710_v23 = vld [vmem:[#allocation2 + $0x2920] ss:$112 sps:$4 sm:$0xff]  }
  0x99   :  { %8525 = vmatprep.subr.bf16.mxu1 %v16634_v27  ;;  %v16713_v25 = vld [vmem:[#allocation2 + $0x2860] ss:$112 sps:$4 sm:$0xff]   ;;  %v16718_v27 = vld [vmem:[#allocation2 + $0x2a04] ss:$112 sps:$4 sm:$0xff]  }
  0x9a   :  { %9169 = vmatmul.mubr.bf16.vlgmr.msra.gmra.mrb[4].mxu0 %v19273_v18 }
  0x9b   :  { %9178 = vmatpush1.bf16.msra.mxu0 %v16629_v26  ;;  %9209 = vmatprep.mubr.bf16.mxu0 %v19278_v24  ;;  %v45_v26 = vld [vmem:[%s21046_s0 + $0x20] sm:$0xff] }
  0x9c   :  { %9179 = vmatprep.subr.bf16.mxu0 %v16637_v28  ;;  %8526 = vmatpush1.bf16.msra.mxu1 %v16632_v29  ;;  %v16721_v28 = vld [vmem:[#allocation2 + $0x2944] ss:$112 sps:$4 sm:$0xff]   ;;  %v19287_v29 = vpack.c.bf16 %v45_v26, %v45_v26  ;;  %v16797_v26 = vld [vmem:[#allocation2 + $0xb90] ss:$112 sps:$4 sm:$0xff]  }
  0x9d   :  { %8527 = vmatprep.subr.bf16.mxu1 %v16640_v31  ;;  %v16719_v31 = vld [vmem:[#allocation2 + $0x2940] ss:$112 sps:$4 sm:$0xff]  }
  0x9f   :  { %9180 = vmatpush1.bf16.msra.mxu0 %v16635_v30  ;;  %v16716_v30 = vld [vmem:[#allocation2 + $0x2a00] ss:$112 sps:$4 sm:$0xff]  }
  0xa0   :  { %9181 = vmatprep.subr.bf16.mxu0 %v16643_v32  ;;  %8528 = vmatpush1.bf16.msra.mxu1 %v16638_v33  ;;  %v16730_v32 = vld [vmem:[#allocation2 + $0xc] ss:$112 sps:$4 sm:$0xff]   ;;  %v16724_v33 = vld [vmem:[#allocation2 + $0x34] ss:$112 sps:$4 sm:$0xff]  }
  0xa1   :  { %8529 = vmatprep.subr.bf16.mxu1 %v16646_v35  ;;  %v16727_v35 = vld [vmem:[#allocation2 + $0x114] ss:$112 sps:$4 sm:$0xff]  }
  0xa3   :  { %9182 = vmatpush1.bf16.msra.mxu0 %v16641_v34  ;;  %v16722_v34 = vld [vmem:[#allocation2 + $0x30] ss:$112 sps:$4 sm:$0xff]  }
  0xa4   :  { %9183 = vmatprep.subr.bf16.mxu0 %v16649_v37  ;;  %8530 = vmatpush1.bf16.msra.mxu1 %v16644_v38  ;;  %v16725_v37 = vld [vmem:[#allocation2 + $0x110] ss:$112 sps:$4 sm:$0xff]   ;;  %v16733_v38 = vld [vmem:[#allocation2 + $0x1f4] ss:$112 sps:$4 sm:$0xff]  }
  0xa5   :  { %8531 = vmatprep.subr.bf16.mxu1 %v16652_v40  ;;  %v16731_v40 = vld [vmem:[#allocation2 + $0x1f0] ss:$112 sps:$4 sm:$0xff]  }
  0xa7   :  { %9184 = vmatpush1.bf16.msra.mxu0 %v16647_v39  ;;  %v16728_v39 = vld [vmem:[#allocation2 + $0x8] ss:$112 sps:$4 sm:$0xff]  }
  0xa8   :  { %9185 = vmatprep.subr.bf16.mxu0 %v16655_v41  ;;  %8532 = vmatpush1.bf16.msra.mxu1 %v16650_v42  ;;  %v16736_v41 = vld [vmem:[#allocation2 + $0xec] ss:$112 sps:$4 sm:$0xff]   ;;  %v16739_v42 = vld [vmem:[#allocation2 + $0x2d4] ss:$112 sps:$4 sm:$0xff]  }
  0xa9   :  { %8533 = vmatprep.subr.bf16.mxu1 %v16658_v44  ;;  %v16737_v44 = vld [vmem:[#allocation2 + $0x2d0] ss:$112 sps:$4 sm:$0xff]  }
  0xab   :  { %9186 = vmatpush1.bf16.msra.mxu0 %v16653_v43  ;;  %v16734_v43 = vld [vmem:[#allocation2 + $0xe8] ss:$112 sps:$4 sm:$0xff]  }
  0xac   :  { %9187 = vmatprep.subr.bf16.mxu0 %v16661_v45  ;;  %8534 = vmatpush1.bf16.msra.mxu1 %v16656_v46  ;;  %v16742_v45 = vld [vmem:[#allocation2 + $0x1cc] ss:$112 sps:$4 sm:$0xff]   ;;  %v16745_v46 = vld [vmem:[#allocation2 + $0x3b4] ss:$112 sps:$4 sm:$0xff]  }
  0xad   :  { %8535 = vmatprep.subr.bf16.mxu1 %v16664_v48  ;;  %v16743_v48 = vld [vmem:[#allocation2 + $0x3b0] ss:$112 sps:$4 sm:$0xff]  }
  0xaf   :  { %9188 = vmatpush1.bf16.msra.mxu0 %v16659_v47  ;;  %v16740_v47 = vld [vmem:[#allocation2 + $0x1c8] ss:$112 sps:$4 sm:$0xff]  }
  0xb0   :  { %9189 = vmatprep.subr.bf16.mxu0 %v16667_v49  ;;  %8536 = vmatpush1.bf16.msra.mxu1 %v16662_v50  ;;  %v16748_v49 = vld [vmem:[#allocation2 + $0x2ac] ss:$112 sps:$4 sm:$0xff]   ;;  %v16751_v50 = vld [vmem:[#allocation2 + $0x494] ss:$112 sps:$4 sm:$0xff]  }
  0xb1   :  { %8537 = vmatprep.subr.bf16.mxu1 %v16670_v53  ;;  %v16749_v53 = vld [vmem:[#allocation2 + $0x490] ss:$112 sps:$4 sm:$0xff]  }
  0xb3   :  { %9190 = vmatpush1.bf16.msra.mxu0 %v16665_v52  ;;  %v16746_v52 = vld [vmem:[#allocation2 + $0x2a8] ss:$112 sps:$4 sm:$0xff]  }
  0xb4   :  { %9191 = vmatprep.subr.bf16.mxu0 %v16673_v54  ;;  %8538 = vmatpush1.bf16.msra.mxu1 %v16668_v55  ;;  %v16754_v54 = vld [vmem:[#allocation2 + $0x38c] ss:$112 sps:$4 sm:$0xff]   ;;  %v16757_v55 = vld [vmem:[#allocation2 + $0x574] ss:$112 sps:$4 sm:$0xff]  }
  0xb5   :  { %8539 = vmatprep.subr.bf16.mxu1 %v16676_v57  ;;  %v16755_v57 = vld [vmem:[#allocation2 + $0x570] ss:$112 sps:$4 sm:$0xff]  }
  0xb7   :  { %9192 = vmatpush1.bf16.msra.mxu0 %v16671_v56  ;;  %v16752_v56 = vld [vmem:[#allocation2 + $0x388] ss:$112 sps:$4 sm:$0xff]  }
  0xb8   :  { %9193 = vmatprep.subr.bf16.mxu0 %v16679_v58  ;;  %8540 = vmatpush1.bf16.msra.mxu1 %v16674_v59  ;;  %v16760_v58 = vld [vmem:[#allocation2 + $0x46c] ss:$112 sps:$4 sm:$0xff]   ;;  %v16763_v59 = vld [vmem:[#allocation2 + $0x654] ss:$112 sps:$4 sm:$0xff]  }
  0xb9   :  { %8541 = vmatprep.subr.bf16.mxu1 %v16682_v61  ;;  %v16761_v61 = vld [vmem:[#allocation2 + $0x650] ss:$112 sps:$4 sm:$0xff]  }
  0xbb   :  { %9194 = vmatpush1.bf16.msra.mxu0 %v16677_v60  ;;  %v16758_v60 = vld [vmem:[#allocation2 + $0x468] ss:$112 sps:$4 sm:$0xff]  }
  0xbc   :  { %9195 = vmatprep.subr.bf16.mxu0 %v16685_v62  ;;  %8542 = vmatpush1.bf16.msra.mxu1 %v16680_v63  ;;  %v16766_v62 = vld [vmem:[#allocation2 + $0x54c] ss:$112 sps:$4 sm:$0xff]   ;;  %v16769_v63 = vld [vmem:[#allocation2 + $0x734] ss:$112 sps:$4 sm:$0xff]  }
  0xbd   :  { %8543 = vmatprep.subr.bf16.mxu1 %v16688_v2  ;;  %v16767_v2 = vld [vmem:[#allocation2 + $0x730] ss:$112 sps:$4 sm:$0xff]  }
  0xbf   :  { %9196 = vmatpush1.bf16.msra.mxu0 %v16683_v1  ;;  %v16764_v1 = vld [vmem:[#allocation2 + $0x548] ss:$112 sps:$4 sm:$0xff]  }
  0xc0   :  { %9197 = vmatprep.subr.bf16.mxu0 %v16691_v3  ;;  %8544 = vmatpush1.bf16.msra.mxu1 %v16686_v4  ;;  %v16772_v3 = vld [vmem:[#allocation2 + $0x62c] ss:$112 sps:$4 sm:$0xff]   ;;  %v16775_v4 = vld [vmem:[#allocation2 + $0x814] ss:$112 sps:$4 sm:$0xff]  }
  0xc1   :  { %8545 = vmatprep.subr.bf16.mxu1 %v16694_v6  ;;  %v16773_v6 = vld [vmem:[#allocation2 + $0x810] ss:$112 sps:$4 sm:$0xff]  }
  0xc3   :  { %9198 = vmatpush1.bf16.msra.mxu0 %v16689_v5  ;;  %v16770_v5 = vld [vmem:[#allocation2 + $0x628] ss:$112 sps:$4 sm:$0xff]  }
  0xc4   :  { %9199 = vmatprep.subr.bf16.mxu0 %v16697_v7  ;;  %8546 = vmatpush1.bf16.msra.mxu1 %v16692_v8  ;;  %v16778_v7 = vld [vmem:[#allocation2 + $0x70c] ss:$112 sps:$4 sm:$0xff]   ;;  %v16781_v8 = vld [vmem:[#allocation2 + $0x8f4] ss:$112 sps:$4 sm:$0xff]  }
  0xc5   :  { %8547 = vmatprep.subr.bf16.mxu1 %v16700_v12  ;;  %v16779_v12 = vld [vmem:[#allocation2 + $0x8f0] ss:$112 sps:$4 sm:$0xff]  }
  0xc7   :  { %9200 = vmatpush1.bf16.msra.mxu0 %v16695_v11  ;;  %v16776_v11 = vld [vmem:[#allocation2 + $0x708] ss:$112 sps:$4 sm:$0xff]  }
  0xc8   :  { %9201 = vmatprep.subr.bf16.mxu0 %v16703_v13  ;;  %8548 = vmatpush1.bf16.msra.mxu1 %v16698_v14  ;;  %v16784_v13 = vld [vmem:[#allocation2 + $0x7ec] ss:$112 sps:$4 sm:$0xff]   ;;  %v16787_v14 = vld [vmem:[#allocation2 + $0x9d4] ss:$112 sps:$4 sm:$0xff]  }
  0xc9   :  { %8549 = vmatprep.subr.bf16.mxu1 %v16706_v16  ;;  %v16785_v16 = vld [vmem:[#allocation2 + $0x9d0] ss:$112 sps:$4 sm:$0xff]  }
  0xcb   :  { %9202 = vmatpush1.bf16.msra.mxu0 %v16701_v15  ;;  %v16782_v15 = vld [vmem:[#allocation2 + $0x7e8] ss:$112 sps:$4 sm:$0xff]  }
  0xcc   :  { %9203 = vmatprep.subr.bf16.mxu0 %v16709_v17  ;;  %8550 = vmatpush1.bf16.msra.mxu1 %v16704_v19  ;;  %v16790_v17 = vld [vmem:[#allocation2 + $0x8cc] ss:$112 sps:$4 sm:$0xff]   ;;  %v16793_v19 = vld [vmem:[#allocation2 + $0xab4] ss:$112 sps:$4 sm:$0xff]  }
  0xcd   :  { %8551 = vmatprep.subr.bf16.mxu1 %v16712_v21  ;;  %v16791_v21 = vld [vmem:[#allocation2 + $0xab0] ss:$112 sps:$4 sm:$0xff]  }
  0xcf   :  { %9204 = vmatpush1.bf16.msra.mxu0 %v16707_v20  ;;  %v16788_v20 = vld [vmem:[#allocation2 + $0x8c8] ss:$112 sps:$4 sm:$0xff]  }
  0xd0   :  { %9205 = vmatprep.subr.bf16.mxu0 %v16715_v22  ;;  %8552 = vmatpush1.bf16.msra.mxu1 %v16710_v23  ;;  %v16796_v22 = vld [vmem:[#allocation2 + $0x9ac] ss:$112 sps:$4 sm:$0xff]   ;;  %v16799_v23 = vld [vmem:[#allocation2 + $0xb94] ss:$112 sps:$4 sm:$0xff]  }
  0xd1   :  { %8562 = vmatprep.subr.bf16.mxu1 %v16718_v27  ;;  %v16802_v27 = vld [vmem:[#allocation2 + $0xa8c] ss:$112 sps:$4 sm:$0xff]  }
  0xd3   :  { %9206 = vmatpush1.bf16.msra.mxu0 %v16713_v25  ;;  %8554 = vmatmul.mubr.bf16.vlgmr.msra.gmra.mrb[0].mxu1 %v19287_v29  ;;  %v16794_v25 = vld [vmem:[#allocation2 + $0x9a8] ss:$112 sps:$4 sm:$0xff]  }
  0xd4   :  { %9207 = vmatprep.subr.bf16.mxu0 %v16721_v28  ;;  %8563 = vmatpush1.bf16.msra.mxu1 %v16716_v30  ;;  %v16805_v28 = vld [vmem:[#allocation2 + $0xc74] ss:$112 sps:$4 sm:$0xff]   ;;  %v16800_v30 = vld [vmem:[#allocation2 + $0xa88] ss:$112 sps:$4 sm:$0xff]  }
  0xd5   :  { %8594 = vmatprep.mubr.bf16.mxu1 %v19183_v0  ;;  %8603 = vmatprep.subr.bf16.mxu1 %v16730_v32  ;;  %v16808_v32 = vld [vmem:[#allocation2 + $0xb6c] ss:$112 sps:$4 sm:$0xff]  }
  0xd7   :  { %9208 = vmatpush1.bf16.msra.mxu0 %v16719_v31  ;;  %v16803_v31 = vld [vmem:[#allocation2 + $0xc70] ss:$112 sps:$4 sm:$0xff]  }
  0xd8   :  { %9423 = vmatprep.subr.bf16.mxu0 %v16724_v33  ;;  %v16811_v33 = vld [vmem:[#allocation2 + $0xd54] ss:$112 sps:$4 sm:$0xff]  }
  0xda   :  { %9210 = vmatmul.mubr.bf16.vlgmr.msra.gmra.mrb[4].mxu0 %v19287_v29 }
  0xdb   :  { %9424 = vmatpush1.bf16.msra.mxu0 %v16722_v34  ;;  %9455 = vmatprep.mubr.bf16.mxu0 %v19252_v51  ;;  %v16806_v34 = vld [vmem:[#allocation2 + $0xb68] ss:$112 sps:$4 sm:$0xff]  }
  0xdc   :  { %9425 = vmatprep.subr.bf16.mxu0 %v16727_v35  ;;  %v16809_v35 = vld [vmem:[#allocation2 + $0xd50] ss:$112 sps:$4 sm:$0xff]  }
  0xdf   :  { %9426 = vmatpush1.bf16.msra.mxu0 %v16725_v37  ;;  %15642 = vmatmul.mubr.msk.bf16.vlgmr.msra.gmra.mrb[0].mxu1 %vm8435_vm0, %v19245_v10  ;;  %v16814_v37 = vld [vmem:[#allocation2 + $0xc4c] ss:$112 sps:$4 sm:$0xff]  }
  0xe0   :  { %9427 = vmatprep.subr.bf16.mxu0 %v16733_v38  ;;  %8604 = vmatpush1.bf16.msra.mxu1 %v16728_v39  ;;  %v16817_v38 = vld [vmem:[#allocation2 + $0xe34] ss:$112 sps:$4 sm:$0xff]   ;;  %v16812_v39 = vld [vmem:[#allocation2 + $0xc48] ss:$112 sps:$4 sm:$0xff]  }
  0xe1   :  { %8635 = vmatprep.mubr.bf16.mxu1 %v19252_v51  ;;  %8605 = vmatprep.subr.bf16.mxu1 %v16736_v41  ;;  %v16815_v41 = vld [vmem:[#allocation2 + $0xe30] ss:$112 sps:$4 sm:$0xff]  }
  0xe3   :  { %9428 = vmatpush1.bf16.msra.mxu0 %v16731_v40 }
  0xe4   :  { %9429 = vmatprep.subr.bf16.mxu0 %v16739_v42  ;;  %8606 = vmatpush1.bf16.msra.mxu1 %v16734_v43  ;;  %v16820_v42 = vld [vmem:[#allocation2 + $0xd2c] ss:$112 sps:$4 sm:$0xff]  }
  0xe5   :  { %8607 = vmatprep.subr.bf16.mxu1 %v16742_v45 }
  0xe7   :  { %9430 = vmatpush1.bf16.msra.mxu0 %v16737_v44  ;;  %v16823_v44 = vld [vmem:[#allocation2 + $0xf14] ss:$112 sps:$4 sm:$0xff]  }
  0xe8   :  { %9431 = vmatprep.subr.bf16.mxu0 %v16745_v46  ;;  %8608 = vmatpush1.bf16.msra.mxu1 %v16740_v47  ;;  %v16818_v46 = vld [vmem:[#allocation2 + $0xd28] ss:$112 sps:$4 sm:$0xff]  }
  0xe9   :  { %8609 = vmatprep.subr.bf16.mxu1 %v16748_v49  ;;  %v16826_v49 = vld [vmem:[#allocation2 + $0xe0c] ss:$112 sps:$4 sm:$0xff]  }
  0xeb   :  { %9432 = vmatpush1.bf16.msra.mxu0 %v16743_v48  ;;  %v16821_v48 = vld [vmem:[#allocation2 + $0xf10] ss:$112 sps:$4 sm:$0xff]  }
  0xec   :  { %9433 = vmatprep.subr.bf16.mxu0 %v16751_v50  ;;  %8610 = vmatpush1.bf16.msra.mxu1 %v16746_v52  ;;  %v16824_v50 = vld [vmem:[#allocation2 + $0xe08] ss:$112 sps:$4 sm:$0xff]   ;;  %v16829_v52 = vld [vmem:[#allocation2 + $0xff4] ss:$112 sps:$4 sm:$0xff]  }
  0xed   :  { %8611 = vmatprep.subr.bf16.mxu1 %v16754_v54  ;;  %v19296_v40 = vpop.f32.mrb[0].mxu0  ;;  %v16832_v54 = vld [vmem:[#allocation2 + $0xeec] ss:$112 sps:$4 sm:$0xff]  }
  0xee   :  { %v19298_v43 = vpop.f32.mrb[1].mxu0 }
  0xef   :  { %9434 = vmatpush1.bf16.msra.mxu0 %v16749_v53  ;;  %v8928_v45 = vpop.f32.mrb[2].mxu0  ;;  %v16827_v53 = vld [vmem:[#allocation2 + $0xff0] ss:$112 sps:$4 sm:$0xff]  }
  0xf0   :  { %9435 = vmatprep.subr.bf16.mxu0 %v16757_v55  ;;  %8612 = vmatpush1.bf16.msra.mxu1 %v16752_v56  ;;  %v8929_v47 = vpop.f32.mrb[3].mxu0  ;;  %v16835_v55 = vld [vmem:[#allocation2 + $0x10d4] ss:$112 sps:$4 sm:$0xff]   ;;  %v16830_v56 = vld [vmem:[#allocation2 + $0xee8] ss:$112 sps:$4 sm:$0xff]  }
  0xf1   :  { %8613 = vmatprep.subr.bf16.mxu1 %v16760_v58  ;;  %v16838_v58 = vld [vmem:[#allocation2 + $0xfcc] ss:$112 sps:$4 sm:$0xff]   ;;  %v16896_v45 = vld [vmem:[#allocation2 + $0x1888] ss:$112 sps:$4 sm:$0xff]  }
  0xf2   :  { %v16904_v47 = vld [vmem:[#allocation2 + $0x196c] ss:$112 sps:$4 sm:$0xff]  }
  0xf3   :  { %9436 = vmatpush1.bf16.msra.mxu0 %v16755_v57  ;;  %v16833_v57 = vld [vmem:[#allocation2 + $0x10d0] ss:$112 sps:$4 sm:$0xff]  }
  0xf4   :  { %9437 = vmatprep.subr.bf16.mxu0 %v16763_v59  ;;  %8614 = vmatpush1.bf16.msra.mxu1 %v16758_v60  ;;  %v16841_v59 = vld [vmem:[#allocation2 + $0x11b4] ss:$112 sps:$4 sm:$0xff]   ;;  %v16836_v60 = vld [vmem:[#allocation2 + $0xfc8] ss:$112 sps:$4 sm:$0xff]  }
  0xf5   :  { %8615 = vmatprep.subr.bf16.mxu1 %v16766_v62  ;;  %v16844_v62 = vld [vmem:[#allocation2 + $0x10ac] ss:$112 sps:$4 sm:$0xff]  }
  0xf7   :  { %9438 = vmatpush1.bf16.msra.mxu0 %v16761_v61  ;;  %v16839_v61 = vld [vmem:[#allocation2 + $0x11b0] ss:$112 sps:$4 sm:$0xff]  }
  0xf8   :  { %9439 = vmatprep.subr.bf16.mxu0 %v16769_v63  ;;  %8616 = vmatpush1.bf16.msra.mxu1 %v16764_v1  ;;  %v16847_v63 = vld [vmem:[#allocation2 + $0x1294] ss:$112 sps:$4 sm:$0xff]   ;;  %v16842_v1 = vld [vmem:[#allocation2 + $0x10a8] ss:$112 sps:$4 sm:$0xff]  }
  0xf9   :  { %8617 = vmatprep.subr.bf16.mxu1 %v16772_v3  ;;  %v16850_v3 = vld [vmem:[#allocation2 + $0x118c] ss:$112 sps:$4 sm:$0xff]  }
  0xfb   :  { %9440 = vmatpush1.bf16.msra.mxu0 %v16767_v2  ;;  %v16845_v2 = vld [vmem:[#allocation2 + $0x1290] ss:$112 sps:$4 sm:$0xff]  }
  0xfc   :  { %9441 = vmatprep.subr.bf16.mxu0 %v16775_v4  ;;  %8618 = vmatpush1.bf16.msra.mxu1 %v16770_v5  ;;  %v16853_v4 = vld [vmem:[#allocation2 + $0x1374] ss:$112 sps:$4 sm:$0xff]   ;;  %v16848_v5 = vld [vmem:[#allocation2 + $0x1188] ss:$112 sps:$4 sm:$0xff]  }
  0xfd   :  { %8619 = vmatprep.subr.bf16.mxu1 %v16778_v7  ;;  %v16856_v7 = vld [vmem:[#allocation2 + $0x126c] ss:$112 sps:$4 sm:$0xff]  }
  0xff   :  { %9442 = vmatpush1.bf16.msra.mxu0 %v16773_v6  ;;  %v16851_v6 = vld [vmem:[#allocation2 + $0x1370] ss:$112 sps:$4 sm:$0xff]  }
 0x100   :  { %9443 = vmatprep.subr.bf16.mxu0 %v16781_v8  ;;  %8620 = vmatpush1.bf16.msra.mxu1 %v16776_v11  ;;  %v16859_v8 = vld [vmem:[#allocation2 + $0x1454] ss:$112 sps:$4 sm:$0xff]   ;;  %v16854_v11 = vld [vmem:[#allocation2 + $0x1268] ss:$112 sps:$4 sm:$0xff]  }
 0x101   :  { %8621 = vmatprep.subr.bf16.mxu1 %v16784_v13  ;;  %v16862_v13 = vld [vmem:[#allocation2 + $0x134c] ss:$112 sps:$4 sm:$0xff]  }
 0x103   :  { %9444 = vmatpush1.bf16.msra.mxu0 %v16779_v12  ;;  %v16857_v12 = vld [vmem:[#allocation2 + $0x1450] ss:$112 sps:$4 sm:$0xff]  }
 0x104   :  { %9445 = vmatprep.subr.bf16.mxu0 %v16787_v14  ;;  %8622 = vmatpush1.bf16.msra.mxu1 %v16782_v15  ;;  %v16865_v14 = vld [vmem:[#allocation2 + $0x1534] ss:$112 sps:$4 sm:$0xff]   ;;  %v16860_v15 = vld [vmem:[#allocation2 + $0x1348] ss:$112 sps:$4 sm:$0xff]  }
 0x105   :  { %8623 = vmatprep.subr.bf16.mxu1 %v16790_v17  ;;  %v16868_v17 = vld [vmem:[#allocation2 + $0x142c] ss:$112 sps:$4 sm:$0xff]  }
 0x107   :  { %9446 = vmatpush1.bf16.msra.mxu0 %v16785_v16  ;;  %v16863_v16 = vld [vmem:[#allocation2 + $0x1530] ss:$112 sps:$4 sm:$0xff]  }
 0x108   :  { %9447 = vmatprep.subr.bf16.mxu0 %v16793_v19  ;;  %8624 = vmatpush1.bf16.msra.mxu1 %v16788_v20  ;;  %v16871_v19 = vld [vmem:[#allocation2 + $0x1614] ss:$112 sps:$4 sm:$0xff]   ;;  %v16866_v20 = vld [vmem:[#allocation2 + $0x1428] ss:$112 sps:$4 sm:$0xff]  }
 0x109   :  { %8625 = vmatprep.subr.bf16.mxu1 %v16796_v22  ;;  %v16874_v22 = vld [vmem:[#allocation2 + $0x150c] ss:$112 sps:$4 sm:$0xff]  }
 0x10b   :  { %9448 = vmatpush1.bf16.msra.mxu0 %v16791_v21  ;;  %v16869_v21 = vld [vmem:[#allocation2 + $0x1610] ss:$112 sps:$4 sm:$0xff]  }
 0x10c   :  { %9449 = vmatprep.subr.bf16.mxu0 %v16799_v23  ;;  %8626 = vmatpush1.bf16.msra.mxu1 %v16794_v25  ;;  %v16877_v23 = vld [vmem:[#allocation2 + $0x16f4] ss:$112 sps:$4 sm:$0xff]   ;;  %v16872_v25 = vld [vmem:[#allocation2 + $0x1508] ss:$112 sps:$4 sm:$0xff]  }
 0x10d   :  { %8627 = vmatprep.subr.bf16.mxu1 %v16802_v27  ;;  %v16880_v27 = vld [vmem:[#allocation2 + $0x15ec] ss:$112 sps:$4 sm:$0xff]  }
 0x10f   :  { %9450 = vmatpush1.bf16.msra.mxu0 %v16797_v26  ;;  %v16875_v26 = vld [vmem:[#allocation2 + $0x16f0] ss:$112 sps:$4 sm:$0xff]  }
 0x110   :  { %9451 = vmatprep.subr.bf16.mxu0 %v16805_v28  ;;  %8628 = vmatpush1.bf16.msra.mxu1 %v16800_v30  ;;  %v16883_v28 = vld [vmem:[#allocation2 + $0x17d4] ss:$112 sps:$4 sm:$0xff]   ;;  %v16878_v30 = vld [vmem:[#allocation2 + $0x15e8] ss:$112 sps:$4 sm:$0xff]  }
 0x111   :  { %8629 = vmatprep.subr.bf16.mxu1 %v16808_v32  ;;  %v16886_v32 = vld [vmem:[#allocation2 + $0x16cc] ss:$112 sps:$4 sm:$0xff]  }
 0x113   :  { %9452 = vmatpush1.bf16.msra.mxu0 %v16803_v31  ;;  %v16881_v31 = vld [vmem:[#allocation2 + $0x17d0] ss:$112 sps:$4 sm:$0xff]  }
 0x114   :  { %9453 = vmatprep.subr.bf16.mxu0 %v16811_v33  ;;  %8630 = vmatpush1.bf16.msra.mxu1 %v16806_v34  ;;  %v16889_v33 = vld [vmem:[#allocation2 + $0x18b4] ss:$112 sps:$4 sm:$0xff]   ;;  %v16884_v34 = vld [vmem:[#allocation2 + $0x16c8] ss:$112 sps:$4 sm:$0xff]  }
 0x115   :  { %8631 = vmatprep.subr.bf16.mxu1 %v16814_v37  ;;  %v16892_v37 = vld [vmem:[#allocation2 + $0x17ac] ss:$112 sps:$4 sm:$0xff]  }
 0x117   :  { %9454 = vmatpush1.bf16.msra.mxu0 %v16809_v35  ;;  %v16887_v35 = vld [vmem:[#allocation2 + $0x18b0] ss:$112 sps:$4 sm:$0xff]  }
 0x118   :  { %9464 = vmatprep.subr.bf16.mxu0 %v16817_v38  ;;  %8632 = vmatpush1.bf16.msra.mxu1 %v16812_v39  ;;  %v16895_v38 = vld [vmem:[#allocation2 + $0x1994] ss:$112 sps:$4 sm:$0xff]   ;;  %v16890_v39 = vld [vmem:[#allocation2 + $0x17a8] ss:$112 sps:$4 sm:$0xff]  }
 0x119   :  { %8633 = vmatprep.subr.bf16.mxu1 %v16820_v42  ;;  %v16898_v42 = vld [vmem:[#allocation2 + $0x188c] ss:$112 sps:$4 sm:$0xff]  }
 0x11a   :  { %9456 = vmatmul.mubr.bf16.vlgmr.msra.gmra.mrb[8].mxu0 %v19259_v9 }
 0x11b   :  { %9465 = vmatpush1.bf16.msra.mxu0 %v16815_v41  ;;  %9496 = vmatprep.mubr.bf16.mxu0 %v19266_v36  ;;  %v16893_v41 = vld [vmem:[#allocation2 + $0x1990] ss:$112 sps:$4 sm:$0xff]  }
 0x11c   :  { %9466 = vmatprep.subr.bf16.mxu0 %v16823_v44  ;;  %8634 = vmatpush1.bf16.msra.mxu1 %v16818_v46  ;;  %v16901_v44 = vld [vmem:[#allocation2 + $0x1a74] ss:$112 sps:$4 sm:$0xff]   ;;  %v16899_v46 = vld [vmem:[#allocation2 + $0x1a70] ss:$112 sps:$4 sm:$0xff]  }
 0x11d   :  { %8644 = vmatprep.subr.bf16.mxu1 %v16826_v49  ;;  %v16902_v49 = vld [vmem:[#allocation2 + $0x1968] ss:$112 sps:$4 sm:$0xff]  }
 0x11f   :  { %9467 = vmatpush1.bf16.msra.mxu0 %v16821_v48  ;;  %8636 = vmatmul.mubr.bf16.vlgmr.msra.gmra.mrb[4].mxu1 %v19259_v9  ;;  %v16907_v48 = vld [vmem:[#allocation2 + $0x1b54] ss:$112 sps:$4 sm:$0xff]  }
 0x120   :  { %9468 = vmatprep.subr.bf16.mxu0 %v16829_v52  ;;  %8645 = vmatpush1.bf16.msra.mxu1 %v16824_v50  ;;  %v16905_v50 = vld [vmem:[#allocation2 + $0x1b50] ss:$112 sps:$4 sm:$0xff]   ;;  %v16910_v52 = vld [vmem:[#allocation2 + $0x1a4c] ss:$112 sps:$4 sm:$0xff]  }
 0x121   :  { %8676 = vmatprep.mubr.bf16.mxu1 %v19266_v36  ;;  %8646 = vmatprep.subr.bf16.mxu1 %v16832_v54  ;;  %v16908_v54 = vld [vmem:[#allocation2 + $0x1a48] ss:$112 sps:$4 sm:$0xff]  }
 0x123   :  { %9469 = vmatpush1.bf16.msra.mxu0 %v16827_v53  ;;  %v16913_v53 = vld [vmem:[#allocation2 + $0x1c34] ss:$112 sps:$4 sm:$0xff]  }
 0x124   :  { %9470 = vmatprep.subr.bf16.mxu0 %v16835_v55  ;;  %8647 = vmatpush1.bf16.msra.mxu1 %v16830_v56  ;;  %v16911_v55 = vld [vmem:[#allocation2 + $0x1c30] ss:$112 sps:$4 sm:$0xff]   ;;  %v16916_v56 = vld [vmem:[#allocation2 + $0x1b2c] ss:$112 sps:$4 sm:$0xff]  }
 0x125   :  { %8648 = vmatprep.subr.bf16.mxu1 %v16838_v58  ;;  %v16914_v58 = vld [vmem:[#allocation2 + $0x1b28] ss:$112 sps:$4 sm:$0xff]  }
 0x127   :  { %9471 = vmatpush1.bf16.msra.mxu0 %v16833_v57  ;;  %v16919_v57 = vld [vmem:[#allocation2 + $0x1d14] ss:$112 sps:$4 sm:$0xff]  }
 0x128   :  { %9472 = vmatprep.subr.bf16.mxu0 %v16841_v59  ;;  %8649 = vmatpush1.bf16.msra.mxu1 %v16836_v60  ;;  %v16917_v59 = vld [vmem:[#allocation2 + $0x1d10] ss:$112 sps:$4 sm:$0xff]   ;;  %v16922_v60 = vld [vmem:[#allocation2 + $0x1c0c] ss:$112 sps:$4 sm:$0xff]  }
 0x129   :  { %8650 = vmatprep.subr.bf16.mxu1 %v16844_v62  ;;  %v16920_v62 = vld [vmem:[#allocation2 + $0x1c08] ss:$112 sps:$4 sm:$0xff]  }
 0x12b   :  { %9473 = vmatpush1.bf16.msra.mxu0 %v16839_v61  ;;  %v16925_v61 = vld [vmem:[#allocation2 + $0x1df4] ss:$112 sps:$4 sm:$0xff]  }
 0x12c   :  { %9474 = vmatprep.subr.bf16.mxu0 %v16847_v63  ;;  %8651 = vmatpush1.bf16.msra.mxu1 %v16842_v1  ;;  %v16923_v63 = vld [vmem:[#allocation2 + $0x1df0] ss:$112 sps:$4 sm:$0xff]   ;;  %v16928_v1 = vld [vmem:[#allocation2 + $0x1cec] ss:$112 sps:$4 sm:$0xff]  }
 0x12d   :  { %8652 = vmatprep.subr.bf16.mxu1 %v16850_v3  ;;  %v16926_v3 = vld [vmem:[#allocation2 + $0x1ce8] ss:$112 sps:$4 sm:$0xff]  }
 0x12f   :  { %9475 = vmatpush1.bf16.msra.mxu0 %v16845_v2  ;;  %v16931_v2 = vld [vmem:[#allocation2 + $0x1ed4] ss:$112 sps:$4 sm:$0xff]  }
 0x130   :  { %9476 = vmatprep.subr.bf16.mxu0 %v16853_v4  ;;  %8653 = vmatpush1.bf16.msra.mxu1 %v16848_v5  ;;  %v16929_v4 = vld [vmem:[#allocation2 + $0x1ed0] ss:$112 sps:$4 sm:$0xff]   ;;  %v16934_v5 = vld [vmem:[#allocation2 + $0x1dcc] ss:$112 sps:$4 sm:$0xff]  }
 0x131   :  { %8654 = vmatprep.subr.bf16.mxu1 %v16856_v7  ;;  %v16932_v7 = vld [vmem:[#allocation2 + $0x1dc8] ss:$112 sps:$4 sm:$0xff]  }
 0x133   :  { %9477 = vmatpush1.bf16.msra.mxu0 %v16851_v6  ;;  %v16937_v6 = vld [vmem:[#allocation2 + $0x1fb4] ss:$112 sps:$4 sm:$0xff]  }
 0x134   :  { %9478 = vmatprep.subr.bf16.mxu0 %v16859_v8  ;;  %8655 = vmatpush1.bf16.msra.mxu1 %v16854_v11  ;;  %v16935_v8 = vld [vmem:[#allocation2 + $0x1fb0] ss:$112 sps:$4 sm:$0xff]   ;;  %v16940_v11 = vld [vmem:[#allocation2 + $0x1eac] ss:$112 sps:$4 sm:$0xff]  }
 0x135   :  { %8656 = vmatprep.subr.bf16.mxu1 %v16862_v13  ;;  %v16938_v13 = vld [vmem:[#allocation2 + $0x1ea8] ss:$112 sps:$4 sm:$0xff]  }
 0x137   :  { %9479 = vmatpush1.bf16.msra.mxu0 %v16857_v12  ;;  %v16943_v12 = vld [vmem:[#allocation2 + $0x2094] ss:$112 sps:$4 sm:$0xff]  }
 0x138   :  { %9480 = vmatprep.subr.bf16.mxu0 %v16865_v14  ;;  %8657 = vmatpush1.bf16.msra.mxu1 %v16860_v15  ;;  %v16941_v14 = vld [vmem:[#allocation2 + $0x2090] ss:$112 sps:$4 sm:$0xff]   ;;  %v16946_v15 = vld [vmem:[#allocation2 + $0x1f8c] ss:$112 sps:$4 sm:$0xff]  }
 0x139   :  { %8658 = vmatprep.subr.bf16.mxu1 %v16868_v17  ;;  %v16944_v17 = vld [vmem:[#allocation2 + $0x1f88] ss:$112 sps:$4 sm:$0xff]  }
 0x13b   :  { %9481 = vmatpush1.bf16.msra.mxu0 %v16863_v16  ;;  %v16949_v16 = vld [vmem:[#allocation2 + $0x2174] ss:$112 sps:$4 sm:$0xff]  }
 0x13c   :  { %9482 = vmatprep.subr.bf16.mxu0 %v16871_v19  ;;  %8659 = vmatpush1.bf16.msra.mxu1 %v16866_v20  ;;  %v16947_v19 = vld [vmem:[#allocation2 + $0x2170] ss:$112 sps:$4 sm:$0xff]   ;;  %v16952_v20 = vld [vmem:[#allocation2 + $0x206c] ss:$112 sps:$4 sm:$0xff]  }
 0x13d   :  { %8660 = vmatprep.subr.bf16.mxu1 %v16874_v22  ;;  %v16950_v22 = vld [vmem:[#allocation2 + $0x2068] ss:$112 sps:$4 sm:$0xff]  }
 0x13f   :  { %9483 = vmatpush1.bf16.msra.mxu0 %v16869_v21  ;;  %v16955_v21 = vld [vmem:[#allocation2 + $0x2254] ss:$112 sps:$4 sm:$0xff]  }
 0x140   :  { %9484 = vmatprep.subr.bf16.mxu0 %v16877_v23  ;;  %8661 = vmatpush1.bf16.msra.mxu1 %v16872_v25  ;;  %v16953_v23 = vld [vmem:[#allocation2 + $0x2250] ss:$112 sps:$4 sm:$0xff]   ;;  %v16958_v25 = vld [vmem:[#allocation2 + $0x214c] ss:$112 sps:$4 sm:$0xff]  }
 0x141   :  { %8662 = vmatprep.subr.bf16.mxu1 %v16880_v27  ;;  %v16956_v27 = vld [vmem:[#allocation2 + $0x2148] ss:$112 sps:$4 sm:$0xff]  }
 0x143   :  { %9485 = vmatpush1.bf16.msra.mxu0 %v16875_v26  ;;  %v16961_v26 = vld [vmem:[#allocation2 + $0x2334] ss:$112 sps:$4 sm:$0xff]  }
 0x144   :  { %9486 = vmatprep.subr.bf16.mxu0 %v16883_v28  ;;  %8663 = vmatpush1.bf16.msra.mxu1 %v16878_v30  ;;  %v16959_v28 = vld [vmem:[#allocation2 + $0x2330] ss:$112 sps:$4 sm:$0xff]   ;;  %v16964_v30 = vld [vmem:[#allocation2 + $0x222c] ss:$112 sps:$4 sm:$0xff]  }
 0x145   :  { %8664 = vmatprep.subr.bf16.mxu1 %v16886_v32  ;;  %v16962_v32 = vld [vmem:[#allocation2 + $0x2228] ss:$112 sps:$4 sm:$0xff]  }
 0x147   :  { %9487 = vmatpush1.bf16.msra.mxu0 %v16881_v31  ;;  %v16967_v31 = vld [vmem:[#allocation2 + $0x2414] ss:$112 sps:$4 sm:$0xff]  }
 0x148   :  { %9488 = vmatprep.subr.bf16.mxu0 %v16889_v33  ;;  %8665 = vmatpush1.bf16.msra.mxu1 %v16884_v34  ;;  %v16965_v33 = vld [vmem:[#allocation2 + $0x2410] ss:$112 sps:$4 sm:$0xff]   ;;  %v16970_v34 = vld [vmem:[#allocation2 + $0x230c] ss:$112 sps:$4 sm:$0xff]  }
 0x149   :  { %8666 = vmatprep.subr.bf16.mxu1 %v16892_v37  ;;  %v16968_v37 = vld [vmem:[#allocation2 + $0x2308] ss:$112 sps:$4 sm:$0xff]  }
 0x14b   :  { %9489 = vmatpush1.bf16.msra.mxu0 %v16887_v35  ;;  %v16973_v35 = vld [vmem:[#allocation2 + $0x24f4] ss:$112 sps:$4 sm:$0xff]  }
 0x14c   :  { %9490 = vmatprep.subr.bf16.mxu0 %v16895_v38  ;;  %8667 = vmatpush1.bf16.msra.mxu1 %v16890_v39  ;;  %v16971_v38 = vld [vmem:[#allocation2 + $0x24f0] ss:$112 sps:$4 sm:$0xff]   ;;  %v16976_v39 = vld [vmem:[#allocation2 + $0x23ec] ss:$112 sps:$4 sm:$0xff]  }
 0x14d   :  { %8668 = vmatprep.subr.bf16.mxu1 %v16898_v42  ;;  %v16974_v42 = vld [vmem:[#allocation2 + $0x23e8] ss:$112 sps:$4 sm:$0xff]  }
 0x14f   :  { %9491 = vmatpush1.bf16.msra.mxu0 %v16893_v41  ;;  %v16979_v41 = vld [vmem:[#allocation2 + $0x25d4] ss:$112 sps:$4 sm:$0xff]  }
 0x150   :  { %9492 = vmatprep.subr.bf16.mxu0 %v16901_v44  ;;  %8669 = vmatpush1.bf16.msra.mxu1 %v16896_v45  ;;  %v16977_v44 = vld [vmem:[#allocation2 + $0x25d0] ss:$112 sps:$4 sm:$0xff]   ;;  %v16982_v45 = vld [vmem:[#allocation2 + $0x24cc] ss:$112 sps:$4 sm:$0xff]  }
 0x151   :  { %8670 = vmatprep.subr.bf16.mxu1 %v16904_v47  ;;  %v16980_v47 = vld [vmem:[#allocation2 + $0x24c8] ss:$112 sps:$4 sm:$0xff]  }
 0x153   :  { %9493 = vmatpush1.bf16.msra.mxu0 %v16899_v46  ;;  %v16985_v46 = vld [vmem:[#allocation2 + $0x26b4] ss:$112 sps:$4 sm:$0xff]  }
 0x154   :  { %9494 = vmatprep.subr.bf16.mxu0 %v16907_v48  ;;  %8671 = vmatpush1.bf16.msra.mxu1 %v16902_v49  ;;  %v16983_v48 = vld [vmem:[#allocation2 + $0x26b0] ss:$112 sps:$4 sm:$0xff]   ;;  %v16988_v49 = vld [vmem:[#allocation2 + $0x25ac] ss:$112 sps:$4 sm:$0xff]  }
 0x155   :  { %8672 = vmatprep.subr.bf16.mxu1 %v16910_v52  ;;  %v16986_v52 = vld [vmem:[#allocation2 + $0x25a8] ss:$112 sps:$4 sm:$0xff]  }
 0x157   :  { %9495 = vmatpush1.bf16.msra.mxu0 %v16905_v50  ;;  %v16991_v50 = vld [vmem:[#allocation2 + $0x2794] ss:$112 sps:$4 sm:$0xff]  }
 0x158   :  { %9505 = vmatprep.subr.bf16.mxu0 %v16913_v53  ;;  %8673 = vmatpush1.bf16.msra.mxu1 %v16908_v54  ;;  %v16989_v53 = vld [vmem:[#allocation2 + $0x2790] ss:$112 sps:$4 sm:$0xff]   ;;  %v16994_v54 = vld [vmem:[#allocation2 + $0x268c] ss:$112 sps:$4 sm:$0xff]  }
 0x159   :  { %8674 = vmatprep.subr.bf16.mxu1 %v16916_v56  ;;  %v16992_v56 = vld [vmem:[#allocation2 + $0x2688] ss:$112 sps:$4 sm:$0xff]  }
 0x15a   :  { %9497 = vmatmul.mubr.bf16.vlgmr.msra.gmra.mrb[8].mxu0 %v19273_v18 }
 0x15b   :  { %9506 = vmatpush1.bf16.msra.mxu0 %v16911_v55  ;;  %9537 = vmatprep.mubr.bf16.mxu0 %v19278_v24  ;;  %v16997_v55 = vld [vmem:[#allocation2 + $0x2874] ss:$112 sps:$4 sm:$0xff]  }
 0x15c   :  { %9507 = vmatprep.subr.bf16.mxu0 %v16919_v57  ;;  %8675 = vmatpush1.bf16.msra.mxu1 %v16914_v58  ;;  %v16995_v57 = vld [vmem:[#allocation2 + $0x2870] ss:$112 sps:$4 sm:$0xff]   ;;  %v17000_v58 = vld [vmem:[#allocation2 + $0x276c] ss:$112 sps:$4 sm:$0xff]  }
 0x15d   :  { %8685 = vmatprep.subr.bf16.mxu1 %v16922_v60  ;;  %v16998_v60 = vld [vmem:[#allocation2 + $0x2768] ss:$112 sps:$4 sm:$0xff]  }
 0x15f   :  { %9508 = vmatpush1.bf16.msra.mxu0 %v16917_v59  ;;  %8677 = vmatmul.mubr.bf16.vlgmr.msra.gmra.mrb[4].mxu1 %v19273_v18  ;;  %v17003_v59 = vld [vmem:[#allocation2 + $0x2954] ss:$112 sps:$4 sm:$0xff]  }
 0x160   :  { %9509 = vmatprep.subr.bf16.mxu0 %v16925_v61  ;;  %8686 = vmatpush1.bf16.msra.mxu1 %v16920_v62  ;;  %v17001_v61 = vld [vmem:[#allocation2 + $0x2950] ss:$112 sps:$4 sm:$0xff]   ;;  %v17006_v62 = vld [vmem:[#allocation2 + $0x284c] ss:$112 sps:$4 sm:$0xff]  }
 0x161   :  { %8717 = vmatprep.mubr.bf16.mxu1 %v19278_v24  ;;  %8687 = vmatprep.subr.bf16.mxu1 %v16928_v1  ;;  %v17004_v1 = vld [vmem:[#allocation2 + $0x2848] ss:$112 sps:$4 sm:$0xff]  }
 0x163   :  { %9510 = vmatpush1.bf16.msra.mxu0 %v16923_v63  ;;  %v17009_v63 = vld [vmem:[#allocation2 + $0x44] ss:$112 sps:$4 sm:$0xff]  }
 0x164   :  { %9511 = vmatprep.subr.bf16.mxu0 %v16931_v2  ;;  %8688 = vmatpush1.bf16.msra.mxu1 %v16926_v3  ;;  %v17007_v2 = vld [vmem:[#allocation2 + $0x40] ss:$112 sps:$4 sm:$0xff]   ;;  %v17012_v3 = vld [vmem:[#allocation2 + $0x292c] ss:$112 sps:$4 sm:$0xff]  }
 0x165   :  { %8689 = vmatprep.subr.bf16.mxu1 %v16934_v5  ;;  %v17010_v5 = vld [vmem:[#allocation2 + $0x2928] ss:$112 sps:$4 sm:$0xff]  }
 0x167   :  { %9512 = vmatpush1.bf16.msra.mxu0 %v16929_v4  ;;  %v17015_v4 = vld [vmem:[#allocation2 + $0x124] ss:$112 sps:$4 sm:$0xff]  }
 0x168   :  { %9513 = vmatprep.subr.bf16.mxu0 %v16937_v6  ;;  %8690 = vmatpush1.bf16.msra.mxu1 %v16932_v7  ;;  %v17013_v6 = vld [vmem:[#allocation2 + $0x120] ss:$112 sps:$4 sm:$0xff]   ;;  %v17018_v7 = vld [vmem:[#allocation2 + $0x2a0c] ss:$112 sps:$4 sm:$0xff]  }
 0x169   :  { %8691 = vmatprep.subr.bf16.mxu1 %v16940_v11  ;;  %v17016_v11 = vld [vmem:[#allocation2 + $0x2a08] ss:$112 sps:$4 sm:$0xff]  }
 0x16b   :  { %9514 = vmatpush1.bf16.msra.mxu0 %v16935_v8  ;;  %v17021_v8 = vld [vmem:[#allocation2 + $0x204] ss:$112 sps:$4 sm:$0xff]  }
 0x16c   :  { %9515 = vmatprep.subr.bf16.mxu0 %v16943_v12  ;;  %8692 = vmatpush1.bf16.msra.mxu1 %v16938_v13  ;;  %v17019_v12 = vld [vmem:[#allocation2 + $0x200] ss:$112 sps:$4 sm:$0xff]   ;;  %v17024_v13 = vld [vmem:[#allocation2 + $0x2e4] ss:$112 sps:$4 sm:$0xff]  }
 0x16d   :  { %8693 = vmatprep.subr.bf16.mxu1 %v16946_v15  ;;  %v17022_v15 = vld [vmem:[#allocation2 + $0x2e0] ss:$112 sps:$4 sm:$0xff]  }
 0x16f   :  { %9516 = vmatpush1.bf16.msra.mxu0 %v16941_v14  ;;  %v17030_v14 = vld [vmem:[#allocation2 + $0x14] ss:$112 sps:$4 sm:$0xff]  }
 0x170   :  { %9517 = vmatprep.subr.bf16.mxu0 %v16949_v16  ;;  %8694 = vmatpush1.bf16.msra.mxu1 %v16944_v17  ;;  %v17027_v16 = vld [vmem:[#allocation2 + $0x3c4] ss:$112 sps:$4 sm:$0xff]   ;;  %v17025_v17 = vld [vmem:[#allocation2 + $0x3c0] ss:$112 sps:$4 sm:$0xff]  }
 0x171   :  { %8695 = vmatprep.subr.bf16.mxu1 %v16952_v20  ;;  %v17028_v20 = vld [vmem:[#allocation2 + $0x10] ss:$112 sps:$4 sm:$0xff]  }
 0x173   :  { %9518 = vmatpush1.bf16.msra.mxu0 %v16947_v19  ;;  %v17033_v19 = vld [vmem:[#allocation2 + $0x4a4] ss:$112 sps:$4 sm:$0xff]  }
 0x174   :  { %9519 = vmatprep.subr.bf16.mxu0 %v16955_v21  ;;  %8696 = vmatpush1.bf16.msra.mxu1 %v16950_v22  ;;  %v17031_v21 = vld [vmem:[#allocation2 + $0x4a0] ss:$112 sps:$4 sm:$0xff]   ;;  %v17036_v22 = vld [vmem:[#allocation2 + $0xf4] ss:$112 sps:$4 sm:$0xff]  }
 0x175   :  { %8697 = vmatprep.subr.bf16.mxu1 %v16958_v25  ;;  %v17034_v25 = vld [vmem:[#allocation2 + $0xf0] ss:$112 sps:$4 sm:$0xff]  }
 0x177   :  { %9520 = vmatpush1.bf16.msra.mxu0 %v16953_v23  ;;  %v17039_v23 = vld [vmem:[#allocation2 + $0x584] ss:$112 sps:$4 sm:$0xff]  }
 0x178   :  { %9521 = vmatprep.subr.bf16.mxu0 %v16961_v26  ;;  %8698 = vmatpush1.bf16.msra.mxu1 %v16956_v27  ;;  %v17037_v27 = vld [vmem:[#allocation2 + $0x580] ss:$112 sps:$4 sm:$0xff]  }
 0x179   :  { %8699 = vmatprep.subr.bf16.mxu1 %v16964_v30  ;;  %v17042_v30 = vld [vmem:[#allocation2 + $0x1d4] ss:$112 sps:$4 sm:$0xff]  }
 0x17b   :  { %9522 = vmatpush1.bf16.msra.mxu0 %v16959_v28 }
 0x17c   :  { %9523 = vmatprep.subr.bf16.mxu0 %v16967_v31  ;;  %8700 = vmatpush1.bf16.msra.mxu1 %v16962_v32  ;;  %v17045_v31 = vld [vmem:[#allocation2 + $0x664] ss:$112 sps:$4 sm:$0xff]  }
 0x17d   :  { %8701 = vmatprep.subr.bf16.mxu1 %v16970_v34  ;;  %v17040_v34 = vld [vmem:[#allocation2 + $0x1d0] ss:$112 sps:$4 sm:$0xff]  }
 0x17f   :  { %9524 = vmatpush1.bf16.msra.mxu0 %v16965_v33 }
 0x180   :  { %9525 = vmatprep.subr.bf16.mxu0 %v16973_v35  ;;  %8702 = vmatpush1.bf16.msra.mxu1 %v16968_v37  ;;  %v17043_v35 = vld [vmem:[#allocation2 + $0x660] ss:$112 sps:$4 sm:$0xff]   ;;  %v17048_v37 = vld [vmem:[#allocation2 + $0x2b4] ss:$112 sps:$4 sm:$0xff]  }
 0x181   :  { %8703 = vmatprep.subr.bf16.mxu1 %v16976_v39 }
 0x183   :  { %9526 = vmatpush1.bf16.msra.mxu0 %v16971_v38  ;;  %v17051_v38 = vld [vmem:[#allocation2 + $0x744] ss:$112 sps:$4 sm:$0xff]  }
 0x184   :  { %9527 = vmatprep.subr.bf16.mxu0 %v16979_v41  ;;  %8704 = vmatpush1.bf16.msra.mxu1 %v16974_v42  ;;  %v17046_v42 = vld [vmem:[#allocation2 + $0x2b0] ss:$112 sps:$4 sm:$0xff]  }
 0x185   :  { %8705 = vmatprep.subr.bf16.mxu1 %v16982_v45  ;;  %v17049_v45 = vld [vmem:[#allocation2 + $0x740] ss:$112 sps:$4 sm:$0xff]  }
 0x187   :  { %9528 = vmatpush1.bf16.msra.mxu0 %v16977_v44 }
 0x188   :  { %9529 = vmatprep.subr.bf16.mxu0 %v16985_v46  ;;  %8706 = vmatpush1.bf16.msra.mxu1 %v16980_v47  ;;  %v17054_v47 = vld [vmem:[#allocation2 + $0x394] ss:$112 sps:$4 sm:$0xff]  }
 0x189   :  { %8707 = vmatprep.subr.bf16.mxu1 %v16988_v49  ;;  %v17052_v49 = vld [vmem:[#allocation2 + $0x390] ss:$112 sps:$4 sm:$0xff]  }
 0x18b   :  { %9530 = vmatpush1.bf16.msra.mxu0 %v16983_v48  ;;  %v17057_v48 = vld [vmem:[#allocation2 + $0x824] ss:$112 sps:$4 sm:$0xff]  }
 0x18c   :  { %9531 = vmatprep.subr.bf16.mxu0 %v16991_v50  ;;  %8708 = vmatpush1.bf16.msra.mxu1 %v16986_v52  ;;  %v17055_v50 = vld [vmem:[#allocation2 + $0x820] ss:$112 sps:$4 sm:$0xff]   ;;  %v17060_v52 = vld [vmem:[#allocation2 + $0x474] ss:$112 sps:$4 sm:$0xff]  }
 0x18d   :  { %8709 = vmatprep.subr.bf16.mxu1 %v16994_v54  ;;  %v17058_v54 = vld [vmem:[#allocation2 + $0x470] ss:$112 sps:$4 sm:$0xff]  }
 0x18f   :  { %9532 = vmatpush1.bf16.msra.mxu0 %v16989_v53  ;;  %v17063_v53 = vld [vmem:[#allocation2 + $0x904] ss:$112 sps:$4 sm:$0xff]  }
 0x190   :  { %9533 = vmatprep.subr.bf16.mxu0 %v16997_v55  ;;  %8710 = vmatpush1.bf16.msra.mxu1 %v16992_v56  ;;  %v17061_v55 = vld [vmem:[#allocation2 + $0x900] ss:$112 sps:$4 sm:$0xff]   ;;  %v17066_v56 = vld [vmem:[#allocation2 + $0x554] ss:$112 sps:$4 sm:$0xff]  }
 0x191   :  { %8711 = vmatprep.subr.bf16.mxu1 %v17000_v58  ;;  %v17064_v58 = vld [vmem:[#allocation2 + $0x550] ss:$112 sps:$4 sm:$0xff]  }
 0x193   :  { %9534 = vmatpush1.bf16.msra.mxu0 %v16995_v57  ;;  %v17069_v57 = vld [vmem:[#allocation2 + $0x9e4] ss:$112 sps:$4 sm:$0xff]  }
 0x194   :  { %9535 = vmatprep.subr.bf16.mxu0 %v17003_v59  ;;  %8712 = vmatpush1.bf16.msra.mxu1 %v16998_v60  ;;  %v17067_v59 = vld [vmem:[#allocation2 + $0x9e0] ss:$112 sps:$4 sm:$0xff]   ;;  %v17072_v60 = vld [vmem:[#allocation2 + $0x634] ss:$112 sps:$4 sm:$0xff]  }
 0x195   :  { %8713 = vmatprep.subr.bf16.mxu1 %v17006_v62  ;;  %v17070_v62 = vld [vmem:[#allocation2 + $0x630] ss:$112 sps:$4 sm:$0xff]  }
 0x197   :  { %9536 = vmatpush1.bf16.msra.mxu0 %v17001_v61  ;;  %v17075_v61 = vld [vmem:[#allocation2 + $0xac4] ss:$112 sps:$4 sm:$0xff]  }
 0x198   :  { %9751 = vmatprep.subr.bf16.mxu0 %v17009_v63  ;;  %8714 = vmatpush1.bf16.msra.mxu1 %v17004_v1  ;;  %v17073_v63 = vld [vmem:[#allocation2 + $0xac0] ss:$112 sps:$4 sm:$0xff]   ;;  %v17078_v1 = vld [vmem:[#allocation2 + $0x714] ss:$112 sps:$4 sm:$0xff]  }
 0x199   :  { %8715 = vmatprep.subr.bf16.mxu1 %v17012_v3  ;;  %v17076_v3 = vld [vmem:[#allocation2 + $0x710] ss:$112 sps:$4 sm:$0xff]  }
 0x19a   :  { %9538 = vmatmul.mubr.bf16.vlgmr.msra.gmra.mrb[8].mxu0 %v19287_v29 }
 0x19b   :  { %9752 = vmatpush1.bf16.msra.mxu0 %v17007_v2  ;;  %9783 = vmatprep.mubr.bf16.mxu0 %v19252_v51  ;;  %v17081_v2 = vld [vmem:[#allocation2 + $0xba4] ss:$112 sps:$4 sm:$0xff]  }
 0x19c   :  { %9753 = vmatprep.subr.bf16.mxu0 %v17015_v4  ;;  %8716 = vmatpush1.bf16.msra.mxu1 %v17010_v5  ;;  %v17079_v4 = vld [vmem:[#allocation2 + $0xba0] ss:$112 sps:$4 sm:$0xff]   ;;  %v17084_v5 = vld [vmem:[#allocation2 + $0x7f4] ss:$112 sps:$4 sm:$0xff]  }
 0x19d   :  { %8726 = vmatprep.subr.bf16.mxu1 %v17018_v7  ;;  %v17082_v7 = vld [vmem:[#allocation2 + $0x7f0] ss:$112 sps:$4 sm:$0xff]  }
 0x19f   :  { %9754 = vmatpush1.bf16.msra.mxu0 %v17013_v6  ;;  %8718 = vmatmul.mubr.bf16.vlgmr.msra.gmra.mrb[4].mxu1 %v19287_v29  ;;  %v17087_v6 = vld [vmem:[#allocation2 + $0xc84] ss:$112 sps:$4 sm:$0xff]  }
 0x1a0   :  { %9755 = vmatprep.subr.bf16.mxu0 %v17021_v8  ;;  %8727 = vmatpush1.bf16.msra.mxu1 %v17016_v11  ;;  %v17085_v8 = vld [vmem:[#allocation2 + $0xc80] ss:$112 sps:$4 sm:$0xff]   ;;  %v17090_v11 = vld [vmem:[#allocation2 + $0x8d4] ss:$112 sps:$4 sm:$0xff]  }
 0x1a1   :  { %8758 = vmatprep.mubr.bf16.mxu1 %v19183_v0  ;;  %8767 = vmatprep.subr.bf16.mxu1 %v17030_v14  ;;  %v17091_v14 = vld [vmem:[#allocation2 + $0xd60] ss:$112 sps:$4 sm:$0xff]  }
 0x1a3   :  { %9756 = vmatpush1.bf16.msra.mxu0 %v17019_v12  ;;  %v17093_v12 = vld [vmem:[#allocation2 + $0xd64] ss:$112 sps:$4 sm:$0xff]  }
 0x1a4   :  { %9757 = vmatprep.subr.bf16.mxu0 %v17024_v13  ;;  %v17088_v13 = vld [vmem:[#allocation2 + $0x8d0] ss:$112 sps:$4 sm:$0xff]  }
 0x1a7   :  { %9758 = vmatpush1.bf16.msra.mxu0 %v17022_v15  ;;  %v17096_v15 = vld [vmem:[#allocation2 + $0x9b4] ss:$112 sps:$4 sm:$0xff]  }
 0x1a8   :  { %9759 = vmatprep.subr.bf16.mxu0 %v17027_v16  ;;  %v17099_v16 = vld [vmem:[#allocation2 + $0xe44] ss:$112 sps:$4 sm:$0xff]  }
 0x1ab   :  { %9760 = vmatpush1.bf16.msra.mxu0 %v17025_v17  ;;  %15643 = vmatmul.mubr.msk.bf16.vlgmr.msra.gmra.mrb[4].mxu1 %vm8435_vm0, %v19245_v10  ;;  %v17094_v17 = vld [vmem:[#allocation2 + $0x9b0] ss:$112 sps:$4 sm:$0xff]  }
 0x1ac   :  { %9761 = vmatprep.subr.bf16.mxu0 %v17033_v19  ;;  %8768 = vmatpush1.bf16.msra.mxu1 %v17028_v20  ;;  %v17097_v19 = vld [vmem:[#allocation2 + $0xe40] ss:$112 sps:$4 sm:$0xff]   ;;  %v17102_v20 = vld [vmem:[#allocation2 + $0xa94] ss:$112 sps:$4 sm:$0xff]  }
 0x1ad   :  { %v19314_v26 = vpop.f32.mrb[4].mxu0  ;;  %8799 = vmatprep.mubr.bf16.mxu1 %v19252_v51  ;;  %8769 = vmatprep.subr.bf16.mxu1 %v17036_v22  ;;  %v17100_v22 = vld [vmem:[#allocation2 + $0xa90] ss:$112 sps:$4 sm:$0xff]  }
 0x1ae   :  { %v19316_v28 = vpop.f32.mrb[5].mxu0 }
 0x1af   :  { %9762 = vmatpush1.bf16.msra.mxu0 %v17031_v21  ;;  %v9215_v32 = vpop.f32.mrb[6].mxu0  ;;  %v17105_v21 = vld [vmem:[#allocation2 + $0xf24] ss:$112 sps:$4 sm:$0xff]  }
 0x1b0   :  { %9763 = vmatprep.subr.bf16.mxu0 %v17039_v23  ;;  %v9216_v33 = vpop.f32.mrb[7].mxu0  ;;  %8770 = vmatpush1.bf16.msra.mxu1 %v17034_v25  ;;  %v17103_v23 = vld [vmem:[#allocation2 + $0xf20] ss:$112 sps:$4 sm:$0xff]   ;;  %v17108_v25 = vld [vmem:[#allocation2 + $0xb74] ss:$112 sps:$4 sm:$0xff]  }
 0x1b1   :  { %8771 = vmatprep.subr.bf16.mxu1 %v17042_v30  ;;  %v17106_v30 = vld [vmem:[#allocation2 + $0xb70] ss:$112 sps:$4 sm:$0xff]   ;;  %v17114_v32 = vld [vmem:[#allocation2 + $0xc54] ss:$112 sps:$4 sm:$0xff]  }
 0x1b2   :  { %v19319_v39 = vpop.f32.mrb[0].mxu1  ;;  %v17117_v33 = vld [vmem:[#allocation2 + $0x10e4] ss:$112 sps:$4 sm:$0xff]  }
 0x1b3   :  { %9764 = vmatpush1.bf16.msra.mxu0 %v17037_v27  ;;  %v19321_v41 = vpop.f32.mrb[1].mxu1  ;;  %v17111_v27 = vld [vmem:[#allocation2 + $0x1004] ss:$112 sps:$4 sm:$0xff]  }
 0x1b4   :  { %9765 = vmatprep.subr.bf16.mxu0 %v17045_v31  ;;  %8772 = vmatpush1.bf16.msra.mxu1 %v17040_v34  ;;  %v8600_v44 = vpop.f32.mrb[2].mxu1  ;;  %v17109_v31 = vld [vmem:[#allocation2 + $0x1000] ss:$112 sps:$4 sm:$0xff]  }
 0x1b5   :  { %v8601_v46 = vpop.f32.mrb[3].mxu1  ;;  %8773 = vmatprep.subr.bf16.mxu1 %v17048_v37  ;;  %v17112_v34 = vld [vmem:[#allocation2 + $0xc50] ss:$112 sps:$4 sm:$0xff]   ;;  %v17120_v37 = vld [vmem:[#allocation2 + $0xd34] ss:$112 sps:$4 sm:$0xff]  }
 0x1b6   :  { %v17121_v44 = vld [vmem:[#allocation2 + $0x11c0] ss:$112 sps:$4 sm:$0xff]  }
 0x1b7   :  { %9766 = vmatpush1.bf16.msra.mxu0 %v17043_v35  ;;  %v17115_v35 = vld [vmem:[#allocation2 + $0x10e0] ss:$112 sps:$4 sm:$0xff]  }
 0x1b8   :  { %9767 = vmatprep.subr.bf16.mxu0 %v17051_v38  ;;  %8774 = vmatpush1.bf16.msra.mxu1 %v17046_v42  ;;  %v17123_v38 = vld [vmem:[#allocation2 + $0x11c4] ss:$112 sps:$4 sm:$0xff]   ;;  %v17118_v42 = vld [vmem:[#allocation2 + $0xd30] ss:$112 sps:$4 sm:$0xff]  }
 0x1b9   :  { %8775 = vmatprep.subr.bf16.mxu1 %v17054_v47  ;;  %v17124_v46 = vld [vmem:[#allocation2 + $0xe10] ss:$112 sps:$4 sm:$0xff]   ;;  %v17129_v47 = vld [vmem:[#allocation2 + $0x12a4] ss:$112 sps:$4 sm:$0xff]  }
 0x1bb   :  { %9768 = vmatpush1.bf16.msra.mxu0 %v17049_v45  ;;  %v17126_v45 = vld [vmem:[#allocation2 + $0xe14] ss:$112 sps:$4 sm:$0xff]  }
 0x1bc   :  { %9769 = vmatprep.subr.bf16.mxu0 %v17057_v48  ;;  %8776 = vmatpush1.bf16.msra.mxu1 %v17052_v49  ;;  %v17127_v48 = vld [vmem:[#allocation2 + $0x12a0] ss:$112 sps:$4 sm:$0xff]   ;;  %v17132_v49 = vld [vmem:[#allocation2 + $0xef4] ss:$112 sps:$4 sm:$0xff]  }
 0x1bd   :  { %8777 = vmatprep.subr.bf16.mxu1 %v17060_v52  ;;  %v17130_v52 = vld [vmem:[#allocation2 + $0xef0] ss:$112 sps:$4 sm:$0xff]  }
 0x1bf   :  { %9770 = vmatpush1.bf16.msra.mxu0 %v17055_v50  ;;  %v17135_v50 = vld [vmem:[#allocation2 + $0x1384] ss:$112 sps:$4 sm:$0xff]  }
 0x1c0   :  { %9771 = vmatprep.subr.bf16.mxu0 %v17063_v53  ;;  %8778 = vmatpush1.bf16.msra.mxu1 %v17058_v54  ;;  %v17133_v53 = vld [vmem:[#allocation2 + $0x1380] ss:$112 sps:$4 sm:$0xff]   ;;  %v17138_v54 = vld [vmem:[#allocation2 + $0xfd4] ss:$112 sps:$4 sm:$0xff]  }
 0x1c1   :  { %8779 = vmatprep.subr.bf16.mxu1 %v17066_v56  ;;  %v17136_v56 = vld [vmem:[#allocation2 + $0xfd0] ss:$112 sps:$4 sm:$0xff]  }
 0x1c3   :  { %9772 = vmatpush1.bf16.msra.mxu0 %v17061_v55  ;;  %v17141_v55 = vld [vmem:[#allocation2 + $0x1464] ss:$112 sps:$4 sm:$0xff]  }
 0x1c4   :  { %9773 = vmatprep.subr.bf16.mxu0 %v17069_v57  ;;  %8780 = vmatpush1.bf16.msra.mxu1 %v17064_v58  ;;  %v17139_v57 = vld [vmem:[#allocation2 + $0x1460] ss:$112 sps:$4 sm:$0xff]   ;;  %v17144_v58 = vld [vmem:[#allocation2 + $0x10b4] ss:$112 sps:$4 sm:$0xff]  }
 0x1c5   :  { %8781 = vmatprep.subr.bf16.mxu1 %v17072_v60  ;;  %v17142_v60 = vld [vmem:[#allocation2 + $0x10b0] ss:$112 sps:$4 sm:$0xff]  }
 0x1c7   :  { %9774 = vmatpush1.bf16.msra.mxu0 %v17067_v59  ;;  %v17147_v59 = vld [vmem:[#allocation2 + $0x1544] ss:$112 sps:$4 sm:$0xff]  }
 0x1c8   :  { %9775 = vmatprep.subr.bf16.mxu0 %v17075_v61  ;;  %8782 = vmatpush1.bf16.msra.mxu1 %v17070_v62  ;;  %v17145_v61 = vld [vmem:[#allocation2 + $0x1540] ss:$112 sps:$4 sm:$0xff]   ;;  %v17150_v62 = vld [vmem:[#allocation2 + $0x1194] ss:$112 sps:$4 sm:$0xff]  }
 0x1c9   :  { %8783 = vmatprep.subr.bf16.mxu1 %v17078_v1  ;;  %v17148_v1 = vld [vmem:[#allocation2 + $0x1190] ss:$112 sps:$4 sm:$0xff]  }
 0x1cb   :  { %9776 = vmatpush1.bf16.msra.mxu0 %v17073_v63  ;;  %v17153_v63 = vld [vmem:[#allocation2 + $0x1624] ss:$112 sps:$4 sm:$0xff]  }
 0x1cc   :  { %9777 = vmatprep.subr.bf16.mxu0 %v17081_v2  ;;  %8784 = vmatpush1.bf16.msra.mxu1 %v17076_v3  ;;  %v17151_v2 = vld [vmem:[#allocation2 + $0x1620] ss:$112 sps:$4 sm:$0xff]   ;;  %v17156_v3 = vld [vmem:[#allocation2 + $0x1274] ss:$112 sps:$4 sm:$0xff]  }
 0x1cd   :  { %8785 = vmatprep.subr.bf16.mxu1 %v17084_v5  ;;  %v17159_v5 = vld [vmem:[#allocation2 + $0x1704] ss:$112 sps:$4 sm:$0xff]  }
 0x1cf   :  { %9778 = vmatpush1.bf16.msra.mxu0 %v17079_v4  ;;  %v17154_v4 = vld [vmem:[#allocation2 + $0x1270] ss:$112 sps:$4 sm:$0xff]  }
 0x1d0   :  { %9779 = vmatprep.subr.bf16.mxu0 %v17087_v6  ;;  %8786 = vmatpush1.bf16.msra.mxu1 %v17082_v7  ;;  %v17157_v6 = vld [vmem:[#allocation2 + $0x1700] ss:$112 sps:$4 sm:$0xff]   ;;  %v17162_v7 = vld [vmem:[#allocation2 + $0x1354] ss:$112 sps:$4 sm:$0xff]  }
 0x1d1   :  { %8787 = vmatprep.subr.bf16.mxu1 %v17090_v11  ;;  %v17165_v11 = vld [vmem:[#allocation2 + $0x17e4] ss:$112 sps:$4 sm:$0xff]  }
 0x1d3   :  { %9780 = vmatpush1.bf16.msra.mxu0 %v17085_v8  ;;  %v17160_v8 = vld [vmem:[#allocation2 + $0x1350] ss:$112 sps:$4 sm:$0xff]  }
 0x1d4   :  { %9781 = vmatprep.subr.bf16.mxu0 %v17093_v12  ;;  %8788 = vmatpush1.bf16.msra.mxu1 %v17088_v13  ;;  %v17163_v12 = vld [vmem:[#allocation2 + $0x17e0] ss:$112 sps:$4 sm:$0xff]   ;;  %v17168_v13 = vld [vmem:[#allocation2 + $0x1434] ss:$112 sps:$4 sm:$0xff]  }
 0x1d5   :  { %8789 = vmatprep.subr.bf16.mxu1 %v17096_v15  ;;  %v17166_v15 = vld [vmem:[#allocation2 + $0x1430] ss:$112 sps:$4 sm:$0xff]  }
 0x1d7   :  { %9782 = vmatpush1.bf16.msra.mxu0 %v17091_v14  ;;  %v17171_v14 = vld [vmem:[#allocation2 + $0x18c4] ss:$112 sps:$4 sm:$0xff]  }
 0x1d8   :  { %9792 = vmatprep.subr.bf16.mxu0 %v17099_v16  ;;  %8790 = vmatpush1.bf16.msra.mxu1 %v17094_v17  ;;  %v17169_v16 = vld [vmem:[#allocation2 + $0x18c0] ss:$112 sps:$4 sm:$0xff]   ;;  %v17174_v17 = vld [vmem:[#allocation2 + $0x1514] ss:$112 sps:$4 sm:$0xff]  }
 0x1d9   :  { %8791 = vmatprep.subr.bf16.mxu1 %v17102_v20  ;;  %v17172_v20 = vld [vmem:[#allocation2 + $0x1510] ss:$112 sps:$4 sm:$0xff]  }
 0x1da   :  { %9784 = vmatmul.mubr.bf16.vlgmr.msra.gmra.mrb[12].mxu0 %v19259_v9 }
 0x1db   :  { %9793 = vmatpush1.bf16.msra.mxu0 %v17097_v19  ;;  %9824 = vmatprep.mubr.bf16.mxu0 %v19266_v36  ;;  %v17177_v19 = vld [vmem:[#allocation2 + $0x19a4] ss:$112 sps:$4 sm:$0xff]  }
 0x1dc   :  { %9794 = vmatprep.subr.bf16.mxu0 %v17105_v21  ;;  %8792 = vmatpush1.bf16.msra.mxu1 %v17100_v22  ;;  %v17175_v21 = vld [vmem:[#allocation2 + $0x19a0] ss:$112 sps:$4 sm:$0xff]   ;;  %v17180_v22 = vld [vmem:[#allocation2 + $0x15f4] ss:$112 sps:$4 sm:$0xff]  }
 0x1dd   :  { %8793 = vmatprep.subr.bf16.mxu1 %v17108_v25  ;;  %v17178_v25 = vld [vmem:[#allocation2 + $0x15f0] ss:$112 sps:$4 sm:$0xff]  }
 0x1df   :  { %9795 = vmatpush1.bf16.msra.mxu0 %v17103_v23  ;;  %v17183_v23 = vld [vmem:[#allocation2 + $0x1a84] ss:$112 sps:$4 sm:$0xff]  }
 0x1e0   :  { %9796 = vmatprep.subr.bf16.mxu0 %v17111_v27  ;;  %8794 = vmatpush1.bf16.msra.mxu1 %v17106_v30  ;;  %v17181_v27 = vld [vmem:[#allocation2 + $0x1a80] ss:$112 sps:$4 sm:$0xff]   ;;  %v17186_v30 = vld [vmem:[#allocation2 + $0x16d4] ss:$112 sps:$4 sm:$0xff]  }
 0x1e1   :  { %8795 = vmatprep.subr.bf16.mxu1 %v17114_v32  ;;  %v17184_v32 = vld [vmem:[#allocation2 + $0x16d0] ss:$112 sps:$4 sm:$0xff]  }
 0x1e3   :  { %9797 = vmatpush1.bf16.msra.mxu0 %v17109_v31  ;;  %v17189_v31 = vld [vmem:[#allocation2 + $0x1b64] ss:$112 sps:$4 sm:$0xff]  }
 0x1e4   :  { %9798 = vmatprep.subr.bf16.mxu0 %v17117_v33  ;;  %8796 = vmatpush1.bf16.msra.mxu1 %v17112_v34  ;;  %v17187_v33 = vld [vmem:[#allocation2 + $0x1b60] ss:$112 sps:$4 sm:$0xff]   ;;  %v17192_v34 = vld [vmem:[#allocation2 + $0x17b4] ss:$112 sps:$4 sm:$0xff]  }
 0x1e5   :  { %8797 = vmatprep.subr.bf16.mxu1 %v17120_v37  ;;  %v17190_v37 = vld [vmem:[#allocation2 + $0x17b0] ss:$112 sps:$4 sm:$0xff]  }
 0x1e7   :  { %9799 = vmatpush1.bf16.msra.mxu0 %v17115_v35  ;;  %v17195_v35 = vld [vmem:[#allocation2 + $0x1c44] ss:$112 sps:$4 sm:$0xff]  }
 0x1e8   :  { %9800 = vmatprep.subr.bf16.mxu0 %v17123_v38  ;;  %8798 = vmatpush1.bf16.msra.mxu1 %v17118_v42  ;;  %v17193_v38 = vld [vmem:[#allocation2 + $0x1c40] ss:$112 sps:$4 sm:$0xff]   ;;  %v17198_v42 = vld [vmem:[#allocation2 + $0x1894] ss:$112 sps:$4 sm:$0xff]  }
 0x1e9   :  { %8808 = vmatprep.subr.bf16.mxu1 %v17126_v45  ;;  %v17196_v45 = vld [vmem:[#allocation2 + $0x1890] ss:$112 sps:$4 sm:$0xff]  }
 0x1eb   :  { %9801 = vmatpush1.bf16.msra.mxu0 %v17121_v44  ;;  %8800 = vmatmul.mubr.bf16.vlgmr.msra.gmra.mrb[8].mxu1 %v19259_v9  ;;  %v17201_v44 = vld [vmem:[#allocation2 + $0x1d24] ss:$112 sps:$4 sm:$0xff]  }
 0x1ec   :  { %9802 = vmatprep.subr.bf16.mxu0 %v17129_v47  ;;  %8809 = vmatpush1.bf16.msra.mxu1 %v17124_v46  ;;  %v17199_v46 = vld [vmem:[#allocation2 + $0x1d20] ss:$112 sps:$4 sm:$0xff]   ;;  %v17204_v47 = vld [vmem:[#allocation2 + $0x1974] ss:$112 sps:$4 sm:$0xff]  }
 0x1ed   :  { %8840 = vmatprep.mubr.bf16.mxu1 %v19266_v36  ;;  %8810 = vmatprep.subr.bf16.mxu1 %v17132_v49  ;;  %v17202_v49 = vld [vmem:[#allocation2 + $0x1970] ss:$112 sps:$4 sm:$0xff]  }
 0x1ef   :  { %9803 = vmatpush1.bf16.msra.mxu0 %v17127_v48  ;;  %v17207_v48 = vld [vmem:[#allocation2 + $0x1e04] ss:$112 sps:$4 sm:$0xff]  }
 0x1f0   :  { %9804 = vmatprep.subr.bf16.mxu0 %v17135_v50  ;;  %8811 = vmatpush1.bf16.msra.mxu1 %v17130_v52  ;;  %v17205_v50 = vld [vmem:[#allocation2 + $0x1e00] ss:$112 sps:$4 sm:$0xff]   ;;  %v17210_v52 = vld [vmem:[#allocation2 + $0x1a54] ss:$112 sps:$4 sm:$0xff]  }
 0x1f1   :  { %8812 = vmatprep.subr.bf16.mxu1 %v17138_v54  ;;  %v17208_v54 = vld [vmem:[#allocation2 + $0x1a50] ss:$112 sps:$4 sm:$0xff]  }
 0x1f3   :  { %9805 = vmatpush1.bf16.msra.mxu0 %v17133_v53  ;;  %v17213_v53 = vld [vmem:[#allocation2 + $0x1ee4] ss:$112 sps:$4 sm:$0xff]  }
 0x1f4   :  { %9806 = vmatprep.subr.bf16.mxu0 %v17141_v55  ;;  %8813 = vmatpush1.bf16.msra.mxu1 %v17136_v56  ;;  %v17211_v55 = vld [vmem:[#allocation2 + $0x1ee0] ss:$112 sps:$4 sm:$0xff]   ;;  %v17216_v56 = vld [vmem:[#allocation2 + $0x1b34] ss:$112 sps:$4 sm:$0xff]  }
 0x1f5   :  { %8814 = vmatprep.subr.bf16.mxu1 %v17144_v58  ;;  %v17214_v58 = vld [vmem:[#allocation2 + $0x1b30] ss:$112 sps:$4 sm:$0xff]  }
 0x1f7   :  { %9807 = vmatpush1.bf16.msra.mxu0 %v17139_v57  ;;  %v17219_v57 = vld [vmem:[#allocation2 + $0x1fc4] ss:$112 sps:$4 sm:$0xff]  }
 0x1f8   :  { %9808 = vmatprep.subr.bf16.mxu0 %v17147_v59  ;;  %8815 = vmatpush1.bf16.msra.mxu1 %v17142_v60  ;;  %v17217_v59 = vld [vmem:[#allocation2 + $0x1fc0] ss:$112 sps:$4 sm:$0xff]   ;;  %v17222_v60 = vld [vmem:[#allocation2 + $0x1c14] ss:$112 sps:$4 sm:$0xff]  }
 0x1f9   :  { %8816 = vmatprep.subr.bf16.mxu1 %v17150_v62  ;;  %v17220_v62 = vld [vmem:[#allocation2 + $0x1c10] ss:$112 sps:$4 sm:$0xff]  }
 0x1fb   :  { %9809 = vmatpush1.bf16.msra.mxu0 %v17145_v61  ;;  %v17225_v61 = vld [vmem:[#allocation2 + $0x20a4] ss:$112 sps:$4 sm:$0xff]  }
 0x1fc   :  { %9810 = vmatprep.subr.bf16.mxu0 %v17153_v63  ;;  %8817 = vmatpush1.bf16.msra.mxu1 %v17148_v1  ;;  %v17223_v63 = vld [vmem:[#allocation2 + $0x20a0] ss:$112 sps:$4 sm:$0xff]   ;;  %v17228_v1 = vld [vmem:[#allocation2 + $0x1cf4] ss:$112 sps:$4 sm:$0xff]  }
 0x1fd   :  { %8818 = vmatprep.subr.bf16.mxu1 %v17156_v3  ;;  %v17226_v3 = vld [vmem:[#allocation2 + $0x1cf0] ss:$112 sps:$4 sm:$0xff]  }
 0x1ff   :  { %9811 = vmatpush1.bf16.msra.mxu0 %v17151_v2  ;;  %v17231_v2 = vld [vmem:[#allocation2 + $0x2184] ss:$112 sps:$4 sm:$0xff]  }
 0x200   :  { %9812 = vmatprep.subr.bf16.mxu0 %v17159_v5  ;;  %8819 = vmatpush1.bf16.msra.mxu1 %v17154_v4  ;;  %v17229_v4 = vld [vmem:[#allocation2 + $0x2180] ss:$112 sps:$4 sm:$0xff]   ;;  %v17234_v5 = vld [vmem:[#allocation2 + $0x1dd4] ss:$112 sps:$4 sm:$0xff]  }
 0x201   :  { %8820 = vmatprep.subr.bf16.mxu1 %v17162_v7  ;;  %v17232_v7 = vld [vmem:[#allocation2 + $0x1dd0] ss:$112 sps:$4 sm:$0xff]  }
 0x203   :  { %9813 = vmatpush1.bf16.msra.mxu0 %v17157_v6  ;;  %v17237_v6 = vld [vmem:[#allocation2 + $0x2264] ss:$112 sps:$4 sm:$0xff]  }
 0x204   :  { %9814 = vmatprep.subr.bf16.mxu0 %v17165_v11  ;;  %8821 = vmatpush1.bf16.msra.mxu1 %v17160_v8  ;;  %v17235_v8 = vld [vmem:[#allocation2 + $0x2260] ss:$112 sps:$4 sm:$0xff]   ;;  %v17240_v11 = vld [vmem:[#allocation2 + $0x1eb4] ss:$112 sps:$4 sm:$0xff]  }
 0x205   :  { %8822 = vmatprep.subr.bf16.mxu1 %v17168_v13  ;;  %v17238_v13 = vld [vmem:[#allocation2 + $0x1eb0] ss:$112 sps:$4 sm:$0xff]  }
 0x207   :  { %9815 = vmatpush1.bf16.msra.mxu0 %v17163_v12  ;;  %v17243_v12 = vld [vmem:[#allocation2 + $0x2344] ss:$112 sps:$4 sm:$0xff]  }
 0x208   :  { %9816 = vmatprep.subr.bf16.mxu0 %v17171_v14  ;;  %8823 = vmatpush1.bf16.msra.mxu1 %v17166_v15  ;;  %v17241_v14 = vld [vmem:[#allocation2 + $0x2340] ss:$112 sps:$4 sm:$0xff]   ;;  %v17246_v15 = vld [vmem:[#allocation2 + $0x1f94] ss:$112 sps:$4 sm:$0xff]  }
 0x209   :  { %8824 = vmatprep.subr.bf16.mxu1 %v17174_v17  ;;  %v17244_v17 = vld [vmem:[#allocation2 + $0x1f90] ss:$112 sps:$4 sm:$0xff]  }
 0x20b   :  { %9817 = vmatpush1.bf16.msra.mxu0 %v17169_v16  ;;  %v17249_v16 = vld [vmem:[#allocation2 + $0x2424] ss:$112 sps:$4 sm:$0xff]  }
 0x20c   :  { %9818 = vmatprep.subr.bf16.mxu0 %v17177_v19  ;;  %8825 = vmatpush1.bf16.msra.mxu1 %v17172_v20  ;;  %v17247_v19 = vld [vmem:[#allocation2 + $0x2420] ss:$112 sps:$4 sm:$0xff]   ;;  %v17252_v20 = vld [vmem:[#allocation2 + $0x2074] ss:$112 sps:$4 sm:$0xff]  }
 0x20d   :  { %8826 = vmatprep.subr.bf16.mxu1 %v17180_v22  ;;  %v17250_v22 = vld [vmem:[#allocation2 + $0x2070] ss:$112 sps:$4 sm:$0xff]  }
 0x20f   :  { %9819 = vmatpush1.bf16.msra.mxu0 %v17175_v21  ;;  %v17255_v21 = vld [vmem:[#allocation2 + $0x2504] ss:$112 sps:$4 sm:$0xff]  }
 0x210   :  { %9820 = vmatprep.subr.bf16.mxu0 %v17183_v23  ;;  %8827 = vmatpush1.bf16.msra.mxu1 %v17178_v25  ;;  %v17253_v23 = vld [vmem:[#allocation2 + $0x2500] ss:$112 sps:$4 sm:$0xff]   ;;  %v17258_v25 = vld [vmem:[#allocation2 + $0x2154] ss:$112 sps:$4 sm:$0xff]  }
 0x211   :  { %8828 = vmatprep.subr.bf16.mxu1 %v17186_v30  ;;  %v17256_v30 = vld [vmem:[#allocation2 + $0x2150] ss:$112 sps:$4 sm:$0xff]  }
 0x213   :  { %9821 = vmatpush1.bf16.msra.mxu0 %v17181_v27  ;;  %v17261_v27 = vld [vmem:[#allocation2 + $0x25e4] ss:$112 sps:$4 sm:$0xff]  }
 0x214   :  { %9822 = vmatprep.subr.bf16.mxu0 %v17189_v31  ;;  %8829 = vmatpush1.bf16.msra.mxu1 %v17184_v32  ;;  %v17259_v31 = vld [vmem:[#allocation2 + $0x25e0] ss:$112 sps:$4 sm:$0xff]   ;;  %v17264_v32 = vld [vmem:[#allocation2 + $0x2234] ss:$112 sps:$4 sm:$0xff]  }
 0x215   :  { %8830 = vmatprep.subr.bf16.mxu1 %v17192_v34  ;;  %v17262_v34 = vld [vmem:[#allocation2 + $0x2230] ss:$112 sps:$4 sm:$0xff]  }
 0x217   :  { %9823 = vmatpush1.bf16.msra.mxu0 %v17187_v33  ;;  %v17267_v33 = vld [vmem:[#allocation2 + $0x26c4] ss:$112 sps:$4 sm:$0xff]  }
 0x218   :  { %9833 = vmatprep.subr.bf16.mxu0 %v17195_v35  ;;  %8831 = vmatpush1.bf16.msra.mxu1 %v17190_v37  ;;  %v17265_v35 = vld [vmem:[#allocation2 + $0x26c0] ss:$112 sps:$4 sm:$0xff]   ;;  %v17270_v37 = vld [vmem:[#allocation2 + $0x2314] ss:$112 sps:$4 sm:$0xff]  }
 0x219   :  { %8832 = vmatprep.subr.bf16.mxu1 %v17198_v42  ;;  %v17268_v42 = vld [vmem:[#allocation2 + $0x2310] ss:$112 sps:$4 sm:$0xff]  }
 0x21a   :  { %9825 = vmatmul.mubr.bf16.vlgmr.msra.gmra.mrb[12].mxu0 %v19273_v18 }
 0x21b   :  { %9834 = vmatpush1.bf16.msra.mxu0 %v17193_v38  ;;  %9865 = vmatprep.mubr.bf16.mxu0 %v19278_v24  ;;  %v17273_v38 = vld [vmem:[#allocation2 + $0x27a4] ss:$112 sps:$4 sm:$0xff]  }
 0x21c   :  { %9835 = vmatprep.subr.bf16.mxu0 %v17201_v44  ;;  %8833 = vmatpush1.bf16.msra.mxu1 %v17196_v45  ;;  %v17271_v44 = vld [vmem:[#allocation2 + $0x27a0] ss:$112 sps:$4 sm:$0xff]   ;;  %v17276_v45 = vld [vmem:[#allocation2 + $0x23f4] ss:$112 sps:$4 sm:$0xff]  }
 0x21d   :  { %8834 = vmatprep.subr.bf16.mxu1 %v17204_v47  ;;  %v17274_v47 = vld [vmem:[#allocation2 + $0x23f0] ss:$112 sps:$4 sm:$0xff]  }
 0x21f   :  { %9836 = vmatpush1.bf16.msra.mxu0 %v17199_v46  ;;  %v17279_v46 = vld [vmem:[#allocation2 + $0x2884] ss:$112 sps:$4 sm:$0xff]  }
 0x220   :  { %9837 = vmatprep.subr.bf16.mxu0 %v17207_v48  ;;  %8835 = vmatpush1.bf16.msra.mxu1 %v17202_v49  ;;  %v17277_v48 = vld [vmem:[#allocation2 + $0x2880] ss:$112 sps:$4 sm:$0xff]   ;;  %v17282_v49 = vld [vmem:[#allocation2 + $0x24d4] ss:$112 sps:$4 sm:$0xff]  }
 0x221   :  { %8836 = vmatprep.subr.bf16.mxu1 %v17210_v52  ;;  %v17280_v52 = vld [vmem:[#allocation2 + $0x24d0] ss:$112 sps:$4 sm:$0xff]  }
 0x223   :  { %9838 = vmatpush1.bf16.msra.mxu0 %v17205_v50  ;;  %v17285_v50 = vld [vmem:[#allocation2 + $0x2964] ss:$112 sps:$4 sm:$0xff]  }
 0x224   :  { %9839 = vmatprep.subr.bf16.mxu0 %v17213_v53  ;;  %8837 = vmatpush1.bf16.msra.mxu1 %v17208_v54  ;;  %v17283_v53 = vld [vmem:[#allocation2 + $0x2960] ss:$112 sps:$4 sm:$0xff]   ;;  %v17288_v54 = vld [vmem:[#allocation2 + $0x25b4] ss:$112 sps:$4 sm:$0xff]  }
 0x225   :  { %8838 = vmatprep.subr.bf16.mxu1 %v17216_v56  ;;  %v17286_v56 = vld [vmem:[#allocation2 + $0x25b0] ss:$112 sps:$4 sm:$0xff]  }
 0x227   :  { %9840 = vmatpush1.bf16.msra.mxu0 %v17211_v55  ;;  %v17297_v55 = vld [vmem:[#allocation2 + $0x2a44] ss:$112 sps:$4 sm:$0xff]  }
 0x228   :  { %9841 = vmatprep.subr.bf16.mxu0 %v17219_v57  ;;  %8839 = vmatpush1.bf16.msra.mxu1 %v17214_v58  ;;  %v17291_v57 = vld [vmem:[#allocation2 + $0x2694] ss:$112 sps:$4 sm:$0xff]   ;;  %v17295_v58 = vld [vmem:[#allocation2 + $0x2a40] ss:$112 sps:$4 sm:$0xff]  }
 0x229   :  { %8849 = vmatprep.subr.bf16.mxu1 %v17222_v60  ;;  %v17289_v60 = vld [vmem:[#allocation2 + $0x2690] ss:$112 sps:$4 sm:$0xff]  }
 0x22b   :  { %9842 = vmatpush1.bf16.msra.mxu0 %v17217_v59  ;;  %8841 = vmatmul.mubr.bf16.vlgmr.msra.gmra.mrb[8].mxu1 %v19273_v18  ;;  %v17303_v59 = vld [vmem:[#allocation2 + $0x54] ss:$112 sps:$4 sm:$0xff]  }
 0x22c   :  { %9843 = vmatprep.subr.bf16.mxu0 %v17225_v61  ;;  %8850 = vmatpush1.bf16.msra.mxu1 %v17220_v62  ;;  %v17294_v61 = vld [vmem:[#allocation2 + $0x2774] ss:$112 sps:$4 sm:$0xff]   ;;  %v17292_v62 = vld [vmem:[#allocation2 + $0x2770] ss:$112 sps:$4 sm:$0xff]  }
 0x22d   :  { %8881 = vmatprep.mubr.bf16.mxu1 %v19278_v24  ;;  %8851 = vmatprep.subr.bf16.mxu1 %v17228_v1  ;;  %v17298_v1 = vld [vmem:[#allocation2 + $0x2850] ss:$112 sps:$4 sm:$0xff]  }
 0x22f   :  { %9844 = vmatpush1.bf16.msra.mxu0 %v17223_v63  ;;  %v17300_v63 = vld [vmem:[#allocation2 + $0x2854] ss:$112 sps:$4 sm:$0xff]  }
 0x230   :  { %9845 = vmatprep.subr.bf16.mxu0 %v17231_v2  ;;  %8852 = vmatpush1.bf16.msra.mxu1 %v17226_v3  ;;  %v17301_v2 = vld [vmem:[#allocation2 + $0x50] ss:$112 sps:$4 sm:$0xff]   ;;  %v17306_v3 = vld [vmem:[#allocation2 + $0x2934] ss:$112 sps:$4 sm:$0xff]  }
 0x231   :  { %8853 = vmatprep.subr.bf16.mxu1 %v17234_v5  ;;  %v17304_v5 = vld [vmem:[#allocation2 + $0x2930] ss:$112 sps:$4 sm:$0xff]  }
 0x233   :  { %9846 = vmatpush1.bf16.msra.mxu0 %v17229_v4  ;;  %v17309_v4 = vld [vmem:[#allocation2 + $0x134] ss:$112 sps:$4 sm:$0xff]  }
 0x234   :  { %9847 = vmatprep.subr.bf16.mxu0 %v17237_v6  ;;  %8854 = vmatpush1.bf16.msra.mxu1 %v17232_v7  ;;  %v17307_v6 = vld [vmem:[#allocation2 + $0x130] ss:$112 sps:$4 sm:$0xff]   ;;  %v17312_v7 = vld [vmem:[#allocation2 + $0x1c] ss:$112 sps:$4 sm:$0xff]  }
 0x235   :  { %8855 = vmatprep.subr.bf16.mxu1 %v17240_v11  ;;  %v17310_v11 = vld [vmem:[#allocation2 + $0x18] ss:$112 sps:$4 sm:$0xff]  }
 0x237   :  { %9848 = vmatpush1.bf16.msra.mxu0 %v17235_v8  ;;  %v17315_v8 = vld [vmem:[#allocation2 + $0x214] ss:$112 sps:$4 sm:$0xff]  }
 0x238   :  { %9849 = vmatprep.subr.bf16.mxu0 %v17243_v12  ;;  %8856 = vmatpush1.bf16.msra.mxu1 %v17238_v13  ;;  %v17313_v12 = vld [vmem:[#allocation2 + $0x210] ss:$112 sps:$4 sm:$0xff]   ;;  %v17318_v13 = vld [vmem:[#allocation2 + $0xfc] ss:$112 sps:$4 sm:$0xff]  }
 0x239   :  { %8857 = vmatprep.subr.bf16.mxu1 %v17246_v15  ;;  %v17316_v15 = vld [vmem:[#allocation2 + $0xf8] ss:$112 sps:$4 sm:$0xff]  }
 0x23b   :  { %9850 = vmatpush1.bf16.msra.mxu0 %v17241_v14  ;;  %v17321_v14 = vld [vmem:[#allocation2 + $0x2f4] ss:$112 sps:$4 sm:$0xff]  }
 0x23c   :  { %9851 = vmatprep.subr.bf16.mxu0 %v17249_v16  ;;  %8858 = vmatpush1.bf16.msra.mxu1 %v17244_v17 }
 0x23d   :  { %8859 = vmatprep.subr.bf16.mxu1 %v17252_v20  ;;  %v17324_v20 = vld [vmem:[#allocation2 + $0x1dc] ss:$112 sps:$4 sm:$0xff]  }
 0x23f   :  { %9852 = vmatpush1.bf16.msra.mxu0 %v17247_v19  ;;  %v17319_v19 = vld [vmem:[#allocation2 + $0x2f0] ss:$112 sps:$4 sm:$0xff]  }
 0x240   :  { %9853 = vmatprep.subr.bf16.mxu0 %v17255_v21  ;;  %8860 = vmatpush1.bf16.msra.mxu1 %v17250_v22  ;;  %v17327_v22 = vld [vmem:[#allocation2 + $0x3d4] ss:$112 sps:$4 sm:$0xff]  }
 0x241   :  { %8861 = vmatprep.subr.bf16.mxu1 %v17258_v25  ;;  %v17322_v25 = vld [vmem:[#allocation2 + $0x1d8] ss:$112 sps:$4 sm:$0xff]  }
 0x243   :  { %9854 = vmatpush1.bf16.msra.mxu0 %v17253_v23 }
 0x244   :  { %9855 = vmatprep.subr.bf16.mxu0 %v17261_v27  ;;  %8862 = vmatpush1.bf16.msra.mxu1 %v17256_v30  ;;  %v17325_v27 = vld [vmem:[#allocation2 + $0x3d0] ss:$112 sps:$4 sm:$0xff]   ;;  %v17330_v30 = vld [vmem:[#allocation2 + $0x2bc] ss:$112 sps:$4 sm:$0xff]  }
 0x245   :  { %8863 = vmatprep.subr.bf16.mxu1 %v17264_v32  ;;  %v17328_v32 = vld [vmem:[#allocation2 + $0x2b8] ss:$112 sps:$4 sm:$0xff]  }
 0x247   :  { %9856 = vmatpush1.bf16.msra.mxu0 %v17259_v31  ;;  %v17333_v31 = vld [vmem:[#allocation2 + $0x4b4] ss:$112 sps:$4 sm:$0xff]  }
 0x248   :  { %9857 = vmatprep.subr.bf16.mxu0 %v17267_v33  ;;  %8864 = vmatpush1.bf16.msra.mxu1 %v17262_v34  ;;  %v17331_v33 = vld [vmem:[#allocation2 + $0x4b0] ss:$112 sps:$4 sm:$0xff]   ;;  %v17336_v34 = vld [vmem:[#allocation2 + $0x39c] ss:$112 sps:$4 sm:$0xff]  }
 0x249   :  { %8865 = vmatprep.subr.bf16.mxu1 %v17270_v37  ;;  %v17334_v37 = vld [vmem:[#allocation2 + $0x398] ss:$112 sps:$4 sm:$0xff]  }
 0x24b   :  { %9858 = vmatpush1.bf16.msra.mxu0 %v17265_v35  ;;  %v17339_v35 = vld [vmem:[#allocation2 + $0x594] ss:$112 sps:$4 sm:$0xff]  }
 0x24c   :  { %9859 = vmatprep.subr.bf16.mxu0 %v17273_v38  ;;  %8866 = vmatpush1.bf16.msra.mxu1 %v17268_v42  ;;  %v17337_v38 = vld [vmem:[#allocation2 + $0x590] ss:$112 sps:$4 sm:$0xff]   ;;  %v17342_v42 = vld [vmem:[#allocation2 + $0x47c] ss:$112 sps:$4 sm:$0xff]  }
 0x24d   :  { %8867 = vmatprep.subr.bf16.mxu1 %v17276_v45  ;;  %v17340_v45 = vld [vmem:[#allocation2 + $0x478] ss:$112 sps:$4 sm:$0xff]  }
 0x24f   :  { %9860 = vmatpush1.bf16.msra.mxu0 %v17271_v44  ;;  %v17345_v44 = vld [vmem:[#allocation2 + $0x674] ss:$112 sps:$4 sm:$0xff]  }
 0x250   :  { %9861 = vmatprep.subr.bf16.mxu0 %v17279_v46  ;;  %8868 = vmatpush1.bf16.msra.mxu1 %v17274_v47  ;;  %v17343_v46 = vld [vmem:[#allocation2 + $0x670] ss:$112 sps:$4 sm:$0xff]   ;;  %v17348_v47 = vld [vmem:[#allocation2 + $0x55c] ss:$112 sps:$4 sm:$0xff]  }
 0x251   :  { %8869 = vmatprep.subr.bf16.mxu1 %v17282_v49  ;;  %v17351_v49 = vld [vmem:[#allocation2 + $0x754] ss:$112 sps:$4 sm:$0xff]  }
 0x253   :  { %9862 = vmatpush1.bf16.msra.mxu0 %v17277_v48 }
 0x254   :  { %9863 = vmatprep.subr.bf16.mxu0 %v17285_v50  ;;  %8870 = vmatpush1.bf16.msra.mxu1 %v17280_v52  ;;  %v17346_v52 = vld [vmem:[#allocation2 + $0x558] ss:$112 sps:$4 sm:$0xff]  }
 0x255   :  { %8871 = vmatprep.subr.bf16.mxu1 %v17288_v54 }
 0x257   :  { %9864 = vmatpush1.bf16.msra.mxu0 %v17283_v53 }
 0x258   :  { %9874 = vmatprep.subr.bf16.mxu0 %v17297_v55  ;;  %8872 = vmatpush1.bf16.msra.mxu1 %v17286_v56  ;;  %v17349_v55 = vld [vmem:[#allocation2 + $0x750] ss:$112 sps:$4 sm:$0xff]   ;;  %v17354_v56 = vld [vmem:[#allocation2 + $0x63c] ss:$112 sps:$4 sm:$0xff]  }
 0x259   :  { %8873 = vmatprep.subr.bf16.mxu1 %v17291_v57  ;;  %v17357_v57 = vld [vmem:[#allocation2 + $0x834] ss:$112 sps:$4 sm:$0xff]  }
 0x25a   :  { %9866 = vmatmul.mubr.bf16.vlgmr.msra.gmra.mrb[12].mxu0 %v19287_v29 }
 0x25b   :  { %9875 = vmatpush1.bf16.msra.mxu0 %v17295_v58  ;;  %9906 = vmatprep.mubr.bf16.mxu0 %v19183_v0  ;;  %v17352_v58 = vld [vmem:[#allocation2 + $0x638] ss:$112 sps:$4 sm:$0xff]  }
 0x25c   :  { %10079 = vmatprep.subr.bf16.mxu0 %v17303_v59  ;;  %8874 = vmatpush1.bf16.msra.mxu1 %v17289_v60  ;;  %v17355_v59 = vld [vmem:[#allocation2 + $0x830] ss:$112 sps:$4 sm:$0xff]   ;;  %v17360_v60 = vld [vmem:[#allocation2 + $0x71c] ss:$112 sps:$4 sm:$0xff]  }
 0x25d   :  { %8875 = vmatprep.subr.bf16.mxu1 %v17294_v61  ;;  %v17363_v61 = vld [vmem:[#allocation2 + $0x914] ss:$112 sps:$4 sm:$0xff]  }
 0x260   :  { %8876 = vmatpush1.bf16.msra.mxu1 %v17292_v62  ;;  %v17358_v62 = vld [vmem:[#allocation2 + $0x718] ss:$112 sps:$4 sm:$0xff]  }
 0x261   :  { %8877 = vmatprep.subr.bf16.mxu1 %v17300_v63  ;;  %v17361_v63 = vld [vmem:[#allocation2 + $0x910] ss:$112 sps:$4 sm:$0xff]  }
 0x264   :  { %8878 = vmatpush1.bf16.msra.mxu1 %v17298_v1  ;;  %v17366_v1 = vld [vmem:[#allocation2 + $0x7fc] ss:$112 sps:$4 sm:$0xff]  }
 0x265   :  { %8879 = vmatprep.subr.bf16.mxu1 %v17306_v3  ;;  %v17364_v3 = vld [vmem:[#allocation2 + $0x7f8] ss:$112 sps:$4 sm:$0xff]  }
 0x266   :  { %15650 = vmatmul.mubr.msk.bf16.vlgmr.msra.gmra.mrb[12].mxu0 %vm8435_vm0, %v19245_v10 }
 0x267   :  { %10080 = vmatpush1.bf16.msra.mxu0 %v17301_v2  ;;  %10111 = vmatprep.mubr.bf16.mxu0 %v19252_v51  ;;  %v17369_v2 = vld [vmem:[#allocation2 + $0x9f4] ss:$112 sps:$4 sm:$0xff]  }
 0x268   :  { %10081 = vmatprep.subr.bf16.mxu0 %v17309_v4  ;;  %8880 = vmatpush1.bf16.msra.mxu1 %v17304_v5  ;;  %v17367_v4 = vld [vmem:[#allocation2 + $0x9f0] ss:$112 sps:$4 sm:$0xff]   ;;  %v17372_v5 = vld [vmem:[#allocation2 + $0x8dc] ss:$112 sps:$4 sm:$0xff]  }
 0x269   :  { %8931 = vmatprep.subr.bf16.mxu1 %v17312_v7  ;;  %v17370_v7 = vld [vmem:[#allocation2 + $0x8d8] ss:$112 sps:$4 sm:$0xff]  }
 0x26b   :  { %10082 = vmatpush1.bf16.msra.mxu0 %v17307_v6  ;;  %8882 = vmatmul.mubr.bf16.vlgmr.msra.gmra.mrb[8].mxu1 %v19287_v29  ;;  %v17375_v6 = vld [vmem:[#allocation2 + $0xad4] ss:$112 sps:$4 sm:$0xff]  }
 0x26c   :  { %10083 = vmatprep.subr.bf16.mxu0 %v17315_v8  ;;  %8932 = vmatpush1.bf16.msra.mxu1 %v17310_v11  ;;  %v17373_v8 = vld [vmem:[#allocation2 + $0xad0] ss:$112 sps:$4 sm:$0xff]   ;;  %v17378_v11 = vld [vmem:[#allocation2 + $0x9bc] ss:$112 sps:$4 sm:$0xff]  }
 0x26d   :  { %v19337_v16 = vpop.f32.mrb[8].mxu0  ;;  %8963 = vmatprep.mubr.bf16.mxu1 %v19252_v51  ;;  %8933 = vmatprep.subr.bf16.mxu1 %v17318_v13  ;;  %v17376_v13 = vld [vmem:[#allocation2 + $0x9b8] ss:$112 sps:$4 sm:$0xff]  }
 0x26e   :  { %v19339_v17 = vpop.f32.mrb[9].mxu0 }
 0x26f   :  { %10084 = vmatpush1.bf16.msra.mxu0 %v17313_v12  ;;  %v9543_v21 = vpop.f32.mrb[10].mxu0  ;;  %v17381_v12 = vld [vmem:[#allocation2 + $0xbb4] ss:$112 sps:$4 sm:$0xff]  }
 0x270   :  { %10085 = vmatprep.subr.bf16.mxu0 %v17321_v14  ;;  %v9544_v23 = vpop.f32.mrb[11].mxu0  ;;  %8934 = vmatpush1.bf16.msra.mxu1 %v17316_v15  ;;  %v17379_v14 = vld [vmem:[#allocation2 + $0xbb0] ss:$112 sps:$4 sm:$0xff]   ;;  %v17384_v15 = vld [vmem:[#allocation2 + $0xa9c] ss:$112 sps:$4 sm:$0xff]  }
 0x271   :  { %8935 = vmatprep.subr.bf16.mxu1 %v17324_v20  ;;  %v17382_v20 = vld [vmem:[#allocation2 + $0xa98] ss:$112 sps:$4 sm:$0xff]   ;;  %v17385_v21 = vld [vmem:[#allocation2 + $0xc90] ss:$112 sps:$4 sm:$0xff]   ;;  %v17393_v23 = vld [vmem:[#allocation2 + $0xd74] ss:$112 sps:$4 sm:$0xff]  }
 0x273   :  { %10086 = vmatpush1.bf16.msra.mxu0 %v17319_v19  ;;  %v17387_v19 = vld [vmem:[#allocation2 + $0xc94] ss:$112 sps:$4 sm:$0xff]  }
 0x274   :  { %10087 = vmatprep.subr.bf16.mxu0 %v17327_v22  ;;  %8936 = vmatpush1.bf16.msra.mxu1 %v17322_v25  ;;  %v17390_v22 = vld [vmem:[#allocation2 + $0xb7c] ss:$112 sps:$4 sm:$0xff]   ;;  %v17388_v25 = vld [vmem:[#allocation2 + $0xb78] ss:$112 sps:$4 sm:$0xff]  }
 0x275   :  { %8937 = vmatprep.subr.bf16.mxu1 %v17330_v30  ;;  %v17396_v30 = vld [vmem:[#allocation2 + $0xc5c] ss:$112 sps:$4 sm:$0xff]  }
 0x277   :  { %10088 = vmatpush1.bf16.msra.mxu0 %v17325_v27  ;;  %v17391_v27 = vld [vmem:[#allocation2 + $0xd70] ss:$112 sps:$4 sm:$0xff]  }
 0x278   :  { %10089 = vmatprep.subr.bf16.mxu0 %v17333_v31  ;;  %8938 = vmatpush1.bf16.msra.mxu1 %v17328_v32  ;;  %v17394_v31 = vld [vmem:[#allocation2 + $0xc58] ss:$112 sps:$4 sm:$0xff]   ;;  %v17399_v32 = vld [vmem:[#allocation2 + $0xe54] ss:$112 sps:$4 sm:$0xff]  }
 0x279   :  { %8939 = vmatprep.subr.bf16.mxu1 %v17336_v34  ;;  %v17402_v34 = vld [vmem:[#allocation2 + $0xd3c] ss:$112 sps:$4 sm:$0xff]  }
 0x27b   :  { %10090 = vmatpush1.bf16.msra.mxu0 %v17331_v33  ;;  %v17397_v33 = vld [vmem:[#allocation2 + $0xe50] ss:$112 sps:$4 sm:$0xff]  }
 0x27c   :  { %10091 = vmatprep.subr.bf16.mxu0 %v17339_v35  ;;  %8940 = vmatpush1.bf16.msra.mxu1 %v17334_v37  ;;  %v17405_v35 = vld [vmem:[#allocation2 + $0xf34] ss:$112 sps:$4 sm:$0xff]   ;;  %v17400_v37 = vld [vmem:[#allocation2 + $0xd38] ss:$112 sps:$4 sm:$0xff]  }
 0x27d   :  { %8941 = vmatprep.subr.bf16.mxu1 %v17342_v42  ;;  %v17408_v42 = vld [vmem:[#allocation2 + $0xe1c] ss:$112 sps:$4 sm:$0xff]  }
 0x27e   :  { %v19342_v48 = vpop.f32.mrb[4].mxu1 }
 0x27f   :  { %10092 = vmatpush1.bf16.msra.mxu0 %v17337_v38  ;;  %v19344_v50 = vpop.f32.mrb[5].mxu1  ;;  %v17403_v38 = vld [vmem:[#allocation2 + $0xf30] ss:$112 sps:$4 sm:$0xff]  }
 0x280   :  { %10093 = vmatprep.subr.bf16.mxu0 %v17345_v44  ;;  %8942 = vmatpush1.bf16.msra.mxu1 %v17340_v45  ;;  %v8764_v53 = vpop.f32.mrb[6].mxu1  ;;  %v17411_v44 = vld [vmem:[#allocation2 + $0x1014] ss:$112 sps:$4 sm:$0xff]   ;;  %v17406_v45 = vld [vmem:[#allocation2 + $0xe18] ss:$112 sps:$4 sm:$0xff]  }
 0x281   :  { %v8765_v54 = vpop.f32.mrb[7].mxu1  ;;  %8943 = vmatprep.subr.bf16.mxu1 %v17348_v47  ;;  %v17414_v47 = vld [vmem:[#allocation2 + $0xefc] ss:$112 sps:$4 sm:$0xff]   ;;  %v17415_v53 = vld [vmem:[#allocation2 + $0x10f0] ss:$112 sps:$4 sm:$0xff]  }
 0x282   :  { %v17420_v54 = vld [vmem:[#allocation2 + $0xfdc] ss:$112 sps:$4 sm:$0xff]  }
 0x283   :  { %10094 = vmatpush1.bf16.msra.mxu0 %v17343_v46  ;;  %v17409_v46 = vld [vmem:[#allocation2 + $0x1010] ss:$112 sps:$4 sm:$0xff]  }
 0x284   :  { %10095 = vmatprep.subr.bf16.mxu0 %v17351_v49  ;;  %8944 = vmatpush1.bf16.msra.mxu1 %v17346_v52  ;;  %v17417_v49 = vld [vmem:[#allocation2 + $0x10f4] ss:$112 sps:$4 sm:$0xff]   ;;  %v17412_v52 = vld [vmem:[#allocation2 + $0xef8] ss:$112 sps:$4 sm:$0xff]  }
 0x285   :  { %8945 = vmatprep.subr.bf16.mxu1 %v17354_v56  ;;  %v17418_v56 = vld [vmem:[#allocation2 + $0xfd8] ss:$112 sps:$4 sm:$0xff]  }
 0x287   :  { %10096 = vmatpush1.bf16.msra.mxu0 %v17349_v55  ;;  %v17423_v55 = vld [vmem:[#allocation2 + $0x11d4] ss:$112 sps:$4 sm:$0xff]  }
 0x288   :  { %10097 = vmatprep.subr.bf16.mxu0 %v17357_v57  ;;  %8946 = vmatpush1.bf16.msra.mxu1 %v17352_v58  ;;  %v17421_v57 = vld [vmem:[#allocation2 + $0x11d0] ss:$112 sps:$4 sm:$0xff]   ;;  %v17426_v58 = vld [vmem:[#allocation2 + $0x10bc] ss:$112 sps:$4 sm:$0xff]  }
 0x289   :  { %8947 = vmatprep.subr.bf16.mxu1 %v17360_v60  ;;  %v17424_v60 = vld [vmem:[#allocation2 + $0x10b8] ss:$112 sps:$4 sm:$0xff]  }
 0x28b   :  { %10098 = vmatpush1.bf16.msra.mxu0 %v17355_v59  ;;  %v17429_v59 = vld [vmem:[#allocation2 + $0x12b4] ss:$112 sps:$4 sm:$0xff]  }
 0x28c   :  { %10099 = vmatprep.subr.bf16.mxu0 %v17363_v61  ;;  %8948 = vmatpush1.bf16.msra.mxu1 %v17358_v62  ;;  %v17427_v61 = vld [vmem:[#allocation2 + $0x12b0] ss:$112 sps:$4 sm:$0xff]   ;;  %v17432_v62 = vld [vmem:[#allocation2 + $0x119c] ss:$112 sps:$4 sm:$0xff]  }
 0x28d   :  { %8949 = vmatprep.subr.bf16.mxu1 %v17366_v1  ;;  %v17430_v1 = vld [vmem:[#allocation2 + $0x1198] ss:$112 sps:$4 sm:$0xff]  }
 0x28f   :  { %10100 = vmatpush1.bf16.msra.mxu0 %v17361_v63  ;;  %v17435_v63 = vld [vmem:[#allocation2 + $0x1394] ss:$112 sps:$4 sm:$0xff]  }
 0x290   :  { %10101 = vmatprep.subr.bf16.mxu0 %v17369_v2  ;;  %8950 = vmatpush1.bf16.msra.mxu1 %v17364_v3  ;;  %v17433_v2 = vld [vmem:[#allocation2 + $0x1390] ss:$112 sps:$4 sm:$0xff]   ;;  %v17438_v3 = vld [vmem:[#allocation2 + $0x127c] ss:$112 sps:$4 sm:$0xff]  }
 0x291   :  { %8951 = vmatprep.subr.bf16.mxu1 %v17372_v5  ;;  %v17436_v5 = vld [vmem:[#allocation2 + $0x1278] ss:$112 sps:$4 sm:$0xff]  }
 0x293   :  { %10102 = vmatpush1.bf16.msra.mxu0 %v17367_v4  ;;  %v17441_v4 = vld [vmem:[#allocation2 + $0x1474] ss:$112 sps:$4 sm:$0xff]  }
 0x294   :  { %10103 = vmatprep.subr.bf16.mxu0 %v17375_v6  ;;  %8952 = vmatpush1.bf16.msra.mxu1 %v17370_v7  ;;  %v17439_v6 = vld [vmem:[#allocation2 + $0x1470] ss:$112 sps:$4 sm:$0xff]   ;;  %v17444_v7 = vld [vmem:[#allocation2 + $0x135c] ss:$112 sps:$4 sm:$0xff]  }
 0x295   :  { %8953 = vmatprep.subr.bf16.mxu1 %v17378_v11  ;;  %v17447_v11 = vld [vmem:[#allocation2 + $0x1554] ss:$112 sps:$4 sm:$0xff]  }
 0x297   :  { %10104 = vmatpush1.bf16.msra.mxu0 %v17373_v8  ;;  %v17442_v8 = vld [vmem:[#allocation2 + $0x1358] ss:$112 sps:$4 sm:$0xff]  }
 0x298   :  { %10105 = vmatprep.subr.bf16.mxu0 %v17381_v12  ;;  %8954 = vmatpush1.bf16.msra.mxu1 %v17376_v13  ;;  %v17445_v12 = vld [vmem:[#allocation2 + $0x1550] ss:$112 sps:$4 sm:$0xff]   ;;  %v17450_v13 = vld [vmem:[#allocation2 + $0x143c] ss:$112 sps:$4 sm:$0xff]  }
 0x299   :  { %8955 = vmatprep.subr.bf16.mxu1 %v17384_v15  ;;  %v17453_v15 = vld [vmem:[#allocation2 + $0x1634] ss:$112 sps:$4 sm:$0xff]  }
 0x29b   :  { %10106 = vmatpush1.bf16.msra.mxu0 %v17379_v14  ;;  %v17448_v14 = vld [vmem:[#allocation2 + $0x1438] ss:$112 sps:$4 sm:$0xff]  }
 0x29c   :  { %10107 = vmatprep.subr.bf16.mxu0 %v17387_v19  ;;  %8956 = vmatpush1.bf16.msra.mxu1 %v17382_v20  ;;  %v17451_v19 = vld [vmem:[#allocation2 + $0x1630] ss:$112 sps:$4 sm:$0xff]   ;;  %v17456_v20 = vld [vmem:[#allocation2 + $0x151c] ss:$112 sps:$4 sm:$0xff]  }
 0x29d   :  { %8957 = vmatprep.subr.bf16.mxu1 %v17390_v22  ;;  %v17454_v22 = vld [vmem:[#allocation2 + $0x1518] ss:$112 sps:$4 sm:$0xff]  }
 0x29f   :  { %10108 = vmatpush1.bf16.msra.mxu0 %v17385_v21  ;;  %v17459_v21 = vld [vmem:[#allocation2 + $0x1714] ss:$112 sps:$4 sm:$0xff]  }
 0x2a0   :  { %10109 = vmatprep.subr.bf16.mxu0 %v17393_v23  ;;  %8958 = vmatpush1.bf16.msra.mxu1 %v17388_v25  ;;  %v17457_v23 = vld [vmem:[#allocation2 + $0x1710] ss:$112 sps:$4 sm:$0xff]   ;;  %v17462_v25 = vld [vmem:[#allocation2 + $0x15fc] ss:$112 sps:$4 sm:$0xff]  }
 0x2a1   :  { %8959 = vmatprep.subr.bf16.mxu1 %v17396_v30  ;;  %v17460_v30 = vld [vmem:[#allocation2 + $0x15f8] ss:$112 sps:$4 sm:$0xff]  }
 0x2a3   :  { %10110 = vmatpush1.bf16.msra.mxu0 %v17391_v27  ;;  %v17465_v27 = vld [vmem:[#allocation2 + $0x17f4] ss:$112 sps:$4 sm:$0xff]  }
 0x2a4   :  { %10120 = vmatprep.subr.bf16.mxu0 %v17399_v32  ;;  %8960 = vmatpush1.bf16.msra.mxu1 %v17394_v31  ;;  %v17463_v31 = vld [vmem:[#allocation2 + $0x17f0] ss:$112 sps:$4 sm:$0xff]   ;;  %v17468_v32 = vld [vmem:[#allocation2 + $0x16dc] ss:$112 sps:$4 sm:$0xff]  }
 0x2a5   :  { %8961 = vmatprep.subr.bf16.mxu1 %v17402_v34  ;;  %v17466_v34 = vld [vmem:[#allocation2 + $0x16d8] ss:$112 sps:$4 sm:$0xff]  }
 0x2a6   :  { %10112 = vmatmul.mubr.bf16.vlgmr.msra.gmra.mrb[16].mxu0 %v19259_v9 }
 0x2a7   :  { %10121 = vmatpush1.bf16.msra.mxu0 %v17397_v33  ;;  %10152 = vmatprep.mubr.bf16.mxu0 %v19266_v36  ;;  %v17471_v33 = vld [vmem:[#allocation2 + $0x18d4] ss:$112 sps:$4 sm:$0xff]  }
 0x2a8   :  { %10122 = vmatprep.subr.bf16.mxu0 %v17405_v35  ;;  %8962 = vmatpush1.bf16.msra.mxu1 %v17400_v37  ;;  %v17469_v35 = vld [vmem:[#allocation2 + $0x18d0] ss:$112 sps:$4 sm:$0xff]   ;;  %v17474_v37 = vld [vmem:[#allocation2 + $0x17bc] ss:$112 sps:$4 sm:$0xff]  }
 0x2a9   :  { %8972 = vmatprep.subr.bf16.mxu1 %v17408_v42  ;;  %v17472_v42 = vld [vmem:[#allocation2 + $0x17b8] ss:$112 sps:$4 sm:$0xff]  }
 0x2ab   :  { %10123 = vmatpush1.bf16.msra.mxu0 %v17403_v38  ;;  %8964 = vmatmul.mubr.bf16.vlgmr.msra.gmra.mrb[12].mxu1 %v19259_v9  ;;  %v17477_v38 = vld [vmem:[#allocation2 + $0x19b4] ss:$112 sps:$4 sm:$0xff]  }
 0x2ac   :  { %10124 = vmatprep.subr.bf16.mxu0 %v17411_v44  ;;  %8973 = vmatpush1.bf16.msra.mxu1 %v17406_v45  ;;  %v17475_v44 = vld [vmem:[#allocation2 + $0x19b0] ss:$112 sps:$4 sm:$0xff]   ;;  %v17480_v45 = vld [vmem:[#allocation2 + $0x189c] ss:$112 sps:$4 sm:$0xff]  }
 0x2ad   :  { %9004 = vmatprep.mubr.bf16.mxu1 %v19266_v36  ;;  %8974 = vmatprep.subr.bf16.mxu1 %v17414_v47  ;;  %v17478_v47 = vld [vmem:[#allocation2 + $0x1898] ss:$112 sps:$4 sm:$0xff]  }
 0x2af   :  { %10125 = vmatpush1.bf16.msra.mxu0 %v17409_v46  ;;  %v17483_v46 = vld [vmem:[#allocation2 + $0x1a94] ss:$112 sps:$4 sm:$0xff]  }
 0x2b0   :  { %10126 = vmatprep.subr.bf16.mxu0 %v17417_v49  ;;  %8975 = vmatpush1.bf16.msra.mxu1 %v17412_v52  ;;  %v17481_v49 = vld [vmem:[#allocation2 + $0x1a90] ss:$112 sps:$4 sm:$0xff]   ;;  %v17486_v52 = vld [vmem:[#allocation2 + $0x197c] ss:$112 sps:$4 sm:$0xff]  }
 0x2b1   :  { %8976 = vmatprep.subr.bf16.mxu1 %v17420_v54  ;;  %v17484_v54 = vld [vmem:[#allocation2 + $0x1978] ss:$112 sps:$4 sm:$0xff]  }
 0x2b3   :  { %10127 = vmatpush1.bf16.msra.mxu0 %v17415_v53  ;;  %v17489_v53 = vld [vmem:[#allocation2 + $0x1b74] ss:$112 sps:$4 sm:$0xff]  }
 0x2b4   :  { %10128 = vmatprep.subr.bf16.mxu0 %v17423_v55  ;;  %8977 = vmatpush1.bf16.msra.mxu1 %v17418_v56  ;;  %v17487_v55 = vld [vmem:[#allocation2 + $0x1b70] ss:$112 sps:$4 sm:$0xff]   ;;  %v17492_v56 = vld [vmem:[#allocation2 + $0x1a5c] ss:$112 sps:$4 sm:$0xff]  }
 0x2b5   :  { %8978 = vmatprep.subr.bf16.mxu1 %v17426_v58  ;;  %v17490_v58 = vld [vmem:[#allocation2 + $0x1a58] ss:$112 sps:$4 sm:$0xff]  }
 0x2b7   :  { %10129 = vmatpush1.bf16.msra.mxu0 %v17421_v57  ;;  %v17495_v57 = vld [vmem:[#allocation2 + $0x1c54] ss:$112 sps:$4 sm:$0xff]  }
 0x2b8   :  { %10130 = vmatprep.subr.bf16.mxu0 %v17429_v59  ;;  %8979 = vmatpush1.bf16.msra.mxu1 %v17424_v60  ;;  %v17493_v59 = vld [vmem:[#allocation2 + $0x1c50] ss:$112 sps:$4 sm:$0xff]   ;;  %v17498_v60 = vld [vmem:[#allocation2 + $0x1b3c] ss:$112 sps:$4 sm:$0xff]  }
 0x2b9   :  { %8980 = vmatprep.subr.bf16.mxu1 %v17432_v62  ;;  %v17496_v62 = vld [vmem:[#allocation2 + $0x1b38] ss:$112 sps:$4 sm:$0xff]  }
 0x2bb   :  { %10131 = vmatpush1.bf16.msra.mxu0 %v17427_v61  ;;  %v17501_v61 = vld [vmem:[#allocation2 + $0x1d34] ss:$112 sps:$4 sm:$0xff]  }
 0x2bc   :  { %10132 = vmatprep.subr.bf16.mxu0 %v17435_v63  ;;  %8981 = vmatpush1.bf16.msra.mxu1 %v17430_v1  ;;  %v17499_v63 = vld [vmem:[#allocation2 + $0x1d30] ss:$112 sps:$4 sm:$0xff]   ;;  %v17504_v1 = vld [vmem:[#allocation2 + $0x1c1c] ss:$112 sps:$4 sm:$0xff]  }
 0x2bd   :  { %8982 = vmatprep.subr.bf16.mxu1 %v17438_v3  ;;  %v17502_v3 = vld [vmem:[#allocation2 + $0x1c18] ss:$112 sps:$4 sm:$0xff]  }
 0x2bf   :  { %10133 = vmatpush1.bf16.msra.mxu0 %v17433_v2  ;;  %v17507_v2 = vld [vmem:[#allocation2 + $0x1e14] ss:$112 sps:$4 sm:$0xff]  }
 0x2c0   :  { %10134 = vmatprep.subr.bf16.mxu0 %v17441_v4  ;;  %8983 = vmatpush1.bf16.msra.mxu1 %v17436_v5  ;;  %v17505_v4 = vld [vmem:[#allocation2 + $0x1e10] ss:$112 sps:$4 sm:$0xff]   ;;  %v17510_v5 = vld [vmem:[#allocation2 + $0x1cfc] ss:$112 sps:$4 sm:$0xff]  }
 0x2c1   :  { %8984 = vmatprep.subr.bf16.mxu1 %v17444_v7  ;;  %v17508_v7 = vld [vmem:[#allocation2 + $0x1cf8] ss:$112 sps:$4 sm:$0xff]  }
 0x2c3   :  { %10135 = vmatpush1.bf16.msra.mxu0 %v17439_v6  ;;  %v17513_v6 = vld [vmem:[#allocation2 + $0x1ef4] ss:$112 sps:$4 sm:$0xff]  }
 0x2c4   :  { %10136 = vmatprep.subr.bf16.mxu0 %v17447_v11  ;;  %8985 = vmatpush1.bf16.msra.mxu1 %v17442_v8  ;;  %v17511_v8 = vld [vmem:[#allocation2 + $0x1ef0] ss:$112 sps:$4 sm:$0xff]   ;;  %v17516_v11 = vld [vmem:[#allocation2 + $0x1ddc] ss:$112 sps:$4 sm:$0xff]  }
 0x2c5   :  { %8986 = vmatprep.subr.bf16.mxu1 %v17450_v13  ;;  %v17514_v13 = vld [vmem:[#allocation2 + $0x1dd8] ss:$112 sps:$4 sm:$0xff]  }
 0x2c7   :  { %10137 = vmatpush1.bf16.msra.mxu0 %v17445_v12  ;;  %v17519_v12 = vld [vmem:[#allocation2 + $0x1fd4] ss:$112 sps:$4 sm:$0xff]  }
 0x2c8   :  { %10138 = vmatprep.subr.bf16.mxu0 %v17453_v15  ;;  %8987 = vmatpush1.bf16.msra.mxu1 %v17448_v14  ;;  %v17517_v14 = vld [vmem:[#allocation2 + $0x1fd0] ss:$112 sps:$4 sm:$0xff]   ;;  %v17522_v15 = vld [vmem:[#allocation2 + $0x1ebc] ss:$112 sps:$4 sm:$0xff]  }
 0x2c9   :  { %8988 = vmatprep.subr.bf16.mxu1 %v17456_v20  ;;  %v17520_v20 = vld [vmem:[#allocation2 + $0x1eb8] ss:$112 sps:$4 sm:$0xff]  }
 0x2cb   :  { %10139 = vmatpush1.bf16.msra.mxu0 %v17451_v19  ;;  %v17525_v19 = vld [vmem:[#allocation2 + $0x20b4] ss:$112 sps:$4 sm:$0xff]  }
 0x2cc   :  { %10140 = vmatprep.subr.bf16.mxu0 %v17459_v21  ;;  %8989 = vmatpush1.bf16.msra.mxu1 %v17454_v22  ;;  %v17523_v21 = vld [vmem:[#allocation2 + $0x20b0] ss:$112 sps:$4 sm:$0xff]   ;;  %v17528_v22 = vld [vmem:[#allocation2 + $0x1f9c] ss:$112 sps:$4 sm:$0xff]  }
 0x2cd   :  { %8990 = vmatprep.subr.bf16.mxu1 %v17462_v25  ;;  %v17526_v25 = vld [vmem:[#allocation2 + $0x1f98] ss:$112 sps:$4 sm:$0xff]  }
 0x2cf   :  { %10141 = vmatpush1.bf16.msra.mxu0 %v17457_v23  ;;  %v17531_v23 = vld [vmem:[#allocation2 + $0x2194] ss:$112 sps:$4 sm:$0xff]  }
 0x2d0   :  { %10142 = vmatprep.subr.bf16.mxu0 %v17465_v27  ;;  %8991 = vmatpush1.bf16.msra.mxu1 %v17460_v30  ;;  %v17529_v27 = vld [vmem:[#allocation2 + $0x2190] ss:$112 sps:$4 sm:$0xff]   ;;  %v17534_v30 = vld [vmem:[#allocation2 + $0x207c] ss:$112 sps:$4 sm:$0xff]  }
 0x2d1   :  { %8992 = vmatprep.subr.bf16.mxu1 %v17468_v32  ;;  %v17532_v32 = vld [vmem:[#allocation2 + $0x2078] ss:$112 sps:$4 sm:$0xff]  }
 0x2d3   :  { %10143 = vmatpush1.bf16.msra.mxu0 %v17463_v31  ;;  %v17537_v31 = vld [vmem:[#allocation2 + $0x2274] ss:$112 sps:$4 sm:$0xff]  }
 0x2d4   :  { %10144 = vmatprep.subr.bf16.mxu0 %v17471_v33  ;;  %8993 = vmatpush1.bf16.msra.mxu1 %v17466_v34  ;;  %v17535_v33 = vld [vmem:[#allocation2 + $0x2270] ss:$112 sps:$4 sm:$0xff]   ;;  %v17540_v34 = vld [vmem:[#allocation2 + $0x215c] ss:$112 sps:$4 sm:$0xff]  }
 0x2d5   :  { %8994 = vmatprep.subr.bf16.mxu1 %v17474_v37  ;;  %v17538_v37 = vld [vmem:[#allocation2 + $0x2158] ss:$112 sps:$4 sm:$0xff]  }
 0x2d7   :  { %10145 = vmatpush1.bf16.msra.mxu0 %v17469_v35  ;;  %v17543_v35 = vld [vmem:[#allocation2 + $0x2354] ss:$112 sps:$4 sm:$0xff]  }
 0x2d8   :  { %10146 = vmatprep.subr.bf16.mxu0 %v17477_v38  ;;  %8995 = vmatpush1.bf16.msra.mxu1 %v17472_v42  ;;  %v17541_v38 = vld [vmem:[#allocation2 + $0x2350] ss:$112 sps:$4 sm:$0xff]   ;;  %v17546_v42 = vld [vmem:[#allocation2 + $0x223c] ss:$112 sps:$4 sm:$0xff]  }
 0x2d9   :  { %8996 = vmatprep.subr.bf16.mxu1 %v17480_v45  ;;  %v17544_v45 = vld [vmem:[#allocation2 + $0x2238] ss:$112 sps:$4 sm:$0xff]  }
 0x2db   :  { %10147 = vmatpush1.bf16.msra.mxu0 %v17475_v44  ;;  %v17549_v44 = vld [vmem:[#allocation2 + $0x2434] ss:$112 sps:$4 sm:$0xff]  }
 0x2dc   :  { %10148 = vmatprep.subr.bf16.mxu0 %v17483_v46  ;;  %8997 = vmatpush1.bf16.msra.mxu1 %v17478_v47  ;;  %v17547_v46 = vld [vmem:[#allocation2 + $0x2430] ss:$112 sps:$4 sm:$0xff]   ;;  %v17552_v47 = vld [vmem:[#allocation2 + $0x231c] ss:$112 sps:$4 sm:$0xff]  }
 0x2dd   :  { %8998 = vmatprep.subr.bf16.mxu1 %v17486_v52  ;;  %v17550_v52 = vld [vmem:[#allocation2 + $0x2318] ss:$112 sps:$4 sm:$0xff]  }
 0x2df   :  { %10149 = vmatpush1.bf16.msra.mxu0 %v17481_v49  ;;  %v17555_v49 = vld [vmem:[#allocation2 + $0x2514] ss:$112 sps:$4 sm:$0xff]  }
 0x2e0   :  { %10150 = vmatprep.subr.bf16.mxu0 %v17489_v53  ;;  %8999 = vmatpush1.bf16.msra.mxu1 %v17484_v54  ;;  %v17553_v53 = vld [vmem:[#allocation2 + $0x2510] ss:$112 sps:$4 sm:$0xff]   ;;  %v17558_v54 = vld [vmem:[#allocation2 + $0x23fc] ss:$112 sps:$4 sm:$0xff]  }
 0x2e1   :  { %9000 = vmatprep.subr.bf16.mxu1 %v17492_v56  ;;  %v17556_v56 = vld [vmem:[#allocation2 + $0x23f8] ss:$112 sps:$4 sm:$0xff]  }
 0x2e3   :  { %10151 = vmatpush1.bf16.msra.mxu0 %v17487_v55  ;;  %v17561_v55 = vld [vmem:[#allocation2 + $0x25f4] ss:$112 sps:$4 sm:$0xff]  }
 0x2e4   :  { %10161 = vmatprep.subr.bf16.mxu0 %v17495_v57  ;;  %9001 = vmatpush1.bf16.msra.mxu1 %v17490_v58  ;;  %v17559_v57 = vld [vmem:[#allocation2 + $0x25f0] ss:$112 sps:$4 sm:$0xff]   ;;  %v17564_v58 = vld [vmem:[#allocation2 + $0x24dc] ss:$112 sps:$4 sm:$0xff]  }
 0x2e5   :  { %9002 = vmatprep.subr.bf16.mxu1 %v17498_v60  ;;  %v17562_v60 = vld [vmem:[#allocation2 + $0x24d8] ss:$112 sps:$4 sm:$0xff]  }
 0x2e6   :  { %10153 = vmatmul.mubr.bf16.vlgmr.msra.gmra.mrb[16].mxu0 %v19273_v18 }
 0x2e7   :  { %10162 = vmatpush1.bf16.msra.mxu0 %v17493_v59  ;;  %10193 = vmatprep.mubr.bf16.mxu0 %v19278_v24  ;;  %v17567_v59 = vld [vmem:[#allocation2 + $0x26d4] ss:$112 sps:$4 sm:$0xff]  }
 0x2e8   :  { %10163 = vmatprep.subr.bf16.mxu0 %v17501_v61  ;;  %9003 = vmatpush1.bf16.msra.mxu1 %v17496_v62  ;;  %v17565_v61 = vld [vmem:[#allocation2 + $0x26d0] ss:$112 sps:$4 sm:$0xff]   ;;  %v17570_v62 = vld [vmem:[#allocation2 + $0x25bc] ss:$112 sps:$4 sm:$0xff]  }
 0x2e9   :  { %9013 = vmatprep.subr.bf16.mxu1 %v17504_v1  ;;  %v17568_v1 = vld [vmem:[#allocation2 + $0x25b8] ss:$112 sps:$4 sm:$0xff]  }
 0x2eb   :  { %10164 = vmatpush1.bf16.msra.mxu0 %v17499_v63  ;;  %9005 = vmatmul.mubr.bf16.vlgmr.msra.gmra.mrb[12].mxu1 %v19273_v18  ;;  %v17573_v63 = vld [vmem:[#allocation2 + $0x27b4] ss:$112 sps:$4 sm:$0xff]  }
 0x2ec   :  { %10165 = vmatprep.subr.bf16.mxu0 %v17507_v2  ;;  %9014 = vmatpush1.bf16.msra.mxu1 %v17502_v3  ;;  %v17571_v2 = vld [vmem:[#allocation2 + $0x27b0] ss:$112 sps:$4 sm:$0xff]   ;;  %v17576_v3 = vld [vmem:[#allocation2 + $0x269c] ss:$112 sps:$4 sm:$0xff]  }
 0x2ed   :  { %9045 = vmatprep.mubr.bf16.mxu1 %v19278_v24  ;;  %9015 = vmatprep.subr.bf16.mxu1 %v17510_v5  ;;  %v17574_v5 = vld [vmem:[#allocation2 + $0x2698] ss:$112 sps:$4 sm:$0xff]  }
 0x2ef   :  { %10166 = vmatpush1.bf16.msra.mxu0 %v17505_v4  ;;  %v17579_v4 = vld [vmem:[#allocation2 + $0x2894] ss:$112 sps:$4 sm:$0xff]  }
 0x2f0   :  { %10167 = vmatprep.subr.bf16.mxu0 %v17513_v6  ;;  %9016 = vmatpush1.bf16.msra.mxu1 %v17508_v7  ;;  %v17577_v6 = vld [vmem:[#allocation2 + $0x2890] ss:$112 sps:$4 sm:$0xff]   ;;  %v17582_v7 = vld [vmem:[#allocation2 + $0x277c] ss:$112 sps:$4 sm:$0xff]  }
 0x2f1   :  { %9017 = vmatprep.subr.bf16.mxu1 %v17516_v11  ;;  %v17580_v11 = vld [vmem:[#allocation2 + $0x2778] ss:$112 sps:$4 sm:$0xff]  }
 0x2f3   :  { %10168 = vmatpush1.bf16.msra.mxu0 %v17511_v8  ;;  %v17585_v8 = vld [vmem:[#allocation2 + $0x2974] ss:$112 sps:$4 sm:$0xff]  }
 0x2f4   :  { %10169 = vmatprep.subr.bf16.mxu0 %v17519_v12  ;;  %9018 = vmatpush1.bf16.msra.mxu1 %v17514_v13  ;;  %v17583_v12 = vld [vmem:[#allocation2 + $0x2970] ss:$112 sps:$4 sm:$0xff]   ;;  %v17588_v13 = vld [vmem:[#allocation2 + $0x285c] ss:$112 sps:$4 sm:$0xff]  }
 0x2f5   :  { %9019 = vmatprep.subr.bf16.mxu1 %v17522_v15  ;;  %v17586_v15 = vld [vmem:[#allocation2 + $0x2858] ss:$112 sps:$4 sm:$0xff]  }
 0x2f7   :  { %10170 = vmatpush1.bf16.msra.mxu0 %v17517_v14  ;;  %v17597_v14 = vld [vmem:[#allocation2 + $0x2a54] ss:$112 sps:$4 sm:$0xff]  }
 0x2f8   :  { %10171 = vmatprep.subr.bf16.mxu0 %v17525_v19  ;;  %9020 = vmatpush1.bf16.msra.mxu1 %v17520_v20  ;;  %v17591_v19 = vld [vmem:[#allocation2 + $0x293c] ss:$112 sps:$4 sm:$0xff]   ;;  %v17595_v20 = vld [vmem:[#allocation2 + $0x2a50] ss:$112 sps:$4 sm:$0xff]  }
 0x2f9   :  { %9021 = vmatprep.subr.bf16.mxu1 %v17528_v22  ;;  %v17589_v22 = vld [vmem:[#allocation2 + $0x2938] ss:$112 sps:$4 sm:$0xff]  }
 0x2fb   :  { %10172 = vmatpush1.bf16.msra.mxu0 %v17523_v21  ;;  %v17600_v21 = vld [vmem:[#allocation2 + $0x64] ss:$112 sps:$4 sm:$0xff]  }
 0x2fc   :  { %10173 = vmatprep.subr.bf16.mxu0 %v17531_v23  ;;  %9022 = vmatpush1.bf16.msra.mxu1 %v17526_v25  ;;  %v17594_v23 = vld [vmem:[#allocation2 + $0x2a1c] ss:$112 sps:$4 sm:$0xff]   ;;  %v17592_v25 = vld [vmem:[#allocation2 + $0x2a18] ss:$112 sps:$4 sm:$0xff]  }
 0x2fd   :  { %9023 = vmatprep.subr.bf16.mxu1 %v17534_v30  ;;  %v17598_v30 = vld [vmem:[#allocation2 + $0x60] ss:$112 sps:$4 sm:$0xff]  }
 0x2ff   :  { %10174 = vmatpush1.bf16.msra.mxu0 %v17529_v27  ;;  %v17606_v27 = vld [vmem:[#allocation2 + $0x2a24] ss:$112 sps:$4 sm:$0xff]  }
 0x300   :  { %10175 = vmatprep.subr.bf16.mxu0 %v17537_v31  ;;  %9024 = vmatpush1.bf16.msra.mxu1 %v17532_v32  ;;  %v17603_v31 = vld [vmem:[#allocation2 + $0x144] ss:$112 sps:$4 sm:$0xff]   ;;  %v17601_v32 = vld [vmem:[#allocation2 + $0x140] ss:$112 sps:$4 sm:$0xff]  }
 0x301   :  { %9025 = vmatprep.subr.bf16.mxu1 %v17540_v34  ;;  %v1435_v34 = vlaneseq }
 0x303   :  { %10176 = vmatpush1.bf16.msra.mxu0 %v17535_v33  ;;  %v17609_v33 = vld [vmem:[#allocation2 + $0x224] ss:$112 sps:$4 sm:$0xff]  }
 0x304   :  { %10177 = vmatprep.subr.bf16.mxu0 %v17543_v35  ;;  %9026 = vmatpush1.bf16.msra.mxu1 %v17538_v37  ;;  %v17604_v35 = vld [vmem:[#allocation2 + $0x2a20] ss:$112 sps:$4 sm:$0xff]  }
 0x305   :  { %9027 = vmatprep.subr.bf16.mxu1 %v17546_v42  ;;  %v17607_v37 = vld [vmem:[#allocation2 + $0x220] ss:$112 sps:$4 sm:$0xff]   ;;  %v17612_v42 = vld [vmem:[#allocation2 + $0x304] ss:$112 sps:$4 sm:$0xff]  }
 0x307   :  { %10178 = vmatpush1.bf16.msra.mxu0 %v17541_v38  ;;  %v17615_v38 = vld [vmem:[#allocation2 + $0x2c] ss:$112 sps:$4 sm:$0xff]  }
 0x308   :  { %10179 = vmatprep.subr.bf16.mxu0 %v17549_v44  ;;  %9028 = vmatpush1.bf16.msra.mxu1 %v17544_v45  ;;  %v19361_v44 = vshrl.u32 %v1435_v34, 7  ;;  %v17654_v34 = vld [vmem:[#allocation2 + $0x924] ss:$112 sps:$4 sm:$0xff]  }
 0x309   :  { %9029 = vmatprep.subr.bf16.mxu1 %v17552_v47  ;;  %v1427_v47 = vld [vmem:[%s21048_s2] sm:$0xff] }
 0x30b   :  { %10180 = vmatpush1.bf16.msra.mxu0 %v17547_v46 }
 0x30c   :  { %10181 = vmatprep.subr.bf16.mxu0 %v17555_v49  ;;  %9030 = vmatpush1.bf16.msra.mxu1 %v17550_v52  ;;  %v19374_v49 = vsub.s32 4, %v19361_v44  ;;  %v17610_v52 = vld [vmem:[#allocation2 + $0x300] ss:$112 sps:$4 sm:$0xff]  }
 0x30d   :  { %9031 = vmatprep.subr.bf16.mxu1 %v17558_v54  ;;  %v19377_v54 = vsub.s32 5, %v19361_v44 }
 0x30f   :  { %10182 = vmatpush1.bf16.msra.mxu0 %v17553_v53 }
 0x310   :  { %10183 = vmatprep.subr.bf16.mxu0 %v17561_v55  ;;  %9032 = vmatpush1.bf16.msra.mxu1 %v17556_v56  ;;  %v17618_v55 = vld [vmem:[#allocation2 + $0x3e4] ss:$112 sps:$4 sm:$0xff]  }
 0x311   :  { %9033 = vmatprep.subr.bf16.mxu1 %v17564_v58  ;;  %v17613_v58 = vld [vmem:[#allocation2 + $0x28] ss:$112 sps:$4 sm:$0xff]  }
 0x313   :  { %10184 = vmatpush1.bf16.msra.mxu0 %v17559_v57  ;;  %v1454_v57 = vrot.slane %v1427_v47, %v19374_v49 }
 0x314   :  { %10185 = vmatprep.subr.bf16.mxu0 %v17567_v59  ;;  %9034 = vmatpush1.bf16.msra.mxu1 %v17562_v60  ;;  %v1458_v59 = vrot.slane %v1427_v47, %v19377_v54  ;;  %v17616_v60 = vld [vmem:[#allocation2 + $0x3e0] ss:$112 sps:$4 sm:$0xff]   ;;  %v17655_v47 = vld [vmem:[#allocation2 + $0x648] ss:$112 sps:$4 sm:$0xff]  }
 0x315   :  { %9035 = vmatprep.subr.bf16.mxu1 %v17570_v62 }
 0x317   :  { %10186 = vmatpush1.bf16.msra.mxu0 %v17565_v61  ;;  %v17621_v61 = vld [vmem:[#allocation2 + $0x10c] ss:$112 sps:$4 sm:$0xff]  }
 0x318   :  { %10187 = vmatprep.subr.bf16.mxu0 %v17573_v63  ;;  %9036 = vmatpush1.bf16.msra.mxu1 %v17568_v1  ;;  %v17624_v63 = vld [vmem:[#allocation2 + $0x4c4] ss:$112 sps:$4 sm:$0xff]  }
 0x319   :  { %9037 = vmatprep.subr.bf16.mxu1 %v17576_v3  ;;  %v17619_v3 = vld [vmem:[#allocation2 + $0x108] ss:$112 sps:$4 sm:$0xff]  }
 0x31b   :  { %10188 = vmatpush1.bf16.msra.mxu0 %v17571_v2 }
 0x31c   :  { %10189 = vmatprep.subr.bf16.mxu0 %v17579_v4  ;;  %9038 = vmatpush1.bf16.msra.mxu1 %v17574_v5 }
 0x31d   :  { %9039 = vmatprep.subr.bf16.mxu1 %v17582_v7 }
 0x31f   :  { %10190 = vmatpush1.bf16.msra.mxu0 %v17577_v6 }
 0x320   :  { %10191 = vmatprep.subr.bf16.mxu0 %v17585_v8  ;;  %9040 = vmatpush1.bf16.msra.mxu1 %v17580_v11  ;;  %v17622_v8 = vld [vmem:[#allocation2 + $0x4c0] ss:$112 sps:$4 sm:$0xff]   ;;  %v17627_v11 = vld [vmem:[#allocation2 + $0x1ec] ss:$112 sps:$4 sm:$0xff]  }
 0x321   :  { %9041 = vmatprep.subr.bf16.mxu1 %v17588_v13  ;;  %v17630_v13 = vld [vmem:[#allocation2 + $0x5a4] ss:$112 sps:$4 sm:$0xff]  }
 0x323   :  { %10192 = vmatpush1.bf16.msra.mxu0 %v17583_v12 }
 0x324   :  { %10202 = vmatprep.subr.bf16.mxu0 %v17597_v14  ;;  %9042 = vmatpush1.bf16.msra.mxu1 %v17586_v15  ;;  %v17625_v14 = vld [vmem:[#allocation2 + $0x1e8] ss:$112 sps:$4 sm:$0xff]   ;;  %v17628_v15 = vld [vmem:[#allocation2 + $0x5a0] ss:$112 sps:$4 sm:$0xff]  }
 0x325   :  { %9043 = vmatprep.subr.bf16.mxu1 %v17591_v19  ;;  %v17633_v19 = vld [vmem:[#allocation2 + $0x2cc] ss:$112 sps:$4 sm:$0xff]  }
 0x326   :  { %10194 = vmatmul.mubr.bf16.vlgmr.msra.gmra.mrb[16].mxu0 %v19287_v29 }
 0x327   :  { %10203 = vmatpush1.bf16.msra.mxu0 %v17595_v20  ;;  %10234 = vmatprep.mubr.bf16.mxu0 %v19183_v0  ;;  %v17636_v20 = vld [vmem:[#allocation2 + $0x684] ss:$112 sps:$4 sm:$0xff]  }
 0x328   :  { %10407 = vmatprep.subr.bf16.mxu0 %v17600_v21  ;;  %9044 = vmatpush1.bf16.msra.mxu1 %v17589_v22  ;;  %v17634_v21 = vld [vmem:[#allocation2 + $0x680] ss:$112 sps:$4 sm:$0xff]   ;;  %v17639_v22 = vld [vmem:[#allocation2 + $0x3ac] ss:$112 sps:$4 sm:$0xff]  }
 0x329   :  { %9054 = vmatprep.subr.bf16.mxu1 %v17594_v23  ;;  %v17642_v23 = vld [vmem:[#allocation2 + $0x764] ss:$112 sps:$4 sm:$0xff]  }
 0x32b   :  { %9046 = vmatmul.mubr.bf16.vlgmr.msra.gmra.mrb[12].mxu1 %v19287_v29 }
 0x32c   :  { %9055 = vmatpush1.bf16.msra.mxu1 %v17592_v25  ;;  %9086 = vmatprep.mubr.bf16.mxu1 %v19183_v0  ;;  %v17640_v25 = vld [vmem:[#allocation2 + $0x760] ss:$112 sps:$4 sm:$0xff]  }
 0x32d   :  { %9218 = vmatprep.subr.bf16.mxu1 %v17606_v27  ;;  %v17645_v27 = vld [vmem:[#allocation2 + $0x48c] ss:$112 sps:$4 sm:$0xff]  }
 0x332   :  { %15652 = vmatmul.mubr.msk.bf16.vlgmr.msra.gmra.mrb[16].mxu0 %vm8435_vm0, %v19245_v10 }
 0x333   :  { %10408 = vmatpush1.bf16.msra.mxu0 %v17598_v30  ;;  %10439 = vmatprep.mubr.bf16.mxu0 %v19252_v51  ;;  %v17648_v30 = vld [vmem:[#allocation2 + $0x844] ss:$112 sps:$4 sm:$0xff]  }
 0x334   :  { %10409 = vmatprep.subr.bf16.mxu0 %v17603_v31  ;;  %v17643_v31 = vld [vmem:[#allocation2 + $0x488] ss:$112 sps:$4 sm:$0xff]  }
 0x337   :  { %10410 = vmatpush1.bf16.msra.mxu0 %v17601_v32  ;;  %15645 = vmatmul.mubr.msk.bf16.vlgmr.msra.gmra.mrb[12].mxu1 %vm8435_vm0, %v19245_v10  ;;  %v17646_v32 = vld [vmem:[#allocation2 + $0x840] ss:$112 sps:$4 sm:$0xff]  }
 0x338   :  { %10411 = vmatprep.subr.bf16.mxu0 %v17609_v33  ;;  %9219 = vmatpush1.bf16.msra.mxu1 %v17604_v35  ;;  %v17651_v33 = vld [vmem:[#allocation2 + $0x56c] ss:$112 sps:$4 sm:$0xff]   ;;  %v17649_v35 = vld [vmem:[#allocation2 + $0x568] ss:$112 sps:$4 sm:$0xff]  }
 0x339   :  { %v19365_v45 = vpop.f32.mrb[12].mxu0  ;;  %9250 = vmatprep.mubr.bf16.mxu1 %v19183_v0  ;;  %9259 = vmatprep.subr.bf16.mxu1 %v17615_v38  ;;  %v17657_v38 = vld [vmem:[#allocation2 + $0x64c] ss:$112 sps:$4 sm:$0xff]  }
 0x33a   :  { %v19368_v46 = vpop.f32.mrb[13].mxu0 }
 0x33b   :  { %10412 = vmatpush1.bf16.msra.mxu0 %v17607_v37  ;;  %v9912_v53 = vpop.f32.mrb[14].mxu0  ;;  %v17652_v37 = vld [vmem:[#allocation2 + $0x920] ss:$112 sps:$4 sm:$0xff]  }
 0x33c   :  { %10413 = vmatprep.subr.bf16.mxu0 %v17612_v42  ;;  %v9913_v56 = vpop.f32.mrb[15].mxu0  ;;  %v17660_v42 = vld [vmem:[#allocation2 + $0xa04] ss:$112 sps:$4 sm:$0xff]   ;;  %v17663_v53 = vld [vmem:[#allocation2 + $0x72c] ss:$112 sps:$4 sm:$0xff]  }
 0x33d   :  { %v17661_v56 = vld [vmem:[#allocation2 + $0x728] ss:$112 sps:$4 sm:$0xff]  }
 0x33e   :  { %v8883_v62 = vpop.f32.mrb[8].mxu1 }
 0x33f   :  { %10414 = vmatpush1.bf16.msra.mxu0 %v17610_v52  ;;  %v16177_v1 = vadd.f32 %v8883_v62, %v1454_v57  ;;  %v8885_v2 = vpop.f32.mrb[9].mxu1  ;;  %15646 = vmatmul.mubr.msk.bf16.vlgmr.msra.gmra.mrb[16].mxu1 %vm8435_vm0, %v19245_v10  ;;  %v17658_v52 = vld [vmem:[#allocation2 + $0xa00] ss:$112 sps:$4 sm:$0xff]   ;;  %v17675_v62 = vld [vmem:[#allocation2 + $0x8ec] ss:$112 sps:$4 sm:$0xff]  }
 0x340   :  { %10415 = vmatprep.subr.bf16.mxu0 %v17618_v55  ;;  %v16179_v4 = vadd.f32 %v8885_v2, %v1458_v59  ;;  %9260 = vmatpush1.bf16.msra.mxu1 %v17613_v58  ;;  %v8887_v5 = vpop.f32.mrb[10].mxu1  ;;  %v17666_v55 = vld [vmem:[#allocation2 + $0xae4] ss:$112 sps:$4 sm:$0xff]   ;;  %v17664_v57 = vld [vmem:[#allocation2 + $0xae0] ss:$112 sps:$4 sm:$0xff]  }
 0x341   :  { %9291 = vmatprep.mubr.bf16.mxu1 %v19252_v51  ;;  %v19385_v6 = vadd.f32 %v16177_v1, %v19296_v40  ;;  %v8888_v7 = vpop.f32.mrb[11].mxu1  ;;  %9261 = vmatprep.subr.bf16.mxu1 %v17621_v61  ;;  %v17631_v40 = vld [vmem:[#allocation2 + $0x2c8] ss:$112 sps:$4 sm:$0xff]   ;;  %v17669_v58 = vld [vmem:[#allocation2 + $0x80c] ss:$112 sps:$4 sm:$0xff]  }
 0x342   :  { %v19388_v12 = vadd.f32 %v16179_v4, %v19298_v43  ;;  %v17637_v43 = vld [vmem:[#allocation2 + $0x3a8] ss:$112 sps:$4 sm:$0xff]   ;;  %v17672_v59 = vld [vmem:[#allocation2 + $0xbc4] ss:$112 sps:$4 sm:$0xff]   ;;  %v17670_v61 = vld [vmem:[#allocation2 + $0xbc0] ss:$112 sps:$4 sm:$0xff]  }
 0x343   :  { %10416 = vmatpush1.bf16.msra.mxu0 %v17616_v60  ;;  %v17667_v60 = vld [vmem:[#allocation2 + $0x808] ss:$112 sps:$4 sm:$0xff]   ;;  %v17676_v2 = vld [vmem:[#allocation2 + $0xca0] ss:$112 sps:$4 sm:$0xff]   ;;  %v17684_v4 = vld [vmem:[#allocation2 + $0xd84] ss:$112 sps:$4 sm:$0xff]  }
 0x344   :  { %10417 = vmatprep.subr.bf16.mxu0 %v17624_v63  ;;  %9262 = vmatpush1.bf16.msra.mxu1 %v17619_v3  ;;  %v17678_v63 = vld [vmem:[#allocation2 + $0xca4] ss:$112 sps:$4 sm:$0xff]   ;;  %v17673_v1 = vld [vmem:[#allocation2 + $0x8e8] ss:$112 sps:$4 sm:$0xff]   ;;  %v17681_v3 = vld [vmem:[#allocation2 + $0x9cc] ss:$112 sps:$4 sm:$0xff]  }
 0x345   :  { %9263 = vmatprep.subr.bf16.mxu1 %v17627_v11  ;;  %v17679_v5 = vld [vmem:[#allocation2 + $0x9c8] ss:$112 sps:$4 sm:$0xff]   ;;  %v17682_v7 = vld [vmem:[#allocation2 + $0xd80] ss:$112 sps:$4 sm:$0xff]  }
 0x346   :  { %v17685_v11 = vld [vmem:[#allocation2 + $0xaa8] ss:$112 sps:$4 sm:$0xff]  }
 0x347   :  { %10418 = vmatpush1.bf16.msra.mxu0 %v17622_v8  ;;  %v17687_v8 = vld [vmem:[#allocation2 + $0xaac] ss:$112 sps:$4 sm:$0xff]  }
 0x348   :  { %10419 = vmatprep.subr.bf16.mxu0 %v17630_v13  ;;  %9264 = vmatpush1.bf16.msra.mxu1 %v17625_v14  ;;  %v17690_v13 = vld [vmem:[#allocation2 + $0xe64] ss:$112 sps:$4 sm:$0xff]   ;;  %v17688_v14 = vld [vmem:[#allocation2 + $0xe60] ss:$112 sps:$4 sm:$0xff]  }
 0x349   :  { %9265 = vmatprep.subr.bf16.mxu1 %v17633_v19  ;;  %v17696_v19 = vld [vmem:[#allocation2 + $0xf44] ss:$112 sps:$4 sm:$0xff]  }
 0x34b   :  { %10420 = vmatpush1.bf16.msra.mxu0 %v17628_v15  ;;  %v17693_v15 = vld [vmem:[#allocation2 + $0xb8c] ss:$112 sps:$4 sm:$0xff]  }
 0x34c   :  { %10421 = vmatprep.subr.bf16.mxu0 %v17636_v20  ;;  %9266 = vmatpush1.bf16.msra.mxu1 %v17631_v40  ;;  %v17691_v20 = vld [vmem:[#allocation2 + $0xb88] ss:$112 sps:$4 sm:$0xff]   ;;  %v17694_v40 = vld [vmem:[#allocation2 + $0xf40] ss:$112 sps:$4 sm:$0xff]  }
 0x34d   :  { %9267 = vmatprep.subr.bf16.mxu1 %v17639_v22  ;;  %v17702_v22 = vld [vmem:[#allocation2 + $0x1024] ss:$112 sps:$4 sm:$0xff]  }
 0x34f   :  { %10422 = vmatpush1.bf16.msra.mxu0 %v17634_v21  ;;  %v17699_v21 = vld [vmem:[#allocation2 + $0xc6c] ss:$112 sps:$4 sm:$0xff]  }
 0x350   :  { %10423 = vmatprep.subr.bf16.mxu0 %v17642_v23  ;;  %9268 = vmatpush1.bf16.msra.mxu1 %v17637_v43  ;;  %v17697_v23 = vld [vmem:[#allocation2 + $0xc68] ss:$112 sps:$4 sm:$0xff]   ;;  %v17700_v43 = vld [vmem:[#allocation2 + $0x1020] ss:$112 sps:$4 sm:$0xff]  }
 0x351   :  { %9269 = vmatprep.subr.bf16.mxu1 %v17645_v27  ;;  %v17708_v27 = vld [vmem:[#allocation2 + $0x1104] ss:$112 sps:$4 sm:$0xff]  }
 0x353   :  { %10424 = vmatpush1.bf16.msra.mxu0 %v17640_v25  ;;  %v17705_v25 = vld [vmem:[#allocation2 + $0xd4c] ss:$112 sps:$4 sm:$0xff]  }
 0x354   :  { %10425 = vmatprep.subr.bf16.mxu0 %v17648_v30  ;;  %9270 = vmatpush1.bf16.msra.mxu1 %v17643_v31  ;;  %v17703_v30 = vld [vmem:[#allocation2 + $0xd48] ss:$112 sps:$4 sm:$0xff]   ;;  %v17706_v31 = vld [vmem:[#allocation2 + $0x1100] ss:$112 sps:$4 sm:$0xff]  }
 0x355   :  { %9271 = vmatprep.subr.bf16.mxu1 %v17651_v33  ;;  %v17714_v33 = vld [vmem:[#allocation2 + $0x11e4] ss:$112 sps:$4 sm:$0xff]  }
 0x357   :  { %10426 = vmatpush1.bf16.msra.mxu0 %v17646_v32  ;;  %v17711_v32 = vld [vmem:[#allocation2 + $0xe2c] ss:$112 sps:$4 sm:$0xff]  }
 0x358   :  { %10427 = vmatprep.subr.bf16.mxu0 %v17654_v34  ;;  %9272 = vmatpush1.bf16.msra.mxu1 %v17649_v35  ;;  %v17709_v34 = vld [vmem:[#allocation2 + $0xe28] ss:$112 sps:$4 sm:$0xff]   ;;  %v17712_v35 = vld [vmem:[#allocation2 + $0x11e0] ss:$112 sps:$4 sm:$0xff]  }
 0x359   :  { %9273 = vmatprep.subr.bf16.mxu1 %v17657_v38  ;;  %v17720_v38 = vld [vmem:[#allocation2 + $0x12c4] ss:$112 sps:$4 sm:$0xff]  }
 0x35b   :  { %10428 = vmatpush1.bf16.msra.mxu0 %v17652_v37  ;;  %v17717_v37 = vld [vmem:[#allocation2 + $0xf0c] ss:$112 sps:$4 sm:$0xff]  }
 0x35c   :  { %10429 = vmatprep.subr.bf16.mxu0 %v17660_v42  ;;  %9274 = vmatpush1.bf16.msra.mxu1 %v17655_v47  ;;  %v17715_v42 = vld [vmem:[#allocation2 + $0xf08] ss:$112 sps:$4 sm:$0xff]   ;;  %v17718_v47 = vld [vmem:[#allocation2 + $0x12c0] ss:$112 sps:$4 sm:$0xff]  }
 0x35d   :  { %9275 = vmatprep.subr.bf16.mxu1 %v17663_v53  ;;  %v17726_v53 = vld [vmem:[#allocation2 + $0x13a4] ss:$112 sps:$4 sm:$0xff]  }
 0x35f   :  { %10430 = vmatpush1.bf16.msra.mxu0 %v17658_v52  ;;  %v17723_v52 = vld [vmem:[#allocation2 + $0xfec] ss:$112 sps:$4 sm:$0xff]  }
 0x360   :  { %10431 = vmatprep.subr.bf16.mxu0 %v17666_v55  ;;  %9276 = vmatpush1.bf16.msra.mxu1 %v17661_v56  ;;  %v17721_v55 = vld [vmem:[#allocation2 + $0xfe8] ss:$112 sps:$4 sm:$0xff]   ;;  %v17724_v56 = vld [vmem:[#allocation2 + $0x13a0] ss:$112 sps:$4 sm:$0xff]  }
 0x361   :  { %9277 = vmatprep.subr.bf16.mxu1 %v17669_v58  ;;  %v17732_v58 = vld [vmem:[#allocation2 + $0x1484] ss:$112 sps:$4 sm:$0xff]  }
 0x363   :  { %10432 = vmatpush1.bf16.msra.mxu0 %v17664_v57  ;;  %v17729_v57 = vld [vmem:[#allocation2 + $0x10cc] ss:$112 sps:$4 sm:$0xff]  }
 0x364   :  { %10433 = vmatprep.subr.bf16.mxu0 %v17672_v59  ;;  %9278 = vmatpush1.bf16.msra.mxu1 %v17667_v60  ;;  %v17727_v59 = vld [vmem:[#allocation2 + $0x10c8] ss:$112 sps:$4 sm:$0xff]   ;;  %v17730_v60 = vld [vmem:[#allocation2 + $0x1480] ss:$112 sps:$4 sm:$0xff]  }
 0x365   :  { %9279 = vmatprep.subr.bf16.mxu1 %v17675_v62  ;;  %v17733_v62 = vld [vmem:[#allocation2 + $0x11a8] ss:$112 sps:$4 sm:$0xff]  }
 0x367   :  { %10434 = vmatpush1.bf16.msra.mxu0 %v17670_v61  ;;  %v17735_v61 = vld [vmem:[#allocation2 + $0x11ac] ss:$112 sps:$4 sm:$0xff]  }
 0x368   :  { %10435 = vmatprep.subr.bf16.mxu0 %v17678_v63  ;;  %9280 = vmatpush1.bf16.msra.mxu1 %v17673_v1  ;;  %v17738_v63 = vld [vmem:[#allocation2 + $0x1564] ss:$112 sps:$4 sm:$0xff]   ;;  %v17736_v1 = vld [vmem:[#allocation2 + $0x1560] ss:$112 sps:$4 sm:$0xff]  }
 0x369   :  { %9281 = vmatprep.subr.bf16.mxu1 %v17681_v3  ;;  %v17744_v3 = vld [vmem:[#allocation2 + $0x1644] ss:$112 sps:$4 sm:$0xff]  }
 0x36b   :  { %10436 = vmatpush1.bf16.msra.mxu0 %v17676_v2  ;;  %v17741_v2 = vld [vmem:[#allocation2 + $0x128c] ss:$112 sps:$4 sm:$0xff]  }
 0x36c   :  { %10437 = vmatprep.subr.bf16.mxu0 %v17684_v4  ;;  %9282 = vmatpush1.bf16.msra.mxu1 %v17679_v5  ;;  %v17739_v4 = vld [vmem:[#allocation2 + $0x1288] ss:$112 sps:$4 sm:$0xff]   ;;  %v17742_v5 = vld [vmem:[#allocation2 + $0x1640] ss:$112 sps:$4 sm:$0xff]  }
 0x36d   :  { %9283 = vmatprep.subr.bf16.mxu1 %v17687_v8  ;;  %v17745_v8 = vld [vmem:[#allocation2 + $0x1368] ss:$112 sps:$4 sm:$0xff]  }
 0x36f   :  { %10438 = vmatpush1.bf16.msra.mxu0 %v17682_v7  ;;  %v17747_v7 = vld [vmem:[#allocation2 + $0x136c] ss:$112 sps:$4 sm:$0xff]  }
 0x370   :  { %10448 = vmatprep.subr.bf16.mxu0 %v17690_v13  ;;  %9284 = vmatpush1.bf16.msra.mxu1 %v17685_v11  ;;  %v17750_v11 = vld [vmem:[#allocation2 + $0x1724] ss:$112 sps:$4 sm:$0xff]   ;;  %v17748_v13 = vld [vmem:[#allocation2 + $0x1720] ss:$112 sps:$4 sm:$0xff]  }
 0x371   :  { %9285 = vmatprep.subr.bf16.mxu1 %v17693_v15  ;;  %v17756_v15 = vld [vmem:[#allocation2 + $0x1804] ss:$112 sps:$4 sm:$0xff]  }
 0x372   :  { %10440 = vmatmul.mubr.bf16.vlgmr.msra.gmra.mrb[20].mxu0 %v19259_v9 }
 0x373   :  { %10449 = vmatpush1.bf16.msra.mxu0 %v17688_v14  ;;  %10480 = vmatprep.mubr.bf16.mxu0 %v19266_v36  ;;  %v17753_v14 = vld [vmem:[#allocation2 + $0x144c] ss:$112 sps:$4 sm:$0xff]  }
 0x374   :  { %10450 = vmatprep.subr.bf16.mxu0 %v17696_v19  ;;  %9286 = vmatpush1.bf16.msra.mxu1 %v17691_v20  ;;  %v17751_v19 = vld [vmem:[#allocation2 + $0x1448] ss:$112 sps:$4 sm:$0xff]   ;;  %v17754_v20 = vld [vmem:[#allocation2 + $0x1800] ss:$112 sps:$4 sm:$0xff]  }
 0x375   :  { %9287 = vmatprep.subr.bf16.mxu1 %v17699_v21  ;;  %v17762_v21 = vld [vmem:[#allocation2 + $0x18e4] ss:$112 sps:$4 sm:$0xff]  }
 0x377   :  { %10451 = vmatpush1.bf16.msra.mxu0 %v17694_v40  ;;  %v17759_v40 = vld [vmem:[#allocation2 + $0x152c] ss:$112 sps:$4 sm:$0xff]  }
 0x378   :  { %10452 = vmatprep.subr.bf16.mxu0 %v17702_v22  ;;  %9288 = vmatpush1.bf16.msra.mxu1 %v17697_v23  ;;  %v17757_v22 = vld [vmem:[#allocation2 + $0x1528] ss:$112 sps:$4 sm:$0xff]   ;;  %v17760_v23 = vld [vmem:[#allocation2 + $0x18e0] ss:$112 sps:$4 sm:$0xff]  }
 0x379   :  { %9289 = vmatprep.subr.bf16.mxu1 %v17705_v25  ;;  %v17768_v25 = vld [vmem:[#allocation2 + $0x19c4] ss:$112 sps:$4 sm:$0xff]  }
 0x37b   :  { %10453 = vmatpush1.bf16.msra.mxu0 %v17700_v43  ;;  %v17765_v43 = vld [vmem:[#allocation2 + $0x160c] ss:$112 sps:$4 sm:$0xff]  }
 0x37c   :  { %10454 = vmatprep.subr.bf16.mxu0 %v17708_v27  ;;  %9290 = vmatpush1.bf16.msra.mxu1 %v17703_v30  ;;  %v17763_v27 = vld [vmem:[#allocation2 + $0x1608] ss:$112 sps:$4 sm:$0xff]   ;;  %v17766_v30 = vld [vmem:[#allocation2 + $0x19c0] ss:$112 sps:$4 sm:$0xff]  }
 0x37d   :  { %9300 = vmatprep.subr.bf16.mxu1 %v17711_v32  ;;  %v17774_v32 = vld [vmem:[#allocation2 + $0x1aa4] ss:$112 sps:$4 sm:$0xff]  }
 0x37f   :  { %10455 = vmatpush1.bf16.msra.mxu0 %v17706_v31  ;;  %9292 = vmatmul.mubr.bf16.vlgmr.msra.gmra.mrb[20].mxu1 %v19259_v9  ;;  %v17771_v31 = vld [vmem:[#allocation2 + $0x16ec] ss:$112 sps:$4 sm:$0xff]  }
 0x380   :  { %10456 = vmatprep.subr.bf16.mxu0 %v17714_v33  ;;  %9301 = vmatpush1.bf16.msra.mxu1 %v17709_v34  ;;  %v17769_v33 = vld [vmem:[#allocation2 + $0x16e8] ss:$112 sps:$4 sm:$0xff]   ;;  %v17772_v34 = vld [vmem:[#allocation2 + $0x1aa0] ss:$112 sps:$4 sm:$0xff]  }
 0x381   :  { %9332 = vmatprep.mubr.bf16.mxu1 %v19266_v36  ;;  %9302 = vmatprep.subr.bf16.mxu1 %v17717_v37  ;;  %v17780_v37 = vld [vmem:[#allocation2 + $0x1b84] ss:$112 sps:$4 sm:$0xff]  }
 0x383   :  { %10457 = vmatpush1.bf16.msra.mxu0 %v17712_v35  ;;  %v17777_v35 = vld [vmem:[#allocation2 + $0x17cc] ss:$112 sps:$4 sm:$0xff]  }
 0x384   :  { %10458 = vmatprep.subr.bf16.mxu0 %v17720_v38  ;;  %9303 = vmatpush1.bf16.msra.mxu1 %v17715_v42  ;;  %v17775_v38 = vld [vmem:[#allocation2 + $0x17c8] ss:$112 sps:$4 sm:$0xff]   ;;  %v17778_v42 = vld [vmem:[#allocation2 + $0x1b80] ss:$112 sps:$4 sm:$0xff]  }
 0x385   :  { %9304 = vmatprep.subr.bf16.mxu1 %v17723_v52  ;;  %v17786_v52 = vld [vmem:[#allocation2 + $0x1c64] ss:$112 sps:$4 sm:$0xff]  }
 0x387   :  { %10459 = vmatpush1.bf16.msra.mxu0 %v17718_v47  ;;  %v17783_v47 = vld [vmem:[#allocation2 + $0x18ac] ss:$112 sps:$4 sm:$0xff]  }
 0x388   :  { %10460 = vmatprep.subr.bf16.mxu0 %v17726_v53  ;;  %9305 = vmatpush1.bf16.msra.mxu1 %v17721_v55  ;;  %v17781_v53 = vld [vmem:[#allocation2 + $0x18a8] ss:$112 sps:$4 sm:$0xff]   ;;  %v17784_v55 = vld [vmem:[#allocation2 + $0x1c60] ss:$112 sps:$4 sm:$0xff]  }
 0x389   :  { %9306 = vmatprep.subr.bf16.mxu1 %v17729_v57  ;;  %v17792_v57 = vld [vmem:[#allocation2 + $0x1d44] ss:$112 sps:$4 sm:$0xff]  }
 0x38b   :  { %10461 = vmatpush1.bf16.msra.mxu0 %v17724_v56  ;;  %v17789_v56 = vld [vmem:[#allocation2 + $0x198c] ss:$112 sps:$4 sm:$0xff]  }
 0x38c   :  { %10462 = vmatprep.subr.bf16.mxu0 %v17732_v58  ;;  %9307 = vmatpush1.bf16.msra.mxu1 %v17727_v59  ;;  %v17787_v58 = vld [vmem:[#allocation2 + $0x1988] ss:$112 sps:$4 sm:$0xff]   ;;  %v17790_v59 = vld [vmem:[#allocation2 + $0x1d40] ss:$112 sps:$4 sm:$0xff]  }
 0x38d   :  { %9308 = vmatprep.subr.bf16.mxu1 %v17735_v61  ;;  %v17798_v61 = vld [vmem:[#allocation2 + $0x1e24] ss:$112 sps:$4 sm:$0xff]  }
 0x38f   :  { %10463 = vmatpush1.bf16.msra.mxu0 %v17730_v60  ;;  %v17795_v60 = vld [vmem:[#allocation2 + $0x1a6c] ss:$112 sps:$4 sm:$0xff]  }
 0x390   :  { %10464 = vmatprep.subr.bf16.mxu0 %v17738_v63  ;;  %9309 = vmatpush1.bf16.msra.mxu1 %v17733_v62  ;;  %v17793_v62 = vld [vmem:[#allocation2 + $0x1a68] ss:$112 sps:$4 sm:$0xff]   ;;  %v17796_v63 = vld [vmem:[#allocation2 + $0x1e20] ss:$112 sps:$4 sm:$0xff]  }
 0x391   :  { %9310 = vmatprep.subr.bf16.mxu1 %v17741_v2  ;;  %v17804_v2 = vld [vmem:[#allocation2 + $0x1f04] ss:$112 sps:$4 sm:$0xff]  }
 0x393   :  { %10465 = vmatpush1.bf16.msra.mxu0 %v17736_v1  ;;  %v17801_v1 = vld [vmem:[#allocation2 + $0x1b4c] ss:$112 sps:$4 sm:$0xff]  }
 0x394   :  { %10466 = vmatprep.subr.bf16.mxu0 %v17744_v3  ;;  %9311 = vmatpush1.bf16.msra.mxu1 %v17739_v4  ;;  %v17799_v3 = vld [vmem:[#allocation2 + $0x1b48] ss:$112 sps:$4 sm:$0xff]   ;;  %v17802_v4 = vld [vmem:[#allocation2 + $0x1f00] ss:$112 sps:$4 sm:$0xff]  }
 0x395   :  { %9312 = vmatprep.subr.bf16.mxu1 %v17747_v7  ;;  %v17810_v7 = vld [vmem:[#allocation2 + $0x1fe4] ss:$112 sps:$4 sm:$0xff]  }
 0x397   :  { %10467 = vmatpush1.bf16.msra.mxu0 %v17742_v5  ;;  %v17807_v5 = vld [vmem:[#allocation2 + $0x1c2c] ss:$112 sps:$4 sm:$0xff]  }
 0x398   :  { %10468 = vmatprep.subr.bf16.mxu0 %v17750_v11  ;;  %9313 = vmatpush1.bf16.msra.mxu1 %v17745_v8  ;;  %v17805_v8 = vld [vmem:[#allocation2 + $0x1c28] ss:$112 sps:$4 sm:$0xff]   ;;  %v17808_v11 = vld [vmem:[#allocation2 + $0x1fe0] ss:$112 sps:$4 sm:$0xff]  }
 0x399   :  { %9314 = vmatprep.subr.bf16.mxu1 %v17753_v14  ;;  %v17816_v14 = vld [vmem:[#allocation2 + $0x20c4] ss:$112 sps:$4 sm:$0xff]  }
 0x39b   :  { %10469 = vmatpush1.bf16.msra.mxu0 %v17748_v13  ;;  %v17813_v13 = vld [vmem:[#allocation2 + $0x1d0c] ss:$112 sps:$4 sm:$0xff]  }
 0x39c   :  { %10470 = vmatprep.subr.bf16.mxu0 %v17756_v15  ;;  %9315 = vmatpush1.bf16.msra.mxu1 %v17751_v19  ;;  %v17811_v15 = vld [vmem:[#allocation2 + $0x1d08] ss:$112 sps:$4 sm:$0xff]   ;;  %v17814_v19 = vld [vmem:[#allocation2 + $0x20c0] ss:$112 sps:$4 sm:$0xff]  }
 0x39d   :  { %9316 = vmatprep.subr.bf16.mxu1 %v17759_v40  ;;  %v17822_v40 = vld [vmem:[#allocation2 + $0x21a4] ss:$112 sps:$4 sm:$0xff]  }
 0x39f   :  { %10471 = vmatpush1.bf16.msra.mxu0 %v17754_v20  ;;  %v17819_v20 = vld [vmem:[#allocation2 + $0x1dec] ss:$112 sps:$4 sm:$0xff]  }
 0x3a0   :  { %10472 = vmatprep.subr.bf16.mxu0 %v17762_v21  ;;  %9317 = vmatpush1.bf16.msra.mxu1 %v17757_v22  ;;  %v17817_v21 = vld [vmem:[#allocation2 + $0x1de8] ss:$112 sps:$4 sm:$0xff]   ;;  %v17820_v22 = vld [vmem:[#allocation2 + $0x21a0] ss:$112 sps:$4 sm:$0xff]  }
 0x3a1   :  { %9318 = vmatprep.subr.bf16.mxu1 %v17765_v43  ;;  %v17828_v43 = vld [vmem:[#allocation2 + $0x2284] ss:$112 sps:$4 sm:$0xff]  }
 0x3a3   :  { %10473 = vmatpush1.bf16.msra.mxu0 %v17760_v23  ;;  %v17825_v23 = vld [vmem:[#allocation2 + $0x1ecc] ss:$112 sps:$4 sm:$0xff]  }
 0x3a4   :  { %10474 = vmatprep.subr.bf16.mxu0 %v17768_v25  ;;  %9319 = vmatpush1.bf16.msra.mxu1 %v17763_v27  ;;  %v17823_v25 = vld [vmem:[#allocation2 + $0x1ec8] ss:$112 sps:$4 sm:$0xff]   ;;  %v17826_v27 = vld [vmem:[#allocation2 + $0x2280] ss:$112 sps:$4 sm:$0xff]  }
 0x3a5   :  { %9320 = vmatprep.subr.bf16.mxu1 %v17771_v31  ;;  %v17834_v31 = vld [vmem:[#allocation2 + $0x2364] ss:$112 sps:$4 sm:$0xff]  }
 0x3a7   :  { %10475 = vmatpush1.bf16.msra.mxu0 %v17766_v30  ;;  %v17831_v30 = vld [vmem:[#allocation2 + $0x1fac] ss:$112 sps:$4 sm:$0xff]  }
 0x3a8   :  { %10476 = vmatprep.subr.bf16.mxu0 %v17774_v32  ;;  %9321 = vmatpush1.bf16.msra.mxu1 %v17769_v33  ;;  %v17829_v32 = vld [vmem:[#allocation2 + $0x1fa8] ss:$112 sps:$4 sm:$0xff]   ;;  %v17832_v33 = vld [vmem:[#allocation2 + $0x2360] ss:$112 sps:$4 sm:$0xff]  }
 0x3a9   :  { %9322 = vmatprep.subr.bf16.mxu1 %v17777_v35  ;;  %v17840_v35 = vld [vmem:[#allocation2 + $0x2444] ss:$112 sps:$4 sm:$0xff]  }
 0x3ab   :  { %10477 = vmatpush1.bf16.msra.mxu0 %v17772_v34  ;;  %v17837_v34 = vld [vmem:[#allocation2 + $0x208c] ss:$112 sps:$4 sm:$0xff]  }
 0x3ac   :  { %10478 = vmatprep.subr.bf16.mxu0 %v17780_v37  ;;  %9323 = vmatpush1.bf16.msra.mxu1 %v17775_v38  ;;  %v17835_v37 = vld [vmem:[#allocation2 + $0x2088] ss:$112 sps:$4 sm:$0xff]   ;;  %v17838_v38 = vld [vmem:[#allocation2 + $0x2440] ss:$112 sps:$4 sm:$0xff]  }
 0x3ad   :  { %9324 = vmatprep.subr.bf16.mxu1 %v17783_v47  ;;  %v17846_v47 = vld [vmem:[#allocation2 + $0x2524] ss:$112 sps:$4 sm:$0xff]  }
 0x3af   :  { %10479 = vmatpush1.bf16.msra.mxu0 %v17778_v42  ;;  %v17843_v42 = vld [vmem:[#allocation2 + $0x216c] ss:$112 sps:$4 sm:$0xff]  }
 0x3b0   :  { %10489 = vmatprep.subr.bf16.mxu0 %v17786_v52  ;;  %9325 = vmatpush1.bf16.msra.mxu1 %v17781_v53  ;;  %v17841_v52 = vld [vmem:[#allocation2 + $0x2168] ss:$112 sps:$4 sm:$0xff]   ;;  %v17844_v53 = vld [vmem:[#allocation2 + $0x2520] ss:$112 sps:$4 sm:$0xff]  }
 0x3b1   :  { %9326 = vmatprep.subr.bf16.mxu1 %v17789_v56  ;;  %v17852_v56 = vld [vmem:[#allocation2 + $0x2604] ss:$112 sps:$4 sm:$0xff]  }
 0x3b2   :  { %10481 = vmatmul.mubr.bf16.vlgmr.msra.gmra.mrb[20].mxu0 %v19273_v18 }
 0x3b3   :  { %10490 = vmatpush1.bf16.msra.mxu0 %v17784_v55  ;;  %10521 = vmatprep.mubr.bf16.mxu0 %v19278_v24  ;;  %v17849_v55 = vld [vmem:[#allocation2 + $0x224c] ss:$112 sps:$4 sm:$0xff]  }
 0x3b4   :  { %10491 = vmatprep.subr.bf16.mxu0 %v17792_v57  ;;  %9327 = vmatpush1.bf16.msra.mxu1 %v17787_v58  ;;  %v17847_v57 = vld [vmem:[#allocation2 + $0x2248] ss:$112 sps:$4 sm:$0xff]   ;;  %v17850_v58 = vld [vmem:[#allocation2 + $0x2600] ss:$112 sps:$4 sm:$0xff]  }
 0x3b5   :  { %9328 = vmatprep.subr.bf16.mxu1 %v17795_v60  ;;  %v17858_v60 = vld [vmem:[#allocation2 + $0x26e4] ss:$112 sps:$4 sm:$0xff]  }
 0x3b7   :  { %10492 = vmatpush1.bf16.msra.mxu0 %v17790_v59  ;;  %v17855_v59 = vld [vmem:[#allocation2 + $0x232c] ss:$112 sps:$4 sm:$0xff]  }
 0x3b8   :  { %10493 = vmatprep.subr.bf16.mxu0 %v17798_v61  ;;  %9329 = vmatpush1.bf16.msra.mxu1 %v17793_v62  ;;  %v17853_v61 = vld [vmem:[#allocation2 + $0x2328] ss:$112 sps:$4 sm:$0xff]   ;;  %v17856_v62 = vld [vmem:[#allocation2 + $0x26e0] ss:$112 sps:$4 sm:$0xff]  }
 0x3b9   :  { %9330 = vmatprep.subr.bf16.mxu1 %v17801_v1  ;;  %v17864_v1 = vld [vmem:[#allocation2 + $0x27c4] ss:$112 sps:$4 sm:$0xff]  }
 0x3bb   :  { %10494 = vmatpush1.bf16.msra.mxu0 %v17796_v63  ;;  %v17861_v63 = vld [vmem:[#allocation2 + $0x240c] ss:$112 sps:$4 sm:$0xff]  }
 0x3bc   :  { %10495 = vmatprep.subr.bf16.mxu0 %v17804_v2  ;;  %9331 = vmatpush1.bf16.msra.mxu1 %v17799_v3  ;;  %v17859_v2 = vld [vmem:[#allocation2 + $0x2408] ss:$112 sps:$4 sm:$0xff]   ;;  %v17862_v3 = vld [vmem:[#allocation2 + $0x27c0] ss:$112 sps:$4 sm:$0xff]  }
 0x3bd   :  { %9341 = vmatprep.subr.bf16.mxu1 %v17807_v5  ;;  %v17870_v5 = vld [vmem:[#allocation2 + $0x28a4] ss:$112 sps:$4 sm:$0xff]  }
 0x3bf   :  { %10496 = vmatpush1.bf16.msra.mxu0 %v17802_v4  ;;  %9333 = vmatmul.mubr.bf16.vlgmr.msra.gmra.mrb[20].mxu1 %v19273_v18  ;;  %v17867_v4 = vld [vmem:[#allocation2 + $0x24ec] ss:$112 sps:$4 sm:$0xff]  }
 0x3c0   :  { %10497 = vmatprep.subr.bf16.mxu0 %v17810_v7  ;;  %9342 = vmatpush1.bf16.msra.mxu1 %v17805_v8  ;;  %v17865_v7 = vld [vmem:[#allocation2 + $0x24e8] ss:$112 sps:$4 sm:$0xff]   ;;  %v17868_v8 = vld [vmem:[#allocation2 + $0x28a0] ss:$112 sps:$4 sm:$0xff]  }
 0x3c1   :  { %9373 = vmatprep.mubr.bf16.mxu1 %v19278_v24  ;;  %9343 = vmatprep.subr.bf16.mxu1 %v17813_v13  ;;  %v17876_v13 = vld [vmem:[#allocation2 + $0x2984] ss:$112 sps:$4 sm:$0xff]  }
 0x3c3   :  { %10498 = vmatpush1.bf16.msra.mxu0 %v17808_v11  ;;  %v17873_v11 = vld [vmem:[#allocation2 + $0x25cc] ss:$112 sps:$4 sm:$0xff]  }
 0x3c4   :  { %10499 = vmatprep.subr.bf16.mxu0 %v17816_v14  ;;  %9344 = vmatpush1.bf16.msra.mxu1 %v17811_v15  ;;  %v17871_v14 = vld [vmem:[#allocation2 + $0x25c8] ss:$112 sps:$4 sm:$0xff]   ;;  %v17874_v15 = vld [vmem:[#allocation2 + $0x2980] ss:$112 sps:$4 sm:$0xff]  }
 0x3c5   :  { %9345 = vmatprep.subr.bf16.mxu1 %v17819_v20  ;;  %v17888_v20 = vld [vmem:[#allocation2 + $0x2a64] ss:$112 sps:$4 sm:$0xff]  }
 0x3c7   :  { %10500 = vmatpush1.bf16.msra.mxu0 %v17814_v19  ;;  %v17879_v19 = vld [vmem:[#allocation2 + $0x26ac] ss:$112 sps:$4 sm:$0xff]  }
 0x3c8   :  { %10501 = vmatprep.subr.bf16.mxu0 %v17822_v40  ;;  %9346 = vmatpush1.bf16.msra.mxu1 %v17817_v21  ;;  %v19399_v40 = vsub.s32 1, %v19361_v44  ;;  %v17877_v21 = vld [vmem:[#allocation2 + $0x26a8] ss:$112 sps:$4 sm:$0xff]  }
 0x3c9   :  { %9347 = vmatprep.subr.bf16.mxu1 %v17825_v23  ;;  %v17886_v23 = vld [vmem:[#allocation2 + $0x2a60] ss:$112 sps:$4 sm:$0xff]  }
 0x3cb   :  { %10502 = vmatpush1.bf16.msra.mxu0 %v17820_v22  ;;  %v17882_v22 = vld [vmem:[#allocation2 + $0x278c] ss:$112 sps:$4 sm:$0xff]  }
 0x3cc   :  { %10503 = vmatprep.subr.bf16.mxu0 %v17828_v43  ;;  %9348 = vmatpush1.bf16.msra.mxu1 %v17823_v25  ;;  %v17894_v43 = vld [vmem:[%s21049_s3 + $0x4] ss:$8 sps:$4 sm:$0xff]  }
 0x3cd   :  { %9349 = vmatprep.subr.bf16.mxu1 %v17831_v30  ;;  %v19407_v25 = vld [vmem:[%s21048_s2] sm:$0xff]  ;;  %v17880_v30 = vld [vmem:[#allocation2 + $0x2788] ss:$112 sps:$4 sm:$0xff]  }
 0x3cf   :  { %10504 = vmatpush1.bf16.msra.mxu0 %v17826_v27  ;;  %v1442_v27 = vrot.slane %v19407_v25, %v19399_v40 }
 0x3d0   :  { %10505 = vmatprep.subr.bf16.mxu0 %v17834_v31  ;;  %9350 = vmatpush1.bf16.msra.mxu1 %v17829_v32  ;;  %v17885_v31 = vld [vmem:[#allocation2 + $0x286c] ss:$112 sps:$4 sm:$0xff]  }
 0x3d1   :  { %9351 = vmatprep.subr.bf16.mxu1 %v17837_v34  ;;  %v16174_v32 = vadd.f32 %v19321_v41, %v1442_v27  ;;  %v17891_v34 = vld [vmem:[#allocation2 + $0x294c] ss:$112 sps:$4 sm:$0xff]   ;;  %v17895_v41 = vld [vmem:[#allocation2 + $0x2a28] ss:$112 sps:$4 sm:$0xff]  }
 0x3d2   :  { %v17919_v27 = vld [vmem:[%s21049_s3 + $0x60] ss:$8 sps:$4 sm:$0xff]  }
 0x3d3   :  { %10506 = vmatpush1.bf16.msra.mxu0 %v17832_v33  ;;  %v17883_v33 = vld [vmem:[#allocation2 + $0x2868] ss:$112 sps:$4 sm:$0xff]  }
 0x3d4   :  { %10507 = vmatprep.subr.bf16.mxu0 %v17840_v35  ;;  %9352 = vmatpush1.bf16.msra.mxu1 %v17835_v37  ;;  %v10736_v35 = vmax.f32 %v16174_v32, 0.0  ;;  %v17889_v37 = vld [vmem:[#allocation2 + $0x2948] ss:$112 sps:$4 sm:$0xff]  }
 0x3d5   :  { %9353 = vmatprep.subr.bf16.mxu1 %v17843_v42  ;;  %v17897_v42 = vld [vmem:[#allocation2 + $0x2a2c] ss:$112 sps:$4 sm:$0xff]  }
 0x3d7   :  { %10508 = vmatpush1.bf16.msra.mxu0 %v17838_v38  ;;  %v17892_v38 = vld [vmem:[%s21049_s3] ss:$8 sps:$4 sm:$0xff]  }
 0x3d8   :  { %10509 = vmatprep.subr.bf16.mxu0 %v17846_v47  ;;  %9354 = vmatpush1.bf16.msra.mxu1 %v17841_v52  ;;  %v17900_v47 = vld [vmem:[%s21049_s3 + $0x14] ss:$8 sps:$4 sm:$0xff]   ;;  %v10764_v52 = vpack.c.bf16 %v10736_v35, %v10736_v35 }
 0x3d9   :  { %9355 = vmatprep.subr.bf16.mxu1 %v17849_v55  ;;  %v17909_v55 = vld [vmem:[#allocation2 + $0x2a34] ss:$112 sps:$4 sm:$0xff]  }
 0x3db   :  { %10510 = vmatpush1.bf16.msra.mxu0 %v17844_v53  ;;  %v17898_v53 = vld [vmem:[%s21049_s3 + $0x10] ss:$8 sps:$4 sm:$0xff]  }
 0x3dc   :  { %10511 = vmatprep.subr.bf16.mxu0 %v17852_v56  ;;  %9356 = vmatpush1.bf16.msra.mxu1 %v17847_v57  ;;  %v17903_v56 = vld [vmem:[%s21049_s3 + $0x24] ss:$8 sps:$4 sm:$0xff]   ;;  %v17901_v57 = vld [vmem:[%s21049_s3 + $0x20] ss:$8 sps:$4 sm:$0xff]  }
 0x3dd   :  { %9357 = vmatprep.subr.bf16.mxu1 %v17855_v59 }
 0x3df   :  { %10512 = vmatpush1.bf16.msra.mxu0 %v17850_v58  ;;  %v17906_v58 = vld [vmem:[%s21049_s3 + $0x34] ss:$8 sps:$4 sm:$0xff]  }
 0x3e0   :  { %10513 = vmatprep.subr.bf16.mxu0 %v17858_v60  ;;  %9358 = vmatpush1.bf16.msra.mxu1 %v17853_v61  ;;  %v17904_v61 = vld [vmem:[%s21049_s3 + $0x30] ss:$8 sps:$4 sm:$0xff]  }
 0x3e1   :  { %9359 = vmatprep.subr.bf16.mxu1 %v17861_v63  ;;  %v17912_v63 = vld [vmem:[%s21049_s3 + $0x44] ss:$8 sps:$4 sm:$0xff]  }
 0x3e3   :  { %10514 = vmatpush1.bf16.msra.mxu0 %v17856_v62 }
 0x3e4   :  { %10515 = vmatprep.subr.bf16.mxu0 %v17864_v1  ;;  %9360 = vmatpush1.bf16.msra.mxu1 %v17859_v2  ;;  %v17907_v2 = vld [vmem:[#allocation2 + $0x2a30] ss:$112 sps:$4 sm:$0xff]  }
 0x3e5   :  { %9361 = vmatprep.subr.bf16.mxu1 %v17867_v4  ;;  %v17918_v4 = vld [vmem:[#allocation2 + $0x3c] ss:$112 sps:$4 sm:$0xff]  }
 0x3e7   :  { %10516 = vmatpush1.bf16.msra.mxu0 %v17862_v3  ;;  %v17910_v3 = vld [vmem:[%s21049_s3 + $0x40] ss:$8 sps:$4 sm:$0xff]  }
 0x3e8   :  { %10517 = vmatprep.subr.bf16.mxu0 %v17870_v5  ;;  %9362 = vmatpush1.bf16.msra.mxu1 %v17865_v7  ;;  %v19452_v5 = vld [vmem:[%s21048_s2 + $0x8] sm:$0xff] }
 0x3e9   :  { %9363 = vmatprep.subr.bf16.mxu1 %v17873_v11  ;;  %v19460_v11 = vsub.s32 0, %v19361_v44 }
 0x3eb   :  { %10518 = vmatpush1.bf16.msra.mxu0 %v17868_v8  ;;  %v17915_v8 = vld [vmem:[%s21049_s3 + $0x54] ss:$8 sps:$4 sm:$0xff]  }
 0x3ec   :  { %10519 = vmatprep.subr.bf16.mxu0 %v17876_v13  ;;  %9364 = vmatpush1.bf16.msra.mxu1 %v17871_v14 }
 0x3ed   :  { %9365 = vmatprep.subr.bf16.mxu1 %v17879_v19 }
 0x3ef   :  { %10520 = vmatpush1.bf16.msra.mxu0 %v17874_v15  ;;  %v1470_v15 = vrot.slane %v19452_v5, %v19460_v11 }
 0x3f0   :  { %10530 = vmatprep.subr.bf16.mxu0 %v17888_v20  ;;  %9366 = vmatpush1.bf16.msra.mxu1 %v17877_v21  ;;  %v17913_v20 = vld [vmem:[%s21049_s3 + $0x50] ss:$8 sps:$4 sm:$0xff]   ;;  %v1474_v21 = vrot.slane %v19452_v5, %v19399_v40 }
 0x3f1   :  { %9367 = vmatprep.subr.bf16.mxu1 %v17882_v22  ;;  %v17921_v22 = vld [vmem:[%s21049_s3 + $0x64] ss:$8 sps:$4 sm:$0xff]  }
 0x3f2   :  { %10522 = vmatmul.mubr.bf16.vlgmr.msra.gmra.mrb[20].mxu0 %v19287_v29 }
 0x3f3   :  { %10531 = vmatpush1.bf16.msra.mxu0 %v17886_v23  ;;  %10562 = vmatprep.mubr.bf16.mxu0 %v19183_v0  ;;  %v17916_v23 = vld [vmem:[#allocation2 + $0x38] ss:$112 sps:$4 sm:$0xff]  }
 0x3f4   :  { %13453 = vmatprep.subr.bf16.mxu0 %v17894_v43  ;;  %9368 = vmatpush1.bf16.msra.mxu1 %v17880_v30  ;;  %v16183_v43 = vadd.f32 %v19314_v26, %v1470_v15  ;;  %v17924_v30 = vld [vmem:[#allocation2 + $0x11c] ss:$112 sps:$4 sm:$0xff]  }
 0x3f5   :  { %9369 = vmatprep.subr.bf16.mxu1 %v17885_v31  ;;  %v16185_v31 = vadd.f32 %v19316_v28, %v1474_v21  ;;  %v17957_v15 = vld [vmem:[%s21049_s3 + $0xc4] ss:$8 sps:$4 sm:$0xff]  }
 0x3f6   :  { %v17960_v21 = vld [vmem:[#allocation2 + $0x65c] ss:$112 sps:$4 sm:$0xff]  }
 0x3f8   :  { %9370 = vmatpush1.bf16.msra.mxu1 %v17883_v33  ;;  %v17927_v33 = vld [vmem:[%s21049_s3 + $0x74] ss:$8 sps:$4 sm:$0xff]  }
 0x3f9   :  { %9371 = vmatprep.subr.bf16.mxu1 %v17891_v34 }
 0x3fc   :  { %9372 = vmatpush1.bf16.msra.mxu1 %v17889_v37 }
 0x3fd   :  { %9382 = vmatprep.subr.bf16.mxu1 %v17897_v42  ;;  %v17925_v42 = vld [vmem:[%s21049_s3 + $0x70] ss:$8 sps:$4 sm:$0xff]  }
 0x3fe   :  { %15654 = vmatmul.mubr.msk.bf16.vlgmr.msra.gmra.mrb[20].mxu0 %vm8435_vm0, %v19245_v10 }
 0x3ff   :  { %13454 = vmatpush1.bf16.msra.mxu0 %v17892_v38  ;;  %13485 = vmatprep.mubr.bf16.mxu0 %v10764_v52  ;;  %v17922_v38 = vld [vmem:[#allocation2 + $0x118] ss:$112 sps:$4 sm:$0xff]   ;;  %v17933_v52 = vld [vmem:[%s21049_s3 + $0x84] ss:$8 sps:$4 sm:$0xff]  }
 0x400   :  { %13455 = vmatprep.subr.bf16.mxu0 %v17900_v47  ;;  %9374 = vmatmul.mubr.bf16.vlgmr.msra.gmra.mrb[20].mxu1 %v19287_v29  ;;  %v17930_v47 = vld [vmem:[#allocation2 + $0x1fc] ss:$112 sps:$4 sm:$0xff]  }
 0x401   :  { %9383 = vmatpush1.bf16.msra.mxu1 %v17895_v41  ;;  %9414 = vmatprep.mubr.bf16.mxu1 %v19183_v0  ;;  %v17928_v41 = vld [vmem:[#allocation2 + $0x1f8] ss:$112 sps:$4 sm:$0xff]  }
 0x402   :  { %9546 = vmatprep.subr.bf16.mxu1 %v17909_v55  ;;  %v17936_v55 = vld [vmem:[#allocation2 + $0x2dc] ss:$112 sps:$4 sm:$0xff]  }
 0x403   :  { %13456 = vmatpush1.bf16.msra.mxu0 %v17898_v53  ;;  %v17931_v53 = vld [vmem:[%s21049_s3 + $0x80] ss:$8 sps:$4 sm:$0xff]  }
 0x404   :  { %13457 = vmatprep.subr.bf16.mxu0 %v17903_v56  ;;  %v17939_v56 = vld [vmem:[%s21049_s3 + $0x94] ss:$8 sps:$4 sm:$0xff]  }
 0x405   :  { %v19436_v59 = vpop.f32.mrb[16].mxu0 }
 0x406   :  { %v19438_v60 = vpop.f32.mrb[17].mxu0 }
 0x407   :  { %13458 = vmatpush1.bf16.msra.mxu0 %v17901_v57  ;;  %v10240_v62 = vpop.f32.mrb[18].mxu0  ;;  %v17934_v57 = vld [vmem:[#allocation2 + $0x2d8] ss:$112 sps:$4 sm:$0xff]  }
 0x408   :  { %13459 = vmatprep.subr.bf16.mxu0 %v17906_v58  ;;  %v10241_v1 = vpop.f32.mrb[19].mxu0  ;;  %v17937_v58 = vld [vmem:[%s21049_s3 + $0x90] ss:$8 sps:$4 sm:$0xff]   ;;  %v17945_v62 = vld [vmem:[%s21049_s3 + $0xa4] ss:$8 sps:$4 sm:$0xff]  }
 0x409   :  { %v17943_v1 = vld [vmem:[%s21049_s3 + $0xa0] ss:$8 sps:$4 sm:$0xff]  }
 0x40a   :  { %v19454_v7 = vpop.f32.mrb[12].mxu1 }
 0x40b   :  { %13460 = vmatpush1.bf16.msra.mxu0 %v17904_v61  ;;  %v19464_v13 = vpop.f32.mrb[13].mxu1  ;;  %v17942_v61 = vld [vmem:[#allocation2 + $0x3bc] ss:$112 sps:$4 sm:$0xff]  }
 0x40c   :  { %13461 = vmatprep.subr.bf16.mxu0 %v17912_v63  ;;  %15647 = vmatmul.mubr.msk.bf16.vlgmr.msra.gmra.mrb[20].mxu1 %vm8435_vm0, %v19245_v10  ;;  %v9092_v14 = vpop.f32.mrb[14].mxu1  ;;  %v17940_v63 = vld [vmem:[#allocation2 + $0x3b8] ss:$112 sps:$4 sm:$0xff]  }
 0x40d   :  { %9547 = vmatpush1.bf16.msra.mxu1 %v17907_v2  ;;  %9578 = vmatprep.mubr.bf16.mxu1 %v19183_v0  ;;  %v9093_v19 = vpop.f32.mrb[15].mxu1  ;;  %v17948_v2 = vld [vmem:[#allocation2 + $0x49c] ss:$112 sps:$4 sm:$0xff]  }
 0x40e   :  { %9587 = vmatprep.subr.bf16.mxu1 %v17918_v4  ;;  %v17946_v4 = vld [vmem:[#allocation2 + $0x498] ss:$112 sps:$4 sm:$0xff]   ;;  %v17954_v14 = vld [vmem:[#allocation2 + $0x57c] ss:$112 sps:$4 sm:$0xff]  }
 0x40f   :  { %13462 = vmatpush1.bf16.msra.mxu0 %v17910_v3  ;;  %v17951_v3 = vld [vmem:[%s21049_s3 + $0xb4] ss:$8 sps:$4 sm:$0xff]   ;;  %v17952_v19 = vld [vmem:[#allocation2 + $0x578] ss:$112 sps:$4 sm:$0xff]  }
 0x410   :  { %13463 = vmatprep.subr.bf16.mxu0 %v17915_v8  ;;  %v17949_v8 = vld [vmem:[%s21049_s3 + $0xb0] ss:$8 sps:$4 sm:$0xff]  }
 0x412   :  { %v9252_v32 = vpop.f32.mrb[16].mxu1 }
 0x413   :  { %13464 = vmatpush1.bf16.msra.mxu0 %v17913_v20  ;;  %v19485_v34 = vadd.f32 %v16183_v43, %v9252_v32  ;;  %v9254_v26 = vpop.f32.mrb[17].mxu1  ;;  %v17955_v20 = vld [vmem:[%s21049_s3 + $0xc0] ss:$8 sps:$4 sm:$0xff]   ;;  %v17969_v32 = vld [vmem:[%s21049_s3 + $0xe4] ss:$8 sps:$4 sm:$0xff]  }
 0x414   :  { %13465 = vmatprep.subr.bf16.mxu0 %v17921_v22  ;;  %15648 = vmatmul.mubr.msk.bf16.vlgmr.msra.gmra.mrb[24].mxu1 %vm8435_vm0, %v19245_v10  ;;  %v19489_v35 = vadd.f32 %v16185_v31, %v9254_v26  ;;  %v9256_v37 = vpop.f32.mrb[18].mxu1  ;;  %v17963_v22 = vld [vmem:[%s21049_s3 + $0xd4] ss:$8 sps:$4 sm:$0xff]   ;;  %v17958_v43 = vld [vmem:[#allocation2 + $0x658] ss:$112 sps:$4 sm:$0xff]   ;;  %v1438_v31 = vrot.slane %v19407_v25, %v19460_v11 }
 0x415   :  { %9588 = vmatpush1.bf16.msra.mxu1 %v17916_v23  ;;  %9619 = vmatprep.mubr.bf16.mxu1 %v19252_v51  ;;  %v9257_v28 = vpop.f32.mrb[19].mxu1  ;;  %v19529_v23 = vsub.s32 3, %v19361_v44  ;;  %v17964_v26 = vld [vmem:[#allocation2 + $0x738] ss:$112 sps:$4 sm:$0xff]  }
 0x416   :  { %9589 = vmatprep.subr.bf16.mxu1 %v17924_v30  ;;  %v17966_v30 = vld [vmem:[#allocation2 + $0x73c] ss:$112 sps:$4 sm:$0xff]   ;;  %v17967_v37 = vld [vmem:[%s21049_s3 + $0xe0] ss:$8 sps:$4 sm:$0xff]   ;;  %v16173_v28 = vadd.f32 %v19319_v39, %v1438_v31 }
 0x417   :  { %13466 = vmatpush1.bf16.msra.mxu0 %v17919_v27  ;;  %v17961_v27 = vld [vmem:[%s21049_s3 + $0xd0] ss:$8 sps:$4 sm:$0xff]   ;;  %v17981_v39 = vld [vmem:[%s21049_s3 + $0x104] ss:$8 sps:$4 sm:$0xff]  }
 0x418   :  { %13467 = vmatprep.subr.bf16.mxu0 %v17927_v33  ;;  %v1450_v33 = vrot.slane %v19407_v25, %v19529_v23  ;;  %v18008_v31 = vld [vmem:[#allocation2 + $0xd5c] ss:$112 sps:$4 sm:$0xff]  }
 0x419   :  { %9590 = vmatpush1.bf16.msra.mxu1 %v17922_v38  ;;  %v17972_v38 = vld [vmem:[#allocation2 + $0x81c] ss:$112 sps:$4 sm:$0xff]  }
 0x41a   :  { %9591 = vmatprep.subr.bf16.mxu1 %v17930_v47  ;;  %v16176_v47 = vadd.f32 %v19344_v50, %v1450_v33  ;;  %v17979_v50 = vld [vmem:[%s21049_s3 + $0x100] ss:$8 sps:$4 sm:$0xff]  }
 0x41b   :  { %13468 = vmatpush1.bf16.msra.mxu0 %v17925_v42  ;;  %v17975_v42 = vld [vmem:[%s21049_s3 + $0xf4] ss:$8 sps:$4 sm:$0xff]   ;;  %v18006_v33 = vld [vmem:[#allocation2 + $0xd58] ss:$112 sps:$4 sm:$0xff]  }
 0x41c   :  { %13469 = vmatprep.subr.bf16.mxu0 %v17933_v52  ;;  %v17970_v52 = vld [vmem:[#allocation2 + $0x818] ss:$112 sps:$4 sm:$0xff]  }
 0x41d   :  { %9592 = vmatpush1.bf16.msra.mxu1 %v17928_v41  ;;  %v17973_v41 = vld [vmem:[%s21049_s3 + $0xf0] ss:$8 sps:$4 sm:$0xff]  }
 0x41e   :  { %9593 = vmatprep.subr.bf16.mxu1 %v17936_v55  ;;  %v10735_v55 = vmax.f32 %v16173_v28, 0.0  ;;  %v18012_v28 = vld [vmem:[#allocation2 + $0xe38] ss:$112 sps:$4 sm:$0xff]  }
 0x41f   :  { %13470 = vmatpush1.bf16.msra.mxu0 %v17931_v53  ;;  %v17978_v53 = vld [vmem:[#allocation2 + $0x8fc] ss:$112 sps:$4 sm:$0xff]  }
 0x420   :  { %13471 = vmatprep.subr.bf16.mxu0 %v17939_v56  ;;  %v10738_v56 = vmax.f32 %v16176_v47, 0.0  ;;  %v18020_v47 = vld [vmem:[#allocation2 + $0xf1c] ss:$112 sps:$4 sm:$0xff]  }
 0x421   :  { %9594 = vmatpush1.bf16.msra.mxu1 %v17934_v57  ;;  %v17976_v57 = vld [vmem:[#allocation2 + $0x8f8] ss:$112 sps:$4 sm:$0xff]  }
 0x422   :  { %9595 = vmatprep.subr.bf16.mxu1 %v17942_v61  ;;  %v17984_v61 = vld [vmem:[#allocation2 + $0x9dc] ss:$112 sps:$4 sm:$0xff]  }
 0x423   :  { %13472 = vmatpush1.bf16.msra.mxu0 %v17937_v58  ;;  %v10763_v58 = vpack.c.bf16 %v10735_v55, %v10735_v55  ;;  %v18026_v55 = vld [vmem:[#allocation2 + $0xffc] ss:$112 sps:$4 sm:$0xff]  }
 0x424   :  { %13473 = vmatprep.subr.bf16.mxu0 %v17945_v62  ;;  %v17987_v62 = vld [vmem:[%s21049_s3 + $0x114] ss:$8 sps:$4 sm:$0xff]  }
 0x425   :  { %9596 = vmatpush1.bf16.msra.mxu1 %v17940_v63  ;;  %v10766_v63 = vpack.c.bf16 %v10738_v56, %v10738_v56  ;;  %v18024_v56 = vld [vmem:[#allocation2 + $0xff8] ss:$112 sps:$4 sm:$0xff]  }
 0x426   :  { %9597 = vmatprep.subr.bf16.mxu1 %v17948_v2  ;;  %v17985_v2 = vld [vmem:[%s21049_s3 + $0x110] ss:$8 sps:$4 sm:$0xff]  }
 0x427   :  { %13474 = vmatpush1.bf16.msra.mxu0 %v17943_v1  ;;  %v17982_v1 = vld [vmem:[#allocation2 + $0x9d8] ss:$112 sps:$4 sm:$0xff]  }
 0x428   :  { %13475 = vmatprep.subr.bf16.mxu0 %v17951_v3  ;;  %v17990_v3 = vld [vmem:[#allocation2 + $0xabc] ss:$112 sps:$4 sm:$0xff]  }
 0x429   :  { %9598 = vmatpush1.bf16.msra.mxu1 %v17946_v4  ;;  %v17993_v4 = vld [vmem:[%s21049_s3 + $0x124] ss:$8 sps:$4 sm:$0xff]  }
 0x42a   :  { %9599 = vmatprep.subr.bf16.mxu1 %v17954_v14  ;;  %v17991_v14 = vld [vmem:[%s21049_s3 + $0x120] ss:$8 sps:$4 sm:$0xff]  }
 0x42b   :  { %13476 = vmatpush1.bf16.msra.mxu0 %v17949_v8  ;;  %v17988_v8 = vld [vmem:[#allocation2 + $0xab8] ss:$112 sps:$4 sm:$0xff]  }
 0x42c   :  { %13477 = vmatprep.subr.bf16.mxu0 %v17957_v15  ;;  %v17996_v15 = vld [vmem:[#allocation2 + $0xb9c] ss:$112 sps:$4 sm:$0xff]  }
 0x42d   :  { %9600 = vmatpush1.bf16.msra.mxu1 %v17952_v19  ;;  %v17999_v19 = vld [vmem:[%s21049_s3 + $0x134] ss:$8 sps:$4 sm:$0xff]  }
 0x42e   :  { %9601 = vmatprep.subr.bf16.mxu1 %v17960_v21  ;;  %v17997_v21 = vld [vmem:[%s21049_s3 + $0x130] ss:$8 sps:$4 sm:$0xff]  }
 0x42f   :  { %13478 = vmatpush1.bf16.msra.mxu0 %v17955_v20  ;;  %v17994_v20 = vld [vmem:[#allocation2 + $0xb98] ss:$112 sps:$4 sm:$0xff]  }
 0x430   :  { %13479 = vmatprep.subr.bf16.mxu0 %v17963_v22  ;;  %v18002_v22 = vld [vmem:[#allocation2 + $0xc7c] ss:$112 sps:$4 sm:$0xff]  }
 0x431   :  { %9602 = vmatpush1.bf16.msra.mxu1 %v17958_v43  ;;  %v18005_v43 = vld [vmem:[%s21049_s3 + $0x144] ss:$8 sps:$4 sm:$0xff]  }
 0x432   :  { %9603 = vmatprep.subr.bf16.mxu1 %v17966_v30  ;;  %v18003_v30 = vld [vmem:[%s21049_s3 + $0x140] ss:$8 sps:$4 sm:$0xff]  }
 0x433   :  { %13480 = vmatpush1.bf16.msra.mxu0 %v17961_v27  ;;  %v18000_v27 = vld [vmem:[#allocation2 + $0xc78] ss:$112 sps:$4 sm:$0xff]  }
 0x434   :  { %13481 = vmatprep.subr.bf16.mxu0 %v17969_v32  ;;  %v18011_v32 = vld [vmem:[%s21049_s3 + $0x154] ss:$8 sps:$4 sm:$0xff]  }
 0x435   :  { %9604 = vmatpush1.bf16.msra.mxu1 %v17964_v26  ;;  %v18009_v26 = vld [vmem:[%s21049_s3 + $0x150] ss:$8 sps:$4 sm:$0xff]  }
 0x436   :  { %9605 = vmatprep.subr.bf16.mxu1 %v17972_v38  ;;  %v18017_v38 = vld [vmem:[%s21049_s3 + $0x164] ss:$8 sps:$4 sm:$0xff]  }
 0x437   :  { %13482 = vmatpush1.bf16.msra.mxu0 %v17967_v37  ;;  %v18014_v37 = vld [vmem:[#allocation2 + $0xe3c] ss:$112 sps:$4 sm:$0xff]  }
 0x438   :  { %13483 = vmatprep.subr.bf16.mxu0 %v17975_v42  ;;  %v18015_v42 = vld [vmem:[%s21049_s3 + $0x160] ss:$8 sps:$4 sm:$0xff]  }
 0x439   :  { %9606 = vmatpush1.bf16.msra.mxu1 %v17970_v52  ;;  %v18023_v52 = vld [vmem:[%s21049_s3 + $0x174] ss:$8 sps:$4 sm:$0xff]  }
 0x43a   :  { %9607 = vmatprep.subr.bf16.mxu1 %v17978_v53  ;;  %v18021_v53 = vld [vmem:[%s21049_s3 + $0x170] ss:$8 sps:$4 sm:$0xff]  }
 0x43b   :  { %13484 = vmatpush1.bf16.msra.mxu0 %v17973_v41  ;;  %v18018_v41 = vld [vmem:[#allocation2 + $0xf18] ss:$112 sps:$4 sm:$0xff]  }
 0x43c   :  { %13494 = vmatprep.subr.bf16.mxu0 %v17981_v39  ;;  %v18029_v39 = vld [vmem:[%s21049_s3 + $0x184] ss:$8 sps:$4 sm:$0xff]  }
 0x43d   :  { %9608 = vmatpush1.bf16.msra.mxu1 %v17976_v57  ;;  %v18027_v57 = vld [vmem:[%s21049_s3 + $0x180] ss:$8 sps:$4 sm:$0xff]  }
 0x43e   :  { %13486 = vmatmul.mubr.bf16.vlgmr.msra.gmra.mrb[24].mxu0 %v10763_v58  ;;  %9609 = vmatprep.subr.bf16.mxu1 %v17984_v61  ;;  %v18035_v58 = vld [vmem:[%s21049_s3 + $0x194] ss:$8 sps:$4 sm:$0xff]   ;;  %v18030_v61 = vld [vmem:[#allocation2 + $0x10d8] ss:$112 sps:$4 sm:$0xff]  }
 0x43f   :  { %13495 = vmatpush1.bf16.msra.mxu0 %v17979_v50  ;;  %13526 = vmatprep.mubr.bf16.mxu0 %v10766_v63  ;;  %v18032_v50 = vld [vmem:[#allocation2 + $0x10dc] ss:$112 sps:$4 sm:$0xff]  }
 0x440   :  { %13496 = vmatprep.subr.bf16.mxu0 %v17987_v62  ;;  %v18033_v62 = vld [vmem:[%s21049_s3 + $0x190] ss:$8 sps:$4 sm:$0xff]   ;;  %v18038_v63 = vld [vmem:[#allocation2 + $0x11bc] ss:$112 sps:$4 sm:$0xff]  }
 0x441   :  { %9610 = vmatpush1.bf16.msra.mxu1 %v17982_v1  ;;  %v18041_v1 = vld [vmem:[%s21049_s3 + $0x1a4] ss:$8 sps:$4 sm:$0xff]  }
 0x442   :  { %9611 = vmatprep.subr.bf16.mxu1 %v17990_v3  ;;  %v18039_v3 = vld [vmem:[%s21049_s3 + $0x1a0] ss:$8 sps:$4 sm:$0xff]  }
 0x443   :  { %13497 = vmatpush1.bf16.msra.mxu0 %v17985_v2  ;;  %v18036_v2 = vld [vmem:[#allocation2 + $0x11b8] ss:$112 sps:$4 sm:$0xff]  }
 0x444   :  { %13498 = vmatprep.subr.bf16.mxu0 %v17993_v4  ;;  %v18044_v4 = vld [vmem:[#allocation2 + $0x129c] ss:$112 sps:$4 sm:$0xff]  }
 0x445   :  { %9612 = vmatpush1.bf16.msra.mxu1 %v17988_v8  ;;  %v18047_v8 = vld [vmem:[%s21049_s3 + $0x1b4] ss:$8 sps:$4 sm:$0xff]  }
 0x446   :  { %9613 = vmatprep.subr.bf16.mxu1 %v17996_v15  ;;  %v18045_v15 = vld [vmem:[%s21049_s3 + $0x1b0] ss:$8 sps:$4 sm:$0xff]  }
 0x447   :  { %13499 = vmatpush1.bf16.msra.mxu0 %v17991_v14  ;;  %v18042_v14 = vld [vmem:[#allocation2 + $0x1298] ss:$112 sps:$4 sm:$0xff]  }
 0x448   :  { %13500 = vmatprep.subr.bf16.mxu0 %v17999_v19  ;;  %v18050_v19 = vld [vmem:[#allocation2 + $0x137c] ss:$112 sps:$4 sm:$0xff]  }
 0x449   :  { %9614 = vmatpush1.bf16.msra.mxu1 %v17994_v20  ;;  %v18053_v20 = vld [vmem:[%s21049_s3 + $0x1c4] ss:$8 sps:$4 sm:$0xff]  }
 0x44a   :  { %9615 = vmatprep.subr.bf16.mxu1 %v18002_v22  ;;  %v18051_v22 = vld [vmem:[%s21049_s3 + $0x1c0] ss:$8 sps:$4 sm:$0xff]  }
 0x44b   :  { %13501 = vmatpush1.bf16.msra.mxu0 %v17997_v21  ;;  %v18048_v21 = vld [vmem:[#allocation2 + $0x1378] ss:$112 sps:$4 sm:$0xff]  }
 0x44c   :  { %13502 = vmatprep.subr.bf16.mxu0 %v18005_v43  ;;  %v18056_v43 = vld [vmem:[#allocation2 + $0x145c] ss:$112 sps:$4 sm:$0xff]  }
 0x44d   :  { %9616 = vmatpush1.bf16.msra.mxu1 %v18000_v27  ;;  %v19633_v27 = vsub.s32 2, %v19361_v44 }
 0x44e   :  { %9617 = vmatprep.subr.bf16.mxu1 %v18008_v31  ;;  %v18054_v31 = vld [vmem:[#allocation2 + $0x1458] ss:$112 sps:$4 sm:$0xff]  }
 0x44f   :  { %13503 = vmatpush1.bf16.msra.mxu0 %v18003_v30  ;;  %v18059_v30 = vld [vmem:[%s21049_s3 + $0x1d4] ss:$8 sps:$4 sm:$0xff]  }
 0x450   :  { %13504 = vmatprep.subr.bf16.mxu0 %v18011_v32  ;;  %v18057_v32 = vld [vmem:[%s21049_s3 + $0x1d0] ss:$8 sps:$4 sm:$0xff]  }
 0x451   :  { %9618 = vmatpush1.bf16.msra.mxu1 %v18006_v33  ;;  %v18062_v33 = vld [vmem:[#allocation2 + $0x153c] ss:$112 sps:$4 sm:$0xff]  }
 0x452   :  { %9628 = vmatprep.subr.bf16.mxu1 %v18014_v37  ;;  %v18065_v37 = vld [vmem:[%s21049_s3 + $0x1e4] ss:$8 sps:$4 sm:$0xff]  }
 0x453   :  { %13505 = vmatpush1.bf16.msra.mxu0 %v18009_v26  ;;  %v1446_v26 = vrot.slane %v19407_v25, %v19633_v27 }
 0x454   :  { %13506 = vmatprep.subr.bf16.mxu0 %v18017_v38  ;;  %9620 = vmatmul.mubr.bf16.vlgmr.msra.gmra.mrb[28].mxu1 %v19259_v9  ;;  %v18060_v38 = vld [vmem:[#allocation2 + $0x1538] ss:$112 sps:$4 sm:$0xff]  }
 0x455   :  { %9629 = vmatpush1.bf16.msra.mxu1 %v18012_v28  ;;  %9660 = vmatprep.mubr.bf16.mxu1 %v19266_v36  ;;  %v18063_v28 = vld [vmem:[%s21049_s3 + $0x1e0] ss:$8 sps:$4 sm:$0xff]  }
 0x456   :  { %9630 = vmatprep.subr.bf16.mxu1 %v18020_v47  ;;  %v16175_v47 = vadd.f32 %v19342_v48, %v1446_v26  ;;  %v18077_v48 = vld [vmem:[%s21049_s3 + $0x204] ss:$8 sps:$4 sm:$0xff]   ;;  %v18105_v26 = vld [vmem:[%s21049_s3 + $0x250] ss:$8 sps:$4 sm:$0xff]  }
 0x457   :  { %13507 = vmatpush1.bf16.msra.mxu0 %v18015_v42  ;;  %v18068_v42 = vld [vmem:[#allocation2 + $0x161c] ss:$112 sps:$4 sm:$0xff]  }
 0x458   :  { %13508 = vmatprep.subr.bf16.mxu0 %v18023_v52  ;;  %v18071_v52 = vld [vmem:[%s21049_s3 + $0x1f4] ss:$8 sps:$4 sm:$0xff]  }
 0x459   :  { %9631 = vmatpush1.bf16.msra.mxu1 %v18018_v41  ;;  %v18066_v41 = vld [vmem:[#allocation2 + $0x1618] ss:$112 sps:$4 sm:$0xff]  }
 0x45a   :  { %9632 = vmatprep.subr.bf16.mxu1 %v18026_v55  ;;  %v18074_v55 = vld [vmem:[#allocation2 + $0x16fc] ss:$112 sps:$4 sm:$0xff]  }
 0x45b   :  { %13509 = vmatpush1.bf16.msra.mxu0 %v18021_v53  ;;  %v18069_v53 = vld [vmem:[%s21049_s3 + $0x1f0] ss:$8 sps:$4 sm:$0xff]  }
 0x45c   :  { %13510 = vmatprep.subr.bf16.mxu0 %v18029_v39  ;;  %v10737_v39 = vmax.f32 %v16175_v47, 0.0  ;;  %v18116_v47 = vld [vmem:[#allocation2 + $0x1d1c] ss:$112 sps:$4 sm:$0xff]  }
 0x45d   :  { %9633 = vmatpush1.bf16.msra.mxu1 %v18024_v56  ;;  %v10740_v56 = vmax.f32 %v19388_v12, 0.0  ;;  %v18081_v12 = vld [vmem:[%s21049_s3 + $0x210] ss:$8 sps:$4 sm:$0xff]  }
 0x45e   :  { %9634 = vmatprep.subr.bf16.mxu1 %v18032_v50  ;;  %v18075_v50 = vld [vmem:[%s21049_s3 + $0x200] ss:$8 sps:$4 sm:$0xff]  }
 0x45f   :  { %13511 = vmatpush1.bf16.msra.mxu0 %v18027_v57  ;;  %v18072_v57 = vld [vmem:[#allocation2 + $0x16f8] ss:$112 sps:$4 sm:$0xff]  }
 0x460   :  { %13512 = vmatprep.subr.bf16.mxu0 %v18035_v58  ;;  %v10765_v58 = vpack.c.bf16 %v10737_v39, %v10737_v39  ;;  %v18125_v39 = vld [vmem:[%s21049_s3 + $0x284] ss:$8 sps:$4 sm:$0xff]  }
 0x461   :  { %9635 = vmatpush1.bf16.msra.mxu1 %v18030_v61  ;;  %v18080_v61 = vld [vmem:[#allocation2 + $0x17dc] ss:$112 sps:$4 sm:$0xff]  }
 0x462   :  { %9636 = vmatprep.subr.bf16.mxu1 %v18038_v63  ;;  %v10768_v63 = vpack.c.bf16 %v10740_v56, %v10740_v56  ;;  %v18123_v56 = vld [vmem:[%s21049_s3 + $0x280] ss:$8 sps:$4 sm:$0xff]  }
 0x463   :  { %13513 = vmatpush1.bf16.msra.mxu0 %v18033_v62  ;;  %v18083_v62 = vld [vmem:[%s21049_s3 + $0x214] ss:$8 sps:$4 sm:$0xff]  }
 0x464   :  { %13514 = vmatprep.subr.bf16.mxu0 %v18041_v1  ;;  %v18078_v1 = vld [vmem:[#allocation2 + $0x17d8] ss:$112 sps:$4 sm:$0xff]  }
 0x465   :  { %9637 = vmatpush1.bf16.msra.mxu1 %v18036_v2  ;;  %v18086_v2 = vld [vmem:[#allocation2 + $0x18bc] ss:$112 sps:$4 sm:$0xff]  }
 0x466   :  { %9638 = vmatprep.subr.bf16.mxu1 %v18044_v4  ;;  %v18084_v4 = vld [vmem:[#allocation2 + $0x18b8] ss:$112 sps:$4 sm:$0xff]  }
 0x467   :  { %13515 = vmatpush1.bf16.msra.mxu0 %v18039_v3  ;;  %v18089_v3 = vld [vmem:[%s21049_s3 + $0x224] ss:$8 sps:$4 sm:$0xff]  }
 0x468   :  { %13516 = vmatprep.subr.bf16.mxu0 %v18047_v8  ;;  %v18087_v8 = vld [vmem:[%s21049_s3 + $0x220] ss:$8 sps:$4 sm:$0xff]  }
 0x469   :  { %9639 = vmatpush1.bf16.msra.mxu1 %v18042_v14  ;;  %v18092_v14 = vld [vmem:[#allocation2 + $0x199c] ss:$112 sps:$4 sm:$0xff]  }
 0x46a   :  { %9640 = vmatprep.subr.bf16.mxu1 %v18050_v19  ;;  %v18090_v19 = vld [vmem:[#allocation2 + $0x1998] ss:$112 sps:$4 sm:$0xff]  }
 0x46b   :  { %13517 = vmatpush1.bf16.msra.mxu0 %v18045_v15  ;;  %v18095_v15 = vld [vmem:[%s21049_s3 + $0x234] ss:$8 sps:$4 sm:$0xff]  }
 0x46c   :  { %13518 = vmatprep.subr.bf16.mxu0 %v18053_v20  ;;  %v18093_v20 = vld [vmem:[%s21049_s3 + $0x230] ss:$8 sps:$4 sm:$0xff]  }
 0x46d   :  { %9641 = vmatpush1.bf16.msra.mxu1 %v18048_v21  ;;  %v18098_v21 = vld [vmem:[#allocation2 + $0x1a7c] ss:$112 sps:$4 sm:$0xff]  }
 0x46e   :  { %9642 = vmatprep.subr.bf16.mxu1 %v18056_v43  ;;  %v18096_v43 = vld [vmem:[#allocation2 + $0x1a78] ss:$112 sps:$4 sm:$0xff]  }
 0x46f   :  { %13519 = vmatpush1.bf16.msra.mxu0 %v18051_v22  ;;  %v18101_v22 = vld [vmem:[%s21049_s3 + $0x244] ss:$8 sps:$4 sm:$0xff]  }
 0x470   :  { %13520 = vmatprep.subr.bf16.mxu0 %v18059_v30  ;;  %v18099_v30 = vld [vmem:[%s21049_s3 + $0x240] ss:$8 sps:$4 sm:$0xff]  }
 0x471   :  { %9643 = vmatpush1.bf16.msra.mxu1 %v18054_v31  ;;  %v18104_v31 = vld [vmem:[#allocation2 + $0x1b5c] ss:$112 sps:$4 sm:$0xff]  }
 0x472   :  { %9644 = vmatprep.subr.bf16.mxu1 %v18062_v33  ;;  %v18102_v33 = vld [vmem:[#allocation2 + $0x1b58] ss:$112 sps:$4 sm:$0xff]  }
 0x473   :  { %13521 = vmatpush1.bf16.msra.mxu0 %v18057_v32  ;;  %v18107_v32 = vld [vmem:[%s21049_s3 + $0x254] ss:$8 sps:$4 sm:$0xff]  }
 0x474   :  { %13522 = vmatprep.subr.bf16.mxu0 %v18065_v37  ;;  %v18110_v37 = vld [vmem:[#allocation2 + $0x1c3c] ss:$112 sps:$4 sm:$0xff]  }
 0x475   :  { %9645 = vmatpush1.bf16.msra.mxu1 %v18060_v38  ;;  %v18113_v38 = vld [vmem:[%s21049_s3 + $0x264] ss:$8 sps:$4 sm:$0xff]  }
 0x476   :  { %9646 = vmatprep.subr.bf16.mxu1 %v18068_v42  ;;  %v18111_v42 = vld [vmem:[%s21049_s3 + $0x260] ss:$8 sps:$4 sm:$0xff]  }
 0x477   :  { %13523 = vmatpush1.bf16.msra.mxu0 %v18063_v28  ;;  %v18108_v28 = vld [vmem:[#allocation2 + $0x1c38] ss:$112 sps:$4 sm:$0xff]  }
 0x478   :  { %13524 = vmatprep.subr.bf16.mxu0 %v18071_v52  ;;  %v18119_v52 = vld [vmem:[%s21049_s3 + $0x274] ss:$8 sps:$4 sm:$0xff]  }
 0x479   :  { %9647 = vmatpush1.bf16.msra.mxu1 %v18066_v41  ;;  %v18114_v41 = vld [vmem:[#allocation2 + $0x1d18] ss:$112 sps:$4 sm:$0xff]  }
 0x47a   :  { %9648 = vmatprep.subr.bf16.mxu1 %v18074_v55  ;;  %v18122_v55 = vld [vmem:[#allocation2 + $0x1dfc] ss:$112 sps:$4 sm:$0xff]  }
 0x47b   :  { %13525 = vmatpush1.bf16.msra.mxu0 %v18069_v53  ;;  %v18117_v53 = vld [vmem:[%s21049_s3 + $0x270] ss:$8 sps:$4 sm:$0xff]  }
 0x47c   :  { %13535 = vmatprep.subr.bf16.mxu0 %v18077_v48  ;;  %v18120_v48 = vld [vmem:[#allocation2 + $0x1df8] ss:$112 sps:$4 sm:$0xff]  }
 0x47d   :  { %9649 = vmatpush1.bf16.msra.mxu1 %v18072_v57  ;;  %v18128_v57 = vld [vmem:[#allocation2 + $0x1edc] ss:$112 sps:$4 sm:$0xff]  }
 0x47e   :  { %13527 = vmatmul.mubr.bf16.vlgmr.msra.gmra.mrb[24].mxu0 %v10765_v58  ;;  %9650 = vmatprep.subr.bf16.mxu1 %v18080_v61  ;;  %v18126_v58 = vld [vmem:[#allocation2 + $0x1ed8] ss:$112 sps:$4 sm:$0xff]  }
 0x47f   :  { %13536 = vmatpush1.bf16.msra.mxu0 %v18075_v50  ;;  %13567 = vmatprep.mubr.bf16.mxu0 %v10768_v63  ;;  %v18131_v50 = vld [vmem:[%s21049_s3 + $0x294] ss:$8 sps:$4 sm:$0xff]   ;;  %v18129_v61 = vld [vmem:[%s21049_s3 + $0x290] ss:$8 sps:$4 sm:$0xff]   ;;  %v18137_v63 = vld [vmem:[%s21049_s3 + $0x2a4] ss:$8 sps:$4 sm:$0xff]  }
 0x480   :  { %13537 = vmatprep.subr.bf16.mxu0 %v18083_v62  ;;  %v18134_v62 = vld [vmem:[#allocation2 + $0x1fbc] ss:$112 sps:$4 sm:$0xff]  }
 0x481   :  { %9651 = vmatpush1.bf16.msra.mxu1 %v18078_v1  ;;  %v18132_v1 = vld [vmem:[#allocation2 + $0x1fb8] ss:$112 sps:$4 sm:$0xff]  }
 0x482   :  { %9652 = vmatprep.subr.bf16.mxu1 %v18086_v2  ;;  %v18140_v2 = vld [vmem:[#allocation2 + $0x209c] ss:$112 sps:$4 sm:$0xff]  }
 0x483   :  { %13538 = vmatpush1.bf16.msra.mxu0 %v18081_v12  ;;  %v18135_v12 = vld [vmem:[%s21049_s3 + $0x2a0] ss:$8 sps:$4 sm:$0xff]  }
 0x484   :  { %13539 = vmatprep.subr.bf16.mxu0 %v18089_v3  ;;  %v18143_v3 = vld [vmem:[%s21049_s3 + $0x2b4] ss:$8 sps:$4 sm:$0xff]  }
 0x485   :  { %9653 = vmatpush1.bf16.msra.mxu1 %v18084_v4  ;;  %v18138_v4 = vld [vmem:[#allocation2 + $0x2098] ss:$112 sps:$4 sm:$0xff]  }
 0x486   :  { %9654 = vmatprep.subr.bf16.mxu1 %v18092_v14  ;;  %v18146_v14 = vld [vmem:[#allocation2 + $0x217c] ss:$112 sps:$4 sm:$0xff]  }
 0x487   :  { %13540 = vmatpush1.bf16.msra.mxu0 %v18087_v8  ;;  %v18141_v8 = vld [vmem:[%s21049_s3 + $0x2b0] ss:$8 sps:$4 sm:$0xff]  }
 0x488   :  { %13541 = vmatprep.subr.bf16.mxu0 %v18095_v15  ;;  %v18149_v15 = vld [vmem:[%s21049_s3 + $0x2c4] ss:$8 sps:$4 sm:$0xff]  }
 0x489   :  { %9655 = vmatpush1.bf16.msra.mxu1 %v18090_v19  ;;  %v18144_v19 = vld [vmem:[#allocation2 + $0x2178] ss:$112 sps:$4 sm:$0xff]  }
 0x48a   :  { %9656 = vmatprep.subr.bf16.mxu1 %v18098_v21  ;;  %v18152_v21 = vld [vmem:[#allocation2 + $0x225c] ss:$112 sps:$4 sm:$0xff]  }
 0x48b   :  { %13542 = vmatpush1.bf16.msra.mxu0 %v18093_v20  ;;  %v18147_v20 = vld [vmem:[%s21049_s3 + $0x2c0] ss:$8 sps:$4 sm:$0xff]  }
 0x48c   :  { %13543 = vmatprep.subr.bf16.mxu0 %v18101_v22  ;;  %v18155_v22 = vld [vmem:[%s21049_s3 + $0x2d4] ss:$8 sps:$4 sm:$0xff]  }
 0x48d   :  { %9657 = vmatpush1.bf16.msra.mxu1 %v18096_v43  ;;  %v19741_v43 = vsub.s32 7, %v19361_v44 }
 0x48e   :  { %9658 = vmatprep.subr.bf16.mxu1 %v18104_v31  ;;  %v18153_v31 = vld [vmem:[%s21049_s3 + $0x2d0] ss:$8 sps:$4 sm:$0xff]  }
 0x48f   :  { %13544 = vmatpush1.bf16.msra.mxu0 %v18099_v30  ;;  %v18150_v30 = vld [vmem:[#allocation2 + $0x2258] ss:$112 sps:$4 sm:$0xff]  }
 0x490   :  { %13545 = vmatprep.subr.bf16.mxu0 %v18107_v32  ;;  %v18158_v32 = vld [vmem:[#allocation2 + $0x233c] ss:$112 sps:$4 sm:$0xff]  }
 0x491   :  { %9659 = vmatpush1.bf16.msra.mxu1 %v18102_v33  ;;  %v18161_v33 = vld [vmem:[%s21049_s3 + $0x2e4] ss:$8 sps:$4 sm:$0xff]  }
 0x492   :  { %9669 = vmatprep.subr.bf16.mxu1 %v18110_v37  ;;  %v18156_v37 = vld [vmem:[#allocation2 + $0x2338] ss:$112 sps:$4 sm:$0xff]  }
 0x493   :  { %13546 = vmatpush1.bf16.msra.mxu0 %v18105_v26  ;;  %v1466_v26 = vrot.slane %v19407_v25, %v19741_v43  ;;  %v18165_v25 = vld [vmem:[%s21049_s3 + $0x2f0] ss:$8 sps:$4 sm:$0xff]  }
 0x494   :  { %13547 = vmatprep.subr.bf16.mxu0 %v18113_v38  ;;  %9661 = vmatmul.mubr.bf16.vlgmr.msra.gmra.mrb[28].mxu1 %v19273_v18  ;;  %v18159_v38 = vld [vmem:[%s21049_s3 + $0x2e0] ss:$8 sps:$4 sm:$0xff]  }
 0x495   :  { %9670 = vmatpush1.bf16.msra.mxu1 %v18108_v28  ;;  %9701 = vmatprep.mubr.bf16.mxu1 %v19278_v24  ;;  %v18164_v28 = vld [vmem:[#allocation2 + $0x241c] ss:$112 sps:$4 sm:$0xff]  }
 0x496   :  { %9671 = vmatprep.subr.bf16.mxu1 %v18116_v47  ;;  %v16182_v47 = vadd.f32 %v19464_v13, %v1466_v26  ;;  %v18171_v13 = vld [vmem:[%s21049_s3 + $0x300] ss:$8 sps:$4 sm:$0xff]  }
 0x497   :  { %13548 = vmatpush1.bf16.msra.mxu0 %v18111_v42  ;;  %v18167_v42 = vld [vmem:[%s21049_s3 + $0x2f4] ss:$8 sps:$4 sm:$0xff]  }
 0x498   :  { %13549 = vmatprep.subr.bf16.mxu0 %v18119_v52  ;;  %v18162_v52 = vld [vmem:[#allocation2 + $0x2418] ss:$112 sps:$4 sm:$0xff]  }
 0x499   :  { %9672 = vmatpush1.bf16.msra.mxu1 %v18114_v41  ;;  %v18170_v41 = vld [vmem:[#allocation2 + $0x24fc] ss:$112 sps:$4 sm:$0xff]  }
 0x49a   :  { %9673 = vmatprep.subr.bf16.mxu1 %v18122_v55  ;;  %v18173_v55 = vld [vmem:[%s21049_s3 + $0x304] ss:$8 sps:$4 sm:$0xff]  }
 0x49b   :  { %13550 = vmatpush1.bf16.msra.mxu0 %v18117_v53  ;;  %v10739_v53 = vmax.f32 %v19385_v6, 0.0  ;;  %v18179_v6 = vld [vmem:[%s21049_s3 + $0x314] ss:$8 sps:$4 sm:$0xff]  }
 0x49c   :  { %13551 = vmatprep.subr.bf16.mxu0 %v18125_v39  ;;  %v10742_v39 = vmax.f32 %v16182_v47, 0.0 }
 0x49d   :  { %9674 = vmatpush1.bf16.msra.mxu1 %v18120_v48  ;;  %v18168_v48 = vld [vmem:[#allocation2 + $0x24f8] ss:$112 sps:$4 sm:$0xff]  }
 0x49e   :  { %9675 = vmatprep.subr.bf16.mxu1 %v18128_v57  ;;  %v18176_v57 = vld [vmem:[#allocation2 + $0x25dc] ss:$112 sps:$4 sm:$0xff]  }
 0x49f   :  { %13552 = vmatpush1.bf16.msra.mxu0 %v18123_v56  ;;  %v10767_v56 = vpack.c.bf16 %v10739_v53, %v10739_v53  ;;  %v18215_v53 = vld [vmem:[%s21049_s3 + $0x384] ss:$8 sps:$4 sm:$0xff]  }
 0x4a0   :  { %13553 = vmatprep.subr.bf16.mxu0 %v18131_v50  ;;  %v10770_v50 = vpack.c.bf16 %v10742_v39, %v10742_v39  ;;  %v18221_v39 = vld [vmem:[%s21049_s3 + $0x394] ss:$8 sps:$4 sm:$0xff]  }
 0x4a1   :  { %9676 = vmatpush1.bf16.msra.mxu1 %v18126_v58  ;;  %v18174_v58 = vld [vmem:[#allocation2 + $0x25d8] ss:$112 sps:$4 sm:$0xff]  }
 0x4a2   :  { %9677 = vmatprep.subr.bf16.mxu1 %v18134_v62  ;;  %v18182_v62 = vld [vmem:[#allocation2 + $0x26bc] ss:$112 sps:$4 sm:$0xff]  }
 0x4a3   :  { %13554 = vmatpush1.bf16.msra.mxu0 %v18129_v61  ;;  %v18177_v61 = vld [vmem:[%s21049_s3 + $0x310] ss:$8 sps:$4 sm:$0xff]  }
 0x4a4   :  { %13555 = vmatprep.subr.bf16.mxu0 %v18137_v63  ;;  %v18185_v63 = vld [vmem:[%s21049_s3 + $0x324] ss:$8 sps:$4 sm:$0xff]  }
 0x4a5   :  { %9678 = vmatpush1.bf16.msra.mxu1 %v18132_v1  ;;  %v18180_v1 = vld [vmem:[#allocation2 + $0x26b8] ss:$112 sps:$4 sm:$0xff]  }
 0x4a6   :  { %9679 = vmatprep.subr.bf16.mxu1 %v18140_v2  ;;  %v18188_v2 = vld [vmem:[#allocation2 + $0x279c] ss:$112 sps:$4 sm:$0xff]  }
 0x4a7   :  { %13556 = vmatpush1.bf16.msra.mxu0 %v18135_v12  ;;  %v18183_v12 = vld [vmem:[%s21049_s3 + $0x320] ss:$8 sps:$4 sm:$0xff]  }
 0x4a8   :  { %13557 = vmatprep.subr.bf16.mxu0 %v18143_v3  ;;  %v18191_v3 = vld [vmem:[%s21049_s3 + $0x334] ss:$8 sps:$4 sm:$0xff]  }
 0x4a9   :  { %9680 = vmatpush1.bf16.msra.mxu1 %v18138_v4  ;;  %v18186_v4 = vld [vmem:[#allocation2 + $0x2798] ss:$112 sps:$4 sm:$0xff]  }
 0x4aa   :  { %9681 = vmatprep.subr.bf16.mxu1 %v18146_v14  ;;  %v18194_v14 = vld [vmem:[#allocation2 + $0x287c] ss:$112 sps:$4 sm:$0xff]  }
 0x4ab   :  { %13558 = vmatpush1.bf16.msra.mxu0 %v18141_v8  ;;  %v18189_v8 = vld [vmem:[%s21049_s3 + $0x330] ss:$8 sps:$4 sm:$0xff]  }
 0x4ac   :  { %13559 = vmatprep.subr.bf16.mxu0 %v18149_v15  ;;  %v18197_v15 = vld [vmem:[%s21049_s3 + $0x344] ss:$8 sps:$4 sm:$0xff]  }
 0x4ad   :  { %9682 = vmatpush1.bf16.msra.mxu1 %v18144_v19  ;;  %v18192_v19 = vld [vmem:[#allocation2 + $0x2878] ss:$112 sps:$4 sm:$0xff]  }
 0x4ae   :  { %9683 = vmatprep.subr.bf16.mxu1 %v18152_v21  ;;  %v18200_v21 = vld [vmem:[#allocation2 + $0x295c] ss:$112 sps:$4 sm:$0xff]  }
 0x4af   :  { %13560 = vmatpush1.bf16.msra.mxu0 %v18147_v20  ;;  %v18195_v20 = vld [vmem:[%s21049_s3 + $0x340] ss:$8 sps:$4 sm:$0xff]  }
 0x4b0   :  { %13561 = vmatprep.subr.bf16.mxu0 %v18155_v22  ;;  %v18203_v22 = vld [vmem:[%s21049_s3 + $0x354] ss:$8 sps:$4 sm:$0xff]  }
 0x4b1   :  { %9684 = vmatpush1.bf16.msra.mxu1 %v18150_v30  ;;  %v18198_v30 = vld [vmem:[#allocation2 + $0x2958] ss:$112 sps:$4 sm:$0xff]  }
 0x4b2   :  { %9685 = vmatprep.subr.bf16.mxu1 %v18158_v32  ;;  %v18206_v32 = vld [vmem:[#allocation2 + $0x2a3c] ss:$112 sps:$4 sm:$0xff]  }
 0x4b3   :  { %13562 = vmatpush1.bf16.msra.mxu0 %v18153_v31  ;;  %v18201_v31 = vld [vmem:[%s21049_s3 + $0x350] ss:$8 sps:$4 sm:$0xff]  }
 0x4b4   :  { %13563 = vmatprep.subr.bf16.mxu0 %v18161_v33  ;;  %v18209_v33 = vld [vmem:[%s21049_s3 + $0x364] ss:$8 sps:$4 sm:$0xff]  }
 0x4b5   :  { %9686 = vmatpush1.bf16.msra.mxu1 %v18156_v37  ;;  %v18204_v37 = vld [vmem:[#allocation2 + $0x2a38] ss:$112 sps:$4 sm:$0xff]  }
 0x4b6   :  { %9687 = vmatprep.subr.bf16.mxu1 %v18164_v28  ;;  %v18207_v28 = vld [vmem:[%s21049_s3 + $0x360] ss:$8 sps:$4 sm:$0xff]  }
 0x4b7   :  { %13564 = vmatpush1.bf16.msra.mxu0 %v18159_v38 }
 0x4b8   :  { %13565 = vmatprep.subr.bf16.mxu0 %v18167_v42  ;;  %v18218_v42 = vld [vmem:[#allocation2 + $0x4c] ss:$112 sps:$4 sm:$0xff]  }
 0x4b9   :  { %9688 = vmatpush1.bf16.msra.mxu1 %v18162_v52  ;;  %v18212_v52 = vld [vmem:[%s21049_s3 + $0x374] ss:$8 sps:$4 sm:$0xff]  }
 0x4ba   :  { %9689 = vmatprep.subr.bf16.mxu1 %v18170_v41  ;;  %v18210_v41 = vld [vmem:[%s21049_s3 + $0x370] ss:$8 sps:$4 sm:$0xff]  }
 0x4bb   :  { %13566 = vmatpush1.bf16.msra.mxu0 %v18165_v25 }
 0x4bc   :  { %13576 = vmatprep.subr.bf16.mxu0 %v18173_v55  ;;  %v18213_v55 = vld [vmem:[%s21049_s3 + $0x380] ss:$8 sps:$4 sm:$0xff]  }
 0x4bd   :  { %9690 = vmatpush1.bf16.msra.mxu1 %v18168_v48  ;;  %v18216_v48 = vld [vmem:[#allocation2 + $0x48] ss:$112 sps:$4 sm:$0xff]  }
 0x4be   :  { %13568 = vmatmul.mubr.bf16.vlgmr.msra.gmra.mrb[24].mxu0 %v10767_v56  ;;  %9691 = vmatprep.subr.bf16.mxu1 %v18176_v57  ;;  %v18224_v56 = vld [vmem:[#allocation2 + $0x12c] ss:$112 sps:$4 sm:$0xff]  }
 0x4bf   :  { %13577 = vmatpush1.bf16.msra.mxu0 %v18171_v13  ;;  %13608 = vmatprep.mubr.bf16.mxu0 %v10770_v50  ;;  %v18219_v13 = vld [vmem:[%s21049_s3 + $0x390] ss:$8 sps:$4 sm:$0xff]  }
 0x4c0   :  { %13578 = vmatprep.subr.bf16.mxu0 %v18179_v6  ;;  %v18227_v6 = vld [vmem:[%s21049_s3 + $0x3a4] ss:$8 sps:$4 sm:$0xff]  }
 0x4c1   :  { %9692 = vmatpush1.bf16.msra.mxu1 %v18174_v58 }
 0x4c2   :  { %9693 = vmatprep.subr.bf16.mxu1 %v18182_v62  ;;  %v1486_v62 = vrot.slane %v19452_v5, %v19374_v49 }
 0x4c3   :  { %13579 = vmatpush1.bf16.msra.mxu0 %v18177_v61  ;;  %v18222_v61 = vld [vmem:[#allocation2 + $0x128] ss:$112 sps:$4 sm:$0xff]  }
 0x4c4   :  { %13580 = vmatprep.subr.bf16.mxu0 %v18185_v63 }
 0x4c5   :  { %9694 = vmatpush1.bf16.msra.mxu1 %v18180_v1  ;;  %v18225_v1 = vld [vmem:[%s21049_s3 + $0x3a0] ss:$8 sps:$4 sm:$0xff]  }
 0x4c6   :  { %9695 = vmatprep.subr.bf16.mxu1 %v18188_v2  ;;  %v1490_v2 = vrot.slane %v19452_v5, %v19377_v54  ;;  %v18239_v5 = vld [vmem:[%s21049_s3 + $0x3c4] ss:$8 sps:$4 sm:$0xff]  }
 0x4c7   :  { %13581 = vmatpush1.bf16.msra.mxu0 %v18183_v12  ;;  %v18230_v12 = vld [vmem:[#allocation2 + $0x20c] ss:$112 sps:$4 sm:$0xff]  }
 0x4c8   :  { %13582 = vmatprep.subr.bf16.mxu0 %v18191_v3  ;;  %v18233_v3 = vld [vmem:[%s21049_s3 + $0x3b4] ss:$8 sps:$4 sm:$0xff]  }
 0x4c9   :  { %9696 = vmatpush1.bf16.msra.mxu1 %v18186_v4  ;;  %v18228_v4 = vld [vmem:[#allocation2 + $0x208] ss:$112 sps:$4 sm:$0xff]  }
 0x4ca   :  { %9697 = vmatprep.subr.bf16.mxu1 %v18194_v14  ;;  %v18231_v14 = vld [vmem:[%s21049_s3 + $0x3b0] ss:$8 sps:$4 sm:$0xff]  }
 0x4cb   :  { %13583 = vmatpush1.bf16.msra.mxu0 %v18189_v8  ;;  %v16189_v8 = vadd.f32 %v19337_v16, %v1486_v62  ;;  %v10744_v62 = vmax.f32 %v19489_v35, 0.0  ;;  %v18267_v35 = vld [vmem:[%s21049_s3 + $0x410] ss:$8 sps:$4 sm:$0xff]  }
 0x4cc   :  { %13584 = vmatprep.subr.bf16.mxu0 %v18197_v15  ;;  %v18236_v15 = vld [vmem:[#allocation2 + $0x2ec] ss:$112 sps:$4 sm:$0xff]  }
 0x4cd   :  { %9698 = vmatpush1.bf16.msra.mxu1 %v18192_v19  ;;  %v16191_v19 = vadd.f32 %v19339_v17, %v1490_v2  ;;  %v18237_v17 = vld [vmem:[%s21049_s3 + $0x3c0] ss:$8 sps:$4 sm:$0xff]   ;;  %v18266_v2 = vld [vmem:[#allocation2 + $0x74c] ss:$112 sps:$4 sm:$0xff]  }
 0x4ce   :  { %9699 = vmatprep.subr.bf16.mxu1 %v18200_v21 }
 0x4cf   :  { %13585 = vmatpush1.bf16.msra.mxu0 %v18195_v20 }
 0x4d0   :  { %13586 = vmatprep.subr.bf16.mxu0 %v18203_v22 }
 0x4d1   :  { %v19801_v26 = vpop.f32.mrb[20].mxu0  ;;  %9700 = vmatpush1.bf16.msra.mxu1 %v18198_v30 }
 0x4d2   :  { %v19803_v38 = vpop.f32.mrb[21].mxu0  ;;  %9710 = vmatprep.subr.bf16.mxu1 %v18206_v32 }
 0x4d3   :  { %13587 = vmatpush1.bf16.msra.mxu0 %v18201_v31  ;;  %v10568_v47 = vpop.f32.mrb[22].mxu0  ;;  %v18234_v31 = vld [vmem:[#allocation2 + $0x2e8] ss:$112 sps:$4 sm:$0xff]  }
 0x4d4   :  { %13588 = vmatprep.subr.bf16.mxu0 %v18209_v33  ;;  %v10569_v25 = vpop.f32.mrb[23].mxu0  ;;  %9702 = vmatmul.mubr.bf16.vlgmr.msra.gmra.mrb[28].mxu1 %v19287_v29  ;;  %v18242_v33 = vld [vmem:[#allocation2 + $0x3cc] ss:$112 sps:$4 sm:$0xff]   ;;  %v18243_v47 = vld [vmem:[%s21049_s3 + $0x3d0] ss:$8 sps:$4 sm:$0xff]  }
 0x4d5   :  { %9711 = vmatpush1.bf16.msra.mxu1 %v18204_v37  ;;  %9742 = vmatprep.mubr.bf16.mxu1 %v19183_v0  ;;  %v19864_v37 = vsub.s32 6, %v19361_v44  ;;  %v19153_v25 = vld [vmem:[%s21048_s2] sm:$0xff] }
 0x4d6   :  { %9915 = vmatprep.subr.bf16.mxu1 %v18218_v42  ;;  %v18240_v42 = vld [vmem:[#allocation2 + $0x3c8] ss:$112 sps:$4 sm:$0xff]  }
 0x4d7   :  { %13589 = vmatpush1.bf16.msra.mxu0 %v18207_v28  ;;  %v18245_v28 = vld [vmem:[%s21049_s3 + $0x3d4] ss:$8 sps:$4 sm:$0xff]   ;;  %v1462_v44 = vrot.slane %v19153_v25, %v19864_v37  ;;  %v18291_v25 = vld [vmem:[%s21049_s3 + $0x450] ss:$8 sps:$4 sm:$0xff]  }
 0x4d8   :  { %13590 = vmatprep.subr.bf16.mxu0 %v18212_v52  ;;  %v18248_v52 = vld [vmem:[#allocation2 + $0x4ac] ss:$112 sps:$4 sm:$0xff]  }
 0x4db   :  { %13591 = vmatpush1.bf16.msra.mxu0 %v18210_v41  ;;  %v18251_v41 = vld [vmem:[%s21049_s3 + $0x3e4] ss:$8 sps:$4 sm:$0xff]  }
 0x4dc   :  { %13592 = vmatprep.subr.bf16.mxu0 %v18215_v53  ;;  %v18246_v53 = vld [vmem:[#allocation2 + $0x4a8] ss:$112 sps:$4 sm:$0xff]  }
 0x4df   :  { %13593 = vmatpush1.bf16.msra.mxu0 %v18213_v55  ;;  %v19828_v57 = vpop.f32.mrb[20].mxu1  ;;  %v18249_v55 = vld [vmem:[%s21049_s3 + $0x3e0] ss:$8 sps:$4 sm:$0xff]  }
 0x4e0   :  { %13594 = vmatprep.subr.bf16.mxu0 %v18221_v39  ;;  %15649 = vmatmul.mubr.msk.bf16.vlgmr.msra.gmra.mrb[28].mxu1 %vm8435_vm0, %v19245_v10  ;;  %v19835_v50 = vpop.f32.mrb[21].mxu1  ;;  %v18254_v39 = vld [vmem:[#allocation2 + $0x58c] ss:$112 sps:$4 sm:$0xff]  }
 0x4e1   :  { %9916 = vmatpush1.bf16.msra.mxu1 %v18216_v48  ;;  %v9420_v58 = vpop.f32.mrb[22].mxu1  ;;  %9947 = vmatprep.mubr.bf16.mxu1 %v19252_v51  ;;  %v16181_v48 = vadd.f32 %v19454_v7, %v1462_v44  ;;  %v18263_v7 = vld [vmem:[%s21049_s3 + $0x404] ss:$8 sps:$4 sm:$0xff]  }
 0x4e2   :  { %v9421_v63 = vpop.f32.mrb[23].mxu1  ;;  %9917 = vmatprep.subr.bf16.mxu1 %v18224_v56  ;;  %v18252_v56 = vld [vmem:[#allocation2 + $0x588] ss:$112 sps:$4 sm:$0xff]   ;;  %v18260_v58 = vld [vmem:[#allocation2 + $0x66c] ss:$112 sps:$4 sm:$0xff]  }
 0x4e3   :  { %13595 = vmatpush1.bf16.msra.mxu0 %v18219_v13  ;;  %v18257_v13 = vld [vmem:[%s21049_s3 + $0x3f4] ss:$8 sps:$4 sm:$0xff]   ;;  %v18258_v63 = vld [vmem:[#allocation2 + $0x668] ss:$112 sps:$4 sm:$0xff]  }
 0x4e4   :  { %13596 = vmatprep.subr.bf16.mxu0 %v18227_v6  ;;  %v18255_v6 = vld [vmem:[%s21049_s3 + $0x3f0] ss:$8 sps:$4 sm:$0xff]   ;;  %v18296_v44 = vld [vmem:[#allocation2 + $0xbac] ss:$112 sps:$4 sm:$0xff]  }
 0x4e5   :  { %9918 = vmatpush1.bf16.msra.mxu1 %v18222_v61  ;;  %v10741_v61 = vmax.f32 %v16181_v48, 0.0  ;;  %v18305_v48 = vld [vmem:[%s21049_s3 + $0x474] ss:$8 sps:$4 sm:$0xff]  }
 0x4e6   :  { %9919 = vmatprep.subr.bf16.mxu1 %v18230_v12 }
 0x4e7   :  { %13597 = vmatpush1.bf16.msra.mxu0 %v18225_v1  ;;  %v9580_v20 = vpop.f32.mrb[24].mxu1  ;;  %v18261_v1 = vld [vmem:[%s21049_s3 + $0x400] ss:$8 sps:$4 sm:$0xff]   ;;  %v10769_v12 = vpack.c.bf16 %v10741_v61, %v10741_v61 }
 0x4e8   :  { %13598 = vmatprep.subr.bf16.mxu0 %v18233_v3  ;;  %v19856_v21 = vadd.f32 %v16189_v8, %v9580_v20  ;;  %v9582_v22 = vpop.f32.mrb[25].mxu1  ;;  %v18269_v3 = vld [vmem:[%s21049_s3 + $0x414] ss:$8 sps:$4 sm:$0xff]   ;;  %v18264_v8 = vld [vmem:[#allocation2 + $0x748] ss:$112 sps:$4 sm:$0xff]  }
 0x4e9   :  { %9920 = vmatpush1.bf16.msra.mxu1 %v18228_v4  ;;  %v19858_v16 = vadd.f32 %v16191_v19, %v9582_v22  ;;  %v9584_v30 = vpop.f32.mrb[26].mxu1  ;;  %v10772_v4 = vpack.c.bf16 %v10744_v62, %v10744_v62  ;;  %v18270_v19 = vld [vmem:[#allocation2 + $0x828] ss:$112 sps:$4 sm:$0xff]   ;;  %v18281_v22 = vld [vmem:[%s21049_s3 + $0x434] ss:$8 sps:$4 sm:$0xff]  }
 0x4ea   :  { %v9585_v32 = vpop.f32.mrb[27].mxu1  ;;  %9921 = vmatprep.subr.bf16.mxu1 %v18236_v15  ;;  %v18275_v15 = vld [vmem:[%s21049_s3 + $0x424] ss:$8 sps:$4 sm:$0xff]   ;;  %v18273_v20 = vld [vmem:[%s21049_s3 + $0x420] ss:$8 sps:$4 sm:$0xff]  }
 0x4eb   :  { %13599 = vmatpush1.bf16.msra.mxu0 %v18231_v14  ;;  %v18272_v14 = vld [vmem:[#allocation2 + $0x82c] ss:$112 sps:$4 sm:$0xff]   ;;  %v18276_v30 = vld [vmem:[#allocation2 + $0x908] ss:$112 sps:$4 sm:$0xff]  }
 0x4ec   :  { %13600 = vmatprep.subr.bf16.mxu0 %v18239_v5  ;;  %v18278_v5 = vld [vmem:[#allocation2 + $0x90c] ss:$112 sps:$4 sm:$0xff]   ;;  %v18306_v61 = vld [vmem:[#allocation2 + $0xd68] ss:$112 sps:$4 sm:$0xff]  }
 0x4ed   :  { %9922 = vmatpush1.bf16.msra.mxu1 %v18234_v31  ;;  %v18279_v31 = vld [vmem:[%s21049_s3 + $0x430] ss:$8 sps:$4 sm:$0xff]   ;;  %v18284_v32 = vld [vmem:[#allocation2 + $0x9ec] ss:$112 sps:$4 sm:$0xff]  }
 0x4ee   :  { %9923 = vmatprep.subr.bf16.mxu1 %v18242_v33  ;;  %v18282_v33 = vld [vmem:[#allocation2 + $0x9e8] ss:$112 sps:$4 sm:$0xff]   ;;  %v18314_v62 = vld [vmem:[#allocation2 + $0xe4c] ss:$112 sps:$4 sm:$0xff]  }
 0x4ef   :  { %13601 = vmatpush1.bf16.msra.mxu0 %v18237_v17  ;;  %v18287_v17 = vld [vmem:[%s21049_s3 + $0x444] ss:$8 sps:$4 sm:$0xff]  }
 0x4f0   :  { %13602 = vmatprep.subr.bf16.mxu0 %v18245_v28  ;;  %v18285_v28 = vld [vmem:[%s21049_s3 + $0x440] ss:$8 sps:$4 sm:$0xff]  }
 0x4f1   :  { %9924 = vmatpush1.bf16.msra.mxu1 %v18240_v42  ;;  %v18290_v42 = vld [vmem:[#allocation2 + $0xacc] ss:$112 sps:$4 sm:$0xff]  }
 0x4f2   :  { %9925 = vmatprep.subr.bf16.mxu1 %v18248_v52  ;;  %v18288_v52 = vld [vmem:[#allocation2 + $0xac8] ss:$112 sps:$4 sm:$0xff]  }
 0x4f3   :  { %13603 = vmatpush1.bf16.msra.mxu0 %v18243_v47  ;;  %v18293_v47 = vld [vmem:[%s21049_s3 + $0x454] ss:$8 sps:$4 sm:$0xff]  }
 0x4f4   :  { %13604 = vmatprep.subr.bf16.mxu0 %v18251_v41  ;;  %v18299_v41 = vld [vmem:[%s21049_s3 + $0x464] ss:$8 sps:$4 sm:$0xff]  }
 0x4f5   :  { %9926 = vmatpush1.bf16.msra.mxu1 %v18246_v53  ;;  %v18294_v53 = vld [vmem:[#allocation2 + $0xba8] ss:$112 sps:$4 sm:$0xff]  }
 0x4f6   :  { %9927 = vmatprep.subr.bf16.mxu1 %v18254_v39  ;;  %v18302_v39 = vld [vmem:[#allocation2 + $0xc8c] ss:$112 sps:$4 sm:$0xff]  }
 0x4f7   :  { %13605 = vmatpush1.bf16.msra.mxu0 %v18249_v55  ;;  %v18297_v55 = vld [vmem:[%s21049_s3 + $0x460] ss:$8 sps:$4 sm:$0xff]  }
 0x4f8   :  { %13606 = vmatprep.subr.bf16.mxu0 %v18257_v13  ;;  %v18300_v13 = vld [vmem:[#allocation2 + $0xc88] ss:$112 sps:$4 sm:$0xff]  }
 0x4f9   :  { %9928 = vmatpush1.bf16.msra.mxu1 %v18252_v56  ;;  %v18303_v56 = vld [vmem:[%s21049_s3 + $0x470] ss:$8 sps:$4 sm:$0xff]  }
 0x4fa   :  { %9929 = vmatprep.subr.bf16.mxu1 %v18260_v58  ;;  %v18311_v58 = vld [vmem:[%s21049_s3 + $0x484] ss:$8 sps:$4 sm:$0xff]  }
 0x4fb   :  { %13607 = vmatpush1.bf16.msra.mxu0 %v18255_v6  ;;  %v18308_v6 = vld [vmem:[#allocation2 + $0xd6c] ss:$112 sps:$4 sm:$0xff]  }
 0x4fc   :  { %13617 = vmatprep.subr.bf16.mxu0 %v18263_v7  ;;  %v18309_v7 = vld [vmem:[%s21049_s3 + $0x480] ss:$8 sps:$4 sm:$0xff]  }
 0x4fd   :  { %9930 = vmatpush1.bf16.msra.mxu1 %v18258_v63  ;;  %v18317_v63 = vld [vmem:[%s21049_s3 + $0x494] ss:$8 sps:$4 sm:$0xff]  }
 0x4fe   :  { %13609 = vmatmul.mubr.bf16.vlgmr.msra.gmra.mrb[24].mxu0 %v10769_v12  ;;  %9931 = vmatprep.subr.bf16.mxu1 %v18266_v2  ;;  %v18315_v12 = vld [vmem:[%s21049_s3 + $0x490] ss:$8 sps:$4 sm:$0xff]   ;;  %v18320_v2 = vld [vmem:[#allocation2 + $0xf2c] ss:$112 sps:$4 sm:$0xff]  }
 0x4ff   :  { %13618 = vmatpush1.bf16.msra.mxu0 %v18261_v1  ;;  %13649 = vmatprep.mubr.bf16.mxu0 %v10772_v4  ;;  %v18312_v1 = vld [vmem:[#allocation2 + $0xe48] ss:$112 sps:$4 sm:$0xff]  }
 0x500   :  { %13619 = vmatprep.subr.bf16.mxu0 %v18269_v3  ;;  %v18323_v3 = vld [vmem:[%s21049_s3 + $0x4a4] ss:$8 sps:$4 sm:$0xff]   ;;  %v18318_v4 = vld [vmem:[#allocation2 + $0xf28] ss:$112 sps:$4 sm:$0xff]  }
 0x501   :  { %9932 = vmatpush1.bf16.msra.mxu1 %v18264_v8  ;;  %v18321_v8 = vld [vmem:[%s21049_s3 + $0x4a0] ss:$8 sps:$4 sm:$0xff]  }
 0x502   :  { %9933 = vmatprep.subr.bf16.mxu1 %v18272_v14  ;;  %v18329_v14 = vld [vmem:[%s21049_s3 + $0x4b4] ss:$8 sps:$4 sm:$0xff]  }
 0x503   :  { %13620 = vmatpush1.bf16.msra.mxu0 %v18267_v35  ;;  %v18326_v35 = vld [vmem:[#allocation2 + $0x100c] ss:$112 sps:$4 sm:$0xff]  }
 0x504   :  { %13621 = vmatprep.subr.bf16.mxu0 %v18275_v15  ;;  %v18324_v15 = vld [vmem:[#allocation2 + $0x1008] ss:$112 sps:$4 sm:$0xff]  }
 0x505   :  { %9934 = vmatpush1.bf16.msra.mxu1 %v18270_v19  ;;  %v18327_v19 = vld [vmem:[%s21049_s3 + $0x4b0] ss:$8 sps:$4 sm:$0xff]  }
 0x506   :  { %9935 = vmatprep.subr.bf16.mxu1 %v18278_v5  ;;  %v18335_v5 = vld [vmem:[%s21049_s3 + $0x4c4] ss:$8 sps:$4 sm:$0xff]  }
 0x507   :  { %13622 = vmatpush1.bf16.msra.mxu0 %v18273_v20  ;;  %v18332_v20 = vld [vmem:[#allocation2 + $0x10ec] ss:$112 sps:$4 sm:$0xff]  }
 0x508   :  { %13623 = vmatprep.subr.bf16.mxu0 %v18281_v22  ;;  %v18330_v22 = vld [vmem:[#allocation2 + $0x10e8] ss:$112 sps:$4 sm:$0xff]  }
 0x509   :  { %9936 = vmatpush1.bf16.msra.mxu1 %v18276_v30  ;;  %v18333_v30 = vld [vmem:[%s21049_s3 + $0x4c0] ss:$8 sps:$4 sm:$0xff]  }
 0x50a   :  { %9937 = vmatprep.subr.bf16.mxu1 %v18284_v32  ;;  %v18341_v32 = vld [vmem:[%s21049_s3 + $0x4d4] ss:$8 sps:$4 sm:$0xff]  }
 0x50b   :  { %13624 = vmatpush1.bf16.msra.mxu0 %v18279_v31  ;;  %v18338_v31 = vld [vmem:[#allocation2 + $0x11cc] ss:$112 sps:$4 sm:$0xff]  }
 0x50c   :  { %13625 = vmatprep.subr.bf16.mxu0 %v18287_v17  ;;  %v18336_v17 = vld [vmem:[#allocation2 + $0x11c8] ss:$112 sps:$4 sm:$0xff]  }
 0x50d   :  { %9938 = vmatpush1.bf16.msra.mxu1 %v18282_v33  ;;  %v18339_v33 = vld [vmem:[%s21049_s3 + $0x4d0] ss:$8 sps:$4 sm:$0xff]  }
 0x50e   :  { %9939 = vmatprep.subr.bf16.mxu1 %v18290_v42  ;;  %v18347_v42 = vld [vmem:[%s21049_s3 + $0x4e4] ss:$8 sps:$4 sm:$0xff]  }
 0x50f   :  { %13626 = vmatpush1.bf16.msra.mxu0 %v18285_v28  ;;  %v18344_v28 = vld [vmem:[#allocation2 + $0x12ac] ss:$112 sps:$4 sm:$0xff]  }
 0x510   :  { %13627 = vmatprep.subr.bf16.mxu0 %v18293_v47  ;;  %v19982_v47 = vld [vmem:[%s21048_s2 + $0x8] sm:$0xff] }
 0x511   :  { %9940 = vmatpush1.bf16.msra.mxu1 %v18288_v52  ;;  %v1482_v52 = vrot.slane %v19982_v47, %v19529_v23 }
 0x512   :  { %9941 = vmatprep.subr.bf16.mxu1 %v18296_v44  ;;  %v18345_v44 = vld [vmem:[%s21049_s3 + $0x4e0] ss:$8 sps:$4 sm:$0xff]  }
 0x513   :  { %13628 = vmatpush1.bf16.msra.mxu0 %v18291_v25  ;;  %v18342_v25 = vld [vmem:[#allocation2 + $0x12a8] ss:$112 sps:$4 sm:$0xff]  }
 0x514   :  { %13629 = vmatprep.subr.bf16.mxu0 %v18299_v41  ;;  %v18350_v41 = vld [vmem:[#allocation2 + $0x138c] ss:$112 sps:$4 sm:$0xff]  }
 0x515   :  { %9942 = vmatpush1.bf16.msra.mxu1 %v18294_v53  ;;  %v18353_v53 = vld [vmem:[%s21049_s3 + $0x4f4] ss:$8 sps:$4 sm:$0xff]  }
 0x516   :  { %9943 = vmatprep.subr.bf16.mxu1 %v18302_v39  ;;  %v18348_v39 = vld [vmem:[#allocation2 + $0x1388] ss:$112 sps:$4 sm:$0xff]  }
 0x517   :  { %13630 = vmatpush1.bf16.msra.mxu0 %v18297_v55  ;;  %v16188_v55 = vadd.f32 %v19835_v50, %v1482_v52  ;;  %v18357_v50 = vld [vmem:[%s21049_s3 + $0x500] ss:$8 sps:$4 sm:$0xff]  }
 0x518   :  { %13631 = vmatprep.subr.bf16.mxu0 %v18305_v48  ;;  %v18351_v48 = vld [vmem:[%s21049_s3 + $0x4f0] ss:$8 sps:$4 sm:$0xff]  }
 0x519   :  { %9944 = vmatpush1.bf16.msra.mxu1 %v18300_v13  ;;  %v18356_v13 = vld [vmem:[#allocation2 + $0x146c] ss:$112 sps:$4 sm:$0xff]   ;;  %v18390_v52 = vld [vmem:[#allocation2 + $0x19a8] ss:$112 sps:$4 sm:$0xff]  }
 0x51a   :  { %9945 = vmatprep.subr.bf16.mxu1 %v18308_v6  ;;  %v18359_v6 = vld [vmem:[%s21049_s3 + $0x504] ss:$8 sps:$4 sm:$0xff]  }
 0x51b   :  { %13632 = vmatpush1.bf16.msra.mxu0 %v18303_v56  ;;  %v10743_v56 = vmax.f32 %v19485_v34, 0.0  ;;  %v18365_v34 = vld [vmem:[%s21049_s3 + $0x514] ss:$8 sps:$4 sm:$0xff]  }
 0x51c   :  { %13633 = vmatprep.subr.bf16.mxu0 %v18311_v58  ;;  %v10746_v58 = vmax.f32 %v16188_v55, 0.0  ;;  %v18399_v55 = vld [vmem:[%s21049_s3 + $0x570] ss:$8 sps:$4 sm:$0xff]  }
 0x51d   :  { %9946 = vmatpush1.bf16.msra.mxu1 %v18306_v61  ;;  %v18354_v61 = vld [vmem:[#allocation2 + $0x1468] ss:$112 sps:$4 sm:$0xff]  }
 0x51e   :  { %9956 = vmatprep.subr.bf16.mxu1 %v18314_v62  ;;  %v18362_v62 = vld [vmem:[#allocation2 + $0x154c] ss:$112 sps:$4 sm:$0xff]  }
 0x51f   :  { %13634 = vmatpush1.bf16.msra.mxu0 %v18309_v7  ;;  %v10771_v7 = vpack.c.bf16 %v10743_v56, %v10743_v56  ;;  %v18405_v56 = vld [vmem:[%s21049_s3 + $0x580] ss:$8 sps:$4 sm:$0xff]  }
 0x520   :  { %13635 = vmatprep.subr.bf16.mxu0 %v18317_v63  ;;  %9948 = vmatmul.mubr.bf16.vlgmr.msra.gmra.mrb[32].mxu1 %v19259_v9  ;;  %v10774_v63 = vpack.c.bf16 %v10746_v58, %v10746_v58  ;;  %v18413_v58 = vld [vmem:[%s21049_s3 + $0x594] ss:$8 sps:$4 sm:$0xff]  }
 0x521   :  { %9957 = vmatpush1.bf16.msra.mxu1 %v18312_v1  ;;  %9988 = vmatprep.mubr.bf16.mxu1 %v19266_v36  ;;  %v18360_v1 = vld [vmem:[#allocation2 + $0x1548] ss:$112 sps:$4 sm:$0xff]  }
 0x522   :  { %9958 = vmatprep.subr.bf16.mxu1 %v18320_v2  ;;  %v18368_v2 = vld [vmem:[#allocation2 + $0x162c] ss:$112 sps:$4 sm:$0xff]  }
 0x523   :  { %13636 = vmatpush1.bf16.msra.mxu0 %v18315_v12  ;;  %v18363_v12 = vld [vmem:[%s21049_s3 + $0x510] ss:$8 sps:$4 sm:$0xff]  }
 0x524   :  { %13637 = vmatprep.subr.bf16.mxu0 %v18323_v3  ;;  %v18371_v3 = vld [vmem:[%s21049_s3 + $0x524] ss:$8 sps:$4 sm:$0xff]  }
 0x525   :  { %9959 = vmatpush1.bf16.msra.mxu1 %v18318_v4  ;;  %v18366_v4 = vld [vmem:[#allocation2 + $0x1628] ss:$112 sps:$4 sm:$0xff]  }
 0x526   :  { %9960 = vmatprep.subr.bf16.mxu1 %v18326_v35  ;;  %v18374_v35 = vld [vmem:[#allocation2 + $0x170c] ss:$112 sps:$4 sm:$0xff]  }
 0x527   :  { %13638 = vmatpush1.bf16.msra.mxu0 %v18321_v8  ;;  %v18369_v8 = vld [vmem:[%s21049_s3 + $0x520] ss:$8 sps:$4 sm:$0xff]  }
 0x528   :  { %13639 = vmatprep.subr.bf16.mxu0 %v18329_v14  ;;  %v18377_v14 = vld [vmem:[%s21049_s3 + $0x534] ss:$8 sps:$4 sm:$0xff]  }
 0x529   :  { %9961 = vmatpush1.bf16.msra.mxu1 %v18324_v15  ;;  %v18372_v15 = vld [vmem:[#allocation2 + $0x1708] ss:$112 sps:$4 sm:$0xff]  }
 0x52a   :  { %9962 = vmatprep.subr.bf16.mxu1 %v18332_v20  ;;  %v18380_v20 = vld [vmem:[#allocation2 + $0x17ec] ss:$112 sps:$4 sm:$0xff]  }
 0x52b   :  { %13640 = vmatpush1.bf16.msra.mxu0 %v18327_v19  ;;  %v18375_v19 = vld [vmem:[%s21049_s3 + $0x530] ss:$8 sps:$4 sm:$0xff]  }
 0x52c   :  { %13641 = vmatprep.subr.bf16.mxu0 %v18335_v5  ;;  %v18383_v5 = vld [vmem:[%s21049_s3 + $0x544] ss:$8 sps:$4 sm:$0xff]  }
 0x52d   :  { %9963 = vmatpush1.bf16.msra.mxu1 %v18330_v22  ;;  %v18378_v22 = vld [vmem:[#allocation2 + $0x17e8] ss:$112 sps:$4 sm:$0xff]  }
 0x52e   :  { %9964 = vmatprep.subr.bf16.mxu1 %v18338_v31  ;;  %v18386_v31 = vld [vmem:[#allocation2 + $0x18cc] ss:$112 sps:$4 sm:$0xff]  }
 0x52f   :  { %13642 = vmatpush1.bf16.msra.mxu0 %v18333_v30  ;;  %v18381_v30 = vld [vmem:[%s21049_s3 + $0x540] ss:$8 sps:$4 sm:$0xff]  }
 0x530   :  { %13643 = vmatprep.subr.bf16.mxu0 %v18341_v32  ;;  %v18389_v32 = vld [vmem:[%s21049_s3 + $0x554] ss:$8 sps:$4 sm:$0xff]  }
 0x531   :  { %9965 = vmatpush1.bf16.msra.mxu1 %v18336_v17  ;;  %v18384_v17 = vld [vmem:[#allocation2 + $0x18c8] ss:$112 sps:$4 sm:$0xff]  }
 0x532   :  { %9966 = vmatprep.subr.bf16.mxu1 %v18344_v28  ;;  %v18392_v28 = vld [vmem:[#allocation2 + $0x19ac] ss:$112 sps:$4 sm:$0xff]  }
 0x533   :  { %13644 = vmatpush1.bf16.msra.mxu0 %v18339_v33  ;;  %v18387_v33 = vld [vmem:[%s21049_s3 + $0x550] ss:$8 sps:$4 sm:$0xff]  }
 0x534   :  { %13645 = vmatprep.subr.bf16.mxu0 %v18347_v42  ;;  %v18395_v42 = vld [vmem:[%s21049_s3 + $0x564] ss:$8 sps:$4 sm:$0xff]  }
 0x535   :  { %9967 = vmatpush1.bf16.msra.mxu1 %v18342_v25  ;;  %v18393_v25 = vld [vmem:[%s21049_s3 + $0x560] ss:$8 sps:$4 sm:$0xff]  }
 0x536   :  { %9968 = vmatprep.subr.bf16.mxu1 %v18350_v41  ;;  %v18401_v41 = vld [vmem:[%s21049_s3 + $0x574] ss:$8 sps:$4 sm:$0xff]  }
 0x537   :  { %13646 = vmatpush1.bf16.msra.mxu0 %v18345_v44  ;;  %v18398_v44 = vld [vmem:[#allocation2 + $0x1a8c] ss:$112 sps:$4 sm:$0xff]  }
 0x538   :  { %13647 = vmatprep.subr.bf16.mxu0 %v18353_v53  ;;  %v18396_v53 = vld [vmem:[#allocation2 + $0x1a88] ss:$112 sps:$4 sm:$0xff]  }
 0x539   :  { %9969 = vmatpush1.bf16.msra.mxu1 %v18348_v39  ;;  %v18404_v39 = vld [vmem:[#allocation2 + $0x1b6c] ss:$112 sps:$4 sm:$0xff]  }
 0x53a   :  { %9970 = vmatprep.subr.bf16.mxu1 %v18356_v13  ;;  %v18402_v13 = vld [vmem:[#allocation2 + $0x1b68] ss:$112 sps:$4 sm:$0xff]  }
 0x53b   :  { %13648 = vmatpush1.bf16.msra.mxu0 %v18351_v48  ;;  %v18407_v48 = vld [vmem:[%s21049_s3 + $0x584] ss:$8 sps:$4 sm:$0xff]  }
 0x53c   :  { %13658 = vmatprep.subr.bf16.mxu0 %v18359_v6  ;;  %v18410_v6 = vld [vmem:[#allocation2 + $0x1c4c] ss:$112 sps:$4 sm:$0xff]  }
 0x53d   :  { %9971 = vmatpush1.bf16.msra.mxu1 %v18354_v61  ;;  %v18408_v61 = vld [vmem:[#allocation2 + $0x1c48] ss:$112 sps:$4 sm:$0xff]  }
 0x53e   :  { %13650 = vmatmul.mubr.bf16.vlgmr.msra.gmra.mrb[24].mxu0 %v10771_v7  ;;  %9972 = vmatprep.subr.bf16.mxu1 %v18362_v62  ;;  %v18416_v7 = vld [vmem:[#allocation2 + $0x1d2c] ss:$112 sps:$4 sm:$0xff]  }
 0x53f   :  { %13659 = vmatpush1.bf16.msra.mxu0 %v18357_v50  ;;  %13690 = vmatprep.mubr.bf16.mxu0 %v10774_v63  ;;  %v18411_v50 = vld [vmem:[%s21049_s3 + $0x590] ss:$8 sps:$4 sm:$0xff]   ;;  %v18419_v62 = vld [vmem:[%s21049_s3 + $0x5a4] ss:$8 sps:$4 sm:$0xff]   ;;  %v18417_v63 = vld [vmem:[%s21049_s3 + $0x5a0] ss:$8 sps:$4 sm:$0xff]  }
 0x540   :  { %13660 = vmatprep.subr.bf16.mxu0 %v18365_v34  ;;  %v18414_v34 = vld [vmem:[#allocation2 + $0x1d28] ss:$112 sps:$4 sm:$0xff]  }
 0x541   :  { %9973 = vmatpush1.bf16.msra.mxu1 %v18360_v1  ;;  %v18422_v1 = vld [vmem:[#allocation2 + $0x1e0c] ss:$112 sps:$4 sm:$0xff]  }
 0x542   :  { %9974 = vmatprep.subr.bf16.mxu1 %v18368_v2  ;;  %v18420_v2 = vld [vmem:[#allocation2 + $0x1e08] ss:$112 sps:$4 sm:$0xff]  }
 0x543   :  { %13661 = vmatpush1.bf16.msra.mxu0 %v18363_v12  ;;  %v18425_v12 = vld [vmem:[%s21049_s3 + $0x5b4] ss:$8 sps:$4 sm:$0xff]  }
 0x544   :  { %13662 = vmatprep.subr.bf16.mxu0 %v18371_v3  ;;  %v18423_v3 = vld [vmem:[%s21049_s3 + $0x5b0] ss:$8 sps:$4 sm:$0xff]  }
 0x545   :  { %9975 = vmatpush1.bf16.msra.mxu1 %v18366_v4  ;;  %v18428_v4 = vld [vmem:[#allocation2 + $0x1eec] ss:$112 sps:$4 sm:$0xff]  }
 0x546   :  { %9976 = vmatprep.subr.bf16.mxu1 %v18374_v35  ;;  %v18426_v35 = vld [vmem:[#allocation2 + $0x1ee8] ss:$112 sps:$4 sm:$0xff]  }
 0x547   :  { %13663 = vmatpush1.bf16.msra.mxu0 %v18369_v8  ;;  %v18431_v8 = vld [vmem:[%s21049_s3 + $0x5c4] ss:$8 sps:$4 sm:$0xff]  }
 0x548   :  { %13664 = vmatprep.subr.bf16.mxu0 %v18377_v14  ;;  %v18429_v14 = vld [vmem:[%s21049_s3 + $0x5c0] ss:$8 sps:$4 sm:$0xff]  }
 0x549   :  { %9977 = vmatpush1.bf16.msra.mxu1 %v18372_v15  ;;  %v18434_v15 = vld [vmem:[#allocation2 + $0x1fcc] ss:$112 sps:$4 sm:$0xff]  }
 0x54a   :  { %9978 = vmatprep.subr.bf16.mxu1 %v18380_v20  ;;  %v18432_v20 = vld [vmem:[#allocation2 + $0x1fc8] ss:$112 sps:$4 sm:$0xff]  }
 0x54b   :  { %13665 = vmatpush1.bf16.msra.mxu0 %v18375_v19  ;;  %v18437_v19 = vld [vmem:[%s21049_s3 + $0x5d4] ss:$8 sps:$4 sm:$0xff]  }
 0x54c   :  { %13666 = vmatprep.subr.bf16.mxu0 %v18383_v5  ;;  %v18435_v5 = vld [vmem:[%s21049_s3 + $0x5d0] ss:$8 sps:$4 sm:$0xff]  }
 0x54d   :  { %9979 = vmatpush1.bf16.msra.mxu1 %v18378_v22  ;;  %v18440_v22 = vld [vmem:[#allocation2 + $0x20ac] ss:$112 sps:$4 sm:$0xff]  }
 0x54e   :  { %9980 = vmatprep.subr.bf16.mxu1 %v18386_v31  ;;  %v18443_v31 = vld [vmem:[%s21049_s3 + $0x5e4] ss:$8 sps:$4 sm:$0xff]  }
 0x54f   :  { %13667 = vmatpush1.bf16.msra.mxu0 %v18381_v30  ;;  %v1478_v30 = vrot.slane %v19982_v47, %v19633_v27 }
 0x550   :  { %13668 = vmatprep.subr.bf16.mxu0 %v18389_v32  ;;  %v18438_v32 = vld [vmem:[#allocation2 + $0x20a8] ss:$112 sps:$4 sm:$0xff]  }
 0x551   :  { %9981 = vmatpush1.bf16.msra.mxu1 %v18384_v17  ;;  %v18441_v17 = vld [vmem:[%s21049_s3 + $0x5e0] ss:$8 sps:$4 sm:$0xff]  }
 0x552   :  { %9982 = vmatprep.subr.bf16.mxu1 %v18392_v28  ;;  %v16187_v28 = vadd.f32 %v19828_v57, %v1478_v30  ;;  %v18455_v57 = vld [vmem:[%s21049_s3 + $0x604] ss:$8 sps:$4 sm:$0xff]   ;;  %v18489_v30 = vld [vmem:[%s21049_s3 + $0x660] ss:$8 sps:$4 sm:$0xff]  }
 0x553   :  { %13669 = vmatpush1.bf16.msra.mxu0 %v18387_v33  ;;  %v18446_v33 = vld [vmem:[#allocation2 + $0x218c] ss:$112 sps:$4 sm:$0xff]  }
 0x554   :  { %13670 = vmatprep.subr.bf16.mxu0 %v18395_v42  ;;  %v18449_v42 = vld [vmem:[%s21049_s3 + $0x5f4] ss:$8 sps:$4 sm:$0xff]  }
 0x555   :  { %9983 = vmatpush1.bf16.msra.mxu1 %v18390_v52  ;;  %v18444_v52 = vld [vmem:[#allocation2 + $0x2188] ss:$112 sps:$4 sm:$0xff]  }
 0x556   :  { %9984 = vmatprep.subr.bf16.mxu1 %v18398_v44  ;;  %v18452_v44 = vld [vmem:[#allocation2 + $0x226c] ss:$112 sps:$4 sm:$0xff]  }
 0x557   :  { %13671 = vmatpush1.bf16.msra.mxu0 %v18393_v25  ;;  %v18447_v25 = vld [vmem:[%s21049_s3 + $0x5f0] ss:$8 sps:$4 sm:$0xff]  }
 0x558   :  { %13672 = vmatprep.subr.bf16.mxu0 %v18401_v41  ;;  %v10745_v41 = vmax.f32 %v16187_v28, 0.0  ;;  %v18500_v28 = vld [vmem:[#allocation2 + $0x296c] ss:$112 sps:$4 sm:$0xff]  }
 0x559   :  { %9985 = vmatpush1.bf16.msra.mxu1 %v18396_v53  ;;  %v10748_v53 = vmax.f32 %v19858_v16, 0.0  ;;  %v18459_v16 = vld [vmem:[%s21049_s3 + $0x610] ss:$8 sps:$4 sm:$0xff]  }
 0x55a   :  { %9986 = vmatprep.subr.bf16.mxu1 %v18404_v39  ;;  %v18453_v39 = vld [vmem:[%s21049_s3 + $0x600] ss:$8 sps:$4 sm:$0xff]  }
 0x55b   :  { %13673 = vmatpush1.bf16.msra.mxu0 %v18399_v55  ;;  %v18450_v55 = vld [vmem:[#allocation2 + $0x2268] ss:$112 sps:$4 sm:$0xff]  }
 0x55c   :  { %13674 = vmatprep.subr.bf16.mxu0 %v18407_v48  ;;  %v10773_v48 = vpack.c.bf16 %v10745_v41, %v10745_v41  ;;  %v18509_v41 = vld [vmem:[%s21049_s3 + $0x694] ss:$8 sps:$4 sm:$0xff]  }
 0x55d   :  { %9987 = vmatpush1.bf16.msra.mxu1 %v18402_v13  ;;  %v18458_v13 = vld [vmem:[#allocation2 + $0x234c] ss:$112 sps:$4 sm:$0xff]  }
 0x55e   :  { %9997 = vmatprep.subr.bf16.mxu1 %v18410_v6  ;;  %v10776_v6 = vpack.c.bf16 %v10748_v53, %v10748_v53  ;;  %v18507_v53 = vld [vmem:[%s21049_s3 + $0x690] ss:$8 sps:$4 sm:$0xff]  }
 0x55f   :  { %13675 = vmatpush1.bf16.msra.mxu0 %v18405_v56  ;;  %v18461_v56 = vld [vmem:[%s21049_s3 + $0x614] ss:$8 sps:$4 sm:$0xff]  }
 0x560   :  { %13676 = vmatprep.subr.bf16.mxu0 %v18413_v58  ;;  %9989 = vmatmul.mubr.bf16.vlgmr.msra.gmra.mrb[32].mxu1 %v19273_v18  ;;  %v18456_v58 = vld [vmem:[#allocation2 + $0x2348] ss:$112 sps:$4 sm:$0xff]  }
 0x561   :  { %9998 = vmatpush1.bf16.msra.mxu1 %v18408_v61  ;;  %10029 = vmatprep.mubr.bf16.mxu1 %v19278_v24  ;;  %v18464_v61 = vld [vmem:[#allocation2 + $0x242c] ss:$112 sps:$4 sm:$0xff]  }
 0x562   :  { %9999 = vmatprep.subr.bf16.mxu1 %v18416_v7  ;;  %v18462_v7 = vld [vmem:[#allocation2 + $0x2428] ss:$112 sps:$4 sm:$0xff]  }
 0x563   :  { %13677 = vmatpush1.bf16.msra.mxu0 %v18411_v50  ;;  %v18467_v50 = vld [vmem:[%s21049_s3 + $0x624] ss:$8 sps:$4 sm:$0xff]  }
 0x564   :  { %13678 = vmatprep.subr.bf16.mxu0 %v18419_v62  ;;  %v18465_v62 = vld [vmem:[%s21049_s3 + $0x620] ss:$8 sps:$4 sm:$0xff]  }
 0x565   :  { %10000 = vmatpush1.bf16.msra.mxu1 %v18414_v34  ;;  %v18470_v34 = vld [vmem:[#allocation2 + $0x250c] ss:$112 sps:$4 sm:$0xff]  }
 0x566   :  { %10001 = vmatprep.subr.bf16.mxu1 %v18422_v1  ;;  %v18468_v1 = vld [vmem:[#allocation2 + $0x2508] ss:$112 sps:$4 sm:$0xff]  }
 0x567   :  { %13679 = vmatpush1.bf16.msra.mxu0 %v18417_v63  ;;  %v18473_v63 = vld [vmem:[%s21049_s3 + $0x634] ss:$8 sps:$4 sm:$0xff]  }
 0x568   :  { %13680 = vmatprep.subr.bf16.mxu0 %v18425_v12  ;;  %v18471_v12 = vld [vmem:[%s21049_s3 + $0x630] ss:$8 sps:$4 sm:$0xff]  }
 0x569   :  { %10002 = vmatpush1.bf16.msra.mxu1 %v18420_v2  ;;  %v18476_v2 = vld [vmem:[#allocation2 + $0x25ec] ss:$112 sps:$4 sm:$0xff]  }
 0x56a   :  { %10003 = vmatprep.subr.bf16.mxu1 %v18428_v4  ;;  %v18474_v4 = vld [vmem:[#allocation2 + $0x25e8] ss:$112 sps:$4 sm:$0xff]  }
 0x56b   :  { %13681 = vmatpush1.bf16.msra.mxu0 %v18423_v3  ;;  %v18479_v3 = vld [vmem:[%s21049_s3 + $0x644] ss:$8 sps:$4 sm:$0xff]  }
 0x56c   :  { %13682 = vmatprep.subr.bf16.mxu0 %v18431_v8  ;;  %v18477_v8 = vld [vmem:[%s21049_s3 + $0x640] ss:$8 sps:$4 sm:$0xff]  }
 0x56d   :  { %10004 = vmatpush1.bf16.msra.mxu1 %v18426_v35  ;;  %v18482_v35 = vld [vmem:[#allocation2 + $0x26cc] ss:$112 sps:$4 sm:$0xff]  }
 0x56e   :  { %10005 = vmatprep.subr.bf16.mxu1 %v18434_v15  ;;  %v18480_v15 = vld [vmem:[#allocation2 + $0x26c8] ss:$112 sps:$4 sm:$0xff]  }
 0x56f   :  { %13683 = vmatpush1.bf16.msra.mxu0 %v18429_v14  ;;  %v18485_v14 = vld [vmem:[%s21049_s3 + $0x654] ss:$8 sps:$4 sm:$0xff]  }
 0x570   :  { %13684 = vmatprep.subr.bf16.mxu0 %v18437_v19  ;;  %v18483_v19 = vld [vmem:[%s21049_s3 + $0x650] ss:$8 sps:$4 sm:$0xff]  }
 0x571   :  { %10006 = vmatpush1.bf16.msra.mxu1 %v18432_v20  ;;  %v18488_v20 = vld [vmem:[#allocation2 + $0x27ac] ss:$112 sps:$4 sm:$0xff]  }
 0x572   :  { %10007 = vmatprep.subr.bf16.mxu1 %v18440_v22  ;;  %v18486_v22 = vld [vmem:[#allocation2 + $0x27a8] ss:$112 sps:$4 sm:$0xff]  }
 0x573   :  { %13685 = vmatpush1.bf16.msra.mxu0 %v18435_v5  ;;  %v18491_v5 = vld [vmem:[%s21049_s3 + $0x664] ss:$8 sps:$4 sm:$0xff]  }
 0x574   :  { %13686 = vmatprep.subr.bf16.mxu0 %v18443_v31  ;;  %v18494_v31 = vld [vmem:[#allocation2 + $0x288c] ss:$112 sps:$4 sm:$0xff]  }
 0x575   :  { %10008 = vmatpush1.bf16.msra.mxu1 %v18438_v32  ;;  %v18497_v32 = vld [vmem:[%s21049_s3 + $0x674] ss:$8 sps:$4 sm:$0xff]  }
 0x576   :  { %10009 = vmatprep.subr.bf16.mxu1 %v18446_v33  ;;  %v18495_v33 = vld [vmem:[%s21049_s3 + $0x670] ss:$8 sps:$4 sm:$0xff]  }
 0x577   :  { %13687 = vmatpush1.bf16.msra.mxu0 %v18441_v17  ;;  %v18492_v17 = vld [vmem:[#allocation2 + $0x2888] ss:$112 sps:$4 sm:$0xff]  }
 0x578   :  { %13688 = vmatprep.subr.bf16.mxu0 %v18449_v42  ;;  %v18503_v42 = vld [vmem:[%s21049_s3 + $0x684] ss:$8 sps:$4 sm:$0xff]  }
 0x579   :  { %10010 = vmatpush1.bf16.msra.mxu1 %v18444_v52  ;;  %v18498_v52 = vld [vmem:[#allocation2 + $0x2968] ss:$112 sps:$4 sm:$0xff]  }
 0x57a   :  { %10011 = vmatprep.subr.bf16.mxu1 %v18452_v44  ;;  %v18506_v44 = vld [vmem:[#allocation2 + $0x2a4c] ss:$112 sps:$4 sm:$0xff]  }
 0x57b   :  { %13689 = vmatpush1.bf16.msra.mxu0 %v18447_v25  ;;  %v18501_v25 = vld [vmem:[%s21049_s3 + $0x680] ss:$8 sps:$4 sm:$0xff]  }
 0x57c   :  { %13699 = vmatprep.subr.bf16.mxu0 %v18455_v57  ;;  %v18504_v57 = vld [vmem:[#allocation2 + $0x2a48] ss:$112 sps:$4 sm:$0xff]  }
 0x57d   :  { %10012 = vmatpush1.bf16.msra.mxu1 %v18450_v55  ;;  %v18518_v55 = vld [vmem:[#allocation2 + $0x5c] ss:$112 sps:$4 sm:$0xff]  }
 0x57e   :  { %13691 = vmatmul.mubr.bf16.vlgmr.msra.gmra.mrb[24].mxu0 %v10773_v48  ;;  %10013 = vmatprep.subr.bf16.mxu1 %v18458_v13  ;;  %v18510_v48 = vld [vmem:[%s21049_s3 + $0x6a0] ss:$8 sps:$4 sm:$0xff]   ;;  %v18515_v13 = vld [vmem:[%s21049_s3 + $0x6b4] ss:$8 sps:$4 sm:$0xff]  }
 0x57f   :  { %13700 = vmatpush1.bf16.msra.mxu0 %v18453_v39  ;;  %13731 = vmatprep.mubr.bf16.mxu0 %v10776_v6  ;;  %v18512_v39 = vld [vmem:[%s21049_s3 + $0x6a4] ss:$8 sps:$4 sm:$0xff]  }
 0x580   :  { %13701 = vmatprep.subr.bf16.mxu0 %v18461_v56  ;;  %v18513_v56 = vld [vmem:[%s21049_s3 + $0x6b0] ss:$8 sps:$4 sm:$0xff]   ;;  %v18521_v6 = vld [vmem:[%s21049_s3 + $0x6c4] ss:$8 sps:$4 sm:$0xff]  }
 0x581   :  { %10014 = vmatpush1.bf16.msra.mxu1 %v18456_v58  ;;  %v18516_v58 = vld [vmem:[#allocation2 + $0x58] ss:$112 sps:$4 sm:$0xff]  }
 0x582   :  { %10015 = vmatprep.subr.bf16.mxu1 %v18464_v61  ;;  %v18524_v61 = vld [vmem:[#allocation2 + $0x13c] ss:$112 sps:$4 sm:$0xff]  }
 0x583   :  { %13702 = vmatpush1.bf16.msra.mxu0 %v18459_v16  ;;  %v18519_v16 = vld [vmem:[%s21049_s3 + $0x6c0] ss:$8 sps:$4 sm:$0xff]  }
 0x584   :  { %13703 = vmatprep.subr.bf16.mxu0 %v18467_v50  ;;  %v18527_v50 = vld [vmem:[%s21049_s3 + $0x6d4] ss:$8 sps:$4 sm:$0xff]  }
 0x585   :  { %10016 = vmatpush1.bf16.msra.mxu1 %v18462_v7  ;;  %v18522_v7 = vld [vmem:[#allocation2 + $0x138] ss:$112 sps:$4 sm:$0xff]  }
 0x586   :  { %10017 = vmatprep.subr.bf16.mxu1 %v18470_v34  ;;  %v18530_v34 = vld [vmem:[#allocation2 + $0x21c] ss:$112 sps:$4 sm:$0xff]  }
 0x587   :  { %13704 = vmatpush1.bf16.msra.mxu0 %v18465_v62  ;;  %v18525_v62 = vld [vmem:[%s21049_s3 + $0x6d0] ss:$8 sps:$4 sm:$0xff]  }
 0x588   :  { %13705 = vmatprep.subr.bf16.mxu0 %v18473_v63  ;;  %v18533_v63 = vld [vmem:[%s21049_s3 + $0x6e4] ss:$8 sps:$4 sm:$0xff]  }
 0x589   :  { %10018 = vmatpush1.bf16.msra.mxu1 %v18468_v1  ;;  %v18528_v1 = vld [vmem:[#allocation2 + $0x218] ss:$112 sps:$4 sm:$0xff]  }
 0x58a   :  { %10019 = vmatprep.subr.bf16.mxu1 %v18476_v2  ;;  %v18531_v2 = vld [vmem:[%s21049_s3 + $0x6e0] ss:$8 sps:$4 sm:$0xff]  }
 0x58b   :  { %13706 = vmatpush1.bf16.msra.mxu0 %v18471_v12  ;;  %v1498_v12 = vrot.slane %v19982_v47, %v19741_v43 }
 0x58c   :  { %13707 = vmatprep.subr.bf16.mxu0 %v18479_v3  ;;  %v18536_v3 = vld [vmem:[#allocation2 + $0x2fc] ss:$112 sps:$4 sm:$0xff]  }
 0x58d   :  { %10020 = vmatpush1.bf16.msra.mxu1 %v18474_v4 }
 0x58e   :  { %10021 = vmatprep.subr.bf16.mxu1 %v18482_v35 }
 0x58f   :  { %13708 = vmatpush1.bf16.msra.mxu0 %v18477_v8  ;;  %v18539_v8 = vld [vmem:[%s21049_s3 + $0x6f4] ss:$8 sps:$4 sm:$0xff]  }
 0x590   :  { %13709 = vmatprep.subr.bf16.mxu0 %v18485_v14 }
 0x591   :  { %10022 = vmatpush1.bf16.msra.mxu1 %v18480_v15 }
 0x592   :  { %10023 = vmatprep.subr.bf16.mxu1 %v18488_v20 }
 0x593   :  { %13710 = vmatpush1.bf16.msra.mxu0 %v18483_v19  ;;  %v18534_v19 = vld [vmem:[#allocation2 + $0x2f8] ss:$112 sps:$4 sm:$0xff]  }
 0x594   :  { %13711 = vmatprep.subr.bf16.mxu0 %v18491_v5  ;;  %v18537_v5 = vld [vmem:[%s21049_s3 + $0x6f0] ss:$8 sps:$4 sm:$0xff]  }
 0x595   :  { %10024 = vmatpush1.bf16.msra.mxu1 %v18486_v22  ;;  %v18542_v22 = vld [vmem:[#allocation2 + $0x3dc] ss:$112 sps:$4 sm:$0xff]  }
 0x596   :  { %10025 = vmatprep.subr.bf16.mxu1 %v18494_v31  ;;  %v18545_v31 = vld [vmem:[%s21049_s3 + $0x704] ss:$8 sps:$4 sm:$0xff]  }
 0x597   :  { %13712 = vmatpush1.bf16.msra.mxu0 %v18489_v30  ;;  %v10747_v30 = vmax.f32 %v19856_v21, 0.0  ;;  %v18551_v21 = vld [vmem:[%s21049_s3 + $0x714] ss:$8 sps:$4 sm:$0xff]  }
 0x598   :  { %13713 = vmatprep.subr.bf16.mxu0 %v18497_v32 }
 0x599   :  { %10026 = vmatpush1.bf16.msra.mxu1 %v18492_v17  ;;  %v18540_v17 = vld [vmem:[#allocation2 + $0x3d8] ss:$112 sps:$4 sm:$0xff]  }
 0x59a   :  { %10027 = vmatprep.subr.bf16.mxu1 %v18500_v28  ;;  %v18548_v28 = vld [vmem:[#allocation2 + $0x4bc] ss:$112 sps:$4 sm:$0xff]  }
 0x59b   :  { %13714 = vmatpush1.bf16.msra.mxu0 %v18495_v33  ;;  %v18543_v33 = vld [vmem:[%s21049_s3 + $0x700] ss:$8 sps:$4 sm:$0xff]  }
 0x59c   :  { %13715 = vmatprep.subr.bf16.mxu0 %v18503_v42  ;;  %v10775_v42 = vpack.c.bf16 %v10747_v30, %v10747_v30  ;;  %v18599_v30 = vld [vmem:[%s21049_s3 + $0x794] ss:$8 sps:$4 sm:$0xff]  }
 0x59d   :  { %10028 = vmatpush1.bf16.msra.mxu1 %v18498_v52 }
 0x59e   :  { %10038 = vmatprep.subr.bf16.mxu1 %v18506_v44  ;;  %v18549_v44 = vld [vmem:[%s21049_s3 + $0x710] ss:$8 sps:$4 sm:$0xff]  }
 0x59f   :  { %13716 = vmatpush1.bf16.msra.mxu0 %v18501_v25  ;;  %v18546_v25 = vld [vmem:[#allocation2 + $0x4b8] ss:$112 sps:$4 sm:$0xff]  }
 0x5a0   :  { %13717 = vmatprep.subr.bf16.mxu0 %v18509_v41  ;;  %10030 = vmatmul.mubr.bf16.vlgmr.msra.gmra.mrb[32].mxu1 %v19287_v29  ;;  %v18554_v41 = vld [vmem:[#allocation2 + $0x59c] ss:$112 sps:$4 sm:$0xff]  }
 0x5a1   :  { %10039 = vmatpush1.bf16.msra.mxu1 %v18504_v57  ;;  %10070 = vmatprep.mubr.bf16.mxu1 %v19183_v0  ;;  %v18557_v57 = vld [vmem:[%s21049_s3 + $0x724] ss:$8 sps:$4 sm:$0xff]  }
 0x5a2   :  { %10243 = vmatprep.subr.bf16.mxu1 %v18518_v55  ;;  %v18555_v55 = vld [vmem:[%s21049_s3 + $0x720] ss:$8 sps:$4 sm:$0xff]  }
 0x5a3   :  { %13718 = vmatpush1.bf16.msra.mxu0 %v18507_v53  ;;  %v18552_v53 = vld [vmem:[#allocation2 + $0x598] ss:$112 sps:$4 sm:$0xff]  }
 0x5a4   :  { %13719 = vmatprep.subr.bf16.mxu0 %v18512_v39  ;;  %v18560_v39 = vld [vmem:[#allocation2 + $0x67c] ss:$112 sps:$4 sm:$0xff]  }
 0x5a7   :  { %13720 = vmatpush1.bf16.msra.mxu0 %v18510_v48  ;;  %v18563_v48 = vld [vmem:[%s21049_s3 + $0x734] ss:$8 sps:$4 sm:$0xff]  }
 0x5a8   :  { %13721 = vmatprep.subr.bf16.mxu0 %v18515_v13  ;;  %v18558_v13 = vld [vmem:[#allocation2 + $0x678] ss:$112 sps:$4 sm:$0xff]  }
 0x5ab   :  { %13722 = vmatpush1.bf16.msra.mxu0 %v18513_v56  ;;  %v18561_v56 = vld [vmem:[%s21049_s3 + $0x730] ss:$8 sps:$4 sm:$0xff]  }
 0x5ac   :  { %13723 = vmatprep.subr.bf16.mxu0 %v18521_v6  ;;  %15651 = vmatmul.mubr.msk.bf16.vlgmr.msra.gmra.mrb[32].mxu1 %vm8435_vm0, %v19245_v10  ;;  %v18566_v6 = vld [vmem:[#allocation2 + $0x75c] ss:$112 sps:$4 sm:$0xff]  }
 0x5ad   :  { %10244 = vmatpush1.bf16.msra.mxu1 %v18516_v58  ;;  %10275 = vmatprep.mubr.bf16.mxu1 %v19252_v51  ;;  %v18569_v58 = vld [vmem:[%s21049_s3 + $0x744] ss:$8 sps:$4 sm:$0xff]  }
 0x5ae   :  { %10245 = vmatprep.subr.bf16.mxu1 %v18524_v61  ;;  %v18567_v61 = vld [vmem:[%s21049_s3 + $0x740] ss:$8 sps:$4 sm:$0xff]  }
 0x5af   :  { %13724 = vmatpush1.bf16.msra.mxu0 %v18519_v16  ;;  %v18564_v16 = vld [vmem:[#allocation2 + $0x758] ss:$112 sps:$4 sm:$0xff]  }
 0x5b0   :  { %13725 = vmatprep.subr.bf16.mxu0 %v18527_v50  ;;  %v18572_v50 = vld [vmem:[#allocation2 + $0x83c] ss:$112 sps:$4 sm:$0xff]  }
 0x5b1   :  { %10246 = vmatpush1.bf16.msra.mxu1 %v18522_v7  ;;  %v18575_v7 = vld [vmem:[%s21049_s3 + $0x754] ss:$8 sps:$4 sm:$0xff]  }
 0x5b2   :  { %10247 = vmatprep.subr.bf16.mxu1 %v18530_v34  ;;  %v18573_v34 = vld [vmem:[%s21049_s3 + $0x750] ss:$8 sps:$4 sm:$0xff]  }
 0x5b3   :  { %13726 = vmatpush1.bf16.msra.mxu0 %v18525_v62  ;;  %v20196_v4 = vpop.f32.mrb[28].mxu1  ;;  %v18570_v62 = vld [vmem:[#allocation2 + $0x838] ss:$112 sps:$4 sm:$0xff]  }
 0x5b4   :  { %13727 = vmatprep.subr.bf16.mxu0 %v18533_v63  ;;  %v9746_v35 = vpop.f32.mrb[29].mxu1  ;;  %v18578_v63 = vld [vmem:[#allocation2 + $0x91c] ss:$112 sps:$4 sm:$0xff]  }
 0x5b5   :  { %10248 = vmatpush1.bf16.msra.mxu1 %v18528_v1  ;;  %v16194_v14 = vadd.f32 %v9746_v35, %v1498_v12  ;;  %v9748_v15 = vpop.f32.mrb[30].mxu1  ;;  %v18581_v1 = vld [vmem:[%s21049_s3 + $0x764] ss:$8 sps:$4 sm:$0xff]   ;;  %v18576_v12 = vld [vmem:[#allocation2 + $0x918] ss:$112 sps:$4 sm:$0xff]  }
 0x5b6   :  { %v9749_v20 = vpop.f32.mrb[31].mxu1  ;;  %10249 = vmatprep.subr.bf16.mxu1 %v18536_v3  ;;  %v18584_v3 = vld [vmem:[#allocation2 + $0x9fc] ss:$112 sps:$4 sm:$0xff]   ;;  %v18582_v35 = vld [vmem:[#allocation2 + $0x9f8] ss:$112 sps:$4 sm:$0xff]  }
 0x5b7   :  { %13728 = vmatpush1.bf16.msra.mxu0 %v18531_v2  ;;  %v10750_v32 = vmax.f32 %v16194_v14, 0.0  ;;  %v18579_v2 = vld [vmem:[%s21049_s3 + $0x760] ss:$8 sps:$4 sm:$0xff]   ;;  %v18585_v14 = vld [vmem:[%s21049_s3 + $0x770] ss:$8 sps:$4 sm:$0xff]  }
 0x5b8   :  { %13729 = vmatprep.subr.bf16.mxu0 %v18539_v8  ;;  %v18587_v8 = vld [vmem:[%s21049_s3 + $0x774] ss:$8 sps:$4 sm:$0xff]   ;;  %v18588_v20 = vld [vmem:[#allocation2 + $0xad8] ss:$112 sps:$4 sm:$0xff]  }
 0x5b9   :  { %10250 = vmatpush1.bf16.msra.mxu1 %v18534_v19  ;;  %v10778_v52 = vpack.c.bf16 %v10750_v32, %v10750_v32  ;;  %v18590_v15 = vld [vmem:[#allocation2 + $0xadc] ss:$112 sps:$4 sm:$0xff]   ;;  %v18597_v32 = vld [vmem:[%s21049_s3 + $0x790] ss:$8 sps:$4 sm:$0xff]  }
 0x5ba   :  { %10251 = vmatprep.subr.bf16.mxu1 %v18542_v22  ;;  %v18593_v19 = vld [vmem:[%s21049_s3 + $0x784] ss:$8 sps:$4 sm:$0xff]  }
 0x5bb   :  { %13730 = vmatpush1.bf16.msra.mxu0 %v18537_v5  ;;  %v18591_v5 = vld [vmem:[%s21049_s3 + $0x780] ss:$8 sps:$4 sm:$0xff]   ;;  %v18596_v22 = vld [vmem:[#allocation2 + $0xbbc] ss:$112 sps:$4 sm:$0xff]  }
 0x5bc   :  { %13740 = vmatprep.subr.bf16.mxu0 %v18545_v31  ;;  %v18594_v31 = vld [vmem:[#allocation2 + $0xbb8] ss:$112 sps:$4 sm:$0xff]  }
 0x5bd   :  { %10252 = vmatpush1.bf16.msra.mxu1 %v18540_v17  ;;  %v18602_v17 = vld [vmem:[#allocation2 + $0xc9c] ss:$112 sps:$4 sm:$0xff]  }
 0x5be   :  { %13732 = vmatmul.mubr.bf16.vlgmr.msra.gmra.mrb[24].mxu0 %v10775_v42  ;;  %10253 = vmatprep.subr.bf16.mxu1 %v18548_v28  ;;  %v18600_v28 = vld [vmem:[#allocation2 + $0xc98] ss:$112 sps:$4 sm:$0xff]  }
 0x5bf   :  { %13741 = vmatpush1.bf16.msra.mxu0 %v18543_v33  ;;  %13772 = vmatprep.mubr.bf16.mxu0 %v10778_v52  ;;  %v18605_v33 = vld [vmem:[%s21049_s3 + $0x7a4] ss:$8 sps:$4 sm:$0xff]   ;;  %v18603_v42 = vld [vmem:[%s21049_s3 + $0x7a0] ss:$8 sps:$4 sm:$0xff]   ;;  %v18611_v52 = vld [vmem:[%s21049_s3 + $0x7b4] ss:$8 sps:$4 sm:$0xff]  }
 0x5c0   :  { %13742 = vmatprep.subr.bf16.mxu0 %v18551_v21  ;;  %v18608_v21 = vld [vmem:[#allocation2 + $0xd7c] ss:$112 sps:$4 sm:$0xff]  }
 0x5c1   :  { %10254 = vmatpush1.bf16.msra.mxu1 %v18546_v25  ;;  %v18606_v25 = vld [vmem:[#allocation2 + $0xd78] ss:$112 sps:$4 sm:$0xff]  }
 0x5c2   :  { %10255 = vmatprep.subr.bf16.mxu1 %v18554_v41  ;;  %v18614_v41 = vld [vmem:[#allocation2 + $0xe5c] ss:$112 sps:$4 sm:$0xff]  }
 0x5c3   :  { %13743 = vmatpush1.bf16.msra.mxu0 %v18549_v44  ;;  %v18609_v44 = vld [vmem:[%s21049_s3 + $0x7b0] ss:$8 sps:$4 sm:$0xff]  }
 0x5c4   :  { %13744 = vmatprep.subr.bf16.mxu0 %v18557_v57  ;;  %v18617_v57 = vld [vmem:[%s21049_s3 + $0x7c4] ss:$8 sps:$4 sm:$0xff]  }
 0x5c5   :  { %10256 = vmatpush1.bf16.msra.mxu1 %v18552_v53  ;;  %v18612_v53 = vld [vmem:[#allocation2 + $0xe58] ss:$112 sps:$4 sm:$0xff]  }
 0x5c6   :  { %10257 = vmatprep.subr.bf16.mxu1 %v18560_v39  ;;  %v18620_v39 = vld [vmem:[#allocation2 + $0xf3c] ss:$112 sps:$4 sm:$0xff]  }
 0x5c7   :  { %13745 = vmatpush1.bf16.msra.mxu0 %v18555_v55  ;;  %v18615_v55 = vld [vmem:[%s21049_s3 + $0x7c0] ss:$8 sps:$4 sm:$0xff]  }
 0x5c8   :  { %13746 = vmatprep.subr.bf16.mxu0 %v18563_v48  ;;  %v18623_v48 = vld [vmem:[%s21049_s3 + $0x7d4] ss:$8 sps:$4 sm:$0xff]  }
 0x5c9   :  { %10258 = vmatpush1.bf16.msra.mxu1 %v18558_v13  ;;  %v18618_v13 = vld [vmem:[#allocation2 + $0xf38] ss:$112 sps:$4 sm:$0xff]  }
 0x5ca   :  { %10259 = vmatprep.subr.bf16.mxu1 %v18566_v6  ;;  %v18621_v6 = vld [vmem:[%s21049_s3 + $0x7d0] ss:$8 sps:$4 sm:$0xff]  }
 0x5cb   :  { %13747 = vmatpush1.bf16.msra.mxu0 %v18561_v56  ;;  %v20291_v56 = vld [vmem:[%s21048_s2 + $0x10] sm:$0xff] }
 0x5cc   :  { %13748 = vmatprep.subr.bf16.mxu0 %v18569_v58  ;;  %v18626_v58 = vld [vmem:[#allocation2 + $0x101c] ss:$112 sps:$4 sm:$0xff]  }
 0x5cd   :  { %10260 = vmatpush1.bf16.msra.mxu1 %v18564_v16  ;;  %v1494_v16 = vrot.slane %v19982_v47, %v19864_v37  ;;  %v18635_v47 = vld [vmem:[%s21049_s3 + $0x7f4] ss:$8 sps:$4 sm:$0xff]  }
 0x5ce   :  { %10261 = vmatprep.subr.bf16.mxu1 %v18572_v50  ;;  %v1506_v50 = vrot.slane %v20291_v56, %v19399_v40 }
 0x5cf   :  { %13749 = vmatpush1.bf16.msra.mxu0 %v18567_v61  ;;  %v18629_v61 = vld [vmem:[%s21049_s3 + $0x7e4] ss:$8 sps:$4 sm:$0xff]  }
 0x5d0   :  { %13750 = vmatprep.subr.bf16.mxu0 %v18575_v7  ;;  %v18624_v7 = vld [vmem:[#allocation2 + $0x1018] ss:$112 sps:$4 sm:$0xff]  }
 0x5d1   :  { %10262 = vmatpush1.bf16.msra.mxu1 %v18570_v62  ;;  %v18627_v62 = vld [vmem:[%s21049_s3 + $0x7e0] ss:$8 sps:$4 sm:$0xff]  }
 0x5d2   :  { %10263 = vmatprep.subr.bf16.mxu1 %v18578_v63  ;;  %v16193_v63 = vadd.f32 %v20196_v4, %v1494_v16  ;;  %v18641_v4 = vld [vmem:[%s21049_s3 + $0x804] ss:$8 sps:$4 sm:$0xff]   ;;  %v18675_v16 = vld [vmem:[%s21049_s3 + $0x860] ss:$8 sps:$4 sm:$0xff]  }
 0x5d3   :  { %13751 = vmatpush1.bf16.msra.mxu0 %v18573_v34  ;;  %v18632_v34 = vld [vmem:[#allocation2 + $0x10fc] ss:$112 sps:$4 sm:$0xff]  }
 0x5d4   :  { %13752 = vmatprep.subr.bf16.mxu0 %v18581_v1  ;;  %v16196_v1 = vadd.f32 %v19368_v46, %v1506_v50  ;;  %v18639_v46 = vld [vmem:[%s21049_s3 + $0x800] ss:$8 sps:$4 sm:$0xff]   ;;  %v18683_v50 = vld [vmem:[%s21049_s3 + $0x874] ss:$8 sps:$4 sm:$0xff]  }
 0x5d5   :  { %10264 = vmatpush1.bf16.msra.mxu1 %v18576_v12  ;;  %v18630_v12 = vld [vmem:[#allocation2 + $0x10f8] ss:$112 sps:$4 sm:$0xff]  }
 0x5d6   :  { %10265 = vmatprep.subr.bf16.mxu1 %v18584_v3  ;;  %v18638_v3 = vld [vmem:[#allocation2 + $0x11dc] ss:$112 sps:$4 sm:$0xff]  }
 0x5d7   :  { %13753 = vmatpush1.bf16.msra.mxu0 %v18579_v2  ;;  %v18633_v2 = vld [vmem:[%s21049_s3 + $0x7f0] ss:$8 sps:$4 sm:$0xff]  }
 0x5d8   :  { %13754 = vmatprep.subr.bf16.mxu0 %v18587_v8  ;;  %v10749_v8 = vmax.f32 %v16193_v63, 0.0  ;;  %v18689_v63 = vld [vmem:[%s21049_s3 + $0x884] ss:$8 sps:$4 sm:$0xff]  }
 0x5d9   :  { %10266 = vmatpush1.bf16.msra.mxu1 %v18582_v35  ;;  %v10752_v35 = vmax.f32 %v16196_v1, 0.0  ;;  %v18687_v1 = vld [vmem:[%s21049_s3 + $0x880] ss:$8 sps:$4 sm:$0xff]  }
 0x5da   :  { %10267 = vmatprep.subr.bf16.mxu1 %v18590_v15  ;;  %v18644_v15 = vld [vmem:[#allocation2 + $0x12bc] ss:$112 sps:$4 sm:$0xff]  }
 0x5db   :  { %13755 = vmatpush1.bf16.msra.mxu0 %v18585_v14  ;;  %v18636_v14 = vld [vmem:[#allocation2 + $0x11d8] ss:$112 sps:$4 sm:$0xff]  }
 0x5dc   :  { %13756 = vmatprep.subr.bf16.mxu0 %v18593_v19  ;;  %v10777_v19 = vpack.c.bf16 %v10749_v8, %v10749_v8  ;;  %v18693_v8 = vld [vmem:[%s21049_s3 + $0x890] ss:$8 sps:$4 sm:$0xff]  }
 0x5dd   :  { %10268 = vmatpush1.bf16.msra.mxu1 %v18588_v20  ;;  %v18647_v20 = vld [vmem:[%s21049_s3 + $0x814] ss:$8 sps:$4 sm:$0xff]  }
 0x5de   :  { %10269 = vmatprep.subr.bf16.mxu1 %v18596_v22  ;;  %v18642_v22 = vld [vmem:[#allocation2 + $0x12b8] ss:$112 sps:$4 sm:$0xff]  }
 0x5df   :  { %13757 = vmatpush1.bf16.msra.mxu0 %v18591_v5  ;;  %v10780_v5 = vpack.c.bf16 %v10752_v35, %v10752_v35  ;;  %v18701_v35 = vld [vmem:[%s21049_s3 + $0x8a4] ss:$8 sps:$4 sm:$0xff]  }
 0x5e0   :  { %13758 = vmatprep.subr.bf16.mxu0 %v18599_v30  ;;  %v18645_v30 = vld [vmem:[%s21049_s3 + $0x810] ss:$8 sps:$4 sm:$0xff]  }
 0x5e1   :  { %10270 = vmatpush1.bf16.msra.mxu1 %v18594_v31  ;;  %v18650_v31 = vld [vmem:[#allocation2 + $0x139c] ss:$112 sps:$4 sm:$0xff]  }
 0x5e2   :  { %10271 = vmatprep.subr.bf16.mxu1 %v18602_v17  ;;  %v18648_v17 = vld [vmem:[#allocation2 + $0x1398] ss:$112 sps:$4 sm:$0xff]  }
 0x5e3   :  { %13759 = vmatpush1.bf16.msra.mxu0 %v18597_v32  ;;  %v18653_v32 = vld [vmem:[%s21049_s3 + $0x824] ss:$8 sps:$4 sm:$0xff]  }
 0x5e4   :  { %13760 = vmatprep.subr.bf16.mxu0 %v18605_v33  ;;  %v18651_v33 = vld [vmem:[%s21049_s3 + $0x820] ss:$8 sps:$4 sm:$0xff]  }
 0x5e5   :  { %10272 = vmatpush1.bf16.msra.mxu1 %v18600_v28  ;;  %v18656_v28 = vld [vmem:[#allocation2 + $0x147c] ss:$112 sps:$4 sm:$0xff]  }
 0x5e6   :  { %10273 = vmatprep.subr.bf16.mxu1 %v18608_v21  ;;  %v18654_v21 = vld [vmem:[#allocation2 + $0x1478] ss:$112 sps:$4 sm:$0xff]  }
 0x5e7   :  { %13761 = vmatpush1.bf16.msra.mxu0 %v18603_v42  ;;  %v18659_v42 = vld [vmem:[%s21049_s3 + $0x834] ss:$8 sps:$4 sm:$0xff]  }
 0x5e8   :  { %13762 = vmatprep.subr.bf16.mxu0 %v18611_v52  ;;  %v18657_v52 = vld [vmem:[%s21049_s3 + $0x830] ss:$8 sps:$4 sm:$0xff]  }
 0x5e9   :  { %10274 = vmatpush1.bf16.msra.mxu1 %v18606_v25  ;;  %v18662_v25 = vld [vmem:[#allocation2 + $0x155c] ss:$112 sps:$4 sm:$0xff]  }
 0x5ea   :  { %10284 = vmatprep.subr.bf16.mxu1 %v18614_v41  ;;  %v18660_v41 = vld [vmem:[#allocation2 + $0x1558] ss:$112 sps:$4 sm:$0xff]  }
 0x5eb   :  { %13763 = vmatpush1.bf16.msra.mxu0 %v18609_v44  ;;  %v18665_v44 = vld [vmem:[%s21049_s3 + $0x844] ss:$8 sps:$4 sm:$0xff]  }
 0x5ec   :  { %13764 = vmatprep.subr.bf16.mxu0 %v18617_v57  ;;  %10276 = vmatmul.mubr.bf16.vlgmr.msra.gmra.mrb[36].mxu1 %v19259_v9  ;;  %v18663_v57 = vld [vmem:[%s21049_s3 + $0x840] ss:$8 sps:$4 sm:$0xff]  }
 0x5ed   :  { %10285 = vmatpush1.bf16.msra.mxu1 %v18612_v53  ;;  %10316 = vmatprep.mubr.bf16.mxu1 %v19266_v36  ;;  %v18668_v53 = vld [vmem:[#allocation2 + $0x163c] ss:$112 sps:$4 sm:$0xff]  }
 0x5ee   :  { %10286 = vmatprep.subr.bf16.mxu1 %v18620_v39  ;;  %v18666_v39 = vld [vmem:[#allocation2 + $0x1638] ss:$112 sps:$4 sm:$0xff]  }
 0x5ef   :  { %13765 = vmatpush1.bf16.msra.mxu0 %v18615_v55  ;;  %v18671_v55 = vld [vmem:[%s21049_s3 + $0x854] ss:$8 sps:$4 sm:$0xff]  }
 0x5f0   :  { %13766 = vmatprep.subr.bf16.mxu0 %v18623_v48  ;;  %v18669_v48 = vld [vmem:[%s21049_s3 + $0x850] ss:$8 sps:$4 sm:$0xff]  }
 0x5f1   :  { %10287 = vmatpush1.bf16.msra.mxu1 %v18618_v13  ;;  %v18674_v13 = vld [vmem:[#allocation2 + $0x171c] ss:$112 sps:$4 sm:$0xff]  }
 0x5f2   :  { %10288 = vmatprep.subr.bf16.mxu1 %v18626_v58  ;;  %v18672_v58 = vld [vmem:[#allocation2 + $0x1718] ss:$112 sps:$4 sm:$0xff]  }
 0x5f3   :  { %13767 = vmatpush1.bf16.msra.mxu0 %v18621_v6  ;;  %v18677_v6 = vld [vmem:[%s21049_s3 + $0x864] ss:$8 sps:$4 sm:$0xff]  }
 0x5f4   :  { %13768 = vmatprep.subr.bf16.mxu0 %v18629_v61  ;;  %v18680_v61 = vld [vmem:[#allocation2 + $0x17fc] ss:$112 sps:$4 sm:$0xff]  }
 0x5f5   :  { %10289 = vmatpush1.bf16.msra.mxu1 %v18624_v7  ;;  %v18678_v7 = vld [vmem:[#allocation2 + $0x17f8] ss:$112 sps:$4 sm:$0xff]  }
 0x5f6   :  { %10290 = vmatprep.subr.bf16.mxu1 %v18632_v34  ;;  %v18686_v34 = vld [vmem:[#allocation2 + $0x18dc] ss:$112 sps:$4 sm:$0xff]  }
 0x5f7   :  { %13769 = vmatpush1.bf16.msra.mxu0 %v18627_v62  ;;  %v18681_v62 = vld [vmem:[%s21049_s3 + $0x870] ss:$8 sps:$4 sm:$0xff]  }
 0x5f8   :  { %13770 = vmatprep.subr.bf16.mxu0 %v18635_v47  ;;  %v18684_v47 = vld [vmem:[#allocation2 + $0x18d8] ss:$112 sps:$4 sm:$0xff]  }
 0x5f9   :  { %10291 = vmatpush1.bf16.msra.mxu1 %v18630_v12  ;;  %v18692_v12 = vld [vmem:[#allocation2 + $0x19bc] ss:$112 sps:$4 sm:$0xff]  }
 0x5fa   :  { %10292 = vmatprep.subr.bf16.mxu1 %v18638_v3  ;;  %v18690_v3 = vld [vmem:[#allocation2 + $0x19b8] ss:$112 sps:$4 sm:$0xff]  }
 0x5fb   :  { %13771 = vmatpush1.bf16.msra.mxu0 %v18633_v2  ;;  %v18695_v2 = vld [vmem:[%s21049_s3 + $0x894] ss:$8 sps:$4 sm:$0xff]  }
 0x5fc   :  { %13781 = vmatprep.subr.bf16.mxu0 %v18641_v4  ;;  %v18698_v4 = vld [vmem:[#allocation2 + $0x1a9c] ss:$112 sps:$4 sm:$0xff]  }
 0x5fd   :  { %10293 = vmatpush1.bf16.msra.mxu1 %v18636_v14  ;;  %v18696_v14 = vld [vmem:[#allocation2 + $0x1a98] ss:$112 sps:$4 sm:$0xff]  }
 0x5fe   :  { %13773 = vmatmul.mubr.bf16.vlgmr.msra.gmra.mrb[24].mxu0 %v10777_v19  ;;  %10294 = vmatprep.subr.bf16.mxu1 %v18644_v15  ;;  %v18704_v15 = vld [vmem:[#allocation2 + $0x1b7c] ss:$112 sps:$4 sm:$0xff]  }
 0x5ff   :  { %13782 = vmatpush1.bf16.msra.mxu0 %v18639_v46  ;;  %13813 = vmatprep.mubr.bf16.mxu0 %v10780_v5  ;;  %v18699_v46 = vld [vmem:[%s21049_s3 + $0x8a0] ss:$8 sps:$4 sm:$0xff]   ;;  %v18707_v19 = vld [vmem:[%s21049_s3 + $0x8b4] ss:$8 sps:$4 sm:$0xff]   ;;  %v18705_v5 = vld [vmem:[%s21049_s3 + $0x8b0] ss:$8 sps:$4 sm:$0xff]  }
 0x600   :  { %13783 = vmatprep.subr.bf16.mxu0 %v18647_v20  ;;  %v18702_v20 = vld [vmem:[#allocation2 + $0x1b78] ss:$112 sps:$4 sm:$0xff]  }
 0x601   :  { %10295 = vmatpush1.bf16.msra.mxu1 %v18642_v22  ;;  %v18710_v22 = vld [vmem:[#allocation2 + $0x1c5c] ss:$112 sps:$4 sm:$0xff]  }
 0x602   :  { %10296 = vmatprep.subr.bf16.mxu1 %v18650_v31  ;;  %v18708_v31 = vld [vmem:[#allocation2 + $0x1c58] ss:$112 sps:$4 sm:$0xff]  }
 0x603   :  { %13784 = vmatpush1.bf16.msra.mxu0 %v18645_v30  ;;  %v18713_v30 = vld [vmem:[%s21049_s3 + $0x8c4] ss:$8 sps:$4 sm:$0xff]  }
 0x604   :  { %13785 = vmatprep.subr.bf16.mxu0 %v18653_v32  ;;  %v18711_v32 = vld [vmem:[%s21049_s3 + $0x8c0] ss:$8 sps:$4 sm:$0xff]  }
 0x605   :  { %10297 = vmatpush1.bf16.msra.mxu1 %v18648_v17  ;;  %v18716_v17 = vld [vmem:[#allocation2 + $0x1d3c] ss:$112 sps:$4 sm:$0xff]  }
 0x606   :  { %10298 = vmatprep.subr.bf16.mxu1 %v18656_v28  ;;  %v18714_v28 = vld [vmem:[#allocation2 + $0x1d38] ss:$112 sps:$4 sm:$0xff]  }
 0x607   :  { %13786 = vmatpush1.bf16.msra.mxu0 %v18651_v33  ;;  %v18719_v33 = vld [vmem:[%s21049_s3 + $0x8d4] ss:$8 sps:$4 sm:$0xff]  }
 0x608   :  { %13787 = vmatprep.subr.bf16.mxu0 %v18659_v42  ;;  %v18717_v42 = vld [vmem:[%s21049_s3 + $0x8d0] ss:$8 sps:$4 sm:$0xff]  }
 0x609   :  { %10299 = vmatpush1.bf16.msra.mxu1 %v18654_v21  ;;  %v18722_v21 = vld [vmem:[#allocation2 + $0x1e1c] ss:$112 sps:$4 sm:$0xff]  }
 0x60a   :  { %10300 = vmatprep.subr.bf16.mxu1 %v18662_v25  ;;  %v18725_v25 = vld [vmem:[%s21049_s3 + $0x8e4] ss:$8 sps:$4 sm:$0xff]  }
 0x60b   :  { %13788 = vmatpush1.bf16.msra.mxu0 %v18657_v52  ;;  %v1502_v52 = vrot.slane %v20291_v56, %v19460_v11 }
 0x60c   :  { %13789 = vmatprep.subr.bf16.mxu0 %v18665_v44  ;;  %v18720_v44 = vld [vmem:[#allocation2 + $0x1e18] ss:$112 sps:$4 sm:$0xff]  }
 0x60d   :  { %10301 = vmatpush1.bf16.msra.mxu1 %v18660_v41  ;;  %v18723_v41 = vld [vmem:[%s21049_s3 + $0x8e0] ss:$8 sps:$4 sm:$0xff]  }
 0x60e   :  { %10302 = vmatprep.subr.bf16.mxu1 %v18668_v53  ;;  %v16195_v53 = vadd.f32 %v19365_v45, %v1502_v52  ;;  %v18746_v45 = vld [vmem:[%s21049_s3 + $0x904] ss:$8 sps:$4 sm:$0xff]   ;;  %v18786_v52 = vld [vmem:[%s21049_s3 + $0x970] ss:$8 sps:$4 sm:$0xff]  }
 0x60f   :  { %13790 = vmatpush1.bf16.msra.mxu0 %v18663_v57  ;;  %v18728_v57 = vld [vmem:[#allocation2 + $0x1efc] ss:$112 sps:$4 sm:$0xff]  }
 0x610   :  { %13791 = vmatprep.subr.bf16.mxu0 %v18671_v55  ;;  %v18731_v55 = vld [vmem:[%s21049_s3 + $0x8f4] ss:$8 sps:$4 sm:$0xff]  }
 0x611   :  { %10303 = vmatpush1.bf16.msra.mxu1 %v18666_v39  ;;  %v18726_v39 = vld [vmem:[#allocation2 + $0x1ef8] ss:$112 sps:$4 sm:$0xff]  }
 0x612   :  { %10304 = vmatprep.subr.bf16.mxu1 %v18674_v13  ;;  %v18734_v13 = vld [vmem:[#allocation2 + $0x1fdc] ss:$112 sps:$4 sm:$0xff]  }
 0x613   :  { %13792 = vmatpush1.bf16.msra.mxu0 %v18669_v48  ;;  %v18729_v48 = vld [vmem:[%s21049_s3 + $0x8f0] ss:$8 sps:$4 sm:$0xff]  }
 0x614   :  { %13793 = vmatprep.subr.bf16.mxu0 %v18677_v6  ;;  %v10751_v6 = vmax.f32 %v16195_v53, 0.0  ;;  %v18800_v53 = vld [vmem:[%s21049_s3 + $0x994] ss:$8 sps:$4 sm:$0xff]  }
 0x615   :  { %10305 = vmatpush1.bf16.msra.mxu1 %v18672_v58  ;;  %v18732_v58 = vld [vmem:[#allocation2 + $0x1fd8] ss:$112 sps:$4 sm:$0xff]  }
 0x616   :  { %10306 = vmatprep.subr.bf16.mxu1 %v18680_v61  ;;  %v18744_v61 = vld [vmem:[%s21049_s3 + $0x900] ss:$8 sps:$4 sm:$0xff]  }
 0x617   :  { %13794 = vmatpush1.bf16.msra.mxu0 %v18675_v16  ;;  %v18737_v16 = vld [vmem:[#allocation2 + $0x20bc] ss:$112 sps:$4 sm:$0xff]  }
 0x618   :  { %13795 = vmatprep.subr.bf16.mxu0 %v18683_v50  ;;  %v10779_v50 = vpack.c.bf16 %v10751_v6, %v10751_v6  ;;  %v18783_v6 = vld [vmem:[#allocation2 + $0x2898] ss:$112 sps:$4 sm:$0xff]  }
 0x619   :  { %10307 = vmatpush1.bf16.msra.mxu1 %v18678_v7  ;;  %v18752_v7 = vld [vmem:[%s21049_s3 + $0x914] ss:$8 sps:$4 sm:$0xff]  }
 0x61a   :  { %10308 = vmatprep.subr.bf16.mxu1 %v18686_v34  ;;  %v18740_v34 = vld [vmem:[#allocation2 + $0x219c] ss:$112 sps:$4 sm:$0xff]  }
 0x61b   :  { %13796 = vmatpush1.bf16.msra.mxu0 %v18681_v62  ;;  %v18735_v62 = vld [vmem:[#allocation2 + $0x20b8] ss:$112 sps:$4 sm:$0xff]  }
 0x61c   :  { %13797 = vmatprep.subr.bf16.mxu0 %v18689_v63  ;;  %v18750_v63 = vld [vmem:[%s21049_s3 + $0x910] ss:$8 sps:$4 sm:$0xff]  }
 0x61d   :  { %10309 = vmatpush1.bf16.msra.mxu1 %v18684_v47  ;;  %v18758_v47 = vld [vmem:[%s21049_s3 + $0x924] ss:$8 sps:$4 sm:$0xff]  }
 0x61e   :  { %10310 = vmatprep.subr.bf16.mxu1 %v18692_v12  ;;  %v18743_v12 = vld [vmem:[#allocation2 + $0x227c] ss:$112 sps:$4 sm:$0xff]  }
 0x61f   :  { %13798 = vmatpush1.bf16.msra.mxu0 %v18687_v1  ;;  %v18738_v1 = vld [vmem:[#allocation2 + $0x2198] ss:$112 sps:$4 sm:$0xff]  }
 0x620   :  { %13799 = vmatprep.subr.bf16.mxu0 %v18695_v2  ;;  %v18756_v2 = vld [vmem:[%s21049_s3 + $0x920] ss:$8 sps:$4 sm:$0xff]  }
 0x621   :  { %10311 = vmatpush1.bf16.msra.mxu1 %v18690_v3  ;;  %v18764_v3 = vld [vmem:[%s21049_s3 + $0x934] ss:$8 sps:$4 sm:$0xff]  }
 0x622   :  { %10312 = vmatprep.subr.bf16.mxu1 %v18698_v4  ;;  %v18749_v4 = vld [vmem:[#allocation2 + $0x235c] ss:$112 sps:$4 sm:$0xff]  }
 0x623   :  { %13800 = vmatpush1.bf16.msra.mxu0 %v18693_v8  ;;  %v18741_v8 = vld [vmem:[#allocation2 + $0x2278] ss:$112 sps:$4 sm:$0xff]  }
 0x624   :  { %13801 = vmatprep.subr.bf16.mxu0 %v18701_v35  ;;  %v18762_v35 = vld [vmem:[%s21049_s3 + $0x930] ss:$8 sps:$4 sm:$0xff]  }
 0x625   :  { %10313 = vmatpush1.bf16.msra.mxu1 %v18696_v14  ;;  %v18770_v14 = vld [vmem:[%s21049_s3 + $0x944] ss:$8 sps:$4 sm:$0xff]  }
 0x626   :  { %10314 = vmatprep.subr.bf16.mxu1 %v18704_v15  ;;  %v18755_v15 = vld [vmem:[#allocation2 + $0x243c] ss:$112 sps:$4 sm:$0xff]  }
 0x627   :  { %13802 = vmatpush1.bf16.msra.mxu0 %v18699_v46  ;;  %v18747_v46 = vld [vmem:[#allocation2 + $0x2358] ss:$112 sps:$4 sm:$0xff]  }
 0x628   :  { %13803 = vmatprep.subr.bf16.mxu0 %v18707_v19  ;;  %v18768_v19 = vld [vmem:[%s21049_s3 + $0x940] ss:$8 sps:$4 sm:$0xff]  }
 0x629   :  { %10315 = vmatpush1.bf16.msra.mxu1 %v18702_v20  ;;  %v18776_v20 = vld [vmem:[%s21049_s3 + $0x954] ss:$8 sps:$4 sm:$0xff]  }
 0x62a   :  { %10325 = vmatprep.subr.bf16.mxu1 %v18710_v22  ;;  %v18761_v22 = vld [vmem:[#allocation2 + $0x251c] ss:$112 sps:$4 sm:$0xff]  }
 0x62b   :  { %13804 = vmatpush1.bf16.msra.mxu0 %v18705_v5  ;;  %v18753_v5 = vld [vmem:[#allocation2 + $0x2438] ss:$112 sps:$4 sm:$0xff]  }
 0x62c   :  { %13805 = vmatprep.subr.bf16.mxu0 %v18713_v30  ;;  %10317 = vmatmul.mubr.bf16.vlgmr.msra.gmra.mrb[36].mxu1 %v19273_v18  ;;  %v18774_v30 = vld [vmem:[%s21049_s3 + $0x950] ss:$8 sps:$4 sm:$0xff]  }
 0x62d   :  { %10326 = vmatpush1.bf16.msra.mxu1 %v18708_v31  ;;  %10357 = vmatprep.mubr.bf16.mxu1 %v19278_v24  ;;  %v18782_v31 = vld [vmem:[%s21049_s3 + $0x964] ss:$8 sps:$4 sm:$0xff]  }
 0x62e   :  { %10327 = vmatprep.subr.bf16.mxu1 %v18716_v17  ;;  %v18767_v17 = vld [vmem:[#allocation2 + $0x25fc] ss:$112 sps:$4 sm:$0xff]  }
 0x62f   :  { %13806 = vmatpush1.bf16.msra.mxu0 %v18711_v32  ;;  %v18759_v32 = vld [vmem:[#allocation2 + $0x2518] ss:$112 sps:$4 sm:$0xff]  }
 0x630   :  { %13807 = vmatprep.subr.bf16.mxu0 %v18719_v33  ;;  %v18780_v33 = vld [vmem:[%s21049_s3 + $0x960] ss:$8 sps:$4 sm:$0xff]  }
 0x631   :  { %10328 = vmatpush1.bf16.msra.mxu1 %v18714_v28  ;;  %v18788_v28 = vld [vmem:[%s21049_s3 + $0x974] ss:$8 sps:$4 sm:$0xff]  }
 0x632   :  { %10329 = vmatprep.subr.bf16.mxu1 %v18722_v21  ;;  %v18773_v21 = vld [vmem:[#allocation2 + $0x26dc] ss:$112 sps:$4 sm:$0xff]  }
 0x633   :  { %13808 = vmatpush1.bf16.msra.mxu0 %v18717_v42  ;;  %v18765_v42 = vld [vmem:[#allocation2 + $0x25f8] ss:$112 sps:$4 sm:$0xff]  }
 0x634   :  { %13809 = vmatprep.subr.bf16.mxu0 %v18725_v25  ;;  %v18794_v25 = vld [vmem:[%s21049_s3 + $0x984] ss:$8 sps:$4 sm:$0xff]  }
 0x635   :  { %10330 = vmatpush1.bf16.msra.mxu1 %v18720_v44  ;;  %v18771_v44 = vld [vmem:[#allocation2 + $0x26d8] ss:$112 sps:$4 sm:$0xff]  }
 0x636   :  { %10331 = vmatprep.subr.bf16.mxu1 %v18728_v57  ;;  %v18792_v57 = vld [vmem:[%s21049_s3 + $0x980] ss:$8 sps:$4 sm:$0xff]  }
 0x637   :  { %13810 = vmatpush1.bf16.msra.mxu0 %v18723_v41  ;;  %v18779_v41 = vld [vmem:[#allocation2 + $0x27bc] ss:$112 sps:$4 sm:$0xff]  }
 0x638   :  { %13811 = vmatprep.subr.bf16.mxu0 %v18731_v55  ;;  %v18777_v55 = vld [vmem:[#allocation2 + $0x27b8] ss:$112 sps:$4 sm:$0xff]  }
 0x639   :  { %10332 = vmatpush1.bf16.msra.mxu1 %v18726_v39  ;;  %v18785_v39 = vld [vmem:[#allocation2 + $0x289c] ss:$112 sps:$4 sm:$0xff]  }
 0x63a   :  { %10333 = vmatprep.subr.bf16.mxu1 %v18734_v13  ;;  %v18803_v13 = vld [vmem:[%s21049_s3 + $0x9a4] ss:$8 sps:$4 sm:$0xff]  }
 0x63b   :  { %13812 = vmatpush1.bf16.msra.mxu0 %v18729_v48  ;;  %v18798_v48 = vld [vmem:[%s21049_s3 + $0x990] ss:$8 sps:$4 sm:$0xff]  }
 0x63c   :  { %13822 = vmatprep.subr.bf16.mxu0 %v18746_v45  ;;  %v18791_v45 = vld [vmem:[#allocation2 + $0x297c] ss:$112 sps:$4 sm:$0xff]  }
 0x63d   :  { %10334 = vmatpush1.bf16.msra.mxu1 %v18732_v58  ;;  %v18801_v58 = vld [vmem:[%s21049_s3 + $0x9a0] ss:$8 sps:$4 sm:$0xff]  }
 0x63e   :  { %13814 = vmatmul.mubr.bf16.vlgmr.msra.gmra.mrb[24].mxu0 %v10779_v50  ;;  %10335 = vmatprep.subr.bf16.mxu1 %v18737_v16  ;;  %v18806_v16 = vld [vmem:[%s21049_s3 + $0x9b4] ss:$8 sps:$4 sm:$0xff]  }
 0x63f   :  { %13823 = vmatpush1.bf16.msra.mxu0 %v18744_v61  ;;  %v18789_v61 = vld [vmem:[#allocation2 + $0x2978] ss:$112 sps:$4 sm:$0xff]   ;;  %v18797_v50 = vld [vmem:[#allocation2 + $0x2a5c] ss:$112 sps:$4 sm:$0xff]  }
 0x640   :  { %13824 = vmatprep.subr.bf16.mxu0 %v18752_v7  ;;  %v18804_v7 = vld [vmem:[%s21049_s3 + $0x9b0] ss:$8 sps:$4 sm:$0xff]  }
 0x641   :  { %10336 = vmatpush1.bf16.msra.mxu1 %v18735_v62  ;;  %v18812_v62 = vld [vmem:[%s21049_s3 + $0x9c4] ss:$8 sps:$4 sm:$0xff]  }
 0x642   :  { %10337 = vmatprep.subr.bf16.mxu1 %v18740_v34  ;;  %v18795_v34 = vld [vmem:[#allocation2 + $0x2a58] ss:$112 sps:$4 sm:$0xff]  }
 0x643   :  { %13825 = vmatpush1.bf16.msra.mxu0 %v18750_v63  ;;  %v18809_v63 = vld [vmem:[#allocation2 + $0x6c] ss:$112 sps:$4 sm:$0xff]  }
 0x644   :  { %13826 = vmatprep.subr.bf16.mxu0 %v18758_v47  ;;  %v18810_v47 = vld [vmem:[%s21049_s3 + $0x9c0] ss:$8 sps:$4 sm:$0xff]  }
 0x645   :  { %10338 = vmatpush1.bf16.msra.mxu1 %v18738_v1  ;;  %v18818_v1 = vld [vmem:[%s21049_s3 + $0x9d4] ss:$8 sps:$4 sm:$0xff]  }
 0x646   :  { %10339 = vmatprep.subr.bf16.mxu1 %v18743_v12  ;;  %v18816_v12 = vld [vmem:[%s21049_s3 + $0x9d0] ss:$8 sps:$4 sm:$0xff]  }
 0x647   :  { %13827 = vmatpush1.bf16.msra.mxu0 %v18756_v2  ;;  %v18824_v2 = vld [vmem:[%s21049_s3 + $0x9e4] ss:$8 sps:$4 sm:$0xff]  }
 0x648   :  { %13828 = vmatprep.subr.bf16.mxu0 %v18764_v3  ;;  %v18822_v3 = vld [vmem:[%s21049_s3 + $0x9e0] ss:$8 sps:$4 sm:$0xff]  }
 0x649   :  { %10340 = vmatpush1.bf16.msra.mxu1 %v18741_v8  ;;  %v18830_v8 = vld [vmem:[%s21049_s3 + $0x9f4] ss:$8 sps:$4 sm:$0xff]  }
 0x64a   :  { %10341 = vmatprep.subr.bf16.mxu1 %v18749_v4  ;;  %v18807_v4 = vld [vmem:[#allocation2 + $0x68] ss:$112 sps:$4 sm:$0xff]  }
 0x64b   :  { %13829 = vmatpush1.bf16.msra.mxu0 %v18762_v35  ;;  %v18815_v35 = vld [vmem:[#allocation2 + $0x14c] ss:$112 sps:$4 sm:$0xff]  }
 0x64c   :  { %13830 = vmatprep.subr.bf16.mxu0 %v18770_v14  ;;  %v18828_v14 = vld [vmem:[%s21049_s3 + $0x9f0] ss:$8 sps:$4 sm:$0xff]  }
 0x64d   :  { %10342 = vmatpush1.bf16.msra.mxu1 %v18747_v46  ;;  %v18836_v46 = vld [vmem:[%s21049_s3 + $0xa04] ss:$8 sps:$4 sm:$0xff]  }
 0x64e   :  { %10343 = vmatprep.subr.bf16.mxu1 %v18755_v15  ;;  %v18813_v15 = vld [vmem:[#allocation2 + $0x148] ss:$112 sps:$4 sm:$0xff]  }
 0x64f   :  { %13831 = vmatpush1.bf16.msra.mxu0 %v18768_v19  ;;  %v18821_v19 = vld [vmem:[#allocation2 + $0x22c] ss:$112 sps:$4 sm:$0xff]  }
 0x650   :  { %13832 = vmatprep.subr.bf16.mxu0 %v18776_v20  ;;  %v1522_v20 = vrot.slane %v20291_v56, %v19377_v54 }
 0x651   :  { %10344 = vmatpush1.bf16.msra.mxu1 %v18753_v5  ;;  %v1510_v5 = vrot.slane %v20291_v56, %v19633_v27 }
 0x652   :  { %10345 = vmatprep.subr.bf16.mxu1 %v18761_v22  ;;  %v18819_v22 = vld [vmem:[#allocation2 + $0x228] ss:$112 sps:$4 sm:$0xff]  }
 0x653   :  { %13833 = vmatpush1.bf16.msra.mxu0 %v18774_v30  ;;  %v1514_v30 = vrot.slane %v20291_v56, %v19529_v23 }
 0x654   :  { %13834 = vmatprep.subr.bf16.mxu0 %v18782_v31  ;;  %v18827_v31 = vld [vmem:[#allocation2 + $0x30c] ss:$112 sps:$4 sm:$0xff]  }
 0x655   :  { %10346 = vmatpush1.bf16.msra.mxu1 %v18759_v32 }
 0x656   :  { %10347 = vmatprep.subr.bf16.mxu1 %v18767_v17 }
 0x657   :  { %13835 = vmatpush1.bf16.msra.mxu0 %v18780_v33 }
 0x658   :  { %13836 = vmatprep.subr.bf16.mxu0 %v18788_v28 }
 0x659   :  { %10348 = vmatpush1.bf16.msra.mxu1 %v18765_v42 }
 0x65a   :  { %10349 = vmatprep.subr.bf16.mxu1 %v18773_v21  ;;  %v18825_v21 = vld [vmem:[#allocation2 + $0x308] ss:$112 sps:$4 sm:$0xff]  }
 0x65b   :  { %13837 = vmatpush1.bf16.msra.mxu0 %v18786_v52 }
 0x65c   :  { %13838 = vmatprep.subr.bf16.mxu0 %v18794_v25  ;;  %v18833_v25 = vld [vmem:[#allocation2 + $0x3ec] ss:$112 sps:$4 sm:$0xff]  }
 0x65d   :  { %10350 = vmatpush1.bf16.msra.mxu1 %v18771_v44 }
 0x65e   :  { %10351 = vmatprep.subr.bf16.mxu1 %v18779_v41 }
 0x65f   :  { %13839 = vmatpush1.bf16.msra.mxu0 %v18792_v57 }
 0x660   :  { %13840 = vmatprep.subr.bf16.mxu0 %v18800_v53  ;;  %v18831_v53 = vld [vmem:[#allocation2 + $0x3e8] ss:$112 sps:$4 sm:$0xff]  }
 0x661   :  { %10352 = vmatpush1.bf16.msra.mxu1 %v18777_v55  ;;  %v18834_v55 = vld [vmem:[%s21049_s3 + $0xa00] ss:$8 sps:$4 sm:$0xff]  }
 0x662   :  { %10353 = vmatprep.subr.bf16.mxu1 %v18785_v39  ;;  %v18839_v39 = vld [vmem:[#allocation2 + $0x4cc] ss:$112 sps:$4 sm:$0xff]  }
 0x663   :  { %13841 = vmatpush1.bf16.msra.mxu0 %v18798_v48  ;;  %v18842_v48 = vld [vmem:[%s21049_s3 + $0xa14] ss:$8 sps:$4 sm:$0xff]  }
 0x664   :  { %13842 = vmatprep.subr.bf16.mxu0 %v18803_v13 }
 0x665   :  { %10354 = vmatpush1.bf16.msra.mxu1 %v18783_v6  ;;  %v18837_v6 = vld [vmem:[#allocation2 + $0x4c8] ss:$112 sps:$4 sm:$0xff]  }
 0x666   :  { %10355 = vmatprep.subr.bf16.mxu1 %v18791_v45  ;;  %v18840_v45 = vld [vmem:[%s21049_s3 + $0xa10] ss:$8 sps:$4 sm:$0xff]  }
 0x667   :  { %13843 = vmatpush1.bf16.msra.mxu0 %v18801_v58  ;;  %v18845_v58 = vld [vmem:[#allocation2 + $0x5ac] ss:$112 sps:$4 sm:$0xff]  }
 0x668   :  { %13844 = vmatprep.subr.bf16.mxu0 %v18806_v16  ;;  %v18848_v16 = vld [vmem:[%s21049_s3 + $0xa24] ss:$8 sps:$4 sm:$0xff]  }
 0x669   :  { %10356 = vmatpush1.bf16.msra.mxu1 %v18789_v61  ;;  %v18843_v61 = vld [vmem:[#allocation2 + $0x5a8] ss:$112 sps:$4 sm:$0xff]  }
 0x66a   :  { %10366 = vmatprep.subr.bf16.mxu1 %v18797_v50  ;;  %v18846_v50 = vld [vmem:[%s21049_s3 + $0xa20] ss:$8 sps:$4 sm:$0xff]  }
 0x66b   :  { %13845 = vmatpush1.bf16.msra.mxu0 %v18804_v7  ;;  %v18851_v7 = vld [vmem:[#allocation2 + $0x68c] ss:$112 sps:$4 sm:$0xff]  }
 0x66c   :  { %13846 = vmatprep.subr.bf16.mxu0 %v18812_v62  ;;  %10358 = vmatmul.mubr.bf16.vlgmr.msra.gmra.mrb[36].mxu1 %v19287_v29  ;;  %v18854_v62 = vld [vmem:[%s21049_s3 + $0xa34] ss:$8 sps:$4 sm:$0xff]  }
 0x66d   :  { %10367 = vmatpush1.bf16.msra.mxu1 %v18795_v34  ;;  %10398 = vmatprep.mubr.bf16.mxu1 %v19183_v0  ;;  %v18849_v34 = vld [vmem:[#allocation2 + $0x688] ss:$112 sps:$4 sm:$0xff]  }
 0x66e   :  { %10571 = vmatprep.subr.bf16.mxu1 %v18809_v63  ;;  %v18852_v63 = vld [vmem:[%s21049_s3 + $0xa30] ss:$8 sps:$4 sm:$0xff]  }
 0x66f   :  { %13847 = vmatpush1.bf16.msra.mxu0 %v18810_v47  ;;  %v18857_v47 = vld [vmem:[#allocation2 + $0x76c] ss:$112 sps:$4 sm:$0xff]  }
 0x670   :  { %13848 = vmatprep.subr.bf16.mxu0 %v18818_v1  ;;  %v18860_v1 = vld [vmem:[%s21049_s3 + $0xa44] ss:$8 sps:$4 sm:$0xff]  }
 0x673   :  { %13849 = vmatpush1.bf16.msra.mxu0 %v18816_v12  ;;  %v18855_v12 = vld [vmem:[#allocation2 + $0x768] ss:$112 sps:$4 sm:$0xff]  }
 0x674   :  { %13850 = vmatprep.subr.bf16.mxu0 %v18824_v2  ;;  %v18858_v2 = vld [vmem:[%s21049_s3 + $0xa40] ss:$8 sps:$4 sm:$0xff]  }
 0x677   :  { %13851 = vmatpush1.bf16.msra.mxu0 %v18822_v3  ;;  %v18863_v3 = vld [vmem:[#allocation2 + $0x84c] ss:$112 sps:$4 sm:$0xff]  }
 0x678   :  { %13852 = vmatprep.subr.bf16.mxu0 %v18830_v8  ;;  %15653 = vmatmul.mubr.msk.bf16.vlgmr.msra.gmra.mrb[36].mxu1 %vm8435_vm0, %v19245_v10  ;;  %v18866_v8 = vld [vmem:[%s21049_s3 + $0xa54] ss:$8 sps:$4 sm:$0xff]  }
 0x679   :  { %10572 = vmatpush1.bf16.msra.mxu1 %v18807_v4  ;;  %10603 = vmatprep.mubr.bf16.mxu1 %v19252_v51  ;;  %v16200_v51 = vadd.f32 %v19438_v60, %v1522_v20  ;;  %v18861_v4 = vld [vmem:[#allocation2 + $0x848] ss:$112 sps:$4 sm:$0xff]   ;;  %v18875_v20 = vld [vmem:[#allocation2 + $0xa0c] ss:$112 sps:$4 sm:$0xff]  }
 0x67a   :  { %10573 = vmatprep.subr.bf16.mxu1 %v18815_v35  ;;  %v18864_v35 = vld [vmem:[%s21049_s3 + $0xa50] ss:$8 sps:$4 sm:$0xff]  }
 0x67b   :  { %13853 = vmatpush1.bf16.msra.mxu0 %v18828_v14  ;;  %v10756_v41 = vmax.f32 %v16200_v51, 0.0  ;;  %v18869_v14 = vld [vmem:[#allocation2 + $0x92c] ss:$112 sps:$4 sm:$0xff]   ;;  %v18879_v51 = vld [vmem:[#allocation2 + $0xae8] ss:$112 sps:$4 sm:$0xff]  }
 0x67c   :  { %13863 = vmatprep.subr.bf16.mxu0 %v18836_v46  ;;  %v18872_v46 = vld [vmem:[%s21049_s3 + $0xa64] ss:$8 sps:$4 sm:$0xff]  }
 0x67d   :  { %10574 = vmatpush1.bf16.msra.mxu1 %v18813_v15  ;;  %v10784_v13 = vpack.c.bf16 %v10756_v41, %v10756_v41  ;;  %v18867_v15 = vld [vmem:[#allocation2 + $0x928] ss:$112 sps:$4 sm:$0xff]   ;;  %v18899_v41 = vld [vmem:[#allocation2 + $0xd8c] ss:$112 sps:$4 sm:$0xff]  }
 0x67e   :  { %10575 = vmatprep.subr.bf16.mxu1 %v18821_v19  ;;  %v18870_v19 = vld [vmem:[%s21049_s3 + $0xa60] ss:$8 sps:$4 sm:$0xff]  }
 0x67f   :  { %v10072_v32 = vpop.f32.mrb[32].mxu1 }
 0x680   :  { %v16197_v17 = vadd.f32 %v10072_v32, %v1510_v5  ;;  %v10074_v33 = vpop.f32.mrb[33].mxu1  ;;  %v18878_v5 = vld [vmem:[%s21049_s3 + $0xa74] ss:$8 sps:$4 sm:$0xff]   ;;  %v18884_v32 = vld [vmem:[%s21049_s3 + $0xa84] ss:$8 sps:$4 sm:$0xff]  }
 0x681   :  { %10576 = vmatpush1.bf16.msra.mxu1 %v18819_v22  ;;  %v16198_v28 = vadd.f32 %v10074_v33, %v1514_v30  ;;  %v10076_v42 = vpop.f32.mrb[34].mxu1  ;;  %v18873_v22 = vld [vmem:[#allocation2 + $0xa08] ss:$112 sps:$4 sm:$0xff]   ;;  %v18887_v33 = vld [vmem:[#allocation2 + $0xbcc] ss:$112 sps:$4 sm:$0xff]  }
 0x682   :  { %v10753_v54 = vmax.f32 %v16197_v17, 0.0  ;;  %v10077_v52 = vpop.f32.mrb[35].mxu1  ;;  %10577 = vmatprep.subr.bf16.mxu1 %v18827_v31  ;;  %v18876_v30 = vld [vmem:[%s21049_s3 + $0xa70] ss:$8 sps:$4 sm:$0xff]   ;;  %v18881_v31 = vld [vmem:[#allocation2 + $0xaec] ss:$112 sps:$4 sm:$0xff]  }
 0x683   :  { %v10754_v44 = vmax.f32 %v16198_v28, 0.0  ;;  %v18882_v17 = vld [vmem:[%s21049_s3 + $0xa80] ss:$8 sps:$4 sm:$0xff]   ;;  %v18890_v28 = vld [vmem:[%s21049_s3 + $0xa94] ss:$8 sps:$4 sm:$0xff]  }
 0x684   :  { %v10781_v60 = vpack.c.bf16 %v10753_v54, %v10753_v54  ;;  %v18885_v42 = vld [vmem:[#allocation2 + $0xbc8] ss:$112 sps:$4 sm:$0xff]   ;;  %v18893_v54 = vld [vmem:[#allocation2 + $0xcac] ss:$112 sps:$4 sm:$0xff]  }
 0x685   :  { %v10782_v57 = vpack.c.bf16 %v10754_v44, %v10754_v44  ;;  %10578 = vmatpush1.bf16.msra.mxu1 %v18825_v21  ;;  %v18888_v21 = vld [vmem:[%s21049_s3 + $0xa90] ss:$8 sps:$4 sm:$0xff]   ;;  %v18896_v52 = vld [vmem:[%s21049_s3 + $0xaa4] ss:$8 sps:$4 sm:$0xff]   ;;  %v18894_v44 = vld [vmem:[%s21049_s3 + $0xaa0] ss:$8 sps:$4 sm:$0xff]  }
 0x686   :  { %10579 = vmatprep.subr.bf16.mxu1 %v18833_v25  ;;  %v18891_v25 = vld [vmem:[#allocation2 + $0xca8] ss:$112 sps:$4 sm:$0xff]  }
 0x687   :  { %13854 = vmatprep.mubr.bf16.mxu0 %v10782_v57  ;;  %v18902_v57 = vld [vmem:[%s21049_s3 + $0xab4] ss:$8 sps:$4 sm:$0xff]  }
 0x688   :  { %13855 = vmatmul.mubr.bf16.vlgmr.msra.gmra.mrb[24].mxu0 %v10781_v60  ;;  %v18905_v60 = vld [vmem:[#allocation2 + $0xe6c] ss:$112 sps:$4 sm:$0xff]  }
 0x689   :  { %10580 = vmatpush1.bf16.msra.mxu1 %v18831_v53  ;;  %13864 = vmatpush1.bf16.msra.mxu0 %v18834_v55  ;;  %v18897_v53 = vld [vmem:[#allocation2 + $0xd88] ss:$112 sps:$4 sm:$0xff]  }
 0x68a   :  { %13895 = vmatprep.mubr.bf16.mxu0 %v10784_v13  ;;  %10581 = vmatprep.subr.bf16.mxu1 %v18839_v39  ;;  %v18900_v55 = vld [vmem:[%s21049_s3 + $0xab0] ss:$8 sps:$4 sm:$0xff]   ;;  %v18908_v39 = vld [vmem:[%s21049_s3 + $0xac4] ss:$8 sps:$4 sm:$0xff]   ;;  %v18906_v13 = vld [vmem:[%s21049_s3 + $0xac0] ss:$8 sps:$4 sm:$0xff]  }
 0x68b   :  { %13865 = vmatprep.subr.bf16.mxu0 %v18842_v48  ;;  %v18903_v48 = vld [vmem:[#allocation2 + $0xe68] ss:$112 sps:$4 sm:$0xff]  }
 0x68d   :  { %10582 = vmatpush1.bf16.msra.mxu1 %v18837_v6  ;;  %13866 = vmatpush1.bf16.msra.mxu0 %v18840_v45  ;;  %v18911_v6 = vld [vmem:[#allocation2 + $0xf4c] ss:$112 sps:$4 sm:$0xff]  }
 0x68e   :  { %10583 = vmatprep.subr.bf16.mxu1 %v18845_v58  ;;  %13867 = vmatprep.subr.bf16.mxu0 %v18848_v16  ;;  %v18914_v45 = vld [vmem:[%s21049_s3 + $0xad4] ss:$8 sps:$4 sm:$0xff]   ;;  %v18909_v58 = vld [vmem:[#allocation2 + $0xf48] ss:$112 sps:$4 sm:$0xff]  }
 0x68f   :  { %v18912_v16 = vld [vmem:[%s21049_s3 + $0xad0] ss:$8 sps:$4 sm:$0xff]  }
 0x691   :  { %10584 = vmatpush1.bf16.msra.mxu1 %v18843_v61  ;;  %13868 = vmatpush1.bf16.msra.mxu0 %v18846_v50  ;;  %v1518_v61 = vrot.slane %v20291_v56, %v19374_v49  ;;  %v18917_v50 = vld [vmem:[#allocation2 + $0x102c] ss:$112 sps:$4 sm:$0xff]  }
 0x692   :  { %10585 = vmatprep.subr.bf16.mxu1 %v18851_v7  ;;  %13869 = vmatprep.subr.bf16.mxu0 %v18854_v62  ;;  %v18920_v7 = vld [vmem:[%s21049_s3 + $0xae4] ss:$8 sps:$4 sm:$0xff]   ;;  %v18918_v62 = vld [vmem:[%s21049_s3 + $0xae0] ss:$8 sps:$4 sm:$0xff]   ;;  %v18926_v56 = vld [vmem:[%s21049_s3 + $0xaf4] ss:$8 sps:$4 sm:$0xff]  }
 0x693   :  { %v18923_v49 = vld [vmem:[#allocation2 + $0x110c] ss:$112 sps:$4 sm:$0xff]  }
 0x695   :  { %10586 = vmatpush1.bf16.msra.mxu1 %v18849_v34  ;;  %13870 = vmatpush1.bf16.msra.mxu0 %v18852_v63  ;;  %v16199_v34 = vadd.f32 %v19436_v59, %v1518_v61  ;;  %v18921_v63 = vld [vmem:[#allocation2 + $0x1108] ss:$112 sps:$4 sm:$0xff]   ;;  %v18989_v59 = vld [vmem:[%s21049_s3 + $0xb04] ss:$8 sps:$4 sm:$0xff]  }
 0x696   :  { %10587 = vmatprep.subr.bf16.mxu1 %v18857_v47  ;;  %13871 = vmatprep.subr.bf16.mxu0 %v18860_v1  ;;  %v18929_v1 = vld [vmem:[#allocation2 + $0x11ec] ss:$112 sps:$4 sm:$0xff]   ;;  %v19041_v61 = vld [vmem:[%s21049_s3 + $0xb90] ss:$8 sps:$4 sm:$0xff]  }
 0x697   :  { %v10755_v47 = vmax.f32 %v16199_v34, 0.0  ;;  %v18962_v34 = vld [vmem:[#allocation2 + $0x1b8c] ss:$112 sps:$4 sm:$0xff]  }
 0x699   :  { %10588 = vmatpush1.bf16.msra.mxu1 %v18855_v12  ;;  %13872 = vmatpush1.bf16.msra.mxu0 %v18858_v2  ;;  %v18927_v12 = vld [vmem:[#allocation2 + $0x11e8] ss:$112 sps:$4 sm:$0xff]  }
 0x69a   :  { %10589 = vmatprep.subr.bf16.mxu1 %v18863_v3  ;;  %13873 = vmatprep.subr.bf16.mxu0 %v18866_v8  ;;  %v18987_v2 = vld [vmem:[%s21049_s3 + $0xb00] ss:$8 sps:$4 sm:$0xff]   ;;  %v10783_v3 = vpack.c.bf16 %v10755_v47, %v10755_v47  ;;  %v18932_v8 = vld [vmem:[#allocation2 + $0x12cc] ss:$112 sps:$4 sm:$0xff]  }
 0x69b   :  { %v19052_v47 = vld [vmem:[%s21049_s3 + $0xbc4] ss:$8 sps:$4 sm:$0xff]  }
 0x69d   :  { %10590 = vmatpush1.bf16.msra.mxu1 %v18861_v4  ;;  %13874 = vmatpush1.bf16.msra.mxu0 %v18864_v35  ;;  %v18995_v4 = vld [vmem:[%s21049_s3 + $0xb14] ss:$8 sps:$4 sm:$0xff]   ;;  %v18930_v35 = vld [vmem:[#allocation2 + $0x12c8] ss:$112 sps:$4 sm:$0xff]  }
 0x69e   :  { %10591 = vmatprep.subr.bf16.mxu1 %v18869_v14  ;;  %13875 = vmatprep.subr.bf16.mxu0 %v18872_v46  ;;  %v18993_v14 = vld [vmem:[%s21049_s3 + $0xb10] ss:$8 sps:$4 sm:$0xff]   ;;  %v18935_v46 = vld [vmem:[#allocation2 + $0x13ac] ss:$112 sps:$4 sm:$0xff]  }
 0x6a1   :  { %10592 = vmatpush1.bf16.msra.mxu1 %v18867_v15  ;;  %13876 = vmatpush1.bf16.msra.mxu0 %v18870_v19  ;;  %v19001_v15 = vld [vmem:[%s21049_s3 + $0xb24] ss:$8 sps:$4 sm:$0xff]   ;;  %v18933_v19 = vld [vmem:[#allocation2 + $0x13a8] ss:$112 sps:$4 sm:$0xff]  }
 0x6a2   :  { %10593 = vmatprep.subr.bf16.mxu1 %v18875_v20  ;;  %13877 = vmatprep.subr.bf16.mxu0 %v18878_v5  ;;  %v18999_v20 = vld [vmem:[%s21049_s3 + $0xb20] ss:$8 sps:$4 sm:$0xff]   ;;  %v18938_v5 = vld [vmem:[#allocation2 + $0x148c] ss:$112 sps:$4 sm:$0xff]  }
 0x6a5   :  { %10594 = vmatpush1.bf16.msra.mxu1 %v18873_v22  ;;  %13878 = vmatpush1.bf16.msra.mxu0 %v18876_v30  ;;  %v19007_v22 = vld [vmem:[%s21049_s3 + $0xb34] ss:$8 sps:$4 sm:$0xff]   ;;  %v18936_v30 = vld [vmem:[#allocation2 + $0x1488] ss:$112 sps:$4 sm:$0xff]  }
 0x6a6   :  { %10595 = vmatprep.subr.bf16.mxu1 %v18881_v31  ;;  %13879 = vmatprep.subr.bf16.mxu0 %v18884_v32  ;;  %v19005_v31 = vld [vmem:[%s21049_s3 + $0xb30] ss:$8 sps:$4 sm:$0xff]   ;;  %v18941_v32 = vld [vmem:[#allocation2 + $0x156c] ss:$112 sps:$4 sm:$0xff]  }
 0x6a9   :  { %10596 = vmatpush1.bf16.msra.mxu1 %v18879_v51  ;;  %13880 = vmatpush1.bf16.msra.mxu0 %v18882_v17  ;;  %v19013_v51 = vld [vmem:[%s21049_s3 + $0xb44] ss:$8 sps:$4 sm:$0xff]   ;;  %v18939_v17 = vld [vmem:[#allocation2 + $0x1568] ss:$112 sps:$4 sm:$0xff]  }
 0x6aa   :  { %10597 = vmatprep.subr.bf16.mxu1 %v18887_v33  ;;  %13881 = vmatprep.subr.bf16.mxu0 %v18890_v28  ;;  %v19011_v33 = vld [vmem:[%s21049_s3 + $0xb40] ss:$8 sps:$4 sm:$0xff]   ;;  %v18944_v28 = vld [vmem:[#allocation2 + $0x164c] ss:$112 sps:$4 sm:$0xff]  }
 0x6ad   :  { %10598 = vmatpush1.bf16.msra.mxu1 %v18885_v42  ;;  %13882 = vmatpush1.bf16.msra.mxu0 %v18888_v21  ;;  %v19019_v42 = vld [vmem:[%s21049_s3 + $0xb54] ss:$8 sps:$4 sm:$0xff]   ;;  %v18942_v21 = vld [vmem:[#allocation2 + $0x1648] ss:$112 sps:$4 sm:$0xff]  }
 0x6ae   :  { %10599 = vmatprep.subr.bf16.mxu1 %v18893_v54  ;;  %13883 = vmatprep.subr.bf16.mxu0 %v18896_v52  ;;  %v19017_v54 = vld [vmem:[%s21049_s3 + $0xb50] ss:$8 sps:$4 sm:$0xff]   ;;  %v18947_v52 = vld [vmem:[#allocation2 + $0x172c] ss:$112 sps:$4 sm:$0xff]  }
 0x6b1   :  { %10600 = vmatpush1.bf16.msra.mxu1 %v18891_v25  ;;  %13884 = vmatpush1.bf16.msra.mxu0 %v18894_v44  ;;  %v19025_v25 = vld [vmem:[%s21049_s3 + $0xb64] ss:$8 sps:$4 sm:$0xff]   ;;  %v18945_v44 = vld [vmem:[#allocation2 + $0x1728] ss:$112 sps:$4 sm:$0xff]  }
 0x6b2   :  { %10601 = vmatprep.subr.bf16.mxu1 %v18899_v41  ;;  %13885 = vmatprep.subr.bf16.mxu0 %v18902_v57  ;;  %v19023_v41 = vld [vmem:[%s21049_s3 + $0xb60] ss:$8 sps:$4 sm:$0xff]   ;;  %v18950_v57 = vld [vmem:[#allocation2 + $0x180c] ss:$112 sps:$4 sm:$0xff]  }
 0x6b5   :  { %10602 = vmatpush1.bf16.msra.mxu1 %v18897_v53  ;;  %13886 = vmatpush1.bf16.msra.mxu0 %v18900_v55  ;;  %v19031_v53 = vld [vmem:[%s21049_s3 + $0xb74] ss:$8 sps:$4 sm:$0xff]   ;;  %v18948_v55 = vld [vmem:[#allocation2 + $0x1808] ss:$112 sps:$4 sm:$0xff]  }
 0x6b6   :  { %10612 = vmatprep.subr.bf16.mxu1 %v18905_v60  ;;  %13887 = vmatprep.subr.bf16.mxu0 %v18908_v39  ;;  %v19029_v60 = vld [vmem:[%s21049_s3 + $0xb70] ss:$8 sps:$4 sm:$0xff]   ;;  %v18953_v39 = vld [vmem:[#allocation2 + $0x18ec] ss:$112 sps:$4 sm:$0xff]  }
 0x6b8   :  { %10604 = vmatmul.mubr.bf16.vlgmr.msra.gmra.mrb[40].mxu1 %v19259_v9  ;;  %v18915_v9 = vld [vmem:[#allocation2 + $0x1028] ss:$112 sps:$4 sm:$0xff]  }
 0x6b9   :  { %10613 = vmatpush1.bf16.msra.mxu1 %v18903_v48  ;;  %13888 = vmatpush1.bf16.msra.mxu0 %v18906_v13  ;;  %v19037_v48 = vld [vmem:[%s21049_s3 + $0xb84] ss:$8 sps:$4 sm:$0xff]   ;;  %v18951_v13 = vld [vmem:[#allocation2 + $0x18e8] ss:$112 sps:$4 sm:$0xff]  }
 0x6ba   :  { %10614 = vmatprep.subr.bf16.mxu1 %v18911_v6  ;;  %13889 = vmatprep.subr.bf16.mxu0 %v18914_v45  ;;  %v19035_v6 = vld [vmem:[%s21049_s3 + $0xb80] ss:$8 sps:$4 sm:$0xff]   ;;  %v18956_v45 = vld [vmem:[#allocation2 + $0x19cc] ss:$112 sps:$4 sm:$0xff]  }
 0x6bb   :  { %10644 = vmatprep.mubr.bf16.mxu1 %v19266_v36  ;;  %v18924_v36 = vld [vmem:[%s21049_s3 + $0xaf0] ss:$8 sps:$4 sm:$0xff]  }
 0x6bd   :  { %10615 = vmatpush1.bf16.msra.mxu1 %v18909_v58  ;;  %13890 = vmatpush1.bf16.msra.mxu0 %v18912_v16  ;;  %v19043_v58 = vld [vmem:[%s21049_s3 + $0xb94] ss:$8 sps:$4 sm:$0xff]   ;;  %v18954_v16 = vld [vmem:[#allocation2 + $0x19c8] ss:$112 sps:$4 sm:$0xff]  }
 0x6be   :  { %10616 = vmatprep.subr.bf16.mxu1 %v18917_v50  ;;  %13891 = vmatprep.subr.bf16.mxu0 %v18920_v7  ;;  %v18959_v50 = vld [vmem:[#allocation2 + $0x1aac] ss:$112 sps:$4 sm:$0xff]  }
 0x6bf   :  { %v19046_v7 = vld [vmem:[%s21049_s3 + $0xba4] ss:$8 sps:$4 sm:$0xff]  }
 0x6c1   :  { %10617 = vmatpush1.bf16.msra.mxu1 %v18915_v9  ;;  %13892 = vmatpush1.bf16.msra.mxu0 %v18918_v62  ;;  %v18957_v9 = vld [vmem:[#allocation2 + $0x1aa8] ss:$112 sps:$4 sm:$0xff]  }
 0x6c2   :  { %10618 = vmatprep.subr.bf16.mxu1 %v18923_v49  ;;  %13893 = vmatprep.subr.bf16.mxu0 %v18926_v56  ;;  %v19044_v62 = vld [vmem:[%s21049_s3 + $0xba0] ss:$8 sps:$4 sm:$0xff]   ;;  %v19049_v49 = vld [vmem:[%s21049_s3 + $0xbb4] ss:$8 sps:$4 sm:$0xff]  }
 0x6c3   :  { %v18960_v56 = vld [vmem:[#allocation2 + $0x1b88] ss:$112 sps:$4 sm:$0xff]  }
 0x6c5   :  { %10619 = vmatpush1.bf16.msra.mxu1 %v18921_v63  ;;  %13894 = vmatpush1.bf16.msra.mxu0 %v18924_v36  ;;  %v19047_v63 = vld [vmem:[%s21049_s3 + $0xbb0] ss:$8 sps:$4 sm:$0xff]   ;;  %v18965_v36 = vld [vmem:[#allocation2 + $0x1c6c] ss:$112 sps:$4 sm:$0xff]  }
 0x6c6   :  { %10620 = vmatprep.subr.bf16.mxu1 %v18929_v1  ;;  %13904 = vmatprep.subr.bf16.mxu0 %v18989_v59  ;;  %v18963_v1 = vld [vmem:[#allocation2 + $0x1c68] ss:$112 sps:$4 sm:$0xff]   ;;  %v18968_v59 = vld [vmem:[#allocation2 + $0x1d4c] ss:$112 sps:$4 sm:$0xff]  }
 0x6c8   :  { %13896 = vmatmul.mubr.bf16.vlgmr.msra.gmra.mrb[24].mxu0 %v10783_v3  ;;  %v18966_v3 = vld [vmem:[#allocation2 + $0x1d48] ss:$112 sps:$4 sm:$0xff]  }
 0x6c9   :  { %10621 = vmatpush1.bf16.msra.mxu1 %v18927_v12  ;;  %13905 = vmatpush1.bf16.msra.mxu0 %v18987_v2  ;;  %v19050_v12 = vld [vmem:[%s21049_s3 + $0xbc0] ss:$8 sps:$4 sm:$0xff]   ;;  %v19055_v2 = vld [vmem:[%s21049_s3 + $0xbd4] ss:$8 sps:$4 sm:$0xff]  }
 0x6ca   :  { %10622 = vmatprep.subr.bf16.mxu1 %v18932_v8  ;;  %13906 = vmatprep.subr.bf16.mxu0 %v18995_v4  ;;  %v18971_v8 = vld [vmem:[#allocation2 + $0x1e2c] ss:$112 sps:$4 sm:$0xff]   ;;  %v19053_v4 = vld [vmem:[%s21049_s3 + $0xbd0] ss:$8 sps:$4 sm:$0xff]  }
 0x6cd   :  { %10623 = vmatpush1.bf16.msra.mxu1 %v18930_v35  ;;  %13907 = vmatpush1.bf16.msra.mxu0 %v18993_v14  ;;  %v19058_v35 = vld [vmem:[%s21049_s3 + $0xbe4] ss:$8 sps:$4 sm:$0xff]   ;;  %v18969_v14 = vld [vmem:[#allocation2 + $0x1e28] ss:$112 sps:$4 sm:$0xff]  }
 0x6ce   :  { %10624 = vmatprep.subr.bf16.mxu1 %v18935_v46  ;;  %13908 = vmatprep.subr.bf16.mxu0 %v19001_v15  ;;  %v19061_v46 = vld [vmem:[%s21049_s3 + $0xbf4] ss:$8 sps:$4 sm:$0xff]   ;;  %v18972_v15 = vld [vmem:[#allocation2 + $0x1f08] ss:$112 sps:$4 sm:$0xff]  }
 0x6d1   :  { %10625 = vmatpush1.bf16.msra.mxu1 %v18933_v19  ;;  %13909 = vmatpush1.bf16.msra.mxu0 %v18999_v20  ;;  %v18977_v19 = vld [vmem:[#allocation2 + $0x1fec] ss:$112 sps:$4 sm:$0xff]   ;;  %v19059_v20 = vld [vmem:[%s21049_s3 + $0xbf0] ss:$8 sps:$4 sm:$0xff]  }
 0x6d2   :  { %10626 = vmatprep.subr.bf16.mxu1 %v18938_v5  ;;  %13910 = vmatprep.subr.bf16.mxu0 %v19007_v22  ;;  %v19064_v5 = vld [vmem:[%s21049_s3 + $0xc04] ss:$8 sps:$4 sm:$0xff]   ;;  %v18975_v22 = vld [vmem:[#allocation2 + $0x1fe8] ss:$112 sps:$4 sm:$0xff]  }
 0x6d5   :  { %10627 = vmatpush1.bf16.msra.mxu1 %v18936_v30  ;;  %13911 = vmatpush1.bf16.msra.mxu0 %v19005_v31  ;;  %v18980_v30 = vld [vmem:[#allocation2 + $0x20cc] ss:$112 sps:$4 sm:$0xff]   ;;  %v18978_v31 = vld [vmem:[#allocation2 + $0x20c8] ss:$112 sps:$4 sm:$0xff]  }
 0x6d6   :  { %10628 = vmatprep.subr.bf16.mxu1 %v18941_v32  ;;  %13912 = vmatprep.subr.bf16.mxu0 %v19013_v51  ;;  %v18983_v32 = vld [vmem:[#allocation2 + $0x21ac] ss:$112 sps:$4 sm:$0xff]   ;;  %v18981_v51 = vld [vmem:[#allocation2 + $0x21a8] ss:$112 sps:$4 sm:$0xff]  }
 0x6d9   :  { %10629 = vmatpush1.bf16.msra.mxu1 %v18939_v17  ;;  %13913 = vmatpush1.bf16.msra.mxu0 %v19011_v33  ;;  %v18986_v17 = vld [vmem:[#allocation2 + $0x228c] ss:$112 sps:$4 sm:$0xff]   ;;  %v18984_v33 = vld [vmem:[#allocation2 + $0x2288] ss:$112 sps:$4 sm:$0xff]  }
 0x6da   :  { %10630 = vmatprep.subr.bf16.mxu1 %v18944_v28  ;;  %13914 = vmatprep.subr.bf16.mxu0 %v19019_v42  ;;  %v18992_v28 = vld [vmem:[#allocation2 + $0x236c] ss:$112 sps:$4 sm:$0xff]   ;;  %v18990_v42 = vld [vmem:[#allocation2 + $0x2368] ss:$112 sps:$4 sm:$0xff]  }
 0x6dd   :  { %10631 = vmatpush1.bf16.msra.mxu1 %v18942_v21  ;;  %13915 = vmatpush1.bf16.msra.mxu0 %v19017_v54  ;;  %v18998_v21 = vld [vmem:[#allocation2 + $0x244c] ss:$112 sps:$4 sm:$0xff]   ;;  %v18996_v54 = vld [vmem:[#allocation2 + $0x2448] ss:$112 sps:$4 sm:$0xff]  }
 0x6de   :  { %10632 = vmatprep.subr.bf16.mxu1 %v18947_v52  ;;  %13916 = vmatprep.subr.bf16.mxu0 %v19025_v25  ;;  %v19004_v52 = vld [vmem:[#allocation2 + $0x252c] ss:$112 sps:$4 sm:$0xff]   ;;  %v19002_v25 = vld [vmem:[#allocation2 + $0x2528] ss:$112 sps:$4 sm:$0xff]  }
 0x6e1   :  { %10633 = vmatpush1.bf16.msra.mxu1 %v18945_v44  ;;  %13917 = vmatpush1.bf16.msra.mxu0 %v19023_v41  ;;  %v19010_v44 = vld [vmem:[#allocation2 + $0x260c] ss:$112 sps:$4 sm:$0xff]   ;;  %v19008_v41 = vld [vmem:[#allocation2 + $0x2608] ss:$112 sps:$4 sm:$0xff]  }
 0x6e2   :  { %10634 = vmatprep.subr.bf16.mxu1 %v18950_v57  ;;  %13918 = vmatprep.subr.bf16.mxu0 %v19031_v53  ;;  %v19016_v57 = vld [vmem:[#allocation2 + $0x26ec] ss:$112 sps:$4 sm:$0xff]   ;;  %v19014_v53 = vld [vmem:[#allocation2 + $0x26e8] ss:$112 sps:$4 sm:$0xff]  }
 0x6e5   :  { %10635 = vmatpush1.bf16.msra.mxu1 %v18948_v55  ;;  %13919 = vmatpush1.bf16.msra.mxu0 %v19029_v60  ;;  %v19022_v55 = vld [vmem:[#allocation2 + $0x27cc] ss:$112 sps:$4 sm:$0xff]   ;;  %v19020_v60 = vld [vmem:[#allocation2 + $0x27c8] ss:$112 sps:$4 sm:$0xff]  }
 0x6e6   :  { %10636 = vmatprep.subr.bf16.mxu1 %v18953_v39  ;;  %13920 = vmatprep.subr.bf16.mxu0 %v19037_v48  ;;  %v19028_v39 = vld [vmem:[#allocation2 + $0x28ac] ss:$112 sps:$4 sm:$0xff]   ;;  %v19026_v48 = vld [vmem:[#allocation2 + $0x28a8] ss:$112 sps:$4 sm:$0xff]  }
 0x6e9   :  { %10637 = vmatpush1.bf16.msra.mxu1 %v18951_v13  ;;  %13921 = vmatpush1.bf16.msra.mxu0 %v19035_v6  ;;  %v19034_v13 = vld [vmem:[#allocation2 + $0x298c] ss:$112 sps:$4 sm:$0xff]   ;;  %v19032_v6 = vld [vmem:[#allocation2 + $0x2988] ss:$112 sps:$4 sm:$0xff]  }
 0x6ea   :  { %10638 = vmatprep.subr.bf16.mxu1 %v18956_v45  ;;  %13922 = vmatprep.subr.bf16.mxu0 %v19043_v58  ;;  %v19040_v45 = vld [vmem:[#allocation2 + $0x2a6c] ss:$112 sps:$4 sm:$0xff]   ;;  %v19038_v58 = vld [vmem:[#allocation2 + $0x2a68] ss:$112 sps:$4 sm:$0xff]  }
 0x6ed   :  { %10639 = vmatpush1.bf16.msra.mxu1 %v18954_v16  ;;  %13923 = vmatpush1.bf16.msra.mxu0 %v19041_v61  ;;  %v20730_v16 = vld [vmem:[%s21048_s2 + $0x18] sm:$0xf] }
 0x6ee   :  { %10640 = vmatprep.subr.bf16.mxu1 %v18959_v50  ;;  %13924 = vmatprep.subr.bf16.mxu0 %v19046_v7  ;;  %v1538_v61 = vrot.slane %v20730_v16, %v19399_v40  ;;  %v19155_v50 = vld [vmem:[%s21048_s2 + $0x10] sm:$0xff] }
 0x6ef   :  { %v1530_v7 = vrot.slane %v19155_v50, %v19741_v43  ;;  %v19067_v43 = vld [vmem:[%s21049_s3 + $0xc14] ss:$8 sps:$4 sm:$0xff]  }
 0x6f1   :  { %10641 = vmatpush1.bf16.msra.mxu1 %v18957_v9  ;;  %13925 = vmatpush1.bf16.msra.mxu0 %v19044_v62 }
 0x6f2   :  { %10642 = vmatprep.subr.bf16.mxu1 %v18962_v34  ;;  %13926 = vmatprep.subr.bf16.mxu0 %v19049_v49 }
 0x6f5   :  { %10643 = vmatpush1.bf16.msra.mxu1 %v18960_v56  ;;  %13927 = vmatpush1.bf16.msra.mxu0 %v19047_v63 }
 0x6f6   :  { %10653 = vmatprep.subr.bf16.mxu1 %v18965_v36  ;;  %13928 = vmatprep.subr.bf16.mxu0 %v19052_v47 }
 0x6f8   :  { %10645 = vmatmul.mubr.bf16.vlgmr.msra.gmra.mrb[40].mxu1 %v19273_v18  ;;  %v18974_v18 = vld [vmem:[#allocation2 + $0x1f0c] ss:$112 sps:$4 sm:$0xff]  }
 0x6f9   :  { %10654 = vmatpush1.bf16.msra.mxu1 %v18963_v1  ;;  %10685 = vmatprep.mubr.bf16.mxu1 %v19278_v24  ;;  %v19056_v24 = vld [vmem:[%s21049_s3 + $0xbe0] ss:$8 sps:$4 sm:$0xff]  }
 0x6fa   :  { %10655 = vmatprep.subr.bf16.mxu1 %v18968_v59  ;;  %13929 = vmatpush1.bf16.msra.mxu0 %v19050_v12  ;;  %v19062_v1 = vld [vmem:[%s21049_s3 + $0xc00] ss:$8 sps:$4 sm:$0xff]   ;;  %v19070_v12 = vld [vmem:[%s21049_s3 + $0xc24] ss:$8 sps:$4 sm:$0xff]  }
 0x6fb   :  { %13930 = vmatprep.subr.bf16.mxu0 %v19055_v2  ;;  %v19068_v2 = vld [vmem:[%s21049_s3 + $0xc20] ss:$8 sps:$4 sm:$0xff]  }
 0x6fd   :  { %10656 = vmatpush1.bf16.msra.mxu1 %v18966_v3  ;;  %v19073_v3 = vld [vmem:[%s21049_s3 + $0xc34] ss:$8 sps:$4 sm:$0xff]  }
 0x6fe   :  { %10657 = vmatprep.subr.bf16.mxu1 %v18971_v8  ;;  %13931 = vmatpush1.bf16.msra.mxu0 %v19053_v4  ;;  %v19071_v8 = vld [vmem:[%s21049_s3 + $0xc30] ss:$8 sps:$4 sm:$0xff]   ;;  %v19076_v4 = vld [vmem:[%s21049_s3 + $0xc44] ss:$8 sps:$4 sm:$0xff]  }
 0x6ff   :  { %13932 = vmatprep.subr.bf16.mxu0 %v19058_v35  ;;  %v19074_v35 = vld [vmem:[%s21049_s3 + $0xc40] ss:$8 sps:$4 sm:$0xff]  }
 0x701   :  { %10658 = vmatpush1.bf16.msra.mxu1 %v18969_v14  ;;  %v19079_v14 = vld [vmem:[%s21049_s3 + $0xc54] ss:$8 sps:$4 sm:$0xff]  }
 0x702   :  { %10659 = vmatprep.subr.bf16.mxu1 %v18974_v18  ;;  %13933 = vmatpush1.bf16.msra.mxu0 %v19056_v24  ;;  %v19077_v18 = vld [vmem:[%s21049_s3 + $0xc50] ss:$8 sps:$4 sm:$0xff]   ;;  %v19082_v24 = vld [vmem:[%s21049_s3 + $0xc64] ss:$8 sps:$4 sm:$0xff]  }
 0x703   :  { %13934 = vmatprep.subr.bf16.mxu0 %v19061_v46  ;;  %v19080_v46 = vld [vmem:[%s21049_s3 + $0xc60] ss:$8 sps:$4 sm:$0xff]  }
 0x705   :  { %10660 = vmatpush1.bf16.msra.mxu1 %v18972_v15  ;;  %v19085_v15 = vld [vmem:[%s21049_s3 + $0xc74] ss:$8 sps:$4 sm:$0xff]  }
 0x706   :  { %10661 = vmatprep.subr.bf16.mxu1 %v18977_v19  ;;  %13935 = vmatpush1.bf16.msra.mxu0 %v19059_v20  ;;  %v19083_v19 = vld [vmem:[%s21049_s3 + $0xc70] ss:$8 sps:$4 sm:$0xff]   ;;  %v19088_v20 = vld [vmem:[%s21049_s3 + $0xc84] ss:$8 sps:$4 sm:$0xff]  }
 0x707   :  { %13945 = vmatprep.subr.bf16.mxu0 %v19064_v5  ;;  %v19086_v5 = vld [vmem:[%s21049_s3 + $0xc80] ss:$8 sps:$4 sm:$0xff]  }
 0x709   :  { %10662 = vmatpush1.bf16.msra.mxu1 %v18975_v22  ;;  %v19091_v22 = vld [vmem:[%s21049_s3 + $0xc94] ss:$8 sps:$4 sm:$0xff]  }
 0x70a   :  { %10663 = vmatprep.subr.bf16.mxu1 %v18980_v30  ;;  %v19089_v30 = vld [vmem:[%s21049_s3 + $0xc90] ss:$8 sps:$4 sm:$0xff]  }
 0x70d   :  { %10664 = vmatpush1.bf16.msra.mxu1 %v18978_v31  ;;  %v19094_v31 = vld [vmem:[%s21049_s3 + $0xca4] ss:$8 sps:$4 sm:$0xff]  }
 0x70e   :  { %10665 = vmatprep.subr.bf16.mxu1 %v18983_v32  ;;  %v19092_v32 = vld [vmem:[%s21049_s3 + $0xca0] ss:$8 sps:$4 sm:$0xff]  }
 0x711   :  { %10666 = vmatpush1.bf16.msra.mxu1 %v18981_v51  ;;  %v19097_v51 = vld [vmem:[%s21049_s3 + $0xcb4] ss:$8 sps:$4 sm:$0xff]  }
 0x712   :  { %10667 = vmatprep.subr.bf16.mxu1 %v18986_v17  ;;  %v19095_v17 = vld [vmem:[%s21049_s3 + $0xcb0] ss:$8 sps:$4 sm:$0xff]  }
 0x715   :  { %10668 = vmatpush1.bf16.msra.mxu1 %v18984_v33  ;;  %v19100_v33 = vld [vmem:[%s21049_s3 + $0xcc4] ss:$8 sps:$4 sm:$0xff]  }
 0x716   :  { %10669 = vmatprep.subr.bf16.mxu1 %v18992_v28  ;;  %v19098_v28 = vld [vmem:[%s21049_s3 + $0xcc0] ss:$8 sps:$4 sm:$0xff]  }
 0x719   :  { %10670 = vmatpush1.bf16.msra.mxu1 %v18990_v42  ;;  %v19103_v42 = vld [vmem:[%s21049_s3 + $0xcd4] ss:$8 sps:$4 sm:$0xff]  }
 0x71a   :  { %10671 = vmatprep.subr.bf16.mxu1 %v18998_v21  ;;  %v19101_v21 = vld [vmem:[%s21049_s3 + $0xcd0] ss:$8 sps:$4 sm:$0xff]  }
 0x71d   :  { %10672 = vmatpush1.bf16.msra.mxu1 %v18996_v54  ;;  %v1534_v54 = vrot.slane %v20730_v16, %v19460_v11  ;;  %v19107_v11 = vld [vmem:[%s21049_s3 + $0xcf0] ss:$8 sps:$4 sm:$0xff]  }
 0x71e   :  { %10673 = vmatprep.subr.bf16.mxu1 %v19004_v52  ;;  %v19106_v52 = vld [vmem:[%s21049_s3 + $0xce4] ss:$8 sps:$4 sm:$0xff]  }
 0x721   :  { %10674 = vmatpush1.bf16.msra.mxu1 %v19002_v25  ;;  %v19104_v25 = vld [vmem:[%s21049_s3 + $0xce0] ss:$8 sps:$4 sm:$0xff]  }
 0x722   :  { %10675 = vmatprep.subr.bf16.mxu1 %v19010_v44  ;;  %v16203_v44 = vadd.f32 %v19801_v26, %v1534_v54  ;;  %v19110_v26 = vld [vmem:[%s21049_s3 + $0xd00] ss:$8 sps:$4 sm:$0xff]  }
 0x725   :  { %10676 = vmatpush1.bf16.msra.mxu1 %v19008_v41  ;;  %v19109_v41 = vld [vmem:[%s21049_s3 + $0xcf4] ss:$8 sps:$4 sm:$0xff]  }
 0x726   :  { %10677 = vmatprep.subr.bf16.mxu1 %v19016_v57  ;;  %v10759_v57 = vmax.f32 %v16203_v44, 0.0 }
 0x729   :  { %10678 = vmatpush1.bf16.msra.mxu1 %v19014_v53  ;;  %v19112_v53 = vld [vmem:[%s21049_s3 + $0xd04] ss:$8 sps:$4 sm:$0xff]  }
 0x72a   :  { %10679 = vmatprep.subr.bf16.mxu1 %v19022_v55  ;;  %v10787_v55 = vpack.c.bf16 %v10759_v57, %v10759_v57 }
 0x72d   :  { %10680 = vmatpush1.bf16.msra.mxu1 %v19020_v60  ;;  %v19115_v60 = vld [vmem:[%s21049_s3 + $0xd14] ss:$8 sps:$4 sm:$0xff]  }
 0x72e   :  { %10681 = vmatprep.subr.bf16.mxu1 %v19028_v39  ;;  %v19113_v39 = vld [vmem:[%s21049_s3 + $0xd10] ss:$8 sps:$4 sm:$0xff]  }
 0x731   :  { %10682 = vmatpush1.bf16.msra.mxu1 %v19026_v48  ;;  %v19118_v48 = vld [vmem:[%s21049_s3 + $0xd24] ss:$8 sps:$4 sm:$0xff]  }
 0x732   :  { %10683 = vmatprep.subr.bf16.mxu1 %v19034_v13  ;;  %v19116_v13 = vld [vmem:[%s21049_s3 + $0xd20] ss:$8 sps:$4 sm:$0xff]  }
 0x735   :  { %10684 = vmatpush1.bf16.msra.mxu1 %v19032_v6  ;;  %v19121_v6 = vld [vmem:[%s21049_s3 + $0xd34] ss:$8 sps:$4 sm:$0xff]  }
 0x736   :  { %10694 = vmatprep.subr.bf16.mxu1 %v19040_v45  ;;  %v19119_v45 = vld [vmem:[%s21049_s3 + $0xd30] ss:$8 sps:$4 sm:$0xff]  }
 0x738   :  { %10686 = vmatmul.mubr.bf16.vlgmr.msra.gmra.mrb[40].mxu1 %v19287_v29  ;;  %v1526_v29 = vrot.slane %v19155_v50, %v19864_v37  ;;  %v19065_v37 = vld [vmem:[%s21049_s3 + $0xc10] ss:$8 sps:$4 sm:$0xff]   ;;  %v19122_v50 = vld [vmem:[%s21049_s3 + $0xd40] ss:$8 sps:$4 sm:$0xff]  }
 0x739   :  { %10695 = vmatpush1.bf16.msra.mxu1 %v19038_v58  ;;  %10726 = vmatprep.mubr.bf16.mxu1 %v19183_v0  ;;  %v16204_v0 = vadd.f32 %v19803_v38, %v1538_v61  ;;  %v19124_v58 = vld [vmem:[%s21049_s3 + $0xd44] ss:$8 sps:$4 sm:$0xff]   ;;  %v11232_v61 = vld [vmem:[%s21052_s6] sm:$0x1] }
 0x73a   :  { %16417 = vpush %v11232_v61  ;;  %v14068_v61 = vld [vmem:[%s21050_s4 + $0x78] sm:$0xff] }
 0x73b   :  { %v10760_v36 = vmax.f32 %v16204_v0, 0.0  ;;  %v19130_v0 = vld [vmem:[%s21049_s3 + $0xd64] ss:$8 sps:$4 sm:$0xff]  }
 0x73d   :  { %v10788_v38 = vpack.c.bf16 %v10760_v36, %v10760_v36  ;;  %v19142_v36 = vld [vmem:[%s21049_s3 + $0xda4] ss:$8 sps:$4 sm:$0xff]  }
 0x744   :  { %15655 = vmatmul.mubr.msk.bf16.vlgmr.msra.gmra.mrb[40].mxu1 %vm8435_vm0, %v19245_v10 }
 0x74b   :  { %v10400_v9 = vpop.f32.mrb[36].mxu1 }
 0x74c   :  { %v16201_v62 = vadd.f32 %v10400_v9, %v1526_v29  ;;  %v10402_v34 = vpop.f32.mrb[37].mxu1  ;;  %v19127_v29 = vld [vmem:[%s21049_s3 + $0xd54] ss:$8 sps:$4 sm:$0xff]   ;;  %v19128_v9 = vld [vmem:[%s21049_s3 + $0xd60] ss:$8 sps:$4 sm:$0xff]  }
 0x74d   :  { %v16202_v49 = vadd.f32 %v10402_v34, %v1530_v7  ;;  %v10404_v56 = vpop.f32.mrb[38].mxu1  ;;  %v19125_v7 = vld [vmem:[%s21049_s3 + $0xd50] ss:$8 sps:$4 sm:$0xff]  }
 0x74e   :  { %v10757_v63 = vmax.f32 %v16201_v62, 0.0  ;;  %v10405_v10 = vpop.f32.mrb[39].mxu1  ;;  %v19133_v62 = vld [vmem:[%s21049_s3 + $0xd74] ss:$8 sps:$4 sm:$0xff]   ;;  %v19131_v34 = vld [vmem:[%s21049_s3 + $0xd70] ss:$8 sps:$4 sm:$0xff]  }
 0x74f   :  { %v10758_v47 = vmax.f32 %v16202_v49, 0.0  ;;  %v19136_v49 = vld [vmem:[%s21049_s3 + $0xd84] ss:$8 sps:$4 sm:$0xff]   ;;  %v19134_v56 = vld [vmem:[%s21049_s3 + $0xd80] ss:$8 sps:$4 sm:$0xff]  }
 0x750   :  { %v10785_v59 = vpack.c.bf16 %v10757_v63, %v10757_v63  ;;  %v19139_v63 = vld [vmem:[%s21049_s3 + $0xd94] ss:$8 sps:$4 sm:$0xff]   ;;  %v19137_v10 = vld [vmem:[%s21049_s3 + $0xd90] ss:$8 sps:$4 sm:$0xff]  }
 0x751   :  { %v10786_v40 = vpack.c.bf16 %v10758_v47, %v10758_v47  ;;  %v19140_v47 = vld [vmem:[%s21049_s3 + $0xda0] ss:$8 sps:$4 sm:$0xff]  }
 0x753   :  { %13936 = vmatprep.mubr.bf16.mxu0 %v10786_v40  ;;  %v19145_v40 = vld [vmem:[%s21049_s3 + $0xdb4] ss:$8 sps:$4 sm:$0xff]  }
 0x754   :  { %13937 = vmatmul.mubr.bf16.vlgmr.msra.gmra.mrb[24].mxu0 %v10785_v59  ;;  %v19143_v59 = vld [vmem:[%s21049_s3 + $0xdb0] ss:$8 sps:$4 sm:$0xff]  }
 0x755   :  { %13946 = vmatpush1.bf16.msra.mxu0 %v19062_v1  ;;  %13977 = vmatprep.mubr.bf16.mxu0 %v10788_v38  ;;  %v11231_v1 = vld [vmem:[%s21049_s3 + $0xdc0] sm:$0xff] }
 0x756   :  { %13947 = vmatprep.subr.bf16.mxu0 %v19067_v43  ;;  %v16097_v43 = vcombine.high %v11231_v1, %v11231_v1  ;;  %v16096_v38 = vcombine.low %v11231_v1, %v11231_v1 }
 0x759   :  { %13948 = vmatpush1.bf16.msra.mxu0 %v19065_v37  ;;  %v13448_v37 = vsel %vm13446_vm1, %v16096_v38, 0 }
 0x75a   :  { %13949 = vmatprep.subr.bf16.mxu0 %v19070_v12  ;;  %v1542_v12 = vrot.slane %v20730_v16, %v19633_v27 }
 0x75d   :  { %13950 = vmatpush1.bf16.msra.mxu0 %v19068_v2  ;;  %v1546_v2 = vrot.slane %v20730_v16, %v19529_v23 }
 0x75e   :  { %13951 = vmatprep.subr.bf16.mxu0 %v19073_v3 }
 0x761   :  { %13952 = vmatpush1.bf16.msra.mxu0 %v19071_v8 }
 0x762   :  { %13953 = vmatprep.subr.bf16.mxu0 %v19076_v4 }
 0x765   :  { %13954 = vmatpush1.bf16.msra.mxu0 %v19074_v35 }
 0x766   :  { %13955 = vmatprep.subr.bf16.mxu0 %v19079_v14 }
 0x769   :  { %13956 = vmatpush1.bf16.msra.mxu0 %v19077_v18 }
 0x76a   :  { %13957 = vmatprep.subr.bf16.mxu0 %v19082_v24 }
 0x76b   :  { %s16418_s3 = spop %16417 }
 0x76d   :  { %13958 = vmatpush1.bf16.msra.mxu0 %v19080_v46 }
 0x76e   :  { %13959 = vmatprep.subr.bf16.mxu0 %v19085_v15 }
 0x771   :  { %13960 = vmatpush1.bf16.msra.mxu0 %v19083_v19 }
 0x772   :  { %13961 = vmatprep.subr.bf16.mxu0 %v19088_v20  ;;  %v11235_v20 = vstv %s16418_s3 }
 0x775   :  { %13962 = vmatpush1.bf16.msra.mxu0 %v19086_v5 }
 0x776   :  { %13963 = vmatprep.subr.bf16.mxu0 %v19091_v22 }
 0x779   :  { %13964 = vmatpush1.bf16.msra.mxu0 %v19089_v30 }
 0x77a   :  { %13965 = vmatprep.subr.bf16.mxu0 %v19094_v31 }
 0x77d   :  { %13966 = vmatpush1.bf16.msra.mxu0 %v19092_v32  ;;  %v14053_v32 = vld [vmem:[%s21050_s4] sm:$0xff] }
 0x77e   :  { %13967 = vmatprep.subr.bf16.mxu0 %v19097_v51  ;;  %v14054_v51 = vld [vmem:[%s21050_s4 + $0x8] sm:$0xff] }
 0x781   :  { %13968 = vmatpush1.bf16.msra.mxu0 %v19095_v17  ;;  %v14055_v17 = vld [vmem:[%s21050_s4 + $0x10] sm:$0xff] }
 0x782   :  { %13969 = vmatprep.subr.bf16.mxu0 %v19100_v33  ;;  %v19184_v33 = vmov 0.0|0.0  }
 0x783   :  { %16131 = vmatprep.subr.bf16.mxu1 %v19184_v33 }
 0x785   :  { %13970 = vmatpush1.bf16.msra.mxu0 %v19098_v28  ;;  %v16132_v28 = vpack.c.bf16 %v14054_v51, %v14053_v32 }
 0x786   :  { %13971 = vmatprep.subr.bf16.mxu0 %v19103_v42  ;;  %v14056_v42 = vld [vmem:[%s21050_s4 + $0x18] sm:$0xff] }
 0x787   :  { %16133 = vmatpush1.bf16.msra.mxu1 %v16132_v28 }
 0x788   :  { %16134 = vmatprep.subr.bf16.mxu1 %v19184_v33 }
 0x789   :  { %13972 = vmatpush1.bf16.msra.mxu0 %v19101_v21  ;;  %v16135_v21 = vpack.c.bf16 %v14056_v42, %v14055_v17 }
 0x78a   :  { %13973 = vmatprep.subr.bf16.mxu0 %v19106_v52  ;;  %v14057_v52 = vld [vmem:[%s21050_s4 + $0x20] sm:$0xff] }
 0x78b   :  { %16136 = vmatpush1.bf16.msra.mxu1 %v16135_v21 }
 0x78c   :  { %16137 = vmatprep.subr.bf16.mxu1 %v19184_v33 }
 0x78d   :  { %13974 = vmatpush1.bf16.msra.mxu0 %v19104_v25  ;;  %v14058_v25 = vld [vmem:[%s21050_s4 + $0x28] sm:$0xff] }
 0x78e   :  { %13975 = vmatprep.subr.bf16.mxu0 %v19109_v41  ;;  %v16138_v44 = vpack.c.bf16 %v14058_v25, %v14057_v52  ;;  %v14059_v41 = vld [vmem:[%s21050_s4 + $0x30] sm:$0xff] }
 0x790   :  { %16139 = vmatpush1.bf16.msra.mxu1 %v16138_v44 }
 0x791   :  { %13976 = vmatpush1.bf16.msra.mxu0 %v19107_v11  ;;  %v14060_v11 = vld [vmem:[%s21050_s4 + $0x38] sm:$0xff]  ;;  %16140 = vmatprep.subr.bf16.mxu1 %v19184_v33 }
 0x792   :  { %13986 = vmatprep.subr.bf16.mxu0 %v19112_v53  ;;  %v16141_v57 = vpack.c.bf16 %v14060_v11, %v14059_v41  ;;  %v14061_v53 = vld [vmem:[%s21050_s4 + $0x40] sm:$0xff] }
 0x794   :  { %13978 = vmatmul.mubr.bf16.vlgmr.msra.gmra.mrb[24].mxu0 %v10787_v55  ;;  %16142 = vmatpush1.bf16.msra.mxu1 %v16141_v57 }
 0x795   :  { %13987 = vmatpush1.bf16.msra.mxu0 %v19110_v26  ;;  %v14062_v26 = vld [vmem:[%s21050_s4 + $0x48] sm:$0xff]  ;;  %16143 = vmatprep.subr.bf16.mxu1 %v19184_v33 }
 0x796   :  { %13988 = vmatprep.subr.bf16.mxu0 %v19115_v60  ;;  %v16144_v55 = vpack.c.bf16 %v14062_v26, %v14061_v53  ;;  %v14063_v60 = vld [vmem:[%s21050_s4 + $0x50] sm:$0xff] }
 0x798   :  { %16145 = vmatpush1.bf16.msra.mxu1 %v16144_v55 }
 0x799   :  { %13989 = vmatpush1.bf16.msra.mxu0 %v19113_v39  ;;  %v14064_v39 = vld [vmem:[%s21050_s4 + $0x58] sm:$0xff]  ;;  %16146 = vmatprep.subr.bf16.mxu1 %v19184_v33 }
 0x79a   :  { %13990 = vmatprep.subr.bf16.mxu0 %v19118_v48  ;;  %v16147_v48 = vpack.c.bf16 %v14064_v39, %v14063_v60 }
 0x79c   :  { %16148 = vmatpush1.bf16.msra.mxu1 %v16147_v48 }
 0x79d   :  { %13991 = vmatpush1.bf16.msra.mxu0 %v19116_v13  ;;  %v14065_v13 = vld [vmem:[%s21050_s4 + $0x60] sm:$0xff]  ;;  %16149 = vmatprep.subr.bf16.mxu1 %v19184_v33 }
 0x79e   :  { %13992 = vmatprep.subr.bf16.mxu0 %v19121_v6  ;;  %v14066_v6 = vld [vmem:[%s21050_s4 + $0x68] sm:$0xff] }
 0x7a1   :  { %13993 = vmatpush1.bf16.msra.mxu0 %v19119_v45  ;;  %v16150_v45 = vpack.c.bf16 %v14066_v6, %v14065_v13 }
 0x7a2   :  { %13994 = vmatprep.subr.bf16.mxu0 %v19124_v58  ;;  %v14067_v58 = vld [vmem:[%s21050_s4 + $0x70] sm:$0xff] }
 0x7a3   :  { %16151 = vmatpush1.bf16.msra.mxu1 %v16150_v45 }
 0x7a4   :  { %16152 = vmatprep.subr.bf16.mxu1 %v19184_v33 }
 0x7a5   :  { %13995 = vmatpush1.bf16.msra.mxu0 %v19122_v50  ;;  %v16153_v50 = vpack.c.bf16 %v14068_v61, %v14067_v58 }
 0x7a6   :  { %13996 = vmatprep.subr.bf16.mxu0 %v19127_v29  ;;  %v14069_v29 = vld [vmem:[%s21050_s4 + $0x80] sm:$0xff] }
 0x7a7   :  { %16154 = vmatpush1.bf16.msra.mxu1 %v16153_v50 }
 0x7a8   :  { %16155 = vmatprep.subr.bf16.mxu1 %v19184_v33 }
 0x7a9   :  { %13997 = vmatpush1.bf16.msra.mxu0 %v19125_v7  ;;  %v14070_v7 = vld [vmem:[%s21050_s4 + $0x88] sm:$0xff] }
 0x7aa   :  { %13998 = vmatprep.subr.bf16.mxu0 %v19130_v0  ;;  %v16156_v0 = vpack.c.bf16 %v14070_v7, %v14069_v29 }
 0x7ac   :  { %16157 = vmatpush1.bf16.msra.mxu1 %v16156_v0 }
 0x7ad   :  { %13999 = vmatpush1.bf16.msra.mxu0 %v19128_v9  ;;  %v14071_v9 = vld [vmem:[%s21050_s4 + $0x90] sm:$0xff]  ;;  %16158 = vmatprep.subr.bf16.mxu1 %v19184_v33 }
 0x7ae   :  { %14000 = vmatprep.subr.bf16.mxu0 %v19133_v62  ;;  %v14072_v62 = vld [vmem:[%s21050_s4 + $0x98] sm:$0xff] }
 0x7b1   :  { %14001 = vmatpush1.bf16.msra.mxu0 %v19131_v34  ;;  %v16159_v34 = vpack.c.bf16 %v14072_v62, %v14071_v9 }
 0x7b2   :  { %14002 = vmatprep.subr.bf16.mxu0 %v19136_v49  ;;  %v14073_v49 = vld [vmem:[%s21050_s4 + $0xa0] sm:$0xff] }
 0x7b3   :  { %16160 = vmatpush1.bf16.msra.mxu1 %v16159_v34 }
 0x7b4   :  { %16161 = vmatprep.subr.bf16.mxu1 %v19184_v33 }
 0x7b5   :  { %14003 = vmatpush1.bf16.msra.mxu0 %v19134_v56  ;;  %v14074_v56 = vld [vmem:[%s21050_s4 + $0xa8] sm:$0xff] }
 0x7b6   :  { %14004 = vmatprep.subr.bf16.mxu0 %v19139_v63  ;;  %v16162_v63 = vpack.c.bf16 %v14074_v56, %v14073_v49 }
 0x7b8   :  { %16163 = vmatpush1.bf16.msra.mxu1 %v16162_v63 }
 0x7b9   :  { %14005 = vmatpush1.bf16.msra.mxu0 %v19137_v10 }
 0x7ba   :  { %14006 = vmatprep.subr.bf16.mxu0 %v19142_v36  ;;  %v19186_v36 = vmov 0.0  }
 0x7bb   :  { %14133 = vmatprep.subr.mxu1 %v19186_v36 }
 0x7bd   :  { %14007 = vmatpush1.bf16.msra.mxu0 %v19140_v47  ;;  %v14075_v47 = vld [vmem:[%s21050_s4 + $0xb0] sm:$0x1f] }
 0x7be   :  { %14008 = vmatprep.subr.bf16.mxu0 %v19145_v40  ;;  %16101 = vmatpush1.msk.msra.mxu1 %vm14085_vm3, %v14075_v47 }
 0x7bf   :  { %16164 = vmatprep.subr.bf16.mxu1 %v19184_v33 }
 0x7c1   :  { %14009 = vmatpush1.bf16.msra.mxu0 %v19143_v59 }
 0x7c2   :  { %16098 = vmatprep.subr.msk.bf16.mxu0 %vm13446_vm1, %v16097_v43 }
 0x7c5   :  { %14011 = vmatpush1.bf16.msra.mxu0 %v13448_v37  ;;  %v14160_v37 = vld [vmem:[%s21051_s5] sm:$0xff] }
 0x817   :  { %v10728_v3 = vpop.f32.mrb[40].mxu1 }
 0x818   :  { %v16205_v8 = vadd.f32 %v10728_v3, %v1542_v12  ;;  %v10730_v4 = vpop.f32.mrb[41].mxu1  ;;  %v14161_v12 = vld [vmem:[%s21051_s5 + $0x8] sm:$0xff] }
 0x819   :  { %v16206_v35 = vadd.f32 %v10730_v4, %v1546_v2  ;;  %v10732_v14 = vpop.f32.mrb[42].mxu1  ;;  %v16165_v4 = vpack.c.bf16 %v14161_v12, %v14160_v37 }
 0x81a   :  { %v10761_v18 = vmax.f32 %v16205_v8, 0.0  ;;  %v10733_v24 = vpop.f32.mrb[43].mxu1  ;;  %v14162_v14 = vld [vmem:[%s21051_s5 + $0x10] sm:$0xff] }
 0x81b   :  { %v10762_v46 = vmax.f32 %v16206_v35, 0.0 }
 0x81c   :  { %v10789_v19 = vpack.c.bf16 %v10761_v18, %v10761_v18  ;;  %v14163_v18 = vld [vmem:[%s21051_s5 + $0x18] sm:$0xff] }
 0x81d   :  { %v10790_v15 = vpack.c.bf16 %v10762_v46, %v10762_v46  ;;  %v16168_v24 = vpack.c.bf16 %v14163_v18, %v14162_v14  ;;  %v14164_v46 = vld [vmem:[%s21051_s5 + $0x20] sm:$0xff] }
 0x81f   :  { %16099 = vmatprep.mubr.msk.bf16.mxu0 %vm13442_vm2, %v10790_v15  ;;  %v14165_v15 = vld [vmem:[%s21051_s5 + $0x28] sm:$0xff] }
 0x820   :  { %14019 = vmatmul.mubr.bf16.vlgmr.msra.gmra.mrb[24].mxu0 %v10789_v19  ;;  %v16171_v19 = vpack.c.bf16 %v14165_v15, %v14164_v46 }
 0x8f3   :  { %v14020_v5 = vpop.f32.mrb[24].mxu0 }
 0x8f4   :  { %v20920_v27 = vadd.f32 %v14020_v5, %v11235_v20  ;;  %v14022_v22 = vpop.f32.mrb[25].mxu0  ;;  %v16100_v5 = vld [vmem:[%s21052_s6 + $0x1] ss:$0 sm:$0xff] }
 0x8f5   :  { %v14024_v23 = vpop.f32.mrb[26].mxu0  ;;  %v20923_v30 = vadd.f32 %v14022_v22, %v11235_v20  ;;  %v14166_v20 = vld [vmem:[%s21051_s5 + $0x30] sm:$0x1] }
 0x8f6   :  { %v14027_v16 = vmax.f32 %v20920_v27, 0.0  ;;  %v14025_v31 = vpop.f32.mrb[27].mxu0 }
 0x8f7   :  { %v14028_v54 = vmax.f32 %v20923_v30, 0.0  ;;  %v16103_v30 = vld [vmem:[%s21052_s6 + $0x2] ss:$0 sm:$0xff] }
 0x8f8   :  { %14031 = vrot.lane.b32.xlu0 %v14027_v16, %s19185_s30 }
 0x8fc   :  { %14033 = vrot.lane.b32.xlu0 %v14028_v54, %s19185_s30 }
 0x96a   :  { %v14032_v10 = vpop.permute.xlu0 %14031 }
 0x96e   :  { %v14034_v40 = vpop.permute.xlu0 %14033 }
 0x96f   :  { %v14036_v1 = vsel %vm14035_vm4, %v14032_v10, %v14034_v40  ;;  %v14040_v43 = vmax.f32 %v14028_v54, %v14034_v40 }
 0x970   :  { %v14039_v59 = vmax.f32 %v14027_v16, %v14036_v1 }
 0x972   :  { %14043 = vrot.lane.b32.xlu1 %v14039_v59, %s19187_s17 }
 0x976   :  { %14045 = vrot.lane.b32.xlu1 %v14040_v43, %s19187_s17 }
 0x9e4   :  { %v14044_v38 = vpop.permute.xlu1 %14043 }
 0x9e8   :  { %v14046_v2 = vpop.permute.xlu1 %14045 }
 0x9e9   :  { %v14048_v3 = vsel %vm14047_vm5, %v14044_v38, %v14046_v2  ;;  %v14052_v8 = vmax.f32 %v14040_v43, %v14046_v2 }
 0x9ea   :  { %v14051_v35 = vmax.f32 %v14039_v59, %v14048_v3 }
 0x9eb   :  { %16102 = vmatprep.mubr.msk.f32.mxu1 %vm14081_vm6, %v14052_v8 }
 0x9ec   :  { %14154 = vmatmul.mubr.f32.vlgmr.msra.gmra.mrb[44].mxu1 %v14051_v35 }
 0x9ed   :  { %16166 = vmatpush3.bf16.msra.mxu1 %v16165_v4  ;;  %16128 = vmatprep.mubr.msk.f32.mxu1 %vm19188_vm8, %v19186_v36 }
 0x9ee   :  { %16167 = vmatprep.subr.bf16.mxu1 %v19184_v33 }
 0x9f1   :  { %16169 = vmatpush3.bf16.msra.mxu1 %v16168_v24 }
 0x9f2   :  { %16170 = vmatprep.subr.bf16.mxu1 %v19184_v33 }
 0x9f5   :  { %16172 = vmatpush3.bf16.msra.mxu1 %v16171_v19 }
 0x9f6   :  { %16126 = vmatprep.subr.mxu1 %v19186_v36 }
 0x9f9   :  { %16127 = vmatpush3.msk.msra.mxu1 %vm14176_vm7, %v14166_v20 }
 0xabf   :  { %v14155_v27 = vpop.f32.mrb[44].mxu1 }
 0xac0   :  { %v14156_v22 = vadd.f32 %v16100_v5, %v14155_v27  ;;  %v14157_v23 = vpop.f32.mrb[45].mxu1 }
 0xac2   :  { %v14159_v16 = vmax.f32 %v14156_v22, 0.0 }
 0xac4   :  { %16129 = vmatmul.mubr.msk.f32.vlgmr.msra.gmra.mrb[46].mxu1 %vm14172_vm9, %v14159_v16 }
 0xb97   :  { %v14246_v31 = vpop.f32.mrb[46].mxu1 }
 0xb98   :  { %v14247_v32 = vadd.f32 %v16103_v30, %v14246_v31  ;;  %v16130_v51 = vpop.f32.mrb[47].mxu1 }
 0xb9a   :  { %v14251_v17 = vsel %vm14250_vm10, %v14247_v32, -inf }
 0xb9b   :  { %14252 = vmax.xlane.f32.xlu0 %v14251_v17 }
 0xc28   :  { %v14253_v33 = vpop.xlane.xlu0 %14252 }
 0xc29   :  { %v14254_v28 = vsub.f32 %v14247_v32, %v14253_v33 }
 0xc2b   :  { %v14255_v42 = vmul.f32 1.442695, %v14254_v28 }
 0xc2d   :  { %19148 = vpow2.f32 %v14255_v42 }
 0xc37   :  { %v19149_v21 = vpop.eup %19148 }
 0xc38   :  { %v14257_v54 = vsel %vm14250_vm10, %v19149_v21, 0.0 }
 0xc39   :  { %14258 = vadd.xlane.f32.xlu1 %v14257_v54 }
 0xcc6   :  { %v14259_v52 = vpop.xlane.xlu1 %14258 }
 0xcc7   :  { %19150 = vlog2.f32 %v14259_v52 }
 0xcd1   :  { %v19151_v25 = vpop.eup %19150 }
 0xcd2   :  { %v14261_v44 = vmul.f32 0.6931472, %v19151_v25 }
 0xcd4   :  { %v14262_v41 = vadd.f32 %v14261_v44, %v14253_v33 }
 0xcd6   :  { %v14263_v11 = vsub.f32 %v14247_v32, %v14262_v41 }
 0xcd8   :  { %14264 = vst.msk [vmem:[%s21053_s7] sm:$0xff] %vm14250_vm10, %v14263_v11 }
 0xcd9   :  { %14269 = vsyncpa [#allocation3], 1 }

</bundles_post_ra>
